<compile_context>
chip_gen: v6e
topology: v6e:2x2x1
jax: 0.10.0
libtpu: 0.0.40
codegen_flags: <defaults>
</compile_context>

<pallas_src>
import numpy as np
import jax
import jax.numpy as jnp
from jax import lax
from jax.experimental import pallas as pl
from jax.experimental.pallas import tpu as pltpu


def _round_up(n, m):
    return ((n + m - 1) // m) * m


# ----------------------------------------------------------------------------
# Pallas kernel (shapes closed over as static Python ints)
# ----------------------------------------------------------------------------
def _make_kernel(T, TB, Hp, CT):
    H2 = 2 * Hp
    H3 = 3 * Hp
    TTB = T * TB
    ROWS = CT * TB          # rows per MLP-head chunk
    n_chunks = T // CT

    def kernel(
        x_ref,       # (T*TB, I)   time-major rows of one batch tile
        wih_ref,     # (I, 3Hp)    fused GRU input weights, lane-padded gates [r|z|n]
        whh_ref,     # (Hp, 3Hp)   fused GRU hidden weights
        bpre_ref,    # (1, 3Hp)    [bih_r+bhh_r | bih_z+bhh_z | bih_n] (padded)
        bhn_ref,     # (1, Hp)     bhh_n (must stay inside r * (...))
        w1_ref,      # (Hp, D1p)   hidden Linear 1 (transposed, padded)
        b1_ref,      # (1, D1p)
        w2_ref,      # (D1p, D2p)  hidden Linear 2
        b2_ref,      # (1, D2p)
        wo_ref,      # (D2p, Op)   output Linear
        bo_ref,      # (1, Op)
        out_ref,     # (T*TB, Op)  lane-dense output slab for this batch tile
        xproj_ref,   # scratch (T*TB, 3Hp) -- hoisted x @ W_ih (+ fused biases)
        acc_ref,     # scratch (T*TB, Hp)  -- relu(GRU outputs)
    ):
        # 1) Hoisted input projection for every timestep & gate: one MXU op.
        #    Default MXU precision (FLOP-heavy, not on the serial critical path).
        xproj_ref[...] = (
            jnp.dot(x_ref[...], wih_ref[...], preferred_element_type=jnp.float32)
            + bpre_ref[...]
        )

        # Loop-invariant operands loaded/broadcast ONCE (no per-iteration
        # broadcast_in_dim re-emission under unroll).
        whh = whh_ref[...]
        bhn_b = jnp.broadcast_to(bhn_ref[...], (TB, Hp))

        # 2) Serial GRU recurrence: only h @ W_hh + nonlinearity on the critical
        #    path. All gate slices are 128-lane aligned; row slices are 8-sublane
        #    aligned -> unmasked vld/vst.
        def step(t, h):
            row = pl.multiple_of(t * TB, TB)
            xp = xproj_ref[pl.ds(row, TB), :]                       # (TB, 3Hp)
            hp = jnp.dot(h, whh, preferred_element_type=jnp.float32,
                         precision=lax.Precision.HIGHEST)           # (TB, 3Hp)
            rz = jax.nn.sigmoid(xp[:, :H2] + hp[:, :H2])            # one sigmoid
            r = rz[:, :Hp]
            z = rz[:, Hp:]
            n = jnp.tanh(xp[:, H2:] + r * (hp[:, H2:] + bhn_b))
            h_new = (1.0 - z) * n + z * h
            # Fused ReLU on store; raw h_new carried for the recurrence.
            acc_ref[pl.ds(row, TB), :] = jnp.maximum(h_new, 0.0)
            return h_new

        lax.fori_loop(0, T, step, jnp.zeros((TB, Hp), jnp.float32),
                      unroll=min(T, 8))

        # 3) MLP head, row-tiled so intermediates stay a few vregs per chunk.
        #    Dropout = identity (eval). Default MXU precision.
        w1 = w1_ref[...]; b1 = b1_ref[...]
        w2 = w2_ref[...]; b2 = b2_ref[...]
        wo = wo_ref[...]; bo = bo_ref[...]

        @pl.loop(0, n_chunks)
        def _(c):
            r0 = pl.multiple_of(c * ROWS, ROWS)
            feats = acc_ref[pl.ds(r0, ROWS), :]
            h1 = jnp.maximum(
                jnp.dot(feats, w1, preferred_element_type=jnp.float32) + b1, 0.0)
            h2 = jnp.maximum(
                jnp.dot(h1, w2, preferred_element_type=jnp.float32) + b2, 0.0)
            out_ref[pl.ds(r0, ROWS), :] = (
                jnp.dot(h2, wo, preferred_element_type=jnp.float32) + bo)

    return kernel


# ----------------------------------------------------------------------------
# Parameter prep: PyTorch-layout params -> fused / transposed / lane-padded
# ----------------------------------------------------------------------------
def prepare_params(params, lane=128):
    (w_ih, w_hh, b_ih, b_hh, W1, b1, W2, b2, Wo, bo) = params
    H = w_hh.shape[1]
    Hp = _round_up(H, lane)
    D1, D2, O = W1.shape[0], W2.shape[0], Wo.shape[0]
    D1p, D2p, Op = _round_up(D1, lane), _round_up(D2, lane), _round_up(O, lane)

    def pad_cols(a, cols):
        return jnp.pad(a, ((0, 0), (0, cols - a.shape[1])))

    def pad2(a, rows, cols):
        return jnp.pad(a, ((0, rows - a.shape[0]), (0, cols - a.shape[1])))

    def gate_pad(w_t):  # (rows, 3H) -> (rows, 3Hp): per-gate lane padding
        r, z, n = w_t[:, :H], w_t[:, H:2 * H], w_t[:, 2 * H:]
        return jnp.concatenate(
            [pad_cols(r, Hp), pad_cols(z, Hp), pad_cols(n, Hp)], axis=1)

    def gate_pad_vec(v):  # (3H,) -> (1, 3Hp)
        r, z, n = v[:H], v[H:2 * H], v[2 * H:]
        p = lambda a: jnp.pad(a, (0, Hp - H))
        return jnp.concatenate([p(r), p(z), p(n)]).reshape(1, 3 * Hp)

    wih = gate_pad(w_ih.T)                                  # (I, 3Hp)
    whh = pad2(gate_pad(w_hh.T), Hp, 3 * Hp)                # (Hp, 3Hp), zero rows for pad
    bpre = gate_pad_vec(
        jnp.concatenate([b_ih[:2 * H] + b_hh[:2 * H], b_ih[2 * H:]]))  # (1, 3Hp)
    bhn = jnp.pad(b_hh[2 * H:], (0, Hp - H)).reshape(1, Hp)            # (1, Hp)

    w1p = pad2(W1.T, Hp, D1p)
    b1p = pad2(b1.reshape(1, -1), 1, D1p)
    w2p = pad2(W2.T, D1p, D2p)
    b2p = pad2(b2.reshape(1, -1), 1, D2p)
    wop = pad2(Wo.T, D2p, Op)
    bop = pad2(bo.reshape(1, -1), 1, Op)
    return (wih, whh, bpre, bhn, w1p, b1p, w2p, b2p, wop, bop)


# ----------------------------------------------------------------------------
# Wrapper
# ----------------------------------------------------------------------------
def seq2seq_rnn_forward(x_ncl, prep, *, output_size):
    """x_ncl: (batch, input_size, seq_len) -- same layout the PyTorch forward gets."""
    (wih, whh, bpre, bhn, w1, b1, w2, b2, wo, bo) = prep
    B, I, T = x_ncl.shape
    Hp = whh.shape[0]
    Op = wo.shape[1]

    TB = 8                              # sublane tile for the batch axis
    Bp = _round_up(max(B, TB), TB)      # sublane-pad the batch (e.g. 2 -> 8)
    nb = Bp // TB
    TTB = T * TB

    # (B, I, T) -> (T, B, I), zero-pad batch, regroup into per-grid-step batch
    # tiles with time-major rows inside each tile:
    #   x_tiles[b, t*TB + i, :] == x[t, b*TB + i, :]
    # All layout plumbing stays in the XLA wrapper; the kernel sees 2-D slabs.
    xt = jnp.transpose(x_ncl, (2, 0, 1)).astype(jnp.float32)     # (T, B, I)
    xt = jnp.pad(xt, ((0, 0), (0, Bp - B), (0, 0)))              # (T, Bp, I)
    x_tiles = (xt.reshape(T, nb, TB, I)
                 .transpose(1, 0, 2, 3)
                 .reshape(nb, TTB, I))

    # MLP-head row tile: CT timesteps (CT*TB <= 256 rows), CT divides T.
    CT = T if T <= 32 else next(c for c in (32, 16, 8, 4, 2, 1) if T % c == 0)

    kernel = _make_kernel(T=T, TB=TB, Hp=Hp, CT=CT)

    def full_spec(shape):
        return pl.BlockSpec(shape, lambda b: (0,) * len(shape))

    out_tiles = pl.pallas_call(
        kernel,
        out_shape=jax.ShapeDtypeStruct((nb, TTB, Op), jnp.float32),
        grid=(nb,),
        in_specs=[
            pl.BlockSpec((None, TTB, I), lambda b: (b, 0, 0)),   # batch tile of x
            full_spec(wih.shape), full_spec(whh.shape),
            full_spec(bpre.shape), full_spec(bhn.shape),
            full_spec(w1.shape), full_spec(b1.shape),
            full_spec(w2.shape), full_spec(b2.shape),
            full_spec(wo.shape), full_spec(bo.shape),
        ],
        out_specs=pl.BlockSpec((None, TTB, Op), lambda b: (b, 0, 0)),
        scratch_shapes=[
            pltpu.VMEM((TTB, wih.shape[1]), jnp.float32),   # hoisted x-projections
            pltpu.VMEM((TTB, Hp), jnp.float32),             # relu(GRU outputs)
        ],
        compiler_params=pltpu.CompilerParams(
            dimension_semantics=("parallel",)),              # v7x: both TCs
    )(x_tiles, wih, whh, bpre, bhn, w1, b1, w2, b2, wo, bo)

    # (nb, T*TB, Op) -> (Bp, T, Op) -> (B, T, output_size)
    out = (out_tiles.reshape(nb, T, TB, Op)
                    .transpose(0, 2, 1, 3)
                    .reshape(Bp, T, Op))
    return out[:B, :, :output_size]


# ----------------------------------------------------------------------------
# Deterministic PyTorch-layout parameter construction
# ----------------------------------------------------------------------------
def make_params(key, input_size, hidden_size, output_size, hidden_layers=(100, 200)):
    ks = jax.random.split(key, 10)
    H, I = hidden_size, input_size
    D1, D2 = hidden_layers
    k = 1.0 / np.sqrt(H)
    # GRU weights/biases, PyTorch layout: (3H, ...) with gate order [r; z; n].
    w_ih = jax.random.uniform(ks[0], (3 * H, I), jnp.float32, -k, k)
    w_hh = jax.random.uniform(ks[1], (3 * H, H), jnp.float32, -k, k)
    b_ih = jax.random.uniform(ks[2], (3 * H,), jnp.float32, -k, k)
    b_hh = jax.random.uniform(ks[3], (3 * H,), jnp.float32, -k, k)
    # Hidden layers (PyTorch Linear layout (out, in)); kaiming-normal weights.
    W1 = jax.random.normal(ks[4], (D1, H), jnp.float32) * np.sqrt(2.0 / H)
    b1 = jax.random.uniform(ks[5], (D1,), jnp.float32, -1 / np.sqrt(H), 1 / np.sqrt(H))
    W2 = jax.random.normal(ks[6], (D2, D1), jnp.float32) * np.sqrt(2.0 / D1)
    b2 = jax.random.uniform(ks[7], (D2,), jnp.float32, -1 / np.sqrt(D1), 1 / np.sqrt(D1))
    Wo = jax.random.normal(ks[8], (output_size, D2), jnp.float32) * np.sqrt(2.0 / D2)
    bo = jax.random.uniform(ks[9], (output_size,), jnp.float32,
                            -1 / np.sqrt(D2), 1 / np.sqrt(D2))
    return (w_ih, w_hh, b_ih, b_hh, W1, b1, W2, b2, Wo, bo)


# ----------------------------------------------------------------------------
# Pure-JAX reference (PyTorch-layout params, HIGHEST-precision math path)
# ----------------------------------------------------------------------------
def reference_forward(x_ncl, params):
    w_ih, w_hh, b_ih, b_hh, W1, b1, W2, b2, Wo, bo = params
    H = w_hh.shape[1]
    hi = lax.Precision.HIGHEST
    x = jnp.transpose(x_ncl, (0, 2, 1))            # (B, T, I)
    B, T, _ = x.shape
    h = jnp.zeros((B, H), jnp.float32)
    outs = []
    for t in range(T):
        xt = x[:, t, :]
        gi = jnp.dot(xt, w_ih.T, precision=hi) + b_ih
        gh = jnp.dot(h, w_hh.T, precision=hi) + b_hh
        r = jax.nn.sigmoid(gi[:, :H] + gh[:, :H])
        z = jax.nn.sigmoid(gi[:, H:2 * H] + gh[:, H:2 * H])
        n = jnp.tanh(gi[:, 2 * H:] + r * gh[:, 2 * H:])
        h = (1.0 - z) * n + z * h
        outs.append(h)
    o = jnp.stack(outs, axis=1)                    # (B, T, H)
    f = jnp.maximum(o, 0.0)
    f = jnp.maximum(jnp.dot(f, W1.T, precision=hi) + b1, 0.0)
    f = jnp.maximum(jnp.dot(f, W2.T, precision=hi) + b2, 0.0)
    return jnp.dot(f, Wo.T, precision=hi) + bo


# ----------------------------------------------------------------------------
if __name__ == "__main__":
    # Small shapes consistent with the module's forward: x is (B, input_size, seq_len).
    batch, input_size, seq_len = 2, 16, 8
    hidden_size, output_size = 32, 16
    hidden_layers = (100, 200)   # module default

    key = jax.random.PRNGKey(0)
    kx, kp = jax.random.split(key)
    x = jax.random.normal(kx, (batch, input_size, seq_len), jnp.float32)
    params = make_params(kp, input_size, hidden_size, output_size, hidden_layers)
    prep = prepare_params(params)

    y = seq2seq_rnn_forward(x, prep, output_size=output_size)
    y = jax.block_until_ready(y)

    y_ref = reference_forward(x, params)
    # The x-projection and MLP head run at default MXU precision (may use bf16
    # passes on v6e/v7x); the recurrence dot stays HIGHEST. 2e-2 comfortably
    # covers default-precision rounding while still catching structural bugs
    # (which would be O(0.1-1)).
    np.testing.assert_allclose(np.asarray(y), np.asarray(y_ref),
                               rtol=2e-2, atol=2e-2)
    assert y.shape == (batch, seq_len, output_size)

    print("KERNEL_OK")
</pallas_src>

<mosaic_0001>
module attributes {stable_mosaic.version = 11 : i64} {
  func.func @kernel(%arg0: i32, %arg1: memref<1x64x16xf32, #tpu.memory_space<vmem>>, %arg2: memref<16x384xf32, #tpu.memory_space<vmem>>, %arg3: memref<128x384xf32, #tpu.memory_space<vmem>>, %arg4: memref<1x384xf32, #tpu.memory_space<vmem>>, %arg5: memref<1x128xf32, #tpu.memory_space<vmem>>, %arg6: memref<128x128xf32, #tpu.memory_space<vmem>>, %arg7: memref<1x128xf32, #tpu.memory_space<vmem>>, %arg8: memref<128x256xf32, #tpu.memory_space<vmem>>, %arg9: memref<1x256xf32, #tpu.memory_space<vmem>>, %arg10: memref<256x128xf32, #tpu.memory_space<vmem>>, %arg11: memref<1x128xf32, #tpu.memory_space<vmem>>, %arg12: memref<1x64x128xf32, #tpu.memory_space<vmem>>, %arg13: memref<64x384xf32, #tpu.memory_space<vmem>>, %arg14: memref<64x128xf32, #tpu.memory_space<vmem>>) attributes {dimension_semantics = [#tpu.dimension_semantics<parallel>], iteration_bounds = array<i64: 1>, scalar_prefetch = 0 : i64, scratch_operands = 2 : i64, tpu.core_type = #tpu.core_type<tc>, window_params = [{transform_indices = @transform_0, window_bounds = array<i64: 1, 64, 16>}, {pipeline_mode = #tpu.pipeline_mode<synchronous>, transform_indices = @transform_1, window_bounds = array<i64: 16, 384>}, {pipeline_mode = #tpu.pipeline_mode<synchronous>, transform_indices = @transform_2, window_bounds = array<i64: 128, 384>}, {pipeline_mode = #tpu.pipeline_mode<synchronous>, transform_indices = @transform_3, window_bounds = array<i64: 1, 384>}, {pipeline_mode = #tpu.pipeline_mode<synchronous>, transform_indices = @transform_4, window_bounds = array<i64: 1, 128>}, {pipeline_mode = #tpu.pipeline_mode<synchronous>, transform_indices = @transform_5, window_bounds = array<i64: 128, 128>}, {pipeline_mode = #tpu.pipeline_mode<synchronous>, transform_indices = @transform_6, window_bounds = array<i64: 1, 128>}, {pipeline_mode = #tpu.pipeline_mode<synchronous>, transform_indices = @transform_7, window_bounds = array<i64: 128, 256>}, {pipeline_mode = #tpu.pipeline_mode<synchronous>, transform_indices = @transform_8, window_bounds = array<i64: 1, 256>}, {pipeline_mode = #tpu.pipeline_mode<synchronous>, transform_indices = @transform_9, window_bounds = array<i64: 256, 128>}, {pipeline_mode = #tpu.pipeline_mode<synchronous>, transform_indices = @transform_10, window_bounds = array<i64: 1, 128>}, {transform_indices = @transform_11, window_bounds = array<i64: 1, 64, 128>}]} {
    %c0 = arith.constant 0 : index
    %c0_0 = arith.constant 0 : index
    %c0_1 = arith.constant 0 : index
    %0 = vector.load %arg1[%c0, %c0_0, %c0_1] : memref<1x64x16xf32, #tpu.memory_space<vmem>>, vector<1x64x16xf32>
    %1 = vector.shape_cast %0 : vector<1x64x16xf32> to vector<64x16xf32>
    %c0_2 = arith.constant 0 : index
    %c0_3 = arith.constant 0 : index
    %2 = vector.load %arg2[%c0_2, %c0_3] : memref<16x384xf32, #tpu.memory_space<vmem>>, vector<16x384xf32>
    %cst = arith.constant dense<0.000000e+00> : vector<64x384xf32>
    %3 = tpu.matmul %1, %2, %cst {dimension_numbers = #tpu.dot_dimension_numbers<[1], [0], [0], [1], [0, 0, 1, 1], [], []>} : vector<64x16xf32>, vector<16x384xf32>, vector<64x384xf32> -> vector<64x384xf32>
    %c0_4 = arith.constant 0 : index
    %c0_5 = arith.constant 0 : index
    %4 = vector.load %arg4[%c0_4, %c0_5] : memref<1x384xf32, #tpu.memory_space<vmem>>, vector<1x384xf32>
    %5 = vector.broadcast %4 : vector<1x384xf32> to vector<64x384xf32>
    %6 = arith.addf %3, %5 : vector<64x384xf32>
    %c0_6 = arith.constant 0 : index
    %c0_7 = arith.constant 0 : index
    %7 = vector.load %arg13[%c0_6, %c0_7] : memref<64x384xf32, #tpu.memory_space<vmem>>, vector<64x384xf32>
    tpu.vector_store %arg13[%c0_6, %c0_7], %6 {strides = array<i32>} : memref<64x384xf32, #tpu.memory_space<vmem>>, vector<64x384xf32>,
    %c0_8 = arith.constant 0 : index
    %c0_9 = arith.constant 0 : index
    %8 = vector.load %arg3[%c0_8, %c0_9] : memref<128x384xf32, #tpu.memory_space<vmem>>, vector<128x384xf32>
    %c0_10 = arith.constant 0 : index
    %c0_11 = arith.constant 0 : index
    %9 = vector.load %arg5[%c0_10, %c0_11] : memref<1x128xf32, #tpu.memory_space<vmem>>, vector<1x128xf32>
    %10 = vector.shape_cast %9 : vector<1x128xf32> to vector<1x128xf32>
    %11 = vector.broadcast %10 : vector<1x128xf32> to vector<8x128xf32>
    %cst_12 = arith.constant 0.000000e+00 : f32
    %12 = vector.broadcast %cst_12 : f32 to vector<8x128xf32>
    %c0_i32 = arith.constant 0 : i32
    %c8_i32 = arith.constant 8 : i32
    %13 = arith.muli %c0_i32, %c8_i32 : i32
    %14 = tpu.assume_multiple %13, 8 : i32
    %15 = arith.index_cast %14 : i32 to index
    %c0_13 = arith.constant 0 : index
    %16 = vector.load %arg13[%15, %c0_13] : memref<64x384xf32, #tpu.memory_space<vmem>>, vector<8x384xf32>
    %cst_14 = arith.constant dense<0.000000e+00> : vector<8x384xf32>
    %17 = tpu.matmul %12, %8, %cst_14 {dimension_numbers = #tpu.dot_dimension_numbers<[1], [0], [0], [1], [0, 0, 1, 1], [], []>, precision = #tpu.contract_precision<fp32>} : vector<8x128xf32>, vector<128x384xf32>, vector<8x384xf32> -> vector<8x384xf32>
    %18 = vector.extract_strided_slice %16 {offsets = [0, 0], sizes = [8, 256], strides = [1, 1]} : vector<8x384xf32> to vector<8x256xf32>
    %19 = vector.extract_strided_slice %17 {offsets = [0, 0], sizes = [8, 256], strides = [1, 1]} : vector<8x384xf32> to vector<8x256xf32>
    %20 = arith.addf %18, %19 : vector<8x256xf32>
    %21 = arith.negf %20 : vector<8x256xf32>
    %22 = math.exp %21 : vector<8x256xf32>
    %cst_15 = arith.constant 1.000000e+00 : f32
    %23 = vector.broadcast %cst_15 : f32 to vector<8x256xf32>
    %24 = arith.addf %23, %22 : vector<8x256xf32>
    %25 = arith.divf %23, %24 : vector<8x256xf32>
    %26 = vector.extract_strided_slice %25 {offsets = [0, 0], sizes = [8, 128], strides = [1, 1]} : vector<8x256xf32> to vector<8x128xf32>
    %27 = vector.extract_strided_slice %25 {offsets = [0, 128], sizes = [8, 128], strides = [1, 1]} : vector<8x256xf32> to vector<8x128xf32>
    %28 = vector.extract_strided_slice %16 {offsets = [0, 256], sizes = [8, 128], strides = [1, 1]} : vector<8x384xf32> to vector<8x128xf32>
    %29 = vector.extract_strided_slice %17 {offsets = [0, 256], sizes = [8, 128], strides = [1, 1]} : vector<8x384xf32> to vector<8x128xf32>
    %30 = arith.addf %29, %11 : vector<8x128xf32>
    %31 = arith.mulf %26, %30 : vector<8x128xf32>
    %32 = arith.addf %28, %31 : vector<8x128xf32>
    %33 = math.tanh %32 : vector<8x128xf32>
    %cst_16 = arith.constant 1.000000e+00 : f32
    %34 = vector.broadcast %cst_16 : f32 to vector<8x128xf32>
    %35 = arith.subf %34, %27 : vector<8x128xf32>
    %36 = arith.mulf %35, %33 : vector<8x128xf32>
    %37 = arith.mulf %27, %12 : vector<8x128xf32>
    %38 = arith.addf %36, %37 : vector<8x128xf32>
    %cst_17 = arith.constant 0.000000e+00 : f32
    %39 = vector.broadcast %cst_17 : f32 to vector<8x128xf32>
    %40 = arith.maximumf %38, %39 : vector<8x128xf32>
    %41 = arith.index_cast %14 : i32 to index
    %c0_18 = arith.constant 0 : index
    %42 = vector.load %arg14[%41, %c0_18] : memref<64x128xf32, #tpu.memory_space<vmem>>, vector<8x128xf32>
    tpu.vector_store %arg14[%41, %c0_18], %40 {strides = array<i32>} : memref<64x128xf32, #tpu.memory_space<vmem>>, vector<8x128xf32>,
    %c1_i32 = arith.constant 1 : i32
    %c8_i32_19 = arith.constant 8 : i32
    %43 = arith.muli %c1_i32, %c8_i32_19 : i32
    %44 = tpu.assume_multiple %43, 8 : i32
    %45 = arith.index_cast %44 : i32 to index
    %c0_20 = arith.constant 0 : index
    %46 = vector.load %arg13[%45, %c0_20] : memref<64x384xf32, #tpu.memory_space<vmem>>, vector<8x384xf32>
    %cst_21 = arith.constant dense<0.000000e+00> : vector<8x384xf32>
    %47 = tpu.matmul %38, %8, %cst_21 {dimension_numbers = #tpu.dot_dimension_numbers<[1], [0], [0], [1], [0, 0, 1, 1], [], []>, precision = #tpu.contract_precision<fp32>} : vector<8x128xf32>, vector<128x384xf32>, vector<8x384xf32> -> vector<8x384xf32>
    %48 = vector.extract_strided_slice %46 {offsets = [0, 0], sizes = [8, 256], strides = [1, 1]} : vector<8x384xf32> to vector<8x256xf32>
    %49 = vector.extract_strided_slice %47 {offsets = [0, 0], sizes = [8, 256], strides = [1, 1]} : vector<8x384xf32> to vector<8x256xf32>
    %50 = arith.addf %48, %49 : vector<8x256xf32>
    %51 = arith.negf %50 : vector<8x256xf32>
    %52 = math.exp %51 : vector<8x256xf32>
    %cst_22 = arith.constant 1.000000e+00 : f32
    %53 = vector.broadcast %cst_22 : f32 to vector<8x256xf32>
    %54 = arith.addf %53, %52 : vector<8x256xf32>
    %55 = arith.divf %53, %54 : vector<8x256xf32>
    %56 = vector.extract_strided_slice %55 {offsets = [0, 0], sizes = [8, 128], strides = [1, 1]} : vector<8x256xf32> to vector<8x128xf32>
    %57 = vector.extract_strided_slice %55 {offsets = [0, 128], sizes = [8, 128], strides = [1, 1]} : vector<8x256xf32> to vector<8x128xf32>
    %58 = vector.extract_strided_slice %46 {offsets = [0, 256], sizes = [8, 128], strides = [1, 1]} : vector<8x384xf32> to vector<8x128xf32>
    %59 = vector.extract_strided_slice %47 {offsets = [0, 256], sizes = [8, 128], strides = [1, 1]} : vector<8x384xf32> to vector<8x128xf32>
    %60 = arith.addf %59, %11 : vector<8x128xf32>
    %61 = arith.mulf %56, %60 : vector<8x128xf32>
    %62 = arith.addf %58, %61 : vector<8x128xf32>
    %63 = math.tanh %62 : vector<8x128xf32>
    %cst_23 = arith.constant 1.000000e+00 : f32
    %64 = vector.broadcast %cst_23 : f32 to vector<8x128xf32>
    %65 = arith.subf %64, %57 : vector<8x128xf32>
    %66 = arith.mulf %65, %63 : vector<8x128xf32>
    %67 = arith.mulf %57, %38 : vector<8x128xf32>
    %68 = arith.addf %66, %67 : vector<8x128xf32>
    %cst_24 = arith.constant 0.000000e+00 : f32
    %69 = vector.broadcast %cst_24 : f32 to vector<8x128xf32>
    %70 = arith.maximumf %68, %69 : vector<8x128xf32>
    %71 = arith.index_cast %44 : i32 to index
    %c0_25 = arith.constant 0 : index
    %72 = vector.load %arg14[%71, %c0_25] : memref<64x128xf32, #tpu.memory_space<vmem>>, vector<8x128xf32>
    tpu.vector_store %arg14[%71, %c0_25], %70 {strides = array<i32>} : memref<64x128xf32, #tpu.memory_space<vmem>>, vector<8x128xf32>,
    %c2_i32 = arith.constant 2 : i32
    %c8_i32_26 = arith.constant 8 : i32
    %73 = arith.muli %c2_i32, %c8_i32_26 : i32
    %74 = tpu.assume_multiple %73, 8 : i32
    %75 = arith.index_cast %74 : i32 to index
    %c0_27 = arith.constant 0 : index
    %76 = vector.load %arg13[%75, %c0_27] : memref<64x384xf32, #tpu.memory_space<vmem>>, vector<8x384xf32>
    %cst_28 = arith.constant dense<0.000000e+00> : vector<8x384xf32>
    %77 = tpu.matmul %68, %8, %cst_28 {dimension_numbers = #tpu.dot_dimension_numbers<[1], [0], [0], [1], [0, 0, 1, 1], [], []>, precision = #tpu.contract_precision<fp32>} : vector<8x128xf32>, vector<128x384xf32>, vector<8x384xf32> -> vector<8x384xf32>
    %78 = vector.extract_strided_slice %76 {offsets = [0, 0], sizes = [8, 256], strides = [1, 1]} : vector<8x384xf32> to vector<8x256xf32>
    %79 = vector.extract_strided_slice %77 {offsets = [0, 0], sizes = [8, 256], strides = [1, 1]} : vector<8x384xf32> to vector<8x256xf32>
    %80 = arith.addf %78, %79 : vector<8x256xf32>
    %81 = arith.negf %80 : vector<8x256xf32>
    %82 = math.exp %81 : vector<8x256xf32>
    %cst_29 = arith.constant 1.000000e+00 : f32
    %83 = vector.broadcast %cst_29 : f32 to vector<8x256xf32>
    %84 = arith.addf %83, %82 : vector<8x256xf32>
    %85 = arith.divf %83, %84 : vector<8x256xf32>
    %86 = vector.extract_strided_slice %85 {offsets = [0, 0], sizes = [8, 128], strides = [1, 1]} : vector<8x256xf32> to vector<8x128xf32>
    %87 = vector.extract_strided_slice %85 {offsets = [0, 128], sizes = [8, 128], strides = [1, 1]} : vector<8x256xf32> to vector<8x128xf32>
    %88 = vector.extract_strided_slice %76 {offsets = [0, 256], sizes = [8, 128], strides = [1, 1]} : vector<8x384xf32> to vector<8x128xf32>
    %89 = vector.extract_strided_slice %77 {offsets = [0, 256], sizes = [8, 128], strides = [1, 1]} : vector<8x384xf32> to vector<8x128xf32>
    %90 = arith.addf %89, %11 : vector<8x128xf32>
    %91 = arith.mulf %86, %90 : vector<8x128xf32>
    %92 = arith.addf %88, %91 : vector<8x128xf32>
    %93 = math.tanh %92 : vector<8x128xf32>
    %cst_30 = arith.constant 1.000000e+00 : f32
    %94 = vector.broadcast %cst_30 : f32 to vector<8x128xf32>
    %95 = arith.subf %94, %87 : vector<8x128xf32>
    %96 = arith.mulf %95, %93 : vector<8x128xf32>
    %97 = arith.mulf %87, %68 : vector<8x128xf32>
    %98 = arith.addf %96, %97 : vector<8x128xf32>
    %cst_31 = arith.constant 0.000000e+00 : f32
    %99 = vector.broadcast %cst_31 : f32 to vector<8x128xf32>
    %100 = arith.maximumf %98, %99 : vector<8x128xf32>
    %101 = arith.index_cast %74 : i32 to index
    %c0_32 = arith.constant 0 : index
    %102 = vector.load %arg14[%101, %c0_32] : memref<64x128xf32, #tpu.memory_space<vmem>>, vector<8x128xf32>
    tpu.vector_store %arg14[%101, %c0_32], %100 {strides = array<i32>} : memref<64x128xf32, #tpu.memory_space<vmem>>, vector<8x128xf32>,
    %c3_i32 = arith.constant 3 : i32
    %c8_i32_33 = arith.constant 8 : i32
    %103 = arith.muli %c3_i32, %c8_i32_33 : i32
    %104 = tpu.assume_multiple %103, 8 : i32
    %105 = arith.index_cast %104 : i32 to index
    %c0_34 = arith.constant 0 : index
    %106 = vector.load %arg13[%105, %c0_34] : memref<64x384xf32, #tpu.memory_space<vmem>>, vector<8x384xf32>
    %cst_35 = arith.constant dense<0.000000e+00> : vector<8x384xf32>
    %107 = tpu.matmul %98, %8, %cst_35 {dimension_numbers = #tpu.dot_dimension_numbers<[1], [0], [0], [1], [0, 0, 1, 1], [], []>, precision = #tpu.contract_precision<fp32>} : vector<8x128xf32>, vector<128x384xf32>, vector<8x384xf32> -> vector<8x384xf32>
    %108 = vector.extract_strided_slice %106 {offsets = [0, 0], sizes = [8, 256], strides = [1, 1]} : vector<8x384xf32> to vector<8x256xf32>
    %109 = vector.extract_strided_slice %107 {offsets = [0, 0], sizes = [8, 256], strides = [1, 1]} : vector<8x384xf32> to vector<8x256xf32>
    %110 = arith.addf %108, %109 : vector<8x256xf32>
    %111 = arith.negf %110 : vector<8x256xf32>
    %112 = math.exp %111 : vector<8x256xf32>
    %cst_36 = arith.constant 1.000000e+00 : f32
    %113 = vector.broadcast %cst_36 : f32 to vector<8x256xf32>
    %114 = arith.addf %113, %112 : vector<8x256xf32>
    %115 = arith.divf %113, %114 : vector<8x256xf32>
    %116 = vector.extract_strided_slice %115 {offsets = [0, 0], sizes = [8, 128], strides = [1, 1]} : vector<8x256xf32> to vector<8x128xf32>
    %117 = vector.extract_strided_slice %115 {offsets = [0, 128], sizes = [8, 128], strides = [1, 1]} : vector<8x256xf32> to vector<8x128xf32>
    %118 = vector.extract_strided_slice %106 {offsets = [0, 256], sizes = [8, 128], strides = [1, 1]} : vector<8x384xf32> to vector<8x128xf32>
    %119 = vector.extract_strided_slice %107 {offsets = [0, 256], sizes = [8, 128], strides = [1, 1]} : vector<8x384xf32> to vector<8x128xf32>
    %120 = arith.addf %119, %11 : vector<8x128xf32>
    %121 = arith.mulf %116, %120 : vector<8x128xf32>
    %122 = arith.addf %118, %121 : vector<8x128xf32>
    %123 = math.tanh %122 : vector<8x128xf32>
    %cst_37 = arith.constant 1.000000e+00 : f32
    %124 = vector.broadcast %cst_37 : f32 to vector<8x128xf32>
    %125 = arith.subf %124, %117 : vector<8x128xf32>
    %126 = arith.mulf %125, %123 : vector<8x128xf32>
    %127 = arith.mulf %117, %98 : vector<8x128xf32>
    %128 = arith.addf %126, %127 : vector<8x128xf32>
    %cst_38 = arith.constant 0.000000e+00 : f32
    %129 = vector.broadcast %cst_38 : f32 to vector<8x128xf32>
    %130 = arith.maximumf %128, %129 : vector<8x128xf32>
    %131 = arith.index_cast %104 : i32 to index
    %c0_39 = arith.constant 0 : index
    %132 = vector.load %arg14[%131, %c0_39] : memref<64x128xf32, #tpu.memory_space<vmem>>, vector<8x128xf32>
    tpu.vector_store %arg14[%131, %c0_39], %130 {strides = array<i32>} : memref<64x128xf32, #tpu.memory_space<vmem>>, vector<8x128xf32>,
    %c4_i32 = arith.constant 4 : i32
    %c8_i32_40 = arith.constant 8 : i32
    %133 = arith.muli %c4_i32, %c8_i32_40 : i32
    %134 = tpu.assume_multiple %133, 8 : i32
    %135 = arith.index_cast %134 : i32 to index
    %c0_41 = arith.constant 0 : index
    %136 = vector.load %arg13[%135, %c0_41] : memref<64x384xf32, #tpu.memory_space<vmem>>, vector<8x384xf32>
    %cst_42 = arith.constant dense<0.000000e+00> : vector<8x384xf32>
    %137 = tpu.matmul %128, %8, %cst_42 {dimension_numbers = #tpu.dot_dimension_numbers<[1], [0], [0], [1], [0, 0, 1, 1], [], []>, precision = #tpu.contract_precision<fp32>} : vector<8x128xf32>, vector<128x384xf32>, vector<8x384xf32> -> vector<8x384xf32>
    %138 = vector.extract_strided_slice %136 {offsets = [0, 0], sizes = [8, 256], strides = [1, 1]} : vector<8x384xf32> to vector<8x256xf32>
    %139 = vector.extract_strided_slice %137 {offsets = [0, 0], sizes = [8, 256], strides = [1, 1]} : vector<8x384xf32> to vector<8x256xf32>
    %140 = arith.addf %138, %139 : vector<8x256xf32>
    %141 = arith.negf %140 : vector<8x256xf32>
    %142 = math.exp %141 : vector<8x256xf32>
    %cst_43 = arith.constant 1.000000e+00 : f32
    %143 = vector.broadcast %cst_43 : f32 to vector<8x256xf32>
    %144 = arith.addf %143, %142 : vector<8x256xf32>
    %145 = arith.divf %143, %144 : vector<8x256xf32>
    %146 = vector.extract_strided_slice %145 {offsets = [0, 0], sizes = [8, 128], strides = [1, 1]} : vector<8x256xf32> to vector<8x128xf32>
    %147 = vector.extract_strided_slice %145 {offsets = [0, 128], sizes = [8, 128], strides = [1, 1]} : vector<8x256xf32> to vector<8x128xf32>
    %148 = vector.extract_strided_slice %136 {offsets = [0, 256], sizes = [8, 128], strides = [1, 1]} : vector<8x384xf32> to vector<8x128xf32>
    %149 = vector.extract_strided_slice %137 {offsets = [0, 256], sizes = [8, 128], strides = [1, 1]} : vector<8x384xf32> to vector<8x128xf32>
    %150 = arith.addf %149, %11 : vector<8x128xf32>
    %151 = arith.mulf %146, %150 : vector<8x128xf32>
    %152 = arith.addf %148, %151 : vector<8x128xf32>
    %153 = math.tanh %152 : vector<8x128xf32>
    %cst_44 = arith.constant 1.000000e+00 : f32
    %154 = vector.broadcast %cst_44 : f32 to vector<8x128xf32>
    %155 = arith.subf %154, %147 : vector<8x128xf32>
    %156 = arith.mulf %155, %153 : vector<8x128xf32>
    %157 = arith.mulf %147, %128 : vector<8x128xf32>
    %158 = arith.addf %156, %157 : vector<8x128xf32>
    %cst_45 = arith.constant 0.000000e+00 : f32
    %159 = vector.broadcast %cst_45 : f32 to vector<8x128xf32>
    %160 = arith.maximumf %158, %159 : vector<8x128xf32>
    %161 = arith.index_cast %134 : i32 to index
    %c0_46 = arith.constant 0 : index
    %162 = vector.load %arg14[%161, %c0_46] : memref<64x128xf32, #tpu.memory_space<vmem>>, vector<8x128xf32>
    tpu.vector_store %arg14[%161, %c0_46], %160 {strides = array<i32>} : memref<64x128xf32, #tpu.memory_space<vmem>>, vector<8x128xf32>,
    %c5_i32 = arith.constant 5 : i32
    %c8_i32_47 = arith.constant 8 : i32
    %163 = arith.muli %c5_i32, %c8_i32_47 : i32
    %164 = tpu.assume_multiple %163, 8 : i32
    %165 = arith.index_cast %164 : i32 to index
    %c0_48 = arith.constant 0 : index
    %166 = vector.load %arg13[%165, %c0_48] : memref<64x384xf32, #tpu.memory_space<vmem>>, vector<8x384xf32>
    %cst_49 = arith.constant dense<0.000000e+00> : vector<8x384xf32>
    %167 = tpu.matmul %158, %8, %cst_49 {dimension_numbers = #tpu.dot_dimension_numbers<[1], [0], [0], [1], [0, 0, 1, 1], [], []>, precision = #tpu.contract_precision<fp32>} : vector<8x128xf32>, vector<128x384xf32>, vector<8x384xf32> -> vector<8x384xf32>
    %168 = vector.extract_strided_slice %166 {offsets = [0, 0], sizes = [8, 256], strides = [1, 1]} : vector<8x384xf32> to vector<8x256xf32>
    %169 = vector.extract_strided_slice %167 {offsets = [0, 0], sizes = [8, 256], strides = [1, 1]} : vector<8x384xf32> to vector<8x256xf32>
    %170 = arith.addf %168, %169 : vector<8x256xf32>
    %171 = arith.negf %170 : vector<8x256xf32>
    %172 = math.exp %171 : vector<8x256xf32>
    %cst_50 = arith.constant 1.000000e+00 : f32
    %173 = vector.broadcast %cst_50 : f32 to vector<8x256xf32>
    %174 = arith.addf %173, %172 : vector<8x256xf32>
    %175 = arith.divf %173, %174 : vector<8x256xf32>
    %176 = vector.extract_strided_slice %175 {offsets = [0, 0], sizes = [8, 128], strides = [1, 1]} : vector<8x256xf32> to vector<8x128xf32>
    %177 = vector.extract_strided_slice %175 {offsets = [0, 128], sizes = [8, 128], strides = [1, 1]} : vector<8x256xf32> to vector<8x128xf32>
    %178 = vector.extract_strided_slice %166 {offsets = [0, 256], sizes = [8, 128], strides = [1, 1]} : vector<8x384xf32> to vector<8x128xf32>
    %179 = vector.extract_strided_slice %167 {offsets = [0, 256], sizes = [8, 128], strides = [1, 1]} : vector<8x384xf32> to vector<8x128xf32>
    %180 = arith.addf %179, %11 : vector<8x128xf32>
    %181 = arith.mulf %176, %180 : vector<8x128xf32>
    %182 = arith.addf %178, %181 : vector<8x128xf32>
    %183 = math.tanh %182 : vector<8x128xf32>
    %cst_51 = arith.constant 1.000000e+00 : f32
    %184 = vector.broadcast %cst_51 : f32 to vector<8x128xf32>
    %185 = arith.subf %184, %177 : vector<8x128xf32>
    %186 = arith.mulf %185, %183 : vector<8x128xf32>
    %187 = arith.mulf %177, %158 : vector<8x128xf32>
    %188 = arith.addf %186, %187 : vector<8x128xf32>
    %cst_52 = arith.constant 0.000000e+00 : f32
    %189 = vector.broadcast %cst_52 : f32 to vector<8x128xf32>
    %190 = arith.maximumf %188, %189 : vector<8x128xf32>
    %191 = arith.index_cast %164 : i32 to index
    %c0_53 = arith.constant 0 : index
    %192 = vector.load %arg14[%191, %c0_53] : memref<64x128xf32, #tpu.memory_space<vmem>>, vector<8x128xf32>
    tpu.vector_store %arg14[%191, %c0_53], %190 {strides = array<i32>} : memref<64x128xf32, #tpu.memory_space<vmem>>, vector<8x128xf32>,
    %c6_i32 = arith.constant 6 : i32
    %c8_i32_54 = arith.constant 8 : i32
    %193 = arith.muli %c6_i32, %c8_i32_54 : i32
    %194 = tpu.assume_multiple %193, 8 : i32
    %195 = arith.index_cast %194 : i32 to index
    %c0_55 = arith.constant 0 : index
    %196 = vector.load %arg13[%195, %c0_55] : memref<64x384xf32, #tpu.memory_space<vmem>>, vector<8x384xf32>
    %cst_56 = arith.constant dense<0.000000e+00> : vector<8x384xf32>
    %197 = tpu.matmul %188, %8, %cst_56 {dimension_numbers = #tpu.dot_dimension_numbers<[1], [0], [0], [1], [0, 0, 1, 1], [], []>, precision = #tpu.contract_precision<fp32>} : vector<8x128xf32>, vector<128x384xf32>, vector<8x384xf32> -> vector<8x384xf32>
    %198 = vector.extract_strided_slice %196 {offsets = [0, 0], sizes = [8, 256], strides = [1, 1]} : vector<8x384xf32> to vector<8x256xf32>
    %199 = vector.extract_strided_slice %197 {offsets = [0, 0], sizes = [8, 256], strides = [1, 1]} : vector<8x384xf32> to vector<8x256xf32>
    %200 = arith.addf %198, %199 : vector<8x256xf32>
    %201 = arith.negf %200 : vector<8x256xf32>
    %202 = math.exp %201 : vector<8x256xf32>
    %cst_57 = arith.constant 1.000000e+00 : f32
    %203 = vector.broadcast %cst_57 : f32 to vector<8x256xf32>
    %204 = arith.addf %203, %202 : vector<8x256xf32>
    %205 = arith.divf %203, %204 : vector<8x256xf32>
    %206 = vector.extract_strided_slice %205 {offsets = [0, 0], sizes = [8, 128], strides = [1, 1]} : vector<8x256xf32> to vector<8x128xf32>
    %207 = vector.extract_strided_slice %205 {offsets = [0, 128], sizes = [8, 128], strides = [1, 1]} : vector<8x256xf32> to vector<8x128xf32>
    %208 = vector.extract_strided_slice %196 {offsets = [0, 256], sizes = [8, 128], strides = [1, 1]} : vector<8x384xf32> to vector<8x128xf32>
    %209 = vector.extract_strided_slice %197 {offsets = [0, 256], sizes = [8, 128], strides = [1, 1]} : vector<8x384xf32> to vector<8x128xf32>
    %210 = arith.addf %209, %11 : vector<8x128xf32>
    %211 = arith.mulf %206, %210 : vector<8x128xf32>
    %212 = arith.addf %208, %211 : vector<8x128xf32>
    %213 = math.tanh %212 : vector<8x128xf32>
    %cst_58 = arith.constant 1.000000e+00 : f32
    %214 = vector.broadcast %cst_58 : f32 to vector<8x128xf32>
    %215 = arith.subf %214, %207 : vector<8x128xf32>
    %216 = arith.mulf %215, %213 : vector<8x128xf32>
    %217 = arith.mulf %207, %188 : vector<8x128xf32>
    %218 = arith.addf %216, %217 : vector<8x128xf32>
    %cst_59 = arith.constant 0.000000e+00 : f32
    %219 = vector.broadcast %cst_59 : f32 to vector<8x128xf32>
    %220 = arith.maximumf %218, %219 : vector<8x128xf32>
    %221 = arith.index_cast %194 : i32 to index
    %c0_60 = arith.constant 0 : index
    %222 = vector.load %arg14[%221, %c0_60] : memref<64x128xf32, #tpu.memory_space<vmem>>, vector<8x128xf32>
    tpu.vector_store %arg14[%221, %c0_60], %220 {strides = array<i32>} : memref<64x128xf32, #tpu.memory_space<vmem>>, vector<8x128xf32>,
    %c7_i32 = arith.constant 7 : i32
    %c8_i32_61 = arith.constant 8 : i32
    %223 = arith.muli %c7_i32, %c8_i32_61 : i32
    %224 = tpu.assume_multiple %223, 8 : i32
    %225 = arith.index_cast %224 : i32 to index
    %c0_62 = arith.constant 0 : index
    %226 = vector.load %arg13[%225, %c0_62] : memref<64x384xf32, #tpu.memory_space<vmem>>, vector<8x384xf32>
    %cst_63 = arith.constant dense<0.000000e+00> : vector<8x384xf32>
    %227 = tpu.matmul %218, %8, %cst_63 {dimension_numbers = #tpu.dot_dimension_numbers<[1], [0], [0], [1], [0, 0, 1, 1], [], []>, precision = #tpu.contract_precision<fp32>} : vector<8x128xf32>, vector<128x384xf32>, vector<8x384xf32> -> vector<8x384xf32>
    %228 = vector.extract_strided_slice %226 {offsets = [0, 0], sizes = [8, 256], strides = [1, 1]} : vector<8x384xf32> to vector<8x256xf32>
    %229 = vector.extract_strided_slice %227 {offsets = [0, 0], sizes = [8, 256], strides = [1, 1]} : vector<8x384xf32> to vector<8x256xf32>
    %230 = arith.addf %228, %229 : vector<8x256xf32>
    %231 = arith.negf %230 : vector<8x256xf32>
    %232 = math.exp %231 : vector<8x256xf32>
    %cst_64 = arith.constant 1.000000e+00 : f32
    %233 = vector.broadcast %cst_64 : f32 to vector<8x256xf32>
    %234 = arith.addf %233, %232 : vector<8x256xf32>
    %235 = arith.divf %233, %234 : vector<8x256xf32>
    %236 = vector.extract_strided_slice %235 {offsets = [0, 0], sizes = [8, 128], strides = [1, 1]} : vector<8x256xf32> to vector<8x128xf32>
    %237 = vector.extract_strided_slice %235 {offsets = [0, 128], sizes = [8, 128], strides = [1, 1]} : vector<8x256xf32> to vector<8x128xf32>
    %238 = vector.extract_strided_slice %226 {offsets = [0, 256], sizes = [8, 128], strides = [1, 1]} : vector<8x384xf32> to vector<8x128xf32>
    %239 = vector.extract_strided_slice %227 {offsets = [0, 256], sizes = [8, 128], strides = [1, 1]} : vector<8x384xf32> to vector<8x128xf32>
    %240 = arith.addf %239, %11 : vector<8x128xf32>
    %241 = arith.mulf %236, %240 : vector<8x128xf32>
    %242 = arith.addf %238, %241 : vector<8x128xf32>
    %243 = math.tanh %242 : vector<8x128xf32>
    %cst_65 = arith.constant 1.000000e+00 : f32
    %244 = vector.broadcast %cst_65 : f32 to vector<8x128xf32>
    %245 = arith.subf %244, %237 : vector<8x128xf32>
    %246 = arith.mulf %245, %243 : vector<8x128xf32>
    %247 = arith.mulf %237, %218 : vector<8x128xf32>
    %248 = arith.addf %246, %247 : vector<8x128xf32>
    %cst_66 = arith.constant 0.000000e+00 : f32
    %249 = vector.broadcast %cst_66 : f32 to vector<8x128xf32>
    %250 = arith.maximumf %248, %249 : vector<8x128xf32>
    %251 = arith.index_cast %224 : i32 to index
    %c0_67 = arith.constant 0 : index
    %252 = vector.load %arg14[%251, %c0_67] : memref<64x128xf32, #tpu.memory_space<vmem>>, vector<8x128xf32>
    tpu.vector_store %arg14[%251, %c0_67], %250 {strides = array<i32>} : memref<64x128xf32, #tpu.memory_space<vmem>>, vector<8x128xf32>,
    %c8_i32_68 = arith.constant 8 : i32
    %c0_69 = arith.constant 0 : index
    %c0_70 = arith.constant 0 : index
    %253 = vector.load %arg6[%c0_69, %c0_70] : memref<128x128xf32, #tpu.memory_space<vmem>>, vector<128x128xf32>
    %c0_71 = arith.constant 0 : index
    %c0_72 = arith.constant 0 : index
    %254 = vector.load %arg7[%c0_71, %c0_72] : memref<1x128xf32, #tpu.memory_space<vmem>>, vector<1x128xf32>
    %c0_73 = arith.constant 0 : index
    %c0_74 = arith.constant 0 : index
    %255 = vector.load %arg8[%c0_73, %c0_74] : memref<128x256xf32, #tpu.memory_space<vmem>>, vector<128x256xf32>
    %c0_75 = arith.constant 0 : index
    %c0_76 = arith.constant 0 : index
    %256 = vector.load %arg9[%c0_75, %c0_76] : memref<1x256xf32, #tpu.memory_space<vmem>>, vector<1x256xf32>
    %c0_77 = arith.constant 0 : index
    %c0_78 = arith.constant 0 : index
    %257 = vector.load %arg10[%c0_77, %c0_78] : memref<256x128xf32, #tpu.memory_space<vmem>>, vector<256x128xf32>
    %c0_79 = arith.constant 0 : index
    %c0_80 = arith.constant 0 : index
    %258 = vector.load %arg11[%c0_79, %c0_80] : memref<1x128xf32, #tpu.memory_space<vmem>>, vector<1x128xf32>
    %c0_i32_81 = arith.constant 0 : i32
    %c1_i32_82 = arith.constant 1 : i32
    %259 = arith.muli %c0_i32_81, %c1_i32_82 : i32
    %c0_i32_83 = arith.constant 0 : i32
    %260 = arith.addi %c0_i32_83, %259 : i32
    %c64_i32 = arith.constant 64 : i32
    %261 = arith.muli %260, %c64_i32 : i32
    %262 = tpu.assume_multiple %261, 64 : i32
    %263 = arith.index_cast %262 : i32 to index
    %c0_84 = arith.constant 0 : index
    %264 = vector.load %arg14[%263, %c0_84] : memref<64x128xf32, #tpu.memory_space<vmem>>, vector<64x128xf32>
    %cst_85 = arith.constant dense<0.000000e+00> : vector<64x128xf32>
    %265 = tpu.matmul %264, %253, %cst_85 {dimension_numbers = #tpu.dot_dimension_numbers<[1], [0], [0], [1], [0, 0, 1, 1], [], []>} : vector<64x128xf32>, vector<128x128xf32>, vector<64x128xf32> -> vector<64x128xf32>
    %266 = vector.broadcast %254 : vector<1x128xf32> to vector<64x128xf32>
    %267 = arith.addf %265, %266 : vector<64x128xf32>
    %cst_86 = arith.constant 0.000000e+00 : f32
    %268 = vector.broadcast %cst_86 : f32 to vector<64x128xf32>
    %269 = arith.maximumf %267, %268 : vector<64x128xf32>
    %cst_87 = arith.constant dense<0.000000e+00> : vector<64x256xf32>
    %270 = tpu.matmul %269, %255, %cst_87 {dimension_numbers = #tpu.dot_dimension_numbers<[1], [0], [0], [1], [0, 0, 1, 1], [], []>} : vector<64x128xf32>, vector<128x256xf32>, vector<64x256xf32> -> vector<64x256xf32>
    %271 = vector.broadcast %256 : vector<1x256xf32> to vector<64x256xf32>
    %272 = arith.addf %270, %271 : vector<64x256xf32>
    %cst_88 = arith.constant 0.000000e+00 : f32
    %273 = vector.broadcast %cst_88 : f32 to vector<64x256xf32>
    %274 = arith.maximumf %272, %273 : vector<64x256xf32>
    %cst_89 = arith.constant dense<0.000000e+00> : vector<64x128xf32>
    %275 = tpu.matmul %274, %257, %cst_89 {dimension_numbers = #tpu.dot_dimension_numbers<[1], [0], [0], [1], [0, 0, 1, 1], [], []>} : vector<64x256xf32>, vector<256x128xf32>, vector<64x128xf32> -> vector<64x128xf32>
    %276 = vector.broadcast %258 : vector<1x128xf32> to vector<64x128xf32>
    %277 = arith.addf %275, %276 : vector<64x128xf32>
    %c0_90 = arith.constant 0 : index
    %278 = arith.index_cast %262 : i32 to index
    %c0_91 = arith.constant 0 : index
    %279 = vector.load %arg12[%c0_90, %278, %c0_91] : memref<1x64x128xf32, #tpu.memory_space<vmem>>, vector<1x64x128xf32>
    %280 = vector.shape_cast %279 : vector<1x64x128xf32> to vector<64x128xf32>
    %281 = vector.shape_cast %277 : vector<64x128xf32> to vector<1x64x128xf32>
    tpu.vector_store %arg12[%c0_90, %278, %c0_91], %281 {strides = array<i32>} : memref<1x64x128xf32, #tpu.memory_space<vmem>>, vector<1x64x128xf32>,
    %c1_i32_92 = arith.constant 1 : i32
    return
  }
  func.func @transform_0(%arg0: i32) -> (i32, i32, i32) {
    %c0_i32 = arith.constant 0 : i32
    %c0_i32_0 = arith.constant 0 : i32
    %c0_i32_1 = arith.constant 0 : i32
    return %arg0, %c0_i32, %c0_i32_0 : i32, i32, i32
  }
  func.func @transform_1(%arg0: i32) -> (i32, i32) {
    %c0_i32 = arith.constant 0 : i32
    %c0_i32_0 = arith.constant 0 : i32
    %c0_i32_1 = arith.constant 0 : i32
    return %c0_i32, %c0_i32_0 : i32, i32
  }
  func.func @transform_2(%arg0: i32) -> (i32, i32) {
    %c0_i32 = arith.constant 0 : i32
    %c0_i32_0 = arith.constant 0 : i32
    %c0_i32_1 = arith.constant 0 : i32
    return %c0_i32, %c0_i32_0 : i32, i32
  }
  func.func @transform_3(%arg0: i32) -> (i32, i32) {
    %c0_i32 = arith.constant 0 : i32
    %c0_i32_0 = arith.constant 0 : i32
    %c0_i32_1 = arith.constant 0 : i32
    return %c0_i32, %c0_i32_0 : i32, i32
  }
  func.func @transform_4(%arg0: i32) -> (i32, i32) {
    %c0_i32 = arith.constant 0 : i32
    %c0_i32_0 = arith.constant 0 : i32
    %c0_i32_1 = arith.constant 0 : i32
    return %c0_i32, %c0_i32_0 : i32, i32
  }
  func.func @transform_5(%arg0: i32) -> (i32, i32) {
    %c0_i32 = arith.constant 0 : i32
    %c0_i32_0 = arith.constant 0 : i32
    %c0_i32_1 = arith.constant 0 : i32
    return %c0_i32, %c0_i32_0 : i32, i32
  }
  func.func @transform_6(%arg0: i32) -> (i32, i32) {
    %c0_i32 = arith.constant 0 : i32
    %c0_i32_0 = arith.constant 0 : i32
    %c0_i32_1 = arith.constant 0 : i32
    return %c0_i32, %c0_i32_0 : i32, i32
  }
  func.func @transform_7(%arg0: i32) -> (i32, i32) {
    %c0_i32 = arith.constant 0 : i32
    %c0_i32_0 = arith.constant 0 : i32
    %c0_i32_1 = arith.constant 0 : i32
    return %c0_i32, %c0_i32_0 : i32, i32
  }
  func.func @transform_8(%arg0: i32) -> (i32, i32) {
    %c0_i32 = arith.constant 0 : i32
    %c0_i32_0 = arith.constant 0 : i32
    %c0_i32_1 = arith.constant 0 : i32
    return %c0_i32, %c0_i32_0 : i32, i32
  }
  func.func @transform_9(%arg0: i32) -> (i32, i32) {
    %c0_i32 = arith.constant 0 : i32
    %c0_i32_0 = arith.constant 0 : i32
    %c0_i32_1 = arith.constant 0 : i32
    return %c0_i32, %c0_i32_0 : i32, i32
  }
  func.func @transform_10(%arg0: i32) -> (i32, i32) {
    %c0_i32 = arith.constant 0 : i32
    %c0_i32_0 = arith.constant 0 : i32
    %c0_i32_1 = arith.constant 0 : i32
    return %c0_i32, %c0_i32_0 : i32, i32
  }
  func.func @transform_11(%arg0: i32) -> (i32, i32, i32) {
    %c0_i32 = arith.constant 0 : i32
    %c0_i32_0 = arith.constant 0 : i32
    %c0_i32_1 = arith.constant 0 : i32
    return %arg0, %c0_i32, %c0_i32_0 : i32, i32, i32
  }
}

</mosaic_0001>

<bundles_post_ra>
// kernel: tpu_custom_call.1
= control target key start
LH: loop header
LB: loop body
LE: loop exit
PB: predicated region body
PF: predicated region fallthrough
CT: control target
= control target key end

     0   :  { %16 = vsyncpa [#allocation5], 0  ;;  %s20573_s0 = inlined_call_operand.vmem [shape: f32[1,64,16], index: 0, kind: input, shape index: {}]   ;;  %s20574_s1 = inlined_call_operand.vmem [shape: f32[16,384], index: 1, kind: input, shape index: {}]   ;;  %s20575_s2 = inlined_call_operand.hbm [shape: f32[128,384], index: 2, kind: input, shape index: {}]   ;;  %s20576_s3 = inlined_call_operand.vmem [shape: f32[1,384], index: 3, kind: input, shape index: {}]   ;;  %s20577_s4 = inlined_call_operand.vmem [shape: f32[1,128], index: 4, kind: input, shape index: {}]   ;;  %s20578_s5 = inlined_call_operand.hbm [shape: f32[128,128], index: 5, kind: input, shape index: {}]   ;;  %s20579_s6 = inlined_call_operand.vmem [shape: f32[1,128], index: 6, kind: input, shape index: {}]   ;;  %s20580_s7 = inlined_call_operand.hbm [shape: f32[128,256], index: 7, kind: input, shape index: {}]   ;;  %s20581_s8 = inlined_call_operand.vmem [shape: f32[1,256], index: 8, kind: input, shape index: {}]   ;;  %s20582_s9 = inlined_call_operand.hbm [shape: f32[256,128], index: 9, kind: input, shape index: {}]   ;;  %s20583_s10 = inlined_call_operand.vmem [shape: f32[1,128], index: 10, kind: input, shape index: {}]   ;;  %s20584_s11 = inlined_call_operand.hbm [shape: f32[1,64,128], index: 11, kind: output, shape index: {}]  }
   0x1   :  { %17 = vsyncpa [#allocation8], 0 }
   0x2   :  { %18 = vsyncpa [#allocation11], 0 }
   0x3   :  { %19 = vsyncpa [#allocation6], 0  ;;  %s16049_s17 = smov [#allocation7]  }
   0x4   :  { %s45_s18 = sshll.u32 %s16049_s17, 4  ;;  %s46_s18 = int_to_ptr.vmem [resolvable:$true] %s45_s18 }
   0x5   :  { %s15949_s19 = scalar_lea.vmem %s46_s18, 2048  ;;  %p15954_p1 = scmp.lt.s32.totalorder %s46_s18, %s46_s18 }
   0x6   :  { %p15950_p0 = scmp.ne.s32.totalorder %s46_s18, %s15949_s19  ;;  %p15955_p2 = scmp.lt.s32.totalorder %s15949_s19, %s15949_s19 }
   0x8   :  { %p15956_p3 = por %p15955_p2, %p15954_p1 }
   0xa   :  { %p15957_p4 = pnand %p15956_p3, %p15950_p0 }
   0xc   :  { %15960 = shalt.err (!%p15957_p4)
}
   0xd   :  { %s16050_s20 = smov 128   ;;  %s16051_s21 = smov 8  }
   0xe   :  { %51 = dma.hbm_to_vmem [thread:$0]  %s20578_s5, 2048, %s46_s18, [#allocation8], %s16050_s20, %s16050_s20, %s16051_s21  }
   0xf   :  { %s16052_s24 = smov [#allocation4]  }
  0x10   :  { %s29_s25 = sshll.u32 %s16052_s24, 4  ;;  %s30_s25 = int_to_ptr.vmem [resolvable:$true] %s29_s25 }
  0x11   :  { %s15969_s26 = scalar_lea.vmem %s30_s25, 6144  ;;  %p15974_p6 = scmp.lt.s32.totalorder %s30_s25, %s30_s25 }
  0x12   :  { %p15970_p5 = scmp.ne.s32.totalorder %s30_s25, %s15969_s26  ;;  %p15975_p7 = scmp.lt.s32.totalorder %s15969_s26, %s15969_s26 }
  0x14   :  { %p15976_p8 = por %p15975_p7, %p15974_p6 }
  0x16   :  { %p15977_p9 = pnand %p15976_p8, %p15970_p5 }
  0x18   :  { %15980 = shalt.err (!%p15977_p9)
}
  0x19   :  { %s16053_s27 = smov 384   ;;  %s16054_s28 = smov 24  }
  0x1a   :  { %35 = dma.hbm_to_vmem [thread:$0]  %s20575_s2, 6144, %s30_s25, [#allocation5], %s16053_s27, %s16053_s27, %s16054_s28  }
  0x1b   :  { %s16055_s12 = smov [#allocation9]  }
  0x1c   :  { %s59_s13 = sshll.u32 %s16055_s12, 4  ;;  %s60_s13 = int_to_ptr.vmem [resolvable:$true] %s59_s13 }
  0x1d   :  { %s15989_s5 = scalar_lea.vmem %s60_s13, 4096  ;;  %p15994_p11 = scmp.lt.s32.totalorder %s60_s13, %s60_s13 }
  0x1e   :  { %p15990_p10 = scmp.ne.s32.totalorder %s60_s13, %s15989_s5  ;;  %p15995_p12 = scmp.lt.s32.totalorder %s15989_s5, %s15989_s5 }
  0x20   :  { %p15996_p13 = por %p15995_p12, %p15994_p11 }
  0x22   :  { %p15997_p0 = pnand %p15996_p13, %p15990_p10 }
  0x24   :  { %16000 = shalt.err (!%p15997_p0)
}
  0x25   :  { %s16056_s14 = smov 256   ;;  %s16057_s15 = smov 16  }
  0x26   :  { %65 = dma.hbm_to_vmem [thread:$0]  %s20580_s7, 4096, %s60_s13, [#allocation8], %s16056_s14, %s16056_s14, %s16057_s15  }
  0x27   :  { %s16058_s18 = smov [#allocation10]  }
  0x28   :  { %s73_s19 = sshll.u32 %s16058_s18, 4  ;;  %s74_s19 = int_to_ptr.vmem [resolvable:$true] %s73_s19 }
  0x29   :  { %s16009_s2 = scalar_lea.vmem %s74_s19, 4096  ;;  %p16014_p2 = scmp.lt.s32.totalorder %s74_s19, %s74_s19 }
  0x2a   :  { %p16010_p1 = scmp.ne.s32.totalorder %s74_s19, %s16009_s2  ;;  %p16015_p3 = scmp.lt.s32.totalorder %s16009_s2, %s16009_s2 }
  0x2c   :  { %p16016_p4 = por %p16015_p3, %p16014_p2 }
  0x2e   :  { %p16017_p5 = pnand %p16016_p4, %p16010_p1 }
  0x30   :  { %16020 = shalt.err (!%p16017_p5)
}
  0x31   :  { %79 = dma.hbm_to_vmem [thread:$0]  %s20582_s9, 4096, %s74_s19, [#allocation11], %s16050_s20, %s16050_s20, %s16051_s21  }
  0x32   :  { %16041 = dma.done.wait [#allocation5], 6144  }
  0x33   :  { %16042 = vsyncadd [#allocation5], 4294961152 }
  0x34   :  { %16043 = dma.done.wait [#allocation8], 6144  }
  0x35   :  { %16044 = vsyncadd [#allocation8], 4294961152 }
  0x36   :  { %16045 = dma.done.wait [#allocation11], 4096  }
  0x37   :  { %16046 = vsyncadd [#allocation11], 4294963200  ;;  %v20593_v0 = vmov 0.0   ;;  %v106_v1 = vld [vmem:[%s20574_s1 + $0x20] sm:$0xff]  ;;  %v105_v2 = vld [vmem:[%s20574_s1 + $0x18] sm:$0xff]  ;;  %vm125_vm0 = vcmask 130048  }
  0x38   :  { %214 = vmatprep.mubr.f32.mxu0 %v20593_v0  ;;  %v103_v3 = vld [vmem:[%s20574_s1 + $0x8] sm:$0xff]  ;;  %178 = vmatprep.subr.mxu0 %v106_v1  ;;  %v102_v4 = vld [vmem:[%s20574_s1] sm:$0xff]  ;;  %v438_v5 = vld [vmem:[#allocation4 + $0x170] sm:$0xff]  ;;  %vm16060_vm1 = vmmov 0  }
  0x39   :  { %v94_v6 = vld [vmem:[%s20573_s0] sm:$0xff]  ;;  %179 = vmatpush1.msra.mxu0 %v105_v2  ;;  %v16156_v7 = vand.u32 4294901760, %v438_v5  ;;  %v107_v8 = vld [vmem:[%s20574_s1 + $0x28] sm:$0xff]  ;;  %v435_v10 = vld [vmem:[#allocation4 + $0x158] sm:$0xff] }
  0x3a   :  { %v437_v9 = vld [vmem:[#allocation4 + $0x168] sm:$0xff]  ;;  %14076 = vmatprep.mubr.msk.f32.mxu1 %vm125_vm0, %v94_v6  ;;  %180 = vmatprep.subr.mxu0 %v103_v3  ;;  %v16164_v12 = vand.u32 4294901760, %v435_v10  ;;  %v104_v13 = vld [vmem:[%s20574_s1 + $0x10] sm:$0xff]  ;;  %v432_v15 = vld [vmem:[#allocation4 + $0x140] sm:$0xff] }
  0x3b   :  { %21116 = vst [vmem:[#allocation17_spill] sm:$0xff] %v16156_v7  ;;  %14072 = vmatprep.subr.mxu1 %v107_v8  ;;  %v16162_v11 = vand.u32 4294901760, %v437_v9  ;;  %v434_v14 = vld [vmem:[#allocation4 + $0x150] sm:$0xff]  ;;  %181 = vmatpush1.msra.mxu0 %v102_v4  ;;  %v16171_v17 = vand.u32 4294901760, %v432_v15  ;;  %v431_v18 = vld [vmem:[#allocation4 + $0x138] sm:$0xff]  ;;  %v429_v19 = vld [vmem:[#allocation4 + $0x128] sm:$0xff]  ;;  %v16174_v20 = vsub.f32 %v438_v5, %v16156_v7 }
  0x3c   :  { %14073 = vmatpush3.msra.mxu1 %v107_v8  ;;  %v16169_v16 = vand.u32 4294901760, %v434_v14  ;;  %454 = vmatprep.subr.mxu0 %v16156_v7  ;;  %v95_v21 = vld [vmem:[%s20573_s0 + $0x8] sm:$0xff]  ;;  %v16181_v22 = vand.u32 4294901760, %v431_v18  ;;  %v16183_v23 = vand.u32 4294901760, %v429_v19  ;;  %v428_v24 = vld [vmem:[#allocation4 + $0x120] sm:$0xff]  ;;  %v426_v26 = vld [vmem:[#allocation4 + $0x110] sm:$0xff]  ;;  %v16189_v27 = vsub.f32 %v435_v10, %v16164_v12 }
  0x3d   :  { %21117 = vst [vmem:[#allocation18_spill] sm:$0xff] %v16174_v20  ;;  %13131 = vmatmul.mubr.msk.f32.vlgmr.msra.gmra.mxu0 %vm125_vm0, %v94_v6  ;;  %v16186_v25 = vsub.f32 %v437_v9, %v16162_v11  ;;  %14074 = vmatprep.subr.mxu1 %v104_v13  ;;  %v16193_v28 = vand.u32 4294901760, %v16174_v20  ;;  %v16195_v29 = vand.u32 4294901760, %v428_v24  ;;  %v16197_v30 = vand.u32 4294901760, %v426_v26  ;;  %v425_v31 = vld [vmem:[#allocation4 + $0x108] sm:$0xff]  ;;  %v16202_v33 = vld [vmem:[#allocation4 + $0xf8] sm:$0xff] }
  0x3e   :  { %21119 = vst [vmem:[#allocation20_spill] sm:$0xff] %v16189_v27  ;;  %456 = vmatpush1.msra.mxu0 %v16162_v11  ;;  %v16200_v32 = vsub.f32 %v434_v14, %v16169_v16  ;;  %v16204_v34 = vld [vmem:[#allocation4 + $0xf0] sm:$0xff]  ;;  %220 = vmatprep.mubr.f32.mxu0 %v20593_v0  ;;  %v16212_v36 = vand.u32 4294901760, %v16189_v27  ;;  %v16214_v37 = vand.u32 4294901760, %v425_v31  ;;  %v16217_v38 = vand.u32 4294901760, %v16202_v33  ;;  %v16219_v39 = vld [vmem:[#allocation4 + $0xe0] sm:$0xff] }
  0x3f   :  { %21118 = vst [vmem:[#allocation19_spill] sm:$0xff] %v16186_v25  ;;  %21120 = vst [vmem:[#allocation21_spill] sm:$0xff] %v16193_v28  ;;  %458 = vmatprep.subr.mxu0 %v16164_v12  ;;  %v16209_v35 = vand.u32 4294901760, %v16186_v25  ;;  %14075 = vmatpush3.msra.mxu1 %v104_v13  ;;  %v559_v40 = vsub.f32 %v16174_v20, %v16193_v28  ;;  %v16228_v42 = vsub.f32 %v432_v15, %v16171_v17  ;;  %v16233_v44 = vld [vmem:[#allocation4 + $0xd8] sm:$0xff]  ;;  %v16259_v53 = vld [vmem:[#allocation4 + $0xc8] sm:$0xff] }
  0x40   :  { %21121 = vst [vmem:[#allocation22_spill] sm:$0xff] %v16197_v30  ;;  %21122 = vst [vmem:[#allocation23_spill] sm:$0xff] %v16200_v32  ;;  %460 = vmatpush1.msra.mxu0 %v16169_v16  ;;  %v16225_v41 = vand.u32 4294901760, %v16200_v32  ;;  %v16231_v43 = vand.u32 4294901760, %v16204_v34  ;;  %v571_v46 = vsub.f32 %v16189_v27, %v16212_v36  ;;  %v16242_v47 = vsub.f32 %v431_v18, %v16181_v22  ;;  %v16261_v54 = vld [vmem:[#allocation4 + $0xc0] sm:$0xff]  ;;  %v16272_v57 = vld [vmem:[%s20573_s0 + $0x10] sm:$0xff] }
  0x41   :  { %21123 = vst [vmem:[#allocation24_spill] sm:$0xff] %v16209_v35  ;;  %21124 = vst [vmem:[#allocation25_spill] sm:$0xff] %v16212_v36  ;;  %462 = vmatprep.subr.mxu0 %v16171_v17  ;;  %13132 = vmatmul.mubr.msk.f32.gmra.mxu0 %vm125_vm0, %v95_v21  ;;  %v565_v45 = vsub.f32 %v16186_v25, %v16209_v35  ;;  %v16245_v48 = vand.u32 4294901760, %v16219_v39  ;;  %v16249_v49 = vand.u32 4294901760, %v559_v40  ;;  %v16254_v51 = vand.u32 4294901760, %v16228_v42  ;;  %v16292_v1 = vld [vmem:[#allocation4 + $0xb0] sm:$0xff] }
  0x42   :  { %21125 = vst [vmem:[#allocation26_spill] sm:$0xff] %v16214_v37  ;;  %21126 = vst [vmem:[#allocation27_spill] sm:$0xff] %v16217_v38  ;;  %14077 = vmatmul.mubr.msk.f32.vlgmr.msra.gmra.mxu1 %vm125_vm0, %v95_v21  ;;  %464 = vmatpush1.msra.mxu0 %v16181_v22  ;;  %v577_v50 = vsub.f32 %v16200_v32, %v16225_v41  ;;  %v16257_v52 = vsub.f32 %v429_v19, %v16183_v23  ;;  %v16267_v56 = vand.u32 4294901760, %v571_v46  ;;  %v16307_v6 = vld [vmem:[#allocation4 + $0xa8] sm:$0xff]  ;;  %v16322_v14 = vld [vmem:[#allocation4 + $0x98] sm:$0xff] }
  0x43   :  { %21127 = vst [vmem:[#allocation28_spill] sm:$0xff] %v16225_v41  ;;  %21128 = vst [vmem:[#allocation29_spill] sm:$0xff] %v16228_v42  ;;  %466 = vmatprep.subr.mxu0 %v16183_v23  ;;  %v16264_v55 = vand.u32 4294901760, %v565_v45  ;;  %226 = vmatprep.mubr.f32.mxu0 %v20593_v0  ;;  %v16275_v58 = vand.u32 4294901760, %v16242_v47  ;;  %v16278_v59 = vand.u32 4294901760, %v16233_v44  ;;  %v583_v61 = vsub.f32 %v16228_v42, %v16254_v51  ;;  %v16466_v36 = vld [vmem:[#allocation4 + $0x48] sm:$0xff] }
  0x44   :  { %21129 = vst [vmem:[#allocation30_spill] sm:$0xff] %v16231_v43  ;;  %21130 = vst [vmem:[#allocation31_spill] sm:$0xff] %v16242_v47  ;;  %561 = vmatprep.subr.mxu1 %v16249_v49  ;;  %468 = vmatpush1.msra.mxu0 %v16195_v29  ;;  %v16282_v60 = vand.u32 4294901760, %v577_v50  ;;  %v16287_v62 = vand.u32 4294901760, %v16257_v52  ;;  %v16290_v63 = vsub.f32 %v428_v24, %v16195_v29  ;;  %v16299_v3 = vand.u32 4294901760, %v16259_v53  ;;  %v16338_v24 = vld [vmem:[#allocation4 + $0x90] sm:$0xff] }
  0x45   :  { %21131 = vst [vmem:[#allocation32_spill] sm:$0xff] %v16245_v48  ;;  %21132 = vst [vmem:[#allocation33_spill] sm:$0xff] %v16249_v49  ;;  %567 = vmatpush1.msra.mxu1 %v16264_v55  ;;  %470 = vmatprep.subr.mxu0 %v16197_v30  ;;  %v589_v2 = vsub.f32 %v16242_v47, %v16275_v58  ;;  %v16302_v4 = vsub.f32 %v426_v26, %v16197_v30  ;;  %v16305_v5 = vand.u32 4294901760, %v16261_v54  ;;  %v16402_v49 = vld [vmem:[#allocation4 + $0x68] sm:$0xff]  ;;  %v16482_v28 = vld [vmem:[#allocation4 + $0x38] sm:$0xff] }
  0x46   :  { %21133 = vst [vmem:[#allocation34_spill] sm:$0xff] %v16254_v51  ;;  %21134 = vst [vmem:[#allocation35_spill] sm:$0xff] %v16257_v52  ;;  %573 = vmatprep.subr.mxu1 %v16267_v56  ;;  %13133 = vmatmul.mubr.msk.f32.gmra.mxu0 %vm125_vm0, %v16272_v57  ;;  %v16312_v8 = vand.u32 4294901760, %v583_v61  ;;  %v595_v9 = vsub.f32 %v16257_v52, %v16287_v62  ;;  %v16317_v10 = vand.u32 4294901760, %v16290_v63  ;;  %v16332_v19 = vand.u32 4294901760, %v16292_v1 }
  0x47   :  { %21135 = vst [vmem:[#allocation36_spill] sm:$0xff] %v16264_v55  ;;  %21136 = vst [vmem:[#allocation37_spill] sm:$0xff] %v16267_v56  ;;  %v16320_v13 = vsub.f32 %v425_v31, %v16214_v37  ;;  %472 = vmatpush1.msra.mxu0 %v16214_v37  ;;  %579 = vmatpush1.msra.mxu1 %v16282_v60  ;;  %v16326_v15 = vand.u32 4294901760, %v589_v2  ;;  %v16329_v18 = vand.u32 4294901760, %v16302_v4  ;;  %v16347_v31 = vld [vmem:[%s20573_s0 + $0x18] sm:$0xff]  ;;  %v16369_v2 = vand.u32 4294901760, %v16322_v14 }
  0x48   :  { %21137 = vst [vmem:[#allocation38_spill] sm:$0xff] %v16275_v58  ;;  %21138 = vst [vmem:[#allocation39_spill] sm:$0xff] %v16278_v59  ;;  %v16336_v21 = vsub.f32 %v16202_v33, %v16217_v38  ;;  %474 = vmatprep.subr.mxu0 %v16217_v38  ;;  %585 = vmatprep.subr.mxu1 %v16312_v8  ;;  %v16342_v26 = vand.u32 4294901760, %v595_v9  ;;  %v601_v40 = vsub.f32 %v16290_v63, %v16317_v10  ;;  %v16371_v9 = vld [vmem:[#allocation4 + $0x80] sm:$0xff]  ;;  %v16386_v56 = vld [vmem:[#allocation4 + $0x78] sm:$0xff]  ;;  %v21174_v51 = vmov 0.0  }
  0x49   :  { %21139 = vst [vmem:[#allocation40_spill] sm:$0xff] %v16282_v60  ;;  %21140 = vst [vmem:[#allocation41_spill] sm:$0xff] %v16287_v62  ;;  %v16352_v45 = vand.u32 4294901760, %v16320_v13  ;;  %v16355_v33 = vand.u32 4294901760, %v16307_v6  ;;  %476 = vmatpush1.msra.mxu0 %v16231_v43  ;;  %591 = vmatpush1.msra.mxu1 %v16326_v15  ;;  %v607_v46 = vsub.f32 %v16302_v4, %v16329_v18  ;;  %v16451_v58 = vld [vmem:[#allocation4 + $0x50] sm:$0xff] }
  0x4a   :  { %21141 = vst [vmem:[#allocation42_spill] sm:$0xff] %v16290_v63  ;;  %21142 = vst [vmem:[#allocation43_spill] sm:$0xff] %v16299_v3  ;;  %v16362_v50 = vand.u32 4294901760, %v16336_v21  ;;  %v16366_v61 = vsub.f32 %v16204_v34, %v16231_v43  ;;  %232 = vmatprep.mubr.f32.mxu0 %v20593_v0  ;;  %478 = vmatprep.subr.mxu0 %v16245_v48  ;;  %v16381_v60 = vsub.f32 %v16219_v39, %v16245_v48 }
  0x4b   :  { %21143 = vst [vmem:[#allocation44_spill] sm:$0xff] %v16302_v4  ;;  %21144 = vst [vmem:[#allocation45_spill] sm:$0xff] %v16305_v5  ;;  %v16384_v34 = vand.u32 4294901760, %v16338_v24  ;;  %597 = vmatprep.subr.mxu1 %v16342_v26  ;;  %13134 = vmatmul.mubr.msk.f32.gmra.mxu0 %vm125_vm0, %v16347_v31  ;;  %v16391_v0 = vand.u32 4294901760, %v607_v46  ;;  %v16400_v39 = vsub.f32 %v16233_v44, %v16278_v59  ;;  %v16418_v44 = vld [vmem:[#allocation4 + $0x60] sm:$0xff] }
  0x4c   :  { %21145 = vst [vmem:[#allocation46_spill] sm:$0xff] %v16312_v8  ;;  %21146 = vst [vmem:[#allocation47_spill] sm:$0xff] %v16317_v10  ;;  %v613_v8 = vsub.f32 %v16320_v13, %v16352_v45  ;;  %v16396_v55 = vand.u32 4294901760, %v16366_v61  ;;  %480 = vmatpush1.msra.mxu0 %v16278_v59  ;;  %v16409_v46 = vand.u32 4294901760, %v16381_v60  ;;  %v16446_v62 = vsub.f32 %v16261_v54, %v16305_v5 }
  0x4d   :  { %21147 = vst [vmem:[#allocation48_spill] sm:$0xff] %v16320_v13  ;;  %21148 = vst [vmem:[#allocation49_spill] sm:$0xff] %v16326_v15  ;;  %v16375_v15 = vand.u32 4294901760, %v601_v40  ;;  %v619_v40 = vsub.f32 %v16336_v21, %v16362_v50  ;;  %482 = vmatprep.subr.mxu0 %v16299_v3  ;;  %v16432_v10 = vand.u32 4294901760, %v16400_v39  ;;  %238 = vmatprep.mubr.f32.mxu0 %v21174_v51  ;;  %v16464_v54 = vand.u32 4294901760, %v16418_v44 }
  0x4e   :  { %21149 = vst [vmem:[#allocation50_spill] sm:$0xff] %v16329_v18  ;;  %21150 = vst [vmem:[#allocation51_spill] sm:$0xff] %v16332_v19  ;;  %484 = vmatpush1.msra.mxu0 %v16305_v5  ;;  %v16461_v41 = vsub.f32 %v16292_v1, %v16332_v19  ;;  %v16480_v1 = vsub.f32 %v16307_v6, %v16355_v33  ;;  %v16498_v6 = vld [vmem:[#allocation4 + $0x30] sm:$0xff]  ;;  %14079 = vmatprep.mubr.msk.f32.mxu1 %vm125_vm0, %v16272_v57 }
  0x4f   :  { %21151 = vst [vmem:[#allocation52_spill] sm:$0xff] %v16336_v21  ;;  %21152 = vst [vmem:[#allocation53_spill] sm:$0xff] %v16342_v26  ;;  %603 = vmatpush1.msra.mxu1 %v16375_v15  ;;  %v16406_v26 = vand.u32 4294901760, %v613_v8  ;;  %v16422_v18 = vand.u32 4294901760, %v619_v40  ;;  %v16427_v8 = vld [vmem:[%s20573_s0 + $0x20] sm:$0xff]  ;;  %v631_v40 = vsub.f32 %v16381_v60, %v16409_v46  ;;  %486 = vmatprep.subr.mxu0 %v16332_v19 }
  0x50   :  { %21153 = vst [vmem:[#allocation54_spill] sm:$0xff] %v16352_v45  ;;  %21154 = vst [vmem:[#allocation55_spill] sm:$0xff] %v16355_v33  ;;  %v16416_v45 = vsub.f32 %v16259_v53, %v16299_v3  ;;  %609 = vmatprep.subr.mxu1 %v16391_v0  ;;  %v16435_v53 = vand.u32 4294901760, %v16386_v56  ;;  %13135 = vmatmul.mubr.msk.f32.gmra.mxu0 %vm125_vm0, %v16427_v8  ;;  %v16496_v19 = vsub.f32 %v16322_v14, %v16369_v2  ;;  %v396_v3 = vld [vmem:[#allocation4 + $0x20] sm:$0xff] }
  0x51   :  { %21155 = vst [vmem:[#allocation56_spill] sm:$0xff] %v16362_v50  ;;  %21156 = vst [vmem:[#allocation57_spill] sm:$0xff] %v16366_v61  ;;  %v16412_v50 = vand.u32 4294901760, %v16371_v9  ;;  %615 = vmatpush1.msra.mxu1 %v16406_v26  ;;  %v16471_v35 = vand.u32 4294901760, %v631_v40  ;;  %488 = vmatpush1.msra.mxu0 %v16355_v33  ;;  %v16489_v40 = vand.u32 4294901760, %v16461_v41  ;;  %v16512_v5 = vand.u32 4294901760, %v16480_v1 }
  0x52   :  { %21157 = vst [vmem:[#allocation58_spill] sm:$0xff] %v16369_v2  ;;  %21158 = vst [vmem:[#allocation59_spill] sm:$0xff] %v16375_v15  ;;  %v625_v15 = vsub.f32 %v16366_v61, %v16396_v55  ;;  %621 = vmatprep.subr.mxu1 %v16422_v18  ;;  %490 = vmatprep.subr.mxu0 %v16369_v2  ;;  %v16515_v14 = vand.u32 4294901760, %v16466_v36  ;;  %v16526_v2 = vsub.f32 %v16338_v24, %v16384_v34 }
  0x53   :  { %21159 = vst [vmem:[#allocation60_spill] sm:$0xff] %v16381_v60  ;;  %21160 = vst [vmem:[#allocation61_spill] sm:$0xff] %v16384_v34  ;;  %492 = vmatpush1.msra.mxu0 %v16384_v34  ;;  %244 = vmatprep.mubr.f32.mxu0 %v21174_v51  ;;  %v16542_v24 = vand.u32 4294901760, %v16498_v6  ;;  %v395_v34 = vld [vmem:[#allocation4 + $0x18] sm:$0xff]  ;;  %v16565_v43 = vand.u32 4294901760, %v396_v3 }
  0x54   :  { %21161 = vst [vmem:[#allocation62_spill] sm:$0xff] %v16391_v0  ;;  %21162 = vst [vmem:[#allocation63_spill] sm:$0xff] %v16396_v55  ;;  %v16442_v0 = vand.u32 4294901760, %v16416_v45  ;;  %v16449_v55 = vand.u32 4294901760, %v16402_v49  ;;  %494 = vmatprep.subr.mxu0 %v16412_v50  ;;  %14080 = vmatmul.mubr.msk.f32.gmra.mxu1 %vm125_vm0, %v16347_v31 }
  0x55   :  { %21163 = vst [vmem:[#allocation64_spill] sm:$0xff] %v16400_v39  ;;  %21164 = vst [vmem:[#allocation65_spill] sm:$0xff] %v16406_v26  ;;  %v16455_v26 = vand.u32 4294901760, %v625_v15  ;;  %496 = vmatpush1.msra.mxu0 %v16435_v53  ;;  %14082 = vmatprep.mubr.msk.f32.mxu1 %vm125_vm0, %v16427_v8 }
  0x56   :  { %21165 = vst [vmem:[#allocation66_spill] sm:$0xff] %v16409_v46  ;;  %21166 = vst [vmem:[#allocation67_spill] sm:$0xff] %v16412_v50  ;;  %v637_v46 = vsub.f32 %v16400_v39, %v16432_v10  ;;  %v643_v15 = vsub.f32 %v16416_v45, %v16442_v0  ;;  %498 = vmatprep.subr.mxu0 %v16449_v55 }
  0x57   :  { %21167 = vst [vmem:[#allocation68_spill] sm:$0xff] %v16416_v45  ;;  %21168 = vst [vmem:[#allocation69_spill] sm:$0xff] %v16422_v18  ;;  %627 = vmatpush1.msra.mxu1 %v16455_v26  ;;  %500 = vmatpush1.msra.mxu0 %v16464_v54 }
  0x58   :  { %21169 = vst [vmem:[#allocation70_spill] sm:$0xff] %v16432_v10  ;;  %21170 = vst [vmem:[#allocation71_spill] sm:$0xff] %v16435_v53  ;;  %v16476_v10 = vand.u32 4294901760, %v16446_v62  ;;  %v16486_v18 = vand.u32 4294901760, %v637_v46  ;;  %633 = vmatprep.subr.mxu1 %v16471_v35  ;;  %v16502_v33 = vand.u32 4294901760, %v643_v15  ;;  %v16507_v46 = vld [vmem:[%s20573_s0 + $0x28] sm:$0xff]  ;;  %v655_v15 = vsub.f32 %v16461_v41, %v16489_v40 }
  0x59   :  { %21171 = vst [vmem:[#allocation72_spill] sm:$0xff] %v16442_v0  ;;  %21172 = vst [vmem:[#allocation73_spill] sm:$0xff] %v16446_v62  ;;  %v16492_v0 = vand.u32 4294901760, %v16451_v58  ;;  %13136 = vmatmul.mubr.msk.f32.gmra.mxu0 %vm125_vm0, %v16507_v46  ;;  %14083 = vmatmul.mubr.msk.f32.gmra.mxu1 %vm125_vm0, %v16507_v46 }
  0x5a   :  { %21173 = vst [vmem:[#allocation74_spill] sm:$0xff] %v16449_v55  ;;  %21175 = vst [vmem:[#allocation75_spill] sm:$0xff] %v16455_v26  ;;  %v649_v26 = vsub.f32 %v16446_v62, %v16476_v10  ;;  %639 = vmatpush1.msra.mxu1 %v16486_v18  ;;  %v16547_v48 = vand.u32 4294901760, %v655_v15  ;;  %250 = vmatprep.mubr.f32.mxu0 %v21174_v51 }
  0x5b   :  { %21176 = vst [vmem:[#allocation76_spill] sm:$0xff] %v16461_v41  ;;  %21177 = vst [vmem:[#allocation77_spill] sm:$0xff] %v16464_v54  ;;  %645 = vmatprep.subr.mxu1 %v16502_v33  ;;  %502 = vmatprep.subr.mxu0 %v16492_v0 }
  0x5c   :  { %21178 = vst [vmem:[#allocation78_spill] sm:$0xff] %v16471_v35  ;;  %21179 = vst [vmem:[#allocation79_spill] sm:$0xff] %v16476_v10  ;;  %v16522_v35 = vand.u32 4294901760, %v16496_v19  ;;  %v16529_v10 = vand.u32 4294901760, %v16482_v28  ;;  %v16533_v59 = vand.u32 4294901760, %v649_v26  ;;  %504 = vmatpush1.msra.mxu0 %v16515_v14 }
  0x5d   :  { %21180 = vst [vmem:[#allocation80_spill] sm:$0xff] %v16480_v1  ;;  %21181 = vst [vmem:[#allocation81_spill] sm:$0xff] %v16486_v18  ;;  %v661_v18 = vsub.f32 %v16480_v1, %v16512_v5 }
  0x5e   :  { %21182 = vst [vmem:[#allocation82_spill] sm:$0xff] %v16489_v40  ;;  %21183 = vst [vmem:[#allocation83_spill] sm:$0xff] %v16492_v0  ;;  %v16539_v40 = vsub.f32 %v16371_v9, %v16412_v50  ;;  %v667_v26 = vsub.f32 %v16496_v19, %v16522_v35  ;;  %v16556_v9 = vsub.f32 %v16386_v56, %v16435_v53  ;;  %v393_v50 = vld [vmem:[#allocation4 + $0x8] sm:$0xff]  ;;  %651 = vmatpush1.msra.mxu1 %v16533_v59 }
  0x5f   :  { %21184 = vst [vmem:[#allocation84_spill] sm:$0xff] %v16496_v19  ;;  %21185 = vst [vmem:[#allocation85_spill] sm:$0xff] %v16502_v33  ;;  %v16560_v33 = vand.u32 4294901760, %v661_v18  ;;  %v392_v19 = vld [vmem:[#allocation4] sm:$0xff]  ;;  %657 = vmatprep.subr.mxu1 %v16547_v48  ;;  %v16580_v53 = vand.u32 4294901760, %v395_v34  ;;  %506 = vmatprep.subr.mxu0 %v16529_v10 }
  0x60   :  { %21186 = vst [vmem:[#allocation86_spill] sm:$0xff] %v16512_v5  ;;  %21187 = vst [vmem:[#allocation87_spill] sm:$0xff] %v16515_v14  ;;  %v16552_v5 = vand.u32 4294901760, %v16526_v2  ;;  %v16563_v15 = vand.u32 4294901760, %v16539_v40  ;;  %v16573_v56 = vand.u32 4294901760, %v667_v26  ;;  %508 = vmatpush1.msra.mxu0 %v16542_v24 }
  0x61   :  { %21188 = vst [vmem:[#allocation88_spill] sm:$0xff] %v16522_v35  ;;  %21189 = vst [vmem:[#allocation89_spill] sm:$0xff] %v16526_v2  ;;  %v16569_v35 = vsub.f32 %v16402_v49, %v16449_v55  ;;  %663 = vmatpush1.msra.mxu1 %v16560_v33  ;;  %v16587_v49 = vld [vmem:[%s20573_s0 + $0x30] sm:$0xff]  ;;  %v16598_v55 = vand.u32 4294901760, %v393_v50  ;;  %510 = vmatprep.subr.mxu0 %v16565_v43 }
  0x62   :  { %21190 = vst [vmem:[#allocation90_spill] sm:$0xff] %v16529_v10  ;;  %21191 = vst [vmem:[#allocation91_spill] sm:$0xff] %v16533_v59  ;;  %v673_v18 = vsub.f32 %v16526_v2, %v16552_v5  ;;  %v16578_v59 = vand.u32 4294901760, %v16556_v9  ;;  %v679_v26 = vsub.f32 %v16539_v40, %v16563_v15  ;;  %669 = vmatprep.subr.mxu1 %v16573_v56  ;;  %13137 = vmatmul.mubr.msk.f32.gmra.mxu0 %vm125_vm0, %v16587_v49 }
  0x63   :  { %21192 = vst [vmem:[#allocation92_spill] sm:$0xff] %v16539_v40  ;;  %21193 = vst [vmem:[#allocation93_spill] sm:$0xff] %v16542_v24  ;;  %v16611_v40 = vand.u32 4294901760, %v392_v19  ;;  %256 = vmatprep.mubr.f32.mxu0 %v21174_v51  ;;  %512 = vmatpush1.msra.mxu0 %v16580_v53 }
  0x64   :  { %21194 = vst [vmem:[#allocation94_spill] sm:$0xff] %v16547_v48  ;;  %21195 = vst [vmem:[#allocation95_spill] sm:$0xff] %v16552_v5  ;;  %v16592_v48 = vand.u32 4294901760, %v16569_v35  ;;  %v16596_v5 = vsub.f32 %v16418_v44, %v16464_v54  ;;  %v685_v2 = vsub.f32 %v16556_v9, %v16578_v59  ;;  %v16615_v44 = vand.u32 4294901760, %v679_v26  ;;  %514 = vmatprep.subr.mxu0 %v16598_v55 }
  0x65   :  { %21196 = vst [vmem:[#allocation96_spill] sm:$0xff] %v16556_v9  ;;  %21197 = vst [vmem:[#allocation97_spill] sm:$0xff] %v16560_v33  ;;  %v16603_v33 = vand.u32 4294901760, %v673_v18  ;;  %v16703_v8 = vsub.f32 %v392_v19, %v16611_v40  ;;  %516 = vmatpush1.msra.mxu0 %v16611_v40  ;;  %14085 = vmatprep.mubr.msk.f32.mxu1 %vm125_vm0, %v16587_v49 }
  0x66   :  { %21198 = vst [vmem:[#allocation98_spill] sm:$0xff] %v16563_v15  ;;  %21199 = vst [vmem:[#allocation99_spill] sm:$0xff] %v16565_v43  ;;  %v16609_v15 = vsub.f32 %v16451_v58, %v16492_v0  ;;  %v691_v57 = vsub.f32 %v16569_v35, %v16592_v48  ;;  %v16620_v18 = vand.u32 4294901760, %v16596_v5  ;;  %v16630_v58 = vand.u32 4294901760, %v685_v2  ;;  %789 = vmatprep.subr.mxu0 %v16174_v20 }
  0x67   :  { %21200 = vst [vmem:[#allocation100_spill] sm:$0xff] %v16569_v35  ;;  %21201 = vst [vmem:[#allocation101_spill] sm:$0xff] %v16573_v56  ;;  %v16637_v56 = vsub.f32 %v16482_v28, %v16529_v10  ;;  %675 = vmatpush1.msra.mxu1 %v16603_v33  ;;  %v16653_v0 = vsub.f32 %v396_v3, %v16565_v43  ;;  %v101_v3 = vld [vmem:[%s20573_s0 + $0x38] sm:$0xff]  ;;  %v16681_v10 = vsub.f32 %v393_v50, %v16598_v55 }
  0x68   :  { %21202 = vst [vmem:[#allocation102_spill] sm:$0xff] %v16578_v59  ;;  %21203 = vst [vmem:[#allocation103_spill] sm:$0xff] %v16580_v53  ;;  %v16624_v59 = vsub.f32 %v16466_v36, %v16515_v14  ;;  %v16633_v26 = vand.u32 4294901760, %v16609_v15  ;;  %v16645_v36 = vand.u32 4294901760, %v691_v57  ;;  %v697_v31 = vsub.f32 %v16596_v5, %v16620_v18  ;;  %681 = vmatprep.subr.mxu1 %v16615_v44 }
  0x69   :  { %21204 = vst [vmem:[#allocation104_spill] sm:$0xff] %v16592_v48  ;;  %21205 = vst [vmem:[#allocation105_spill] sm:$0xff] %v16596_v5  ;;  %v16641_v48 = vsub.f32 %v16498_v6, %v16542_v24  ;;  %v16660_v6 = vand.u32 4294901760, %v16637_v56  ;;  %687 = vmatpush1.msra.mxu1 %v16630_v58  ;;  %v16700_v24 = vand.u32 4294901760, %v16681_v10  ;;  %13138 = vmatmul.mubr.msk.f32.gmra.mxu0 %vm125_vm0, %v101_v3  ;;  %v16717_v19 = vand.u32 4294901760, %v16703_v8 }
  0x6a   :  { %21206 = vst [vmem:[#allocation106_spill] sm:$0xff] %v16598_v55  ;;  %21207 = vst [vmem:[#allocation107_spill] sm:$0xff] %v16603_v33  ;;  %v16650_v2 = vand.u32 4294901760, %v16624_v59  ;;  %v703_v28 = vsub.f32 %v16609_v15, %v16633_v26  ;;  %v16666_v33 = vsub.f32 %v395_v34, %v16580_v53  ;;  %693 = vmatprep.subr.mxu1 %v16645_v36  ;;  %549 = vmatprep.mubr.f32.mxu0 %v21174_v51 }
  0x6b   :  { %21208 = vst [vmem:[#allocation108_spill] sm:$0xff] %v16609_v15  ;;  %21209 = vst [vmem:[#allocation109_spill] sm:$0xff] %v16611_v40  ;;  %v16663_v57 = vand.u32 4294901760, %v16641_v48  ;;  %v739_v46 = vsub.f32 %v16681_v10, %v16700_v24  ;;  %14086 = vmatmul.mubr.msk.f32.gmra.mxu1 %vm125_vm0, %v101_v3  ;;  %v21239_v3 = vld [vmem:[#allocation84_spill] sm:$0xff] }
  0x6c   :  { %21210 = vst [vmem:[#allocation110_spill] sm:$0xff] %v16615_v44  ;;  %21211 = vst [vmem:[#allocation111_spill] sm:$0xff] %v16620_v18  ;;  %v16673_v44 = vand.u32 4294901760, %v697_v31  ;;  %v16678_v18 = vand.u32 4294901760, %v16653_v0  ;;  %v16686_v34 = vand.u32 4294901760, %v703_v28  ;;  %v715_v31 = vsub.f32 %v16637_v56, %v16660_v6  ;;  %780 = vmatprep.mubr.f32.mxu1 %v21174_v51 }
  0x6d   :  { %21212 = vst [vmem:[#allocation112_spill] sm:$0xff] %v16624_v59  ;;  %21213 = vst [vmem:[#allocation113_spill] sm:$0xff] %v16630_v58  ;;  %v16691_v58 = vand.u32 4294901760, %v16666_v33  ;;  %v721_v50 = vsub.f32 %v16641_v48, %v16663_v57  ;;  %550 = vmatmul.mubr.f32.vlgmr.msra.gmra.mxu0 %v21174_v51 }
  0x6e   :  { %21214 = vst [vmem:[#allocation114_spill] sm:$0xff] %v16633_v26  ;;  %21215 = vst [vmem:[#allocation115_spill] sm:$0xff] %v16637_v56  ;;  %v709_v26 = vsub.f32 %v16624_v59, %v16650_v2  ;;  %v727_v28 = vsub.f32 %v16653_v0, %v16678_v18  ;;  %699 = vmatpush1.msra.mxu1 %v16673_v44  ;;  %792 = vmatpush1.msra.mxu0 %v16186_v25 }
  0x6f   :  { %21216 = vst [vmem:[#allocation116_spill] sm:$0xff] %v16641_v48  ;;  %21217 = vst [vmem:[#allocation117_spill] sm:$0xff] %v16645_v36  ;;  %v733_v36 = vsub.f32 %v16666_v33, %v16691_v58  ;;  %705 = vmatprep.subr.mxu1 %v16686_v34  ;;  %795 = vmatprep.subr.mxu0 %v16189_v27 }
  0x70   :  { %21218 = vst [vmem:[#allocation118_spill] sm:$0xff] %v16650_v2  ;;  %21219 = vst [vmem:[#allocation119_spill] sm:$0xff] %v16653_v0  ;;  %v16695_v2 = vand.u32 4294901760, %v709_v26  ;;  %v16712_v26 = vand.u32 4294901760, %v715_v31  ;;  %v745_v31 = vsub.f32 %v16703_v8, %v16717_v19  ;;  %798 = vmatpush1.msra.mxu0 %v16200_v32  ;;  %915 = vmatprep.mubr.f32.mxu0 %v21174_v51 }
  0x71   :  { %21220 = vst [vmem:[#allocation120_spill] sm:$0xff] %v16660_v6  ;;  %21221 = vst [vmem:[#allocation121_spill] sm:$0xff] %v16663_v57  ;;  %801 = vmatprep.subr.mxu0 %v16228_v42 }
  0x72   :  { %21222 = vst [vmem:[#allocation122_spill] sm:$0xff] %v16666_v33  ;;  %21223 = vst [vmem:[#allocation123_spill] sm:$0xff] %v16673_v44  ;;  %711 = vmatpush1.msra.mxu1 %v16695_v2  ;;  %v16725_v44 = vand.u32 4294901760, %v721_v50  ;;  %v16740_v50 = vand.u32 4294901760, %v739_v46  ;;  %v16744_v49 = vand.u32 4294901760, %v745_v31  ;;  %804 = vmatpush1.msra.mxu0 %v16242_v47  ;;  %v21241_v46 = vld [vmem:[#allocation89_spill] sm:$0xff] }
  0x73   :  { %21224 = vst [vmem:[#allocation124_spill] sm:$0xff] %v16678_v18  ;;  %21225 = vst [vmem:[#allocation125_spill] sm:$0xff] %v16681_v10  ;;  %717 = vmatprep.subr.mxu1 %v16712_v26  ;;  %807 = vmatprep.subr.mxu0 %v16257_v52  ;;  %v21242_v31 = vld [vmem:[#allocation39_spill] sm:$0xff] }
  0x74   :  { %21226 = vst [vmem:[#allocation126_spill] sm:$0xff] %v16686_v34  ;;  %21227 = vst [vmem:[#allocation127_spill] sm:$0xff] %v16691_v58  ;;  %v16732_v58 = vand.u32 4294901760, %v727_v28  ;;  %v16736_v34 = vand.u32 4294901760, %v733_v36  ;;  %723 = vmatpush1.msra.mxu1 %v16725_v44  ;;  %810 = vmatpush1.msra.mxu0 %v16290_v63  ;;  %v21238_v36 = vld [vmem:[#allocation30_spill] sm:$0xff]  ;;  %v21240_v28 = vld [vmem:[#allocation32_spill] sm:$0xff] }
  0x75   :  { %21228 = vst [vmem:[#allocation128_spill] sm:$0xff] %v16695_v2  ;;  %21229 = vst [vmem:[#allocation129_spill] sm:$0xff] %v16700_v24  ;;  %813 = vmatprep.subr.mxu0 %v16302_v4  ;;  %v427_v63 = vld [vmem:[#allocation4 + $0x118] sm:$0xff]  ;;  %v406_v2 = vld [vmem:[#allocation4 + $0x70] sm:$0xff] }
  0x76   :  { %21230 = vst [vmem:[#allocation130_spill] sm:$0xff] %v16703_v8  ;;  %21231 = vst [vmem:[#allocation131_spill] sm:$0xff] %v16712_v26  ;;  %729 = vmatprep.subr.mxu1 %v16732_v58  ;;  %816 = vmatpush1.msra.mxu0 %v16320_v13  ;;  %v21282_v13 = vld [vmem:[#allocation114_spill] sm:$0xff] }
  0x77   :  { %21232 = vst [vmem:[#allocation132_spill] sm:$0xff] %v16717_v19  ;;  %21233 = vst [vmem:[#allocation133_spill] sm:$0xff] %v16725_v44  ;;  %735 = vmatpush1.msra.mxu1 %v16736_v34  ;;  %819 = vmatprep.subr.mxu0 %v16336_v21  ;;  %v21280_v21 = vld [vmem:[#allocation111_spill] sm:$0xff] }
  0x78   :  { %21234 = vst [vmem:[#allocation134_spill] sm:$0xff] %v16732_v58  ;;  %21235 = vst [vmem:[#allocation135_spill] sm:$0xff] %v16736_v34  ;;  %741 = vmatprep.subr.mxu1 %v16740_v50  ;;  %822 = vmatpush1.msra.mxu0 %v16366_v61  ;;  %v21279_v61 = vld [vmem:[#allocation104_spill] sm:$0xff] }
  0x79   :  { %21236 = vst [vmem:[#allocation136_spill] sm:$0xff] %v16740_v50  ;;  %21237 = vst [vmem:[#allocation137_spill] sm:$0xff] %v16744_v49  ;;  %747 = vmatpush1.msra.mxu1 %v16744_v49  ;;  %825 = vmatprep.subr.mxu0 %v16381_v60  ;;  %v21277_v60 = vld [vmem:[#allocation102_spill] sm:$0xff]  ;;  %v412_v50 = vld [vmem:[#allocation4 + $0xa0] sm:$0xff] }
  0x7a   :  { %781 = vmatmul.mubr.f32.vlgmr.msra.gmra.mxu1 %v21174_v51  ;;  %923 = vmatprep.subr.mxu1 %v16156_v7 }
  0x7b   :  { %925 = vmatpush1.msra.mxu1 %v16162_v11  ;;  %828 = vmatpush1.msra.mxu0 %v16400_v39  ;;  %v21266_v39 = vld [vmem:[#allocation56_spill] sm:$0xff]  ;;  %v21289_v52 = vld [vmem:[#allocation127_spill] sm:$0xff] }
  0x7c   :  { %927 = vmatprep.subr.mxu1 %v16164_v12  ;;  %831 = vmatprep.subr.mxu0 %v16416_v45  ;;  %v21243_v45 = vld [vmem:[#allocation92_spill] sm:$0xff] }
  0x7d   :  { %929 = vmatpush1.msra.mxu1 %v16169_v16  ;;  %834 = vmatpush1.msra.mxu0 %v16446_v62  ;;  %v21244_v62 = vld [vmem:[#allocation43_spill] sm:$0xff] }
  0x7e   :  { %931 = vmatprep.subr.mxu1 %v16171_v17  ;;  %837 = vmatprep.subr.mxu0 %v16461_v41  ;;  %v21245_v41 = vld [vmem:[#allocation45_spill] sm:$0xff] }
  0x7f   :  { %933 = vmatpush1.msra.mxu1 %v16181_v22  ;;  %840 = vmatpush1.msra.mxu0 %v16480_v1  ;;  %v21246_v1 = vld [vmem:[#allocation51_spill] sm:$0xff] }
  0x80   :  { %935 = vmatprep.subr.mxu1 %v16183_v23  ;;  %843 = vmatprep.subr.mxu0 %v21239_v3  ;;  %v21247_v3 = vld [vmem:[#allocation55_spill] sm:$0xff] }
  0x81   :  { %937 = vmatpush1.msra.mxu1 %v16195_v29  ;;  %846 = vmatpush1.msra.mxu0 %v21241_v46  ;;  %v21248_v46 = vld [vmem:[#allocation58_spill] sm:$0xff] }
  0x82   :  { %939 = vmatprep.subr.mxu1 %v16197_v30  ;;  %849 = vmatprep.subr.mxu0 %v21243_v45  ;;  %v21249_v45 = vld [vmem:[#allocation61_spill] sm:$0xff] }
  0x83   :  { %941 = vmatpush1.msra.mxu1 %v16214_v37  ;;  %852 = vmatpush1.msra.mxu0 %v16556_v9  ;;  %v21250_v9 = vld [vmem:[#allocation67_spill] sm:$0xff] }
  0x84   :  { %943 = vmatprep.subr.mxu1 %v16217_v38  ;;  %855 = vmatprep.subr.mxu0 %v16569_v35  ;;  %v21251_v35 = vld [vmem:[#allocation71_spill] sm:$0xff] }
  0x85   :  { %945 = vmatpush1.msra.mxu1 %v21238_v36  ;;  %858 = vmatpush1.msra.mxu0 %v16596_v5  ;;  %v21252_v5 = vld [vmem:[#allocation74_spill] sm:$0xff] }
  0x86   :  { %947 = vmatprep.subr.mxu1 %v21240_v28  ;;  %861 = vmatprep.subr.mxu0 %v16609_v15  ;;  %v21260_v15 = vld [vmem:[#allocation34_spill] sm:$0xff] }
  0x87   :  { %949 = vmatpush1.msra.mxu1 %v21242_v31  ;;  %864 = vmatpush1.msra.mxu0 %v16624_v59  ;;  %v21253_v59 = vld [vmem:[#allocation83_spill] sm:$0xff] }
  0x88   :  { %951 = vmatprep.subr.mxu1 %v21244_v62  ;;  %867 = vmatprep.subr.mxu0 %v16637_v56  ;;  %v21256_v56 = vld [vmem:[#allocation93_spill] sm:$0xff] }
  0x89   :  { %953 = vmatpush1.msra.mxu1 %v21245_v41  ;;  %870 = vmatpush1.msra.mxu0 %v16641_v48  ;;  %v21254_v48 = vld [vmem:[#allocation90_spill] sm:$0xff] }
  0x8a   :  { %955 = vmatprep.subr.mxu1 %v21246_v1  ;;  %873 = vmatprep.subr.mxu0 %v16653_v0  ;;  %v21255_v0 = vld [vmem:[#allocation21_spill] sm:$0xff] }
  0x8b   :  { %957 = vmatpush1.msra.mxu1 %v21247_v3  ;;  %876 = vmatpush1.msra.mxu0 %v16666_v33  ;;  %v21257_v33 = vld [vmem:[#allocation24_spill] sm:$0xff] }
  0x8c   :  { %959 = vmatprep.subr.mxu1 %v21248_v46  ;;  %879 = vmatprep.subr.mxu0 %v16681_v10  ;;  %v21258_v10 = vld [vmem:[#allocation25_spill] sm:$0xff] }
  0x8d   :  { %961 = vmatpush1.msra.mxu1 %v21249_v45  ;;  %882 = vmatpush1.msra.mxu0 %v16703_v8  ;;  %v21259_v8 = vld [vmem:[#allocation28_spill] sm:$0xff] }
  0x8e   :  { %963 = vmatprep.subr.mxu1 %v21250_v9  ;;  %916 = vmatmul.mubr.f32.vlgmr.msra.gmra.mxu0 %v21174_v51 }
  0x8f   :  { %965 = vmatpush1.msra.mxu1 %v21251_v35  ;;  %1028 = vmatprep.subr.mxu0 %v21255_v0  ;;  %v21261_v0 = vld [vmem:[#allocation38_spill] sm:$0xff] }
  0x90   :  { %967 = vmatprep.subr.mxu1 %v21252_v5  ;;  %1032 = vmatpush1.msra.mxu0 %v21257_v33  ;;  %v21262_v33 = vld [vmem:[#allocation41_spill] sm:$0xff] }
  0x91   :  { %969 = vmatpush1.msra.mxu1 %v16464_v54  ;;  %1036 = vmatprep.subr.mxu0 %v21258_v10  ;;  %v21263_v10 = vld [vmem:[#allocation47_spill] sm:$0xff] }
  0x92   :  { %971 = vmatprep.subr.mxu1 %v21253_v59  ;;  %1040 = vmatpush1.msra.mxu0 %v21259_v8  ;;  %v21264_v8 = vld [vmem:[#allocation50_spill] sm:$0xff] }
  0x93   :  { %973 = vmatpush1.msra.mxu1 %v16515_v14  ;;  %1044 = vmatprep.subr.mxu0 %v21260_v15  ;;  %v21265_v15 = vld [vmem:[#allocation54_spill] sm:$0xff] }
  0x94   :  { %975 = vmatprep.subr.mxu1 %v21254_v48  ;;  %1018 = vmatprep.mubr.f32.mxu1 %v21174_v51 }
  0x95   :  { %977 = vmatpush1.msra.mxu1 %v21256_v56  ;;  %1048 = vmatpush1.msra.mxu0 %v21261_v0  ;;  %v21267_v0 = vld [vmem:[#allocation63_spill] sm:$0xff] }
  0x96   :  { %979 = vmatprep.subr.mxu1 %v16565_v43  ;;  %1052 = vmatprep.subr.mxu0 %v21262_v33  ;;  %v21268_v33 = vld [vmem:[#allocation66_spill] sm:$0xff] }
  0x97   :  { %981 = vmatpush1.msra.mxu1 %v16580_v53  ;;  %1056 = vmatpush1.msra.mxu0 %v21263_v10  ;;  %v21269_v10 = vld [vmem:[#allocation70_spill] sm:$0xff] }
  0x98   :  { %983 = vmatprep.subr.mxu1 %v16598_v55  ;;  %1060 = vmatprep.subr.mxu0 %v21264_v8  ;;  %v21270_v8 = vld [vmem:[#allocation72_spill] sm:$0xff] }
  0x99   :  { %985 = vmatpush1.msra.mxu1 %v16611_v40  ;;  %1064 = vmatpush1.msra.mxu0 %v21265_v15  ;;  %v21271_v15 = vld [vmem:[#allocation79_spill] sm:$0xff] }
  0x9a   :  { %1019 = vmatmul.mubr.f32.vlgmr.msra.gmra.mxu1 %v21174_v51  ;;  %1193 = vmatprep.subr.mxu1 %v16156_v7 }
  0x9b   :  { %1195 = vmatpush1.msra.mxu1 %v16162_v11  ;;  %1068 = vmatprep.subr.mxu0 %v21266_v39  ;;  %v21272_v39 = vld [vmem:[#allocation82_spill] sm:$0xff] }
  0x9c   :  { %1197 = vmatprep.subr.mxu1 %v16164_v12  ;;  %1072 = vmatpush1.msra.mxu0 %v21267_v0  ;;  %v21273_v0 = vld [vmem:[#allocation86_spill] sm:$0xff] }
  0x9d   :  { %1199 = vmatpush1.msra.mxu1 %v16169_v16  ;;  %1076 = vmatprep.subr.mxu0 %v21268_v33  ;;  %v21274_v33 = vld [vmem:[#allocation88_spill] sm:$0xff] }
  0x9e   :  { %1201 = vmatprep.subr.mxu1 %v16171_v17  ;;  %1080 = vmatpush1.msra.mxu0 %v21269_v10  ;;  %v439_v10 = vld [vmem:[#allocation4 + $0x178] sm:$0xff] }
  0x9f   :  { %1203 = vmatpush1.msra.mxu1 %v16181_v22  ;;  %1084 = vmatprep.subr.mxu0 %v21270_v8  ;;  %v21275_v8 = vld [vmem:[#allocation95_spill] sm:$0xff] }
  0xa0   :  { %1205 = vmatprep.subr.mxu1 %v16183_v23  ;;  %1088 = vmatpush1.msra.mxu0 %v21271_v15  ;;  %v21276_v15 = vld [vmem:[#allocation98_spill] sm:$0xff] }
  0xa1   :  { %1207 = vmatpush1.msra.mxu1 %v16195_v29  ;;  %1092 = vmatprep.subr.mxu0 %v21272_v39  ;;  %v436_v39 = vld [vmem:[#allocation4 + $0x160] sm:$0xff] }
  0xa2   :  { %1209 = vmatprep.subr.mxu1 %v16197_v30  ;;  %1096 = vmatpush1.msra.mxu0 %v21273_v0  ;;  %v16856_v0 = vand.u32 4294901760, %v439_v10 }
  0xa3   :  { %1211 = vmatpush1.msra.mxu1 %v16214_v37  ;;  %1100 = vmatprep.subr.mxu0 %v21274_v33  ;;  %v433_v33 = vld [vmem:[#allocation4 + $0x148] sm:$0xff] }
  0xa4   :  { %1213 = vmatprep.subr.mxu1 %v16217_v38  ;;  %1104 = vmatpush1.msra.mxu0 %v21275_v8  ;;  %21278 = vst [vmem:[#allocation138_spill] sm:$0xff] %v16856_v0  ;;  %v16862_v8 = vand.u32 4294901760, %v436_v39  ;;  %v16868_v4 = vand.u32 4294901760, %v433_v33 }
  0xa5   :  { %1215 = vmatpush1.msra.mxu1 %v21238_v36  ;;  %1108 = vmatprep.subr.mxu0 %v21276_v15  ;;  %v430_v15 = vld [vmem:[#allocation4 + $0x130] sm:$0xff] }
  0xa6   :  { %1217 = vmatprep.subr.mxu1 %v21240_v28  ;;  %1112 = vmatpush1.msra.mxu0 %v21277_v60  ;;  %21281 = vst [vmem:[#allocation139_spill] sm:$0xff] %v16862_v8  ;;  %v21283_v60 = vld [vmem:[#allocation118_spill] sm:$0xff]  ;;  %21284 = vst [vmem:[#allocation140_spill] sm:$0xff] %v16868_v4 }
  0xa7   :  { %1219 = vmatpush1.msra.mxu1 %v21242_v31  ;;  %1116 = vmatprep.subr.mxu0 %v21279_v61  ;;  %v16871_v61 = vsub.f32 %v439_v10, %v16856_v0  ;;  %v16884_v10 = vand.u32 4294901760, %v427_v63 }
  0xa8   :  { %1221 = vmatprep.subr.mxu1 %v21244_v62  ;;  %1120 = vmatpush1.msra.mxu0 %v21280_v21  ;;  %v16875_v21 = vand.u32 4294901760, %v430_v15 }
  0xa9   :  { %1223 = vmatpush1.msra.mxu1 %v21245_v41  ;;  %1124 = vmatprep.subr.mxu0 %v21282_v13  ;;  %21285 = vst [vmem:[#allocation141_spill] sm:$0xff] %v16871_v61  ;;  %21288 = vst [vmem:[#allocation144_spill] sm:$0xff] %v16884_v10  ;;  %v424_v13 = vld [vmem:[#allocation4 + $0x100] sm:$0xff] }
  0xaa   :  { %1225 = vmatprep.subr.mxu1 %v21246_v1  ;;  %1128 = vmatpush1.msra.mxu0 %v21283_v60  ;;  %21286 = vst [vmem:[#allocation142_spill] sm:$0xff] %v16875_v21  ;;  %v16880_v60 = vsub.f32 %v436_v39, %v16862_v8  ;;  %v421_v39 = vld [vmem:[#allocation4 + $0xe8] sm:$0xff]  ;;  %v16904_v47 = vand.u32 4294901760, %v424_v13 }
  0xab   :  { %1227 = vmatpush1.msra.mxu1 %v21247_v3  ;;  %1132 = vmatprep.subr.mxu0 %v16660_v6  ;;  %v16889_v6 = vand.u32 4294901760, %v16871_v61  ;;  %v16918_v42 = vand.u32 4294901760, %v421_v39 }
  0xac   :  { %1229 = vmatprep.subr.mxu1 %v21248_v46  ;;  %1136 = vmatpush1.msra.mxu0 %v16663_v57  ;;  %21287 = vst [vmem:[#allocation143_spill] sm:$0xff] %v16880_v60  ;;  %v16892_v57 = vsub.f32 %v433_v33, %v16868_v4  ;;  %21294 = vst [vmem:[#allocation149_spill] sm:$0xff] %v16904_v47  ;;  %v418_v33 = vld [vmem:[#allocation4 + $0xd0] sm:$0xff]  ;;  %v16932_v49 = vsub.f32 %v424_v13, %v16904_v47  ;;  %v397_v46 = vld [vmem:[#allocation4 + $0x28] sm:$0xff] }
  0xad   :  { %1231 = vmatpush1.msra.mxu1 %v21249_v45  ;;  %1140 = vmatprep.subr.mxu0 %v16678_v18  ;;  %21290 = vst [vmem:[#allocation145_spill] sm:$0xff] %v16889_v6  ;;  %v16897_v18 = vsub.f32 %v430_v15, %v16875_v21  ;;  %v1385_v15 = vsub.f32 %v16871_v61, %v16889_v6  ;;  %21297 = vst [vmem:[#allocation152_spill] sm:$0xff] %v16918_v42  ;;  %v16929_v25 = vand.u32 4294901760, %v418_v33 }
  0xae   :  { %1233 = vmatprep.subr.mxu1 %v21250_v9  ;;  %1144 = vmatpush1.msra.mxu0 %v21289_v52  ;;  %21291 = vst [vmem:[#allocation146_spill] sm:$0xff] %v16892_v57  ;;  %v16902_v52 = vand.u32 4294901760, %v16880_v60  ;;  %21300 = vst [vmem:[#allocation155_spill] sm:$0xff] %v16932_v49  ;;  %v16948_v13 = vsub.f32 %v421_v39, %v16918_v42  ;;  %v16959_v26 = vand.u32 4294901760, %v16932_v49  ;;  %v17046_v62 = vand.u32 4294901760, %v397_v46 }
  0xaf   :  { %1235 = vmatpush1.msra.mxu1 %v21251_v35  ;;  %1148 = vmatprep.subr.mxu0 %v16700_v24  ;;  %21292 = vst [vmem:[#allocation147_spill] sm:$0xff] %v16897_v18  ;;  %v16909_v24 = vsub.f32 %v427_v63, %v16884_v10  ;;  %v16923_v32 = vand.u32 4294901760, %v16897_v18  ;;  %v415_v63 = vld [vmem:[#allocation4 + $0xb8] sm:$0xff]  ;;  %21299 = vst [vmem:[#allocation154_spill] sm:$0xff] %v16929_v25  ;;  %v16941_v34 = vand.u32 4294901760, %v1385_v15 }
  0xb0   :  { %1237 = vmatprep.subr.mxu1 %v21252_v5  ;;  %1152 = vmatpush1.msra.mxu0 %v16717_v19  ;;  %21293 = vst [vmem:[#allocation148_spill] sm:$0xff] %v16902_v52  ;;  %v16916_v19 = vand.u32 4294901760, %v16892_v57  ;;  %v1392_v27 = vsub.f32 %v16880_v60, %v16902_v52  ;;  %v16945_v44 = vand.u32 4294901760, %v415_v63  ;;  %21304 = vst [vmem:[#allocation159_spill] sm:$0xff] %v16948_v13 }
  0xb1   :  { %1239 = vmatpush1.msra.mxu1 %v16464_v54  ;;  %1185 = vmatprep.mubr.f32.mxu0 %v21174_v51  ;;  %21295 = vst [vmem:[#allocation150_spill] sm:$0xff] %v16909_v24  ;;  %21298 = vst [vmem:[#allocation153_spill] sm:$0xff] %v16923_v32  ;;  %v16937_v20 = vand.u32 4294901760, %v16909_v24  ;;  %v16964_v39 = vsub.f32 %v418_v33, %v16929_v25  ;;  %v16993_v54 = vand.u32 4294901760, %v406_v2 }
  0xb2   :  { %1241 = vmatprep.subr.mxu1 %v21253_v59  ;;  %1186 = vmatmul.mubr.f32.vlgmr.msra.gmra.mxu0 %v21174_v51  ;;  %21296 = vst [vmem:[#allocation151_spill] sm:$0xff] %v16916_v19  ;;  %21302 = vst [vmem:[#allocation157_spill] sm:$0xff] %v16941_v34  ;;  %v1399_v58 = vsub.f32 %v16892_v57, %v16916_v19  ;;  %v16956_v15 = vand.u32 4294901760, %v1392_v27  ;;  %v16980_v33 = vsub.f32 %v415_v63, %v16945_v44  ;;  %v403_v59 = vld [vmem:[#allocation4 + $0x58] sm:$0xff] }
  0xb3   :  { %1243 = vmatpush1.msra.mxu1 %v16515_v14  ;;  %14088 = vmatprep.subr.mxu0 %v21174_v51  ;;  %21301 = vst [vmem:[#allocation156_spill] sm:$0xff] %v16937_v20  ;;  %21303 = vst [vmem:[#allocation158_spill] sm:$0xff] %v16945_v44  ;;  %v17009_v35 = vand.u32 4294901760, %v403_v59  ;;  %v17076_v38 = vsub.f32 %v397_v46, %v17046_v62 }
  0xb4   :  { %1245 = vmatprep.subr.mxu1 %v21254_v48  ;;  %14089 = vmatpush3.msra.mxu0 %v16856_v0  ;;  %21305 = vst [vmem:[#allocation160_spill] sm:$0xff] %v16956_v15  ;;  %21306 = vst [vmem:[#allocation161_spill] sm:$0xff] %v16959_v26  ;;  %v16972_v27 = vand.u32 4294901760, %v1399_v58  ;;  %v1420_v58 = vsub.f32 %v16932_v49, %v16959_v26  ;;  %v17007_v5 = vand.u32 4294901760, %v16980_v33 }
  0xb5   :  { %1247 = vmatpush1.msra.mxu1 %v21256_v56  ;;  %14090 = vmatprep.subr.mxu0 %v21174_v51  ;;  %21308 = vst [vmem:[#allocation163_spill] sm:$0xff] %v16964_v39  ;;  %v16975_v56 = vand.u32 4294901760, %v16948_v13  ;;  %21312 = vst [vmem:[#allocation167_spill] sm:$0xff] %v16980_v33  ;;  %v17042_v41 = vsub.f32 %v403_v59, %v17009_v35 }
  0xb6   :  { %1249 = vmatprep.subr.mxu1 %v16565_v43  ;;  %14091 = vmatpush3.msra.mxu0 %v16862_v8  ;;  %v16961_v43 = vand.u32 4294901760, %v412_v50  ;;  %21309 = vst [vmem:[#allocation164_spill] sm:$0xff] %v16972_v27  ;;  %21315 = vst [vmem:[#allocation170_spill] sm:$0xff] %v16993_v54 }
  0xb7   :  { %1251 = vmatpush1.msra.mxu1 %v16580_v53  ;;  %14092 = vmatprep.subr.mxu0 %v21174_v51  ;;  %v1406_v53 = vsub.f32 %v16897_v18, %v16923_v32  ;;  %21310 = vst [vmem:[#allocation165_spill] sm:$0xff] %v16975_v56  ;;  %21318 = vst [vmem:[#allocation173_spill] sm:$0xff] %v17007_v5  ;;  %v17071_v36 = vand.u32 4294901760, %v17042_v41 }
  0xb8   :  { %1253 = vmatprep.subr.mxu1 %v16598_v55  ;;  %1288 = vmatprep.mubr.f32.mxu1 %v21174_v51  ;;  %v409_v55 = vld [vmem:[#allocation4 + $0x88] sm:$0xff]  ;;  %21307 = vst [vmem:[#allocation162_spill] sm:$0xff] %v16961_v43  ;;  %v16996_v63 = vsub.f32 %v412_v50, %v16961_v43  ;;  %21319 = vst [vmem:[#allocation174_spill] sm:$0xff] %v17009_v35  ;;  %v400_v50 = vld [vmem:[#allocation4 + $0x40] sm:$0xff] }
  0xb9   :  { %1255 = vmatpush1.msra.mxu1 %v16611_v40  ;;  %14093 = vmatpush3.msra.mxu0 %v16868_v4  ;;  %v1413_v40 = vsub.f32 %v16909_v24, %v16937_v20  ;;  %v16977_v48 = vand.u32 4294901760, %v409_v55  ;;  %v16984_v14 = vand.u32 4294901760, %v1406_v53  ;;  %v17030_v3 = vand.u32 4294901760, %v400_v50  ;;  %21327 = vst [vmem:[#allocation182_spill] sm:$0xff] %v17042_v41  ;;  %21328 = vst [vmem:[#allocation183_spill] sm:$0xff] %v17046_v62 }
  0xba   :  { %1289 = vmatmul.mubr.f32.vlgmr.msra.gmra.mxu1 %v21174_v51  ;;  %14094 = vmatprep.subr.mxu0 %v21174_v51  ;;  %21316 = vst [vmem:[#allocation171_spill] sm:$0xff] %v16996_v63  ;;  %v17023_v45 = vand.u32 4294901760, %v16996_v63  ;;  %21334 = vst [vmem:[#allocation189_spill] sm:$0xff] %v17071_v36 }
  0xbb   :  { %14123 = vmatprep.subr.mxu1 %v21174_v51  ;;  %14095 = vmatpush3.msra.mxu0 %v16875_v21  ;;  %21311 = vst [vmem:[#allocation166_spill] sm:$0xff] %v16977_v48  ;;  %21313 = vst [vmem:[#allocation168_spill] sm:$0xff] %v16984_v14  ;;  %v17000_v53 = vand.u32 4294901760, %v1413_v40  ;;  %v17012_v9 = vsub.f32 %v409_v55, %v16977_v48  ;;  %v17018_v40 = vand.u32 4294901760, %v1420_v58 }
  0xbc   :  { %14124 = vmatpush3.msra.mxu1 %v16941_v34  ;;  %14096 = vmatprep.subr.mxu0 %v21174_v51  ;;  %v16991_v34 = vand.u32 4294901760, %v16964_v39  ;;  %21322 = vst [vmem:[#allocation177_spill] sm:$0xff] %v17023_v45  ;;  %v17026_v55 = vsub.f32 %v406_v2, %v16993_v54  ;;  %21324 = vst [vmem:[#allocation179_spill] sm:$0xff] %v17030_v3  ;;  %v394_v2 = vld [vmem:[#allocation4 + $0x10] sm:$0xff]  ;;  %v17062_v28 = vsub.f32 %v400_v50, %v17030_v3 }
  0xbd   :  { %14125 = vmatprep.subr.mxu1 %v21174_v51  ;;  %14097 = vmatpush3.msra.mxu0 %v16884_v10  ;;  %21317 = vst [vmem:[#allocation172_spill] sm:$0xff] %v17000_v53  ;;  %21320 = vst [vmem:[#allocation175_spill] sm:$0xff] %v17012_v9  ;;  %v17039_v1 = vand.u32 4294901760, %v17012_v9  ;;  %v17059_v59 = vand.u32 4294901760, %v394_v2 }
  0xbe   :  { %14126 = vmatpush3.msra.mxu1 %v16956_v15  ;;  %21314 = vst [vmem:[#allocation169_spill] sm:$0xff] %v16991_v34  ;;  %14098 = vmatprep.subr.mxu0 %v21174_v51  ;;  %v1427_v15 = vsub.f32 %v16948_v13, %v16975_v56  ;;  %21321 = vst [vmem:[#allocation176_spill] sm:$0xff] %v17018_v40  ;;  %v17055_v31 = vand.u32 4294901760, %v17026_v55 }
  0xbf   :  { %14127 = vmatprep.subr.mxu1 %v21174_v51  ;;  %14099 = vmatpush3.msra.mxu0 %v16904_v47  ;;  %21323 = vst [vmem:[#allocation178_spill] sm:$0xff] %v17026_v55  ;;  %21326 = vst [vmem:[#allocation181_spill] sm:$0xff] %v17039_v1  ;;  %v17090_v37 = vsub.f32 %v394_v2, %v17059_v59 }
  0xc0   :  { %14128 = vmatpush3.msra.mxu1 %v16972_v27  ;;  %14100 = vmatprep.subr.mxu0 %v21174_v51  ;;  %v1434_v27 = vsub.f32 %v16964_v39, %v16991_v34  ;;  %v17034_v58 = vand.u32 4294901760, %v1427_v15  ;;  %21330 = vst [vmem:[#allocation185_spill] sm:$0xff] %v17055_v31  ;;  %21331 = vst [vmem:[#allocation186_spill] sm:$0xff] %v17059_v59 }
  0xc1   :  { %14129 = vmatprep.subr.mxu1 %v21174_v51  ;;  %14101 = vmatpush3.msra.mxu0 %v16918_v42  ;;  %21332 = vst [vmem:[#allocation187_spill] sm:$0xff] %v17062_v28  ;;  %21335 = vst [vmem:[#allocation190_spill] sm:$0xff] %v17076_v38 }
  0xc2   :  { %14130 = vmatpush3.msra.mxu1 %v16984_v14  ;;  %14102 = vmatprep.subr.mxu0 %v21174_v51  ;;  %21325 = vst [vmem:[#allocation180_spill] sm:$0xff] %v17034_v58  ;;  %v1441_v14 = vsub.f32 %v16980_v33, %v17007_v5  ;;  %v17050_v15 = vand.u32 4294901760, %v1434_v27  ;;  %21338 = vst [vmem:[#allocation193_spill] sm:$0xff] %v17090_v37 }
  0xc3   :  { %14131 = vmatprep.subr.mxu1 %v21174_v51  ;;  %14103 = vmatpush3.msra.mxu0 %v16929_v25 }
  0xc4   :  { %14132 = vmatpush3.msra.mxu1 %v17000_v53  ;;  %14104 = vmatprep.subr.mxu0 %v21174_v51  ;;  %21329 = vst [vmem:[#allocation184_spill] sm:$0xff] %v17050_v15  ;;  %v1448_v53 = vsub.f32 %v16996_v63, %v17023_v45  ;;  %v17066_v27 = vand.u32 4294901760, %v1441_v14  ;;  %v1462_v14 = vsub.f32 %v17026_v55, %v17055_v31 }
  0xc5   :  { %14133 = vmatprep.subr.mxu1 %v21174_v51  ;;  %14105 = vmatpush3.msra.mxu0 %v16945_v44 }
  0xc6   :  { %14134 = vmatpush3.msra.mxu1 %v17018_v40  ;;  %14106 = vmatprep.subr.mxu0 %v21174_v51  ;;  %21333 = vst [vmem:[#allocation188_spill] sm:$0xff] %v17066_v27  ;;  %v1455_v40 = vsub.f32 %v17012_v9, %v17039_v1  ;;  %v17080_v50 = vand.u32 4294901760, %v1448_v53  ;;  %v1469_v53 = vsub.f32 %v17042_v41, %v17071_v36  ;;  %v17105_v2 = vand.u32 4294901760, %v1462_v14 }
  0xc7   :  { %14135 = vmatprep.subr.mxu1 %v21174_v51  ;;  %14107 = vmatpush3.msra.mxu0 %v16961_v43 }
  0xc8   :  { %14136 = vmatpush3.msra.mxu1 %v17034_v58  ;;  %14108 = vmatprep.subr.mxu0 %v21174_v51  ;;  %21336 = vst [vmem:[#allocation191_spill] sm:$0xff] %v17080_v50  ;;  %v17087_v58 = vand.u32 4294901760, %v17062_v28  ;;  %v17094_v46 = vand.u32 4294901760, %v1455_v40  ;;  %21341 = vst [vmem:[#allocation196_spill] sm:$0xff] %v17105_v2  ;;  %v17116_v30 = vand.u32 4294901760, %v1469_v53 }
  0xc9   :  { %14137 = vmatprep.subr.mxu1 %v21174_v51  ;;  %14109 = vmatpush3.msra.mxu0 %v16977_v48 }
  0xca   :  { %14138 = vmatpush3.msra.mxu1 %v17050_v15  ;;  %14110 = vmatprep.subr.mxu0 %v21174_v51  ;;  %21337 = vst [vmem:[#allocation192_spill] sm:$0xff] %v17087_v58  ;;  %21339 = vst [vmem:[#allocation194_spill] sm:$0xff] %v17094_v46  ;;  %v17101_v15 = vand.u32 4294901760, %v17076_v38  ;;  %v1476_v40 = vsub.f32 %v17062_v28, %v17087_v58 }
  0xcb   :  { %14139 = vmatprep.subr.mxu1 %v21174_v51  ;;  %14111 = vmatpush3.msra.mxu0 %v16993_v54  ;;  %21343 = vst [vmem:[#allocation198_spill] sm:$0xff] %v17116_v30 }
  0xcc   :  { %14140 = vmatpush3.msra.mxu1 %v17066_v27  ;;  %14112 = vmatprep.subr.mxu0 %v21174_v51  ;;  %21340 = vst [vmem:[#allocation195_spill] sm:$0xff] %v17101_v15  ;;  %v17112_v27 = vand.u32 4294901760, %v17090_v37  ;;  %v1483_v14 = vsub.f32 %v17076_v38, %v17101_v15 }
  0xcd   :  { %14141 = vmatprep.subr.mxu1 %v21174_v51  ;;  %14113 = vmatpush3.msra.mxu0 %v17009_v35 }
  0xce   :  { %14142 = vmatpush3.msra.mxu1 %v17080_v50  ;;  %14114 = vmatprep.subr.mxu0 %v21174_v51  ;;  %21342 = vst [vmem:[#allocation197_spill] sm:$0xff] %v17112_v27  ;;  %v17126_v50 = vand.u32 4294901760, %v1476_v40  ;;  %v1490_v53 = vsub.f32 %v17090_v37, %v17112_v27 }
  0xcf   :  { %14143 = vmatprep.subr.mxu1 %v21174_v51  ;;  %14115 = vmatpush3.msra.mxu0 %v17030_v3 }
  0xd0   :  { %14144 = vmatpush3.msra.mxu1 %v17094_v46  ;;  %14116 = vmatprep.subr.mxu0 %v21174_v51  ;;  %21344 = vst [vmem:[#allocation199_spill] sm:$0xff] %v17126_v50  ;;  %v17141_v40 = vand.u32 4294901760, %v1490_v53 }
  0xd1   :  { %14145 = vmatprep.subr.mxu1 %v21174_v51  ;;  %14117 = vmatpush3.msra.mxu0 %v17046_v62 }
  0xd2   :  { %14146 = vmatpush3.msra.mxu1 %v17105_v2  ;;  %14118 = vmatprep.subr.mxu0 %v21174_v51  ;;  %v17135_v2 = vand.u32 4294901760, %v1483_v14  ;;  %21346 = vst [vmem:[#allocation201_spill] sm:$0xff] %v17141_v40  ;;  %v110_v14 = vlaneseq }
  0xd3   :  { %14147 = vmatprep.subr.mxu1 %v21174_v51  ;;  %14119 = vmatpush3.msra.mxu0 %v17059_v59 }
  0xd4   :  { %14148 = vmatpush3.msra.mxu1 %v17116_v30  ;;  %14120 = vmatprep.mubr.msk.f32.mxu0 %vm16060_vm1, %v21174_v51  ;;  %21345 = vst [vmem:[#allocation200_spill] sm:$0xff] %v17135_v2  ;;  %v17230_v53 = vshrl.u32 %v110_v14, 7 }
  0xd5   :  { %14149 = vmatprep.subr.mxu1 %v21174_v51  ;;  %14158 = vmatprep.subr.mxu0 %v21174_v51 }
  0xd6   :  { %14121 = vmatmul.mubr.f32.vlgmr.msra.gmra.mxu0 %v21174_v51  ;;  %14150 = vmatpush3.msra.mxu1 %v17126_v50  ;;  %21347 = vst [vmem:[#allocation202_spill] sm:$0xff] %v17230_v53 }
  0xd7   :  { %14159 = vmatpush3.msra.mxu0 %v16871_v61  ;;  %14151 = vmatprep.subr.mxu1 %v21174_v51  ;;  %v21416_v61 = vld [vmem:[#allocation131_spill] sm:$0xff] }
  0xd8   :  { %14160 = vmatprep.subr.mxu0 %v21174_v51  ;;  %14152 = vmatpush3.msra.mxu1 %v17135_v2 }
  0xd9   :  { %14161 = vmatpush3.msra.mxu0 %v16880_v60  ;;  %14153 = vmatprep.subr.mxu1 %v21174_v51  ;;  %v21414_v60 = vld [vmem:[#allocation128_spill] sm:$0xff] }
  0xda   :  { %14162 = vmatprep.subr.mxu0 %v21174_v51  ;;  %14154 = vmatpush3.msra.mxu1 %v17141_v40 }
  0xdb   :  { %14155 = vmatprep.mubr.msk.f32.mxu1 %vm16060_vm1, %v21174_v51  ;;  %14163 = vmatpush3.msra.mxu0 %v16892_v57  ;;  %v21412_v57 = vld [vmem:[#allocation126_spill] sm:$0xff] }
  0xdc   :  { %14156 = vmatmul.mubr.f32.vlgmr.msra.gmra.mxu1 %v21174_v51  ;;  %14164 = vmatprep.subr.mxu0 %v21174_v51 }
  0xdd   :  { %14193 = vmatprep.subr.mxu1 %v21174_v51  ;;  %14165 = vmatpush3.msra.mxu0 %v16897_v18  ;;  %v21407_v18 = vld [vmem:[#allocation113_spill] sm:$0xff] }
  0xde   :  { %14194 = vmatpush3.msra.mxu1 %v16856_v0  ;;  %14166 = vmatprep.subr.mxu0 %v21174_v51 }
  0xdf   :  { %14195 = vmatprep.subr.mxu1 %v21174_v51  ;;  %14167 = vmatpush3.msra.mxu0 %v16909_v24  ;;  %v21405_v24 = vld [vmem:[#allocation110_spill] sm:$0xff] }
  0xe0   :  { %14196 = vmatpush3.msra.mxu1 %v16862_v8  ;;  %14168 = vmatprep.subr.mxu0 %v21174_v51 }
  0xe1   :  { %14197 = vmatprep.subr.mxu1 %v21174_v51  ;;  %14169 = vmatpush3.msra.mxu0 %v16932_v49  ;;  %v21403_v49 = vld [vmem:[#allocation107_spill] sm:$0xff] }
  0xe2   :  { %14198 = vmatpush3.msra.mxu1 %v16868_v4  ;;  %14170 = vmatprep.subr.mxu0 %v21174_v51 }
  0xe3   :  { %14199 = vmatprep.subr.mxu1 %v21174_v51  ;;  %14171 = vmatpush3.msra.mxu0 %v16948_v13  ;;  %v21401_v13 = vld [vmem:[#allocation101_spill] sm:$0xff] }
  0xe4   :  { %14200 = vmatpush3.msra.mxu1 %v16875_v21  ;;  %14172 = vmatprep.subr.mxu0 %v21174_v51 }
  0xe5   :  { %14201 = vmatprep.subr.mxu1 %v21174_v51  ;;  %14173 = vmatpush3.msra.mxu0 %v16964_v39  ;;  %v21399_v39 = vld [vmem:[#allocation97_spill] sm:$0xff] }
  0xe6   :  { %14202 = vmatpush3.msra.mxu1 %v16884_v10  ;;  %14174 = vmatprep.subr.mxu0 %v21174_v51 }
  0xe7   :  { %14203 = vmatprep.subr.mxu1 %v21174_v51  ;;  %14175 = vmatpush3.msra.mxu0 %v16980_v33  ;;  %v21392_v33 = vld [vmem:[#allocation85_spill] sm:$0xff] }
  0xe8   :  { %14204 = vmatpush3.msra.mxu1 %v16904_v47  ;;  %14176 = vmatprep.subr.mxu0 %v21174_v51 }
  0xe9   :  { %14205 = vmatprep.subr.mxu1 %v21174_v51  ;;  %14177 = vmatpush3.msra.mxu0 %v16996_v63  ;;  %v21390_v63 = vld [vmem:[#allocation81_spill] sm:$0xff] }
  0xea   :  { %14206 = vmatpush3.msra.mxu1 %v16918_v42  ;;  %14178 = vmatprep.subr.mxu0 %v21174_v51 }
  0xeb   :  { %14207 = vmatprep.subr.mxu1 %v21174_v51  ;;  %14179 = vmatpush3.msra.mxu0 %v17012_v9  ;;  %v21389_v9 = vld [vmem:[#allocation51_spill] sm:$0xff] }
  0xec   :  { %14208 = vmatpush3.msra.mxu1 %v16929_v25  ;;  %14180 = vmatprep.subr.mxu0 %v21174_v51 }
  0xed   :  { %14209 = vmatprep.subr.mxu1 %v21174_v51  ;;  %14181 = vmatpush3.msra.mxu0 %v17026_v55 }
  0xee   :  { %14210 = vmatpush3.msra.mxu1 %v16945_v44  ;;  %14182 = vmatprep.subr.mxu0 %v21174_v51 }
  0xef   :  { %14211 = vmatprep.subr.mxu1 %v21174_v51  ;;  %14183 = vmatpush3.msra.mxu0 %v17042_v41  ;;  %v21385_v41 = vld [vmem:[#allocation75_spill] sm:$0xff] }
  0xf0   :  { %14212 = vmatpush3.msra.mxu1 %v16961_v43  ;;  %14184 = vmatprep.subr.mxu0 %v21174_v51 }
  0xf1   :  { %14213 = vmatprep.subr.mxu1 %v21174_v51  ;;  %14185 = vmatpush3.msra.mxu0 %v17062_v28  ;;  %v21381_v28 = vld [vmem:[#allocation69_spill] sm:$0xff] }
  0xf2   :  { %14214 = vmatpush3.msra.mxu1 %v16977_v48  ;;  %14186 = vmatprep.subr.mxu0 %v21174_v51 }
  0xf3   :  { %14215 = vmatprep.subr.mxu1 %v21174_v51  ;;  %14187 = vmatpush3.msra.mxu0 %v17076_v38  ;;  %v21376_v38 = vld [vmem:[#allocation30_spill] sm:$0xff] }
  0xf4   :  { %14216 = vmatpush3.msra.mxu1 %v16993_v54  ;;  %14188 = vmatprep.subr.mxu0 %v21174_v51 }
  0xf5   :  { %14217 = vmatprep.subr.mxu1 %v21174_v51  ;;  %14189 = vmatpush3.msra.mxu0 %v17090_v37 }
  0xf6   :  { %14190 = vmatprep.mubr.msk.f32.mxu0 %vm16060_vm1, %v21174_v51  ;;  %14218 = vmatpush3.msra.mxu1 %v17009_v35 }
  0xf7   :  { %14191 = vmatmul.mubr.f32.vlgmr.msra.gmra.mxu0 %v21174_v51  ;;  %14219 = vmatprep.subr.mxu1 %v21174_v51 }
  0xf8   :  { %14228 = vmatprep.subr.mxu0 %v21174_v51  ;;  %14220 = vmatpush3.msra.mxu1 %v17030_v3 }
  0xf9   :  { %14229 = vmatpush3.msra.mxu0 %v16889_v6  ;;  %14221 = vmatprep.subr.mxu1 %v21174_v51 }
  0xfa   :  { %14230 = vmatprep.subr.mxu0 %v21174_v51  ;;  %14222 = vmatpush3.msra.mxu1 %v17046_v62 }
  0xfb   :  { %14231 = vmatpush3.msra.mxu0 %v16902_v52  ;;  %14223 = vmatprep.subr.mxu1 %v21174_v51 }
  0xfc   :  { %14232 = vmatprep.subr.mxu0 %v21174_v51  ;;  %14224 = vmatpush3.msra.mxu1 %v17059_v59 }
  0xfd   :  { %14225 = vmatprep.mubr.msk.f32.mxu1 %vm16060_vm1, %v21174_v51  ;;  %14233 = vmatpush3.msra.mxu0 %v16916_v19  ;;  %v21349_v19 = vsub.s32 0, %v17230_v53 }
  0xfe   :  { %14226 = vmatmul.mubr.f32.vlgmr.msra.gmra.mxu1 %v21174_v51  ;;  %14234 = vmatprep.subr.mxu0 %v21174_v51 }
  0xff   :  { %14263 = vmatprep.subr.mxu1 %v21174_v51  ;;  %14235 = vmatpush3.msra.mxu0 %v16923_v32  ;;  %v120_v32 = vsub.s32 2, %v17230_v53 }
 0x100   :  { %14264 = vmatpush3.msra.mxu1 %v16856_v0  ;;  %14236 = vmatprep.subr.mxu0 %v21174_v51 }
 0x101   :  { %14265 = vmatprep.subr.mxu1 %v21174_v51  ;;  %14237 = vmatpush3.msra.mxu0 %v16937_v20  ;;  %v17247_v20 = vld [vmem:[%s20576_s3] sm:$0x7] }
 0x102   :  { %14266 = vmatpush3.msra.mxu1 %v16862_v8  ;;  %14238 = vmatprep.subr.mxu0 %v21174_v51  ;;  %v17265_v52 = vrot.slane %v17247_v20, %v21349_v19 }
 0x103   :  { %14267 = vmatprep.subr.mxu1 %v21174_v51  ;;  %14239 = vmatpush3.msra.mxu0 %v16959_v26  ;;  %v17249_v26 = vpop.f32.mrf.mxu0 }
 0x104   :  { %14268 = vmatpush3.msra.mxu1 %v16868_v4  ;;  %14240 = vmatprep.subr.mxu0 %v21174_v51  ;;  %v217_v8 = vadd.f32 %v17249_v26, %v17265_v52 }
 0x105   :  { %14269 = vmatprep.subr.mxu1 %v21174_v51  ;;  %14241 = vmatpush3.msra.mxu0 %v16975_v56  ;;  %v17255_v14 = vpop.f32.mrf.mxu0  ;;  %v17258_v56 = vrot.slane %v17247_v20, %v120_v32  ;;  %v14078_v32 = vpop.f32.mrf.mxu1 }
 0x106   :  { %14270 = vmatpush3.msra.mxu1 %v16875_v21  ;;  %14242 = vmatprep.subr.mxu0 %v21174_v51 }
 0x107   :  { %14271 = vmatprep.subr.mxu1 %v21174_v51  ;;  %14243 = vmatpush3.msra.mxu0 %v16991_v34  ;;  %21348 = vst [vmem:[#allocation203_spill] sm:$0xff] %v17258_v56  ;;  %v222_v34 = vpop.f32.mrf.mxu0  ;;  %v17277_v19 = vadd.f32 %v14078_v32, %v17258_v56 }
 0x108   :  { %14272 = vmatpush3.msra.mxu1 %v16884_v10  ;;  %14244 = vmatprep.subr.mxu0 %v21174_v51  ;;  %v17272_v6 = vadd.f32 %v222_v34, %v17265_v52 }
 0x109   :  { %14273 = vmatprep.subr.mxu1 %v21174_v51  ;;  %14245 = vmatpush3.msra.mxu0 %v17007_v5  ;;  %21351 = vst [vmem:[#allocation205_spill] sm:$0xff] %v17277_v19  ;;  %v17279_v37 = vpop.f32.mrf.mxu0  ;;  %v21374_v5 = vld [vmem:[#allocation27_spill] sm:$0xff] }
 0x10a   :  { %14274 = vmatpush3.msra.mxu1 %v16904_v47  ;;  %14246 = vmatprep.subr.mxu0 %v21174_v51  ;;  %21350 = vst [vmem:[#allocation204_spill] sm:$0xff] %v17272_v6  ;;  %21352 = vst [vmem:[#allocation206_spill] sm:$0xff] %v17279_v37  ;;  %v21362_v37 = vld [vmem:[#allocation36_spill] sm:$0xff] }
 0x10b   :  { %14275 = vmatprep.subr.mxu1 %v21174_v51  ;;  %14247 = vmatpush3.msra.mxu0 %v17023_v45  ;;  %v228_v34 = vpop.f32.mrf.mxu0  ;;  %v21373_v45 = vld [vmem:[#allocation53_spill] sm:$0xff] }
 0x10c   :  { %14276 = vmatpush3.msra.mxu1 %v16918_v42  ;;  %14248 = vmatprep.subr.mxu0 %v21174_v51  ;;  %v17290_v32 = vadd.f32 %v228_v34, %v17265_v52 }
 0x10d   :  { %14277 = vmatprep.subr.mxu1 %v21174_v51  ;;  %14249 = vmatpush3.msra.mxu0 %v17039_v1  ;;  %v17294_v19 = vpop.f32.mrf.mxu0 }
 0x10e   :  { %14278 = vmatpush3.msra.mxu1 %v16929_v25  ;;  %14250 = vmatprep.subr.mxu0 %v21174_v51  ;;  %21353 = vst [vmem:[#allocation207_spill] sm:$0xff] %v17290_v32  ;;  %21354 = vst [vmem:[#allocation208_spill] sm:$0xff] %v17294_v19 }
 0x10f   :  { %14279 = vmatprep.subr.mxu1 %v21174_v51  ;;  %14251 = vmatpush3.msra.mxu0 %v17055_v31  ;;  %v234_v34 = vpop.f32.mrf.mxu0  ;;  %v21369_v31 = vld [vmem:[#allocation49_spill] sm:$0xff] }
 0x110   :  { %14280 = vmatpush3.msra.mxu1 %v16945_v44  ;;  %14252 = vmatprep.subr.mxu0 %v21174_v51  ;;  %v17305_v32 = vadd.f32 %v234_v34, %v17265_v52 }
 0x111   :  { %14281 = vmatprep.subr.mxu1 %v21174_v51  ;;  %14253 = vmatpush3.msra.mxu0 %v17071_v36  ;;  %v17309_v19 = vpop.f32.mrf.mxu0  ;;  %v21365_v36 = vld [vmem:[#allocation46_spill] sm:$0xff] }
 0x112   :  { %14282 = vmatpush3.msra.mxu1 %v16961_v43  ;;  %14254 = vmatprep.subr.mxu0 %v21174_v51  ;;  %21355 = vst [vmem:[#allocation209_spill] sm:$0xff] %v17305_v32  ;;  %21356 = vst [vmem:[#allocation210_spill] sm:$0xff] %v17309_v19 }
 0x113   :  { %14283 = vmatprep.subr.mxu1 %v21174_v51  ;;  %14255 = vmatpush3.msra.mxu0 %v17087_v58  ;;  %v240_v34 = vpop.f32.mrf.mxu0 }
 0x114   :  { %14284 = vmatpush3.msra.mxu1 %v16977_v48  ;;  %14256 = vmatprep.subr.mxu0 %v21174_v51  ;;  %v17322_v32 = vadd.f32 %v240_v34, %v17265_v52 }
 0x115   :  { %14285 = vmatprep.subr.mxu1 %v21174_v51  ;;  %14257 = vmatpush3.msra.mxu0 %v17101_v15  ;;  %v17325_v19 = vpop.f32.mrf.mxu0  ;;  %v21363_v15 = vld [vmem:[#allocation37_spill] sm:$0xff] }
 0x116   :  { %14286 = vmatpush3.msra.mxu1 %v16993_v54  ;;  %14258 = vmatprep.subr.mxu0 %v21174_v51  ;;  %21357 = vst [vmem:[#allocation211_spill] sm:$0xff] %v17322_v32  ;;  %21358 = vst [vmem:[#allocation212_spill] sm:$0xff] %v17325_v19  ;;  %v21361_v19 = vld [vmem:[#allocation33_spill] sm:$0xff] }
 0x117   :  { %14287 = vmatprep.subr.mxu1 %v21174_v51  ;;  %14259 = vmatpush3.msra.mxu0 %v17112_v27  ;;  %v17345_v27 = vpop.f32.mrf.mxu1 }
 0x118   :  { %14260 = vmatprep.mubr.msk.f32.mxu0 %vm16060_vm1, %v21174_v51  ;;  %14288 = vmatpush3.msra.mxu1 %v17009_v35  ;;  %v21425_v35 = vld [vmem:[#allocation137_spill] sm:$0xff] }
 0x119   :  { %14261 = vmatmul.mubr.f32.vlgmr.msra.gmra.mxu0 %v21174_v51  ;;  %14289 = vmatprep.subr.mxu1 %v21174_v51  ;;  %v246_v6 = vpop.f32.mrf.mxu0 }
 0x11a   :  { %14295 = vmatprep.mubr.msk.f32.mxu1 %vm16060_vm1, %v21174_v51  ;;  %14290 = vmatpush3.msra.mxu1 %v17030_v3  ;;  %v17336_v34 = vadd.f32 %v246_v6, %v17265_v52  ;;  %v21364_v6 = vld [vmem:[#allocation40_spill] sm:$0xff]  ;;  %v21422_v3 = vld [vmem:[#allocation135_spill] sm:$0xff] }
 0x11b   :  { %1954 = vmatprep.subr.mxu0 %v16156_v7  ;;  %14291 = vmatprep.subr.mxu1 %v21174_v51  ;;  %v17340_v32 = vpop.f32.mrf.mxu0 }
 0x11c   :  { %1956 = vmatpush1.msra.mxu0 %v16162_v11  ;;  %14292 = vmatpush3.msra.mxu1 %v17046_v62  ;;  %21359 = vst [vmem:[#allocation213_spill] sm:$0xff] %v17336_v34  ;;  %21360 = vst [vmem:[#allocation214_spill] sm:$0xff] %v17340_v32  ;;  %v14081_v34 = vpop.f32.mrf.mxu1  ;;  %v21366_v32 = vld [vmem:[#allocation22_spill] sm:$0xff] }
 0x11d   :  { %1958 = vmatprep.subr.mxu0 %v16164_v12  ;;  %14293 = vmatprep.subr.mxu1 %v21174_v51  ;;  %v21420_v62 = vld [vmem:[#allocation134_spill] sm:$0xff] }
 0x11e   :  { %1960 = vmatpush1.msra.mxu0 %v16169_v16  ;;  %14294 = vmatpush3.msra.mxu1 %v17059_v59  ;;  %v17361_v1 = vpop.f32.mrf.mxu1  ;;  %v21418_v59 = vld [vmem:[#allocation133_spill] sm:$0xff] }
 0x11f   :  { %1962 = vmatprep.subr.mxu0 %v16171_v17  ;;  %14296 = vmatmul.mubr.f32.vlgmr.msra.gmra.mxu1 %v21174_v51 }
 0x120   :  { %2066 = vmatprep.subr.mxu1 %v21361_v19  ;;  %1964 = vmatpush1.msra.mxu0 %v16181_v22 }
 0x121   :  { %2072 = vmatpush1.msra.mxu1 %v21362_v37  ;;  %1966 = vmatprep.subr.mxu0 %v16183_v23  ;;  %v17354_v37 = vadd.f32 %v14081_v34, %v17258_v56  ;;  %v21377_v34 = vld [vmem:[#allocation62_spill] sm:$0xff] }
 0x122   :  { %2078 = vmatprep.subr.mxu1 %v21363_v15  ;;  %1968 = vmatpush1.msra.mxu0 %v16195_v29  ;;  %v252_v58 = vpop.f32.mrf.mxu0  ;;  %v21370_v15 = vld [vmem:[#allocation26_spill] sm:$0xff] }
 0x123   :  { %2084 = vmatpush1.msra.mxu1 %v21364_v6  ;;  %1970 = vmatprep.subr.mxu0 %v21366_v32  ;;  %21367 = vst [vmem:[#allocation22_spill] sm:$0xff] %v17354_v37  ;;  %v17357_v19 = vadd.f32 %v252_v58, %v17265_v52  ;;  %21371 = vst [vmem:[#allocation26_spill] sm:$0xff] %v17361_v1  ;;  %v21378_v58 = vld [vmem:[#allocation32_spill] sm:$0xff]  ;;  %v21380_v37 = vld [vmem:[#allocation39_spill] sm:$0xff] }
 0x124   :  { %2090 = vmatprep.subr.mxu1 %v21365_v36  ;;  %1972 = vmatpush1.msra.mxu0 %v21370_v15  ;;  %v17363_v6 = vpop.f32.mrf.mxu0  ;;  %v21375_v36 = vld [vmem:[#allocation59_spill] sm:$0xff] }
 0x125   :  { %21368 = vst [vmem:[#allocation215_spill] sm:$0xff] %v17357_v19  ;;  %2096 = vmatpush1.msra.mxu1 %v21369_v31  ;;  %21372 = vst [vmem:[#allocation216_spill] sm:$0xff] %v17363_v6  ;;  %1974 = vmatprep.subr.mxu0 %v21374_v5  ;;  %v21379_v19 = vld [vmem:[#allocation65_spill] sm:$0xff]  ;;  %v14084_v31 = vpop.f32.mrf.mxu1  ;;  %v21382_v6 = vld [vmem:[#allocation43_spill] sm:$0xff] }
 0x126   :  { %2102 = vmatprep.subr.mxu1 %v21373_v45  ;;  %1976 = vmatpush1.msra.mxu0 %v21376_v38  ;;  %v17376_v45 = vadd.f32 %v14084_v31, %v17258_v56  ;;  %v21393_v31 = vld [vmem:[#allocation58_spill] sm:$0xff] }
 0x127   :  { %2108 = vmatpush1.msra.mxu1 %v21375_v36  ;;  %1978 = vmatprep.subr.mxu0 %v21378_v58  ;;  %v17383_v55 = vpop.f32.mrf.mxu1 }
 0x128   :  { %2114 = vmatprep.subr.mxu1 %v21377_v34  ;;  %1980 = vmatpush1.msra.mxu0 %v21380_v37  ;;  %21383 = vst [vmem:[#allocation27_spill] sm:$0xff] %v17376_v45  ;;  %v21386_v34 = vld [vmem:[#allocation45_spill] sm:$0xff]  ;;  %21387 = vst [vmem:[#allocation32_spill] sm:$0xff] %v17383_v55  ;;  %v21397_v55 = vld [vmem:[#allocation67_spill] sm:$0xff] }
 0x129   :  { %2120 = vmatpush1.msra.mxu1 %v21379_v19  ;;  %v258_v1 = vpop.f32.mrf.mxu0  ;;  %1982 = vmatprep.subr.mxu0 %v21382_v6  ;;  %v21388_v19 = vld [vmem:[#allocation78_spill] sm:$0xff] }
 0x12a   :  { %2126 = vmatprep.subr.mxu1 %v21381_v28  ;;  %v17379_v36 = vadd.f32 %v258_v1, %v17265_v52  ;;  %1984 = vmatpush1.msra.mxu0 %v21386_v34  ;;  %v21391_v28 = vld [vmem:[#allocation55_spill] sm:$0xff] }
 0x12b   :  { %2132 = vmatpush1.msra.mxu1 %v21385_v41  ;;  %1986 = vmatprep.subr.mxu0 %v21389_v9  ;;  %v21394_v1 = vld [vmem:[#allocation91_spill] sm:$0xff]  ;;  %v14087_v45 = vpop.f32.mrf.mxu1  ;;  %v21396_v41 = vld [vmem:[#allocation94_spill] sm:$0xff] }
 0x12c   :  { %21384 = vst [vmem:[#allocation30_spill] sm:$0xff] %v17379_v36  ;;  %2138 = vmatprep.subr.mxu1 %v21388_v19  ;;  %1988 = vmatpush1.msra.mxu0 %v21391_v28  ;;  %v21395_v36 = vld [vmem:[#allocation61_spill] sm:$0xff]  ;;  %v17396_v19 = vadd.f32 %v14087_v45, %v17258_v56 }
 0x12d   :  { %2144 = vmatpush1.msra.mxu1 %v21390_v63  ;;  %1990 = vmatprep.subr.mxu0 %v21393_v31  ;;  %v21400_v63 = vld [vmem:[#allocation71_spill] sm:$0xff]  ;;  %v21408_v45 = vld [vmem:[#allocation117_spill] sm:$0xff]  ;;  %v17430_v40 = vpop.f32.mrf.mxu1 }
 0x12e   :  { %2150 = vmatprep.subr.mxu1 %v21392_v33  ;;  %1992 = vmatpush1.msra.mxu0 %v21395_v36  ;;  %21398 = vst [vmem:[#allocation39_spill] sm:$0xff] %v17396_v19  ;;  %v21402_v33 = vld [vmem:[#allocation74_spill] sm:$0xff]  ;;  %v21409_v19 = vld [vmem:[#allocation87_spill] sm:$0xff]  ;;  %21427 = vst [vmem:[#allocation45_spill] sm:$0xff] %v17430_v40 }
 0x12f   :  { %2156 = vmatpush1.msra.mxu1 %v21394_v1  ;;  %1994 = vmatprep.subr.mxu0 %v21397_v55  ;;  %v21404_v1 = vld [vmem:[#allocation77_spill] sm:$0xff] }
 0x130   :  { %2162 = vmatprep.subr.mxu1 %v21396_v41  ;;  %1996 = vmatpush1.msra.mxu0 %v21400_v63  ;;  %v21406_v41 = vld [vmem:[#allocation83_spill] sm:$0xff] }
 0x131   :  { %2168 = vmatpush1.msra.mxu1 %v21399_v39  ;;  %1998 = vmatprep.subr.mxu0 %v21402_v33  ;;  %v21410_v39 = vld [vmem:[#allocation123_spill] sm:$0xff] }
 0x132   :  { %2174 = vmatprep.subr.mxu1 %v21401_v13  ;;  %2000 = vmatpush1.msra.mxu0 %v21404_v1  ;;  %v21411_v13 = vld [vmem:[#allocation90_spill] sm:$0xff] }
 0x133   :  { %2180 = vmatpush1.msra.mxu1 %v21403_v49  ;;  %2002 = vmatprep.subr.mxu0 %v21406_v41  ;;  %v21413_v49 = vld [vmem:[#allocation93_spill] sm:$0xff] }
 0x134   :  { %2186 = vmatprep.subr.mxu1 %v21405_v24  ;;  %2285 = vmatprep.mubr.f32.mxu1 %v21174_v51  ;;  %v21415_v24 = vld [vmem:[#allocation99_spill] sm:$0xff] }
 0x135   :  { %2192 = vmatpush1.msra.mxu1 %v21407_v18  ;;  %2004 = vmatpush1.msra.mxu0 %v21409_v19  ;;  %v21417_v18 = vld [vmem:[#allocation103_spill] sm:$0xff] }
 0x136   :  { %2198 = vmatprep.subr.mxu1 %v21408_v45  ;;  %2006 = vmatprep.subr.mxu0 %v21411_v13  ;;  %v21419_v45 = vld [vmem:[#allocation106_spill] sm:$0xff] }
 0x137   :  { %2204 = vmatpush1.msra.mxu1 %v21410_v39  ;;  %2008 = vmatpush1.msra.mxu0 %v21413_v49  ;;  %v21421_v39 = vld [vmem:[#allocation109_spill] sm:$0xff] }
 0x138   :  { %2210 = vmatprep.subr.mxu1 %v21412_v57  ;;  %2010 = vmatprep.subr.mxu0 %v21415_v24  ;;  %v21423_v57 = vld [vmem:[#allocation136_spill] sm:$0xff] }
 0x139   :  { %2216 = vmatpush1.msra.mxu1 %v21414_v60  ;;  %2012 = vmatpush1.msra.mxu0 %v21417_v18  ;;  %v21424_v60 = vld [vmem:[#allocation18_spill] sm:$0xff]  ;;  %v20972_v18 = vsub.s32 1, %v17230_v53  ;;  %v21458_v53 = vld [vmem:[#allocation108_spill] sm:$0xff] }
 0x13a   :  { %2222 = vmatprep.subr.mxu1 %v21416_v61  ;;  %2014 = vmatprep.subr.mxu0 %v21419_v45  ;;  %v17428_v61 = vpop.f32.mrf.mxu0  ;;  %v782_v54 = vpop.f32.mrf.mxu1 }
 0x13b   :  { %2228 = vmatpush1.msra.mxu1 %v21418_v59  ;;  %2016 = vmatpush1.msra.mxu0 %v21421_v39  ;;  %21426 = vst [vmem:[#allocation43_spill] sm:$0xff] %v17428_v61 }
 0x13c   :  { %2234 = vmatprep.subr.mxu1 %v21420_v62  ;;  %2049 = vmatprep.mubr.f32.mxu0 %v21174_v51  ;;  %v551_v59 = vpop.f32.mrf.mxu0  ;;  %v784_v48 = vpop.f32.mrf.mxu1 }
 0x13d   :  { %2240 = vmatpush1.msra.mxu1 %v21422_v3  ;;  %2295 = vmatprep.subr.mxu0 %v21424_v60  ;;  %v783_v47 = vadd.f32 %v782_v54, %v551_v59 }
 0x13e   :  { %2246 = vmatprep.subr.mxu1 %v21423_v57  ;;  %v553_v62 = vpop.f32.mrf.mxu0 }
 0x13f   :  { %2252 = vmatpush1.msra.mxu1 %v21425_v35  ;;  %v785_v39 = vadd.f32 %v784_v48, %v553_v62 }
 0x140   :  { %2431 = vmatprep.subr.mxu1 %v16156_v7 }
 0x14e   :  { %v917_v2 = vpop.f32.mrf.mxu0 }
 0x14f   :  { %v918_v61 = vadd.f32 %v917_v2, %v783_v47 }
 0x150   :  { %v919_v3 = vpop.f32.mrf.mxu0 }
 0x151   :  { %v920_v24 = vadd.f32 %v919_v3, %v785_v39 }
 0x15a   :  { %v1020_v50 = vpop.f32.mrf.mxu1 }
 0x15b   :  { %v1021_v10 = vadd.f32 %v1020_v50, %v918_v61 }
 0x15c   :  { %v1022_v30 = vpop.f32.mrf.mxu1 }
 0x15d   :  { %v1023_v13 = vadd.f32 %v1022_v30, %v920_v24 }
 0x172   :  { %v1187_v43 = vpop.f32.mrf.mxu0 }
 0x173   :  { %v1188_v21 = vadd.f32 %v1187_v43, %v1021_v10 }
 0x174   :  { %v1189_v57 = vpop.f32.mrf.mxu0 }
 0x175   :  { %v1190_v43 = vadd.f32 %v1189_v57, %v1023_v13 }
 0x17a   :  { %v1290_v44 = vpop.f32.mrf.mxu1 }
 0x17b   :  { %v1291_v40 = vadd.f32 %v1290_v44, %v1188_v21 }
 0x17c   :  { %v1292_v35 = vpop.f32.mrf.mxu1 }
 0x17d   :  { %v1923_v7 = vadd.f32 %v1291_v40, %v217_v8  ;;  %v1293_v47 = vadd.f32 %v1292_v35, %v1190_v43  ;;  %v17445_v35 = vld [vmem:[%s20577_s4] ss:$0 sm:$0xff] }
 0x196   :  { %v1377_v60 = vpop.f32.mrf.mxu0 }
 0x198   :  { %v14122_v25 = vpop.f32.mrf.mxu0 }
 0x199   :  { %v13148_v25 = vmul.f32 -1.442695, %v1923_v7 }
 0x19b   :  { %15857 = vpow2.f32 %v13148_v25 }
 0x19c   :  { %v1527_v46 = vpop.f32.mrf.mxu1 }
 0x19d   :  { %v1528_v7 = vadd.f32 %v1527_v46, %v1377_v60  ;;  %v330_v60 = vadd.f32 %v17345_v27, %v17258_v56  ;;  %v21459_v56 = vld [vmem:[#allocation17_spill] sm:$0xff] }
 0x19e   :  { %v14157_v42 = vpop.f32.mrf.mxu1 }
 0x19f   :  { %v17438_v42 = vrot.slane %v17247_v20, %v20972_v18  ;;  %v21457_v18 = vld [vmem:[#allocation109_spill] sm:$0xff] }
 0x1a8   :  { %v15858_v62 = vpop.eup %15857 }
 0x1a9   :  { %v1931_v21 = vadd.f32 1.0, %v15858_v62  ;;  %v21433_v62 = vld [vmem:[#allocation31_spill] sm:$0xff] }
 0x1b7   :  { %v1629_v4 = vpop.f32.mrf.mxu0 }
 0x1b8   :  { %v1630_v30 = vadd.f32 %v1629_v4, %v1528_v7  ;;  %v21435_v7 = vld [vmem:[#allocation42_spill] sm:$0xff] }
 0x1b9   :  { %v14192_v0 = vpop.f32.mrf.mxu0 }
 0x1ba   :  { %v219_v0 = vadd.f32 %v17255_v14, %v17438_v42 }
 0x1bc   :  { %v1924_v52 = vadd.f32 %v1293_v47, %v219_v0  ;;  %v21429_v47 = vld [vmem:[#allocation19_spill] sm:$0xff]  ;;  %v21430_v0 = vld [vmem:[#allocation20_spill] sm:$0xff] }
 0x1be   :  { %v1715_v45 = vpop.f32.mrf.mxu1  ;;  %v13149_v48 = vmul.f32 -1.442695, %v1924_v52  ;;  %v21431_v52 = vld [vmem:[#allocation23_spill] sm:$0xff] }
 0x1bf   :  { %v1716_v24 = vadd.f32 %v1715_v45, %v1630_v30  ;;  %v21437_v30 = vld [vmem:[#allocation48_spill] sm:$0xff] }
 0x1c0   :  { %v14227_v49 = vpop.f32.mrf.mxu1  ;;  %15859 = vpow2.f32 %v13149_v48  ;;  %v21432_v48 = vld [vmem:[#allocation29_spill] sm:$0xff] }
 0x1c1   :  { %15861 = vrcp.f32 %v1931_v21  ;;  %v21434_v21 = vld [vmem:[#allocation35_spill] sm:$0xff] }
 0x1cd   :  { %v15860_v44 = vpop.eup %15859 }
 0x1ce   :  { %v1932_v8 = vadd.f32 1.0, %v15860_v44  ;;  %v15862_v10 = vpop.eup %15861  ;;  %v21440_v44 = vld [vmem:[#allocation60_spill] sm:$0xff] }
 0x1d0   :  { %15863 = vrcp.f32 %v1932_v8  ;;  %v21443_v8 = vld [vmem:[#allocation73_spill] sm:$0xff] }
 0x1d9   :  { %v1833_v61 = vpop.f32.mrf.mxu0 }
 0x1da   :  { %v1834_v20 = vadd.f32 %v1833_v61, %v1716_v24  ;;  %v21436_v61 = vld [vmem:[#allocation44_spill] sm:$0xff]  ;;  %v21439_v24 = vld [vmem:[#allocation57_spill] sm:$0xff] }
 0x1db   :  { %v14262_v54 = vpop.f32.mrf.mxu0 }
 0x1dc   :  { %v21438_v54 = vld [vmem:[#allocation52_spill] sm:$0xff] }
 0x1dd   :  { %v15864_v39 = vpop.eup %15863 }
 0x1de   :  { %v1941_v59 = vsub.f32 1.0, %v15864_v39  ;;  %v1943_v46 = vmul.f32 0.0, %v15864_v39  ;;  %v21451_v39 = vld [vmem:[#allocation99_spill] sm:$0xff] }
 0x1df   :  { %v1919_v57 = vpop.f32.mrf.mxu1 }
 0x1e0   :  { %v1920_v26 = vadd.f32 %v1919_v57, %v1834_v20  ;;  %v21441_v20 = vld [vmem:[#allocation64_spill] sm:$0xff] }
 0x1e1   :  { %v14297_v49 = vpop.f32.mrf.mxu1  ;;  %v21442_v57 = vld [vmem:[#allocation68_spill] sm:$0xff] }
 0x1e2   :  { %v1937_v3 = vadd.f32 %v17445_v35, %v1920_v26  ;;  %v21444_v26 = vld [vmem:[#allocation76_spill] sm:$0xff] }
 0x1e3   :  { %v21445_v49 = vld [vmem:[#allocation80_spill] sm:$0xff] }
 0x1e4   :  { %v1938_v4 = vmul.f32 %v15862_v10, %v1937_v3  ;;  %v21446_v3 = vld [vmem:[#allocation84_spill] sm:$0xff]  ;;  %v21447_v10 = vld [vmem:[#allocation90_spill] sm:$0xff] }
 0x1e6   :  { %v1939_v13 = vadd.f32 %v1938_v4, %v330_v60  ;;  %v21448_v60 = vld [vmem:[#allocation89_spill] sm:$0xff] }
 0x1e7   :  { %v21449_v4 = vld [vmem:[#allocation93_spill] sm:$0xff] }
 0x1e8   :  { %15865 = vtanh.f32 %v1939_v13  ;;  %v21450_v13 = vld [vmem:[#allocation92_spill] sm:$0xff] }
 0x1f5   :  { %v15866_v50 = vpop.eup %15865 }
 0x1f6   :  { %v1942_v2 = vmul.f32 %v15866_v50, %v1941_v59  ;;  %v21452_v59 = vld [vmem:[#allocation96_spill] sm:$0xff]  ;;  %v21453_v50 = vld [vmem:[#allocation103_spill] sm:$0xff] }
 0x1f8   :  { %v17450_v40 = vadd.f32 %v1943_v46, %v1942_v2  ;;  %v21454_v46 = vld [vmem:[#allocation100_spill] sm:$0xff]  ;;  %v21455_v2 = vld [vmem:[#allocation106_spill] sm:$0xff] }
 0x1fa   :  { %21428 = vst [vmem:[#allocation51_spill] sm:$0xff] %v17450_v40  ;;  %v17453_v14 = vand.u32 4294901760, %v17450_v40 }
 0x1fc   :  { %2287 = vmatmul.mubr.f32.vlgmr.msra.gmra.mxu1 %v17453_v14  ;;  %v17458_v45 = vsub.f32 %v17450_v40, %v17453_v14 }
 0x1fd   :  { %2433 = vmatpush1.msra.mxu1 %v16162_v11  ;;  %2526 = vmatprep.mubr.f32.mxu1 %v21174_v51 }
 0x1fe   :  { %2435 = vmatprep.subr.mxu1 %v16164_v12  ;;  %v17464_v27 = vand.u32 4294901760, %v17458_v45 }
 0x1ff   :  { %2437 = vmatpush1.msra.mxu1 %v16169_v16 }
 0x200   :  { %2439 = vmatprep.subr.mxu1 %v16171_v17  ;;  %v2053_v25 = vsub.f32 %v17458_v45, %v17464_v27 }
 0x201   :  { %2441 = vmatpush1.msra.mxu1 %v16181_v22 }
 0x202   :  { %2443 = vmatprep.subr.mxu1 %v16183_v23  ;;  %v17472_v43 = vand.u32 4294901760, %v2053_v25  ;;  %v21456_v25 = vld [vmem:[#allocation105_spill] sm:$0xff] }
 0x203   :  { %2445 = vmatpush1.msra.mxu1 %v16195_v29 }
 0x204   :  { %2447 = vmatprep.subr.mxu1 %v21366_v32  ;;  %2055 = vmatmul.mubr.f32.vlgmr.msra.gmra.mxu0 %v17472_v43 }
 0x205   :  { %2298 = vmatpush1.msra.mxu0 %v21429_v47  ;;  %2449 = vmatpush1.msra.mxu1 %v21370_v15 }
 0x206   :  { %2301 = vmatprep.subr.mxu0 %v21430_v0  ;;  %2451 = vmatprep.subr.mxu1 %v21374_v5 }
 0x207   :  { %2304 = vmatpush1.msra.mxu0 %v21431_v52  ;;  %2453 = vmatpush1.msra.mxu1 %v21376_v38 }
 0x208   :  { %2307 = vmatprep.subr.mxu0 %v21432_v48  ;;  %2455 = vmatprep.subr.mxu1 %v21378_v58 }
 0x209   :  { %2310 = vmatpush1.msra.mxu0 %v21433_v62  ;;  %2457 = vmatpush1.msra.mxu1 %v21380_v37 }
 0x20a   :  { %2313 = vmatprep.subr.mxu0 %v21434_v21  ;;  %2459 = vmatprep.subr.mxu1 %v21382_v6 }
 0x20b   :  { %2316 = vmatpush1.msra.mxu0 %v21435_v7  ;;  %2461 = vmatpush1.msra.mxu1 %v21386_v34  ;;  %v21532_v7 = vld [vmem:[#allocation143_spill] sm:$0xff] }
 0x20c   :  { %2319 = vmatprep.subr.mxu0 %v21436_v61  ;;  %2463 = vmatprep.subr.mxu1 %v21389_v9  ;;  %v21531_v61 = vld [vmem:[#allocation141_spill] sm:$0xff] }
 0x20d   :  { %2322 = vmatpush1.msra.mxu0 %v21437_v30  ;;  %2465 = vmatpush1.msra.mxu1 %v21391_v28  ;;  %v21530_v30 = vld [vmem:[#allocation186_spill] sm:$0xff] }
 0x20e   :  { %2325 = vmatprep.subr.mxu0 %v21438_v54  ;;  %2467 = vmatprep.subr.mxu1 %v21393_v31  ;;  %v21526_v54 = vld [vmem:[#allocation201_spill] sm:$0xff] }
 0x20f   :  { %2328 = vmatpush1.msra.mxu0 %v21439_v24  ;;  %2469 = vmatpush1.msra.mxu1 %v21395_v36  ;;  %v21524_v24 = vld [vmem:[#allocation200_spill] sm:$0xff] }
 0x210   :  { %2331 = vmatprep.subr.mxu0 %v21440_v44  ;;  %2471 = vmatprep.subr.mxu1 %v21397_v55  ;;  %v21522_v44 = vld [vmem:[#allocation199_spill] sm:$0xff] }
 0x211   :  { %2334 = vmatpush1.msra.mxu0 %v21441_v20  ;;  %2473 = vmatpush1.msra.mxu1 %v21400_v63  ;;  %v21520_v20 = vld [vmem:[#allocation198_spill] sm:$0xff] }
 0x212   :  { %2337 = vmatprep.subr.mxu0 %v21442_v57  ;;  %2475 = vmatprep.subr.mxu1 %v21402_v33  ;;  %v21518_v57 = vld [vmem:[#allocation196_spill] sm:$0xff] }
 0x213   :  { %2340 = vmatpush1.msra.mxu0 %v21443_v8  ;;  %2477 = vmatpush1.msra.mxu1 %v21404_v1  ;;  %v21516_v8 = vld [vmem:[#allocation194_spill] sm:$0xff] }
 0x214   :  { %2343 = vmatprep.subr.mxu0 %v21444_v26  ;;  %2479 = vmatprep.subr.mxu1 %v21406_v41  ;;  %v21500_v26 = vld [vmem:[#allocation129_spill] sm:$0xff] }
 0x215   :  { %2346 = vmatpush1.msra.mxu0 %v21445_v49  ;;  %2481 = vmatpush1.msra.mxu1 %v21409_v19  ;;  %v21499_v49 = vld [vmem:[#allocation164_spill] sm:$0xff] }
 0x216   :  { %2349 = vmatprep.subr.mxu0 %v21446_v3  ;;  %2483 = vmatprep.subr.mxu1 %v21447_v10  ;;  %v21497_v3 = vld [vmem:[#allocation124_spill] sm:$0xff] }
 0x217   :  { %2352 = vmatpush1.msra.mxu0 %v21448_v60  ;;  %2485 = vmatpush1.msra.mxu1 %v21449_v4  ;;  %v21465_v60 = vld [vmem:[#allocation125_spill] sm:$0xff] }
 0x218   :  { %2355 = vmatprep.subr.mxu0 %v21450_v13  ;;  %2487 = vmatprep.subr.mxu1 %v21451_v39  ;;  %v21460_v13 = vld [vmem:[#allocation112_spill] sm:$0xff] }
 0x219   :  { %2358 = vmatpush1.msra.mxu0 %v21452_v59  ;;  %2489 = vmatpush1.msra.mxu1 %v21453_v50  ;;  %v21461_v59 = vld [vmem:[#allocation115_spill] sm:$0xff] }
 0x21a   :  { %2361 = vmatprep.subr.mxu0 %v21454_v46  ;;  %2491 = vmatprep.subr.mxu1 %v21455_v2  ;;  %v21462_v46 = vld [vmem:[#allocation116_spill] sm:$0xff] }
 0x21b   :  { %2364 = vmatpush1.msra.mxu0 %v21456_v25  ;;  %2493 = vmatpush1.msra.mxu1 %v21457_v18  ;;  %v21463_v25 = vld [vmem:[#allocation119_spill] sm:$0xff] }
 0x21c   :  { %2367 = vmatprep.subr.mxu0 %v21458_v53  ;;  %2530 = vmatmul.mubr.f32.vlgmr.msra.gmra.mxu1 %v17464_v27  ;;  %v21464_v53 = vld [vmem:[#allocation122_spill] sm:$0xff] }
 0x21d   :  { %2705 = vmatprep.subr.mxu1 %v21459_v56  ;;  %2370 = vmatpush1.msra.mxu0 %v21460_v13  ;;  %v21466_v13 = vld [vmem:[#allocation130_spill] sm:$0xff] }
 0x21e   :  { %2707 = vmatpush1.msra.mxu1 %v16162_v11  ;;  %2373 = vmatprep.subr.mxu0 %v21461_v59  ;;  %v21472_v59 = vld [vmem:[#allocation38_spill] sm:$0xff] }
 0x21f   :  { %2709 = vmatprep.subr.mxu1 %v16164_v12  ;;  %2376 = vmatpush1.msra.mxu0 %v21462_v46  ;;  %v21467_v46 = vld [vmem:[#allocation21_spill] sm:$0xff] }
 0x220   :  { %2711 = vmatpush1.msra.mxu1 %v16169_v16  ;;  %2379 = vmatprep.subr.mxu0 %v21463_v25  ;;  %v21468_v25 = vld [vmem:[#allocation24_spill] sm:$0xff] }
 0x221   :  { %2713 = vmatprep.subr.mxu1 %v16171_v17  ;;  %2382 = vmatpush1.msra.mxu0 %v21464_v53  ;;  %v21469_v53 = vld [vmem:[#allocation25_spill] sm:$0xff] }
 0x222   :  { %2715 = vmatpush1.msra.mxu1 %v16181_v22  ;;  %2385 = vmatprep.subr.mxu0 %v21465_v60  ;;  %v21470_v60 = vld [vmem:[#allocation28_spill] sm:$0xff] }
 0x223   :  { %2717 = vmatprep.subr.mxu1 %v16183_v23  ;;  %2388 = vmatpush1.msra.mxu0 %v21466_v13  ;;  %v21471_v13 = vld [vmem:[#allocation34_spill] sm:$0xff] }
 0x224   :  { %2421 = vmatprep.mubr.f32.mxu0 %v21174_v51  ;;  %2719 = vmatpush1.msra.mxu1 %v16195_v29 }
 0x225   :  { %2424 = vmatmul.mubr.f32.vlgmr.msra.gmra.mxu0 %v17458_v45  ;;  %2539 = vmatprep.subr.mxu0 %v21467_v46  ;;  %v21473_v46 = vld [vmem:[#allocation41_spill] sm:$0xff] }
 0x226   :  { %2721 = vmatprep.subr.mxu1 %v21366_v32  ;;  %2543 = vmatpush1.msra.mxu0 %v21468_v25  ;;  %v21474_v25 = vld [vmem:[#allocation47_spill] sm:$0xff] }
 0x227   :  { %2723 = vmatpush1.msra.mxu1 %v21370_v15  ;;  %2547 = vmatprep.subr.mxu0 %v21469_v53  ;;  %v21475_v53 = vld [vmem:[#allocation50_spill] sm:$0xff] }
 0x228   :  { %2725 = vmatprep.subr.mxu1 %v21374_v5  ;;  %2551 = vmatpush1.msra.mxu0 %v21470_v60  ;;  %v21476_v60 = vld [vmem:[#allocation54_spill] sm:$0xff] }
 0x229   :  { %2727 = vmatpush1.msra.mxu1 %v21376_v38  ;;  %2555 = vmatprep.subr.mxu0 %v21471_v13  ;;  %v21477_v13 = vld [vmem:[#allocation56_spill] sm:$0xff] }
 0x22a   :  { %2729 = vmatprep.subr.mxu1 %v21378_v58  ;;  %2559 = vmatpush1.msra.mxu0 %v21472_v59  ;;  %v21478_v59 = vld [vmem:[#allocation63_spill] sm:$0xff] }
 0x22b   :  { %2731 = vmatpush1.msra.mxu1 %v21380_v37  ;;  %2563 = vmatprep.subr.mxu0 %v21473_v46  ;;  %v21479_v46 = vld [vmem:[#allocation66_spill] sm:$0xff] }
 0x22c   :  { %2733 = vmatprep.subr.mxu1 %v21382_v6  ;;  %2567 = vmatpush1.msra.mxu0 %v21474_v25  ;;  %v21480_v25 = vld [vmem:[#allocation70_spill] sm:$0xff] }
 0x22d   :  { %2735 = vmatpush1.msra.mxu1 %v21386_v34  ;;  %2571 = vmatprep.subr.mxu0 %v21475_v53  ;;  %v21481_v53 = vld [vmem:[#allocation72_spill] sm:$0xff] }
 0x22e   :  { %2737 = vmatprep.subr.mxu1 %v21389_v9  ;;  %2575 = vmatpush1.msra.mxu0 %v21476_v60  ;;  %v21482_v60 = vld [vmem:[#allocation79_spill] sm:$0xff] }
 0x22f   :  { %2739 = vmatpush1.msra.mxu1 %v21391_v28  ;;  %2579 = vmatprep.subr.mxu0 %v21477_v13  ;;  %v21483_v13 = vld [vmem:[#allocation82_spill] sm:$0xff] }
 0x230   :  { %2741 = vmatprep.subr.mxu1 %v21393_v31  ;;  %2583 = vmatpush1.msra.mxu0 %v21478_v59  ;;  %v21484_v59 = vld [vmem:[#allocation86_spill] sm:$0xff] }
 0x231   :  { %2743 = vmatpush1.msra.mxu1 %v21395_v36  ;;  %2587 = vmatprep.subr.mxu0 %v21479_v46  ;;  %v21485_v46 = vld [vmem:[#allocation88_spill] sm:$0xff] }
 0x232   :  { %2745 = vmatprep.subr.mxu1 %v21397_v55  ;;  %2591 = vmatpush1.msra.mxu0 %v21480_v25  ;;  %v21486_v25 = vld [vmem:[#allocation95_spill] sm:$0xff] }
 0x233   :  { %2747 = vmatpush1.msra.mxu1 %v21400_v63  ;;  %2595 = vmatprep.subr.mxu0 %v21481_v53  ;;  %v21487_v53 = vld [vmem:[#allocation98_spill] sm:$0xff] }
 0x234   :  { %2749 = vmatprep.subr.mxu1 %v21402_v33  ;;  %2599 = vmatpush1.msra.mxu0 %v21482_v60  ;;  %v21488_v60 = vld [vmem:[#allocation102_spill] sm:$0xff] }
 0x235   :  { %2751 = vmatpush1.msra.mxu1 %v21404_v1  ;;  %2603 = vmatprep.subr.mxu0 %v21483_v13  ;;  %v21489_v13 = vld [vmem:[#allocation104_spill] sm:$0xff] }
 0x236   :  { %2753 = vmatprep.subr.mxu1 %v21406_v41  ;;  %2607 = vmatpush1.msra.mxu0 %v21484_v59  ;;  %v21490_v59 = vld [vmem:[#allocation111_spill] sm:$0xff] }
 0x237   :  { %2755 = vmatpush1.msra.mxu1 %v21409_v19  ;;  %2611 = vmatprep.subr.mxu0 %v21485_v46  ;;  %v21494_v46 = vld [vmem:[#allocation120_spill] sm:$0xff] }
 0x238   :  { %2757 = vmatprep.subr.mxu1 %v21447_v10  ;;  %2615 = vmatpush1.msra.mxu0 %v21486_v25  ;;  %v21491_v25 = vld [vmem:[#allocation114_spill] sm:$0xff] }
 0x239   :  { %2759 = vmatpush1.msra.mxu1 %v21449_v4  ;;  %2619 = vmatprep.subr.mxu0 %v21487_v53  ;;  %v21492_v53 = vld [vmem:[#allocation118_spill] sm:$0xff] }
 0x23a   :  { %2761 = vmatprep.subr.mxu1 %v21451_v39  ;;  %2623 = vmatpush1.msra.mxu0 %v21488_v60  ;;  %v21493_v60 = vld [vmem:[#allocation157_spill] sm:$0xff] }
 0x23b   :  { %2763 = vmatpush1.msra.mxu1 %v21453_v50  ;;  %2627 = vmatprep.subr.mxu0 %v21489_v13  ;;  %v21495_v13 = vld [vmem:[#allocation121_spill] sm:$0xff] }
 0x23c   :  { %2765 = vmatprep.subr.mxu1 %v21455_v2  ;;  %2631 = vmatpush1.msra.mxu0 %v21490_v59  ;;  %v21496_v59 = vld [vmem:[#allocation160_spill] sm:$0xff] }
 0x23d   :  { %2767 = vmatpush1.msra.mxu1 %v21457_v18  ;;  %2800 = vmatprep.mubr.f32.mxu1 %v21174_v51 }
 0x23e   :  { %2635 = vmatprep.subr.mxu0 %v21491_v25  ;;  %2802 = vmatmul.mubr.f32.vlgmr.msra.gmra.mxu1 %v17453_v14  ;;  %v21498_v25 = vld [vmem:[#allocation127_spill] sm:$0xff] }
 0x23f   :  { %14333 = vmatprep.subr.mxu1 %v21174_v51  ;;  %2639 = vmatpush1.msra.mxu0 %v21492_v53  ;;  %v21514_v53 = vld [vmem:[#allocation191_spill] sm:$0xff] }
 0x240   :  { %14334 = vmatpush3.msra.mxu1 %v21493_v60  ;;  %2643 = vmatprep.subr.mxu0 %v21494_v46  ;;  %v21501_v60 = vld [vmem:[#allocation132_spill] sm:$0xff] }
 0x241   :  { %14335 = vmatprep.subr.mxu1 %v21174_v51  ;;  %2647 = vmatpush1.msra.mxu0 %v21495_v13  ;;  %v21502_v46 = vld [vmem:[#allocation168_spill] sm:$0xff] }
 0x242   :  { %14336 = vmatpush3.msra.mxu1 %v21496_v59  ;;  %2651 = vmatprep.subr.mxu0 %v21497_v3  ;;  %v21503_v3 = vld [vmem:[#allocation138_spill] sm:$0xff]  ;;  %v21510_v59 = vld [vmem:[#allocation184_spill] sm:$0xff] }
 0x243   :  { %14337 = vmatprep.subr.mxu1 %v21174_v51  ;;  %2655 = vmatpush1.msra.mxu0 %v21498_v25  ;;  %v21504_v25 = vld [vmem:[#allocation172_spill] sm:$0xff] }
 0x244   :  { %14338 = vmatpush3.msra.mxu1 %v21499_v49  ;;  %2659 = vmatprep.subr.mxu0 %v21500_v26  ;;  %v21505_v26 = vld [vmem:[#allocation139_spill] sm:$0xff]  ;;  %v21508_v49 = vld [vmem:[#allocation180_spill] sm:$0xff] }
 0x245   :  { %14339 = vmatprep.subr.mxu1 %v21174_v51  ;;  %2663 = vmatpush1.msra.mxu0 %v21501_v60  ;;  %v21506_v60 = vld [vmem:[#allocation176_spill] sm:$0xff] }
 0x246   :  { %2696 = vmatprep.mubr.f32.mxu0 %v21174_v51  ;;  %14340 = vmatpush3.msra.mxu1 %v21502_v46  ;;  %v21507_v46 = vld [vmem:[#allocation140_spill] sm:$0xff] }
 0x247   :  { %2698 = vmatmul.mubr.f32.vlgmr.msra.gmra.mxu0 %v17453_v14  ;;  %14298 = vmatprep.subr.mxu0 %v21174_v51  ;;  %v21512_v13 = vld [vmem:[#allocation188_spill] sm:$0xff] }
 0x248   :  { %14341 = vmatprep.subr.mxu1 %v21174_v51  ;;  %14299 = vmatpush3.msra.mxu0 %v21503_v3 }
 0x249   :  { %14342 = vmatpush3.msra.mxu1 %v21504_v25  ;;  %14300 = vmatprep.subr.mxu0 %v21174_v51  ;;  %v21509_v25 = vld [vmem:[#allocation142_spill] sm:$0xff] }
 0x24a   :  { %14343 = vmatprep.subr.mxu1 %v21174_v51  ;;  %14301 = vmatpush3.msra.mxu0 %v21505_v26 }
 0x24b   :  { %14344 = vmatpush3.msra.mxu1 %v21506_v60  ;;  %14302 = vmatprep.subr.mxu0 %v21174_v51  ;;  %v21511_v60 = vld [vmem:[#allocation144_spill] sm:$0xff] }
 0x24c   :  { %14345 = vmatprep.subr.mxu1 %v21174_v51  ;;  %14303 = vmatpush3.msra.mxu0 %v21507_v46 }
 0x24d   :  { %14346 = vmatpush3.msra.mxu1 %v21508_v49  ;;  %14304 = vmatprep.subr.mxu0 %v21174_v51  ;;  %v21513_v49 = vld [vmem:[#allocation149_spill] sm:$0xff] }
 0x24e   :  { %14347 = vmatprep.subr.mxu1 %v21174_v51  ;;  %14305 = vmatpush3.msra.mxu0 %v21509_v25 }
 0x24f   :  { %14348 = vmatpush3.msra.mxu1 %v21510_v59  ;;  %14306 = vmatprep.subr.mxu0 %v21174_v51  ;;  %v21515_v59 = vld [vmem:[#allocation152_spill] sm:$0xff] }
 0x250   :  { %14349 = vmatprep.subr.mxu1 %v21174_v51  ;;  %14307 = vmatpush3.msra.mxu0 %v21511_v60 }
 0x251   :  { %14350 = vmatpush3.msra.mxu1 %v21512_v13  ;;  %14308 = vmatprep.subr.mxu0 %v21174_v51  ;;  %v21517_v13 = vld [vmem:[#allocation154_spill] sm:$0xff] }
 0x252   :  { %14351 = vmatprep.subr.mxu1 %v21174_v51  ;;  %14309 = vmatpush3.msra.mxu0 %v21513_v49 }
 0x253   :  { %14352 = vmatpush3.msra.mxu1 %v21514_v53  ;;  %14310 = vmatprep.subr.mxu0 %v21174_v51  ;;  %v21519_v53 = vld [vmem:[#allocation158_spill] sm:$0xff] }
 0x254   :  { %14353 = vmatprep.subr.mxu1 %v21174_v51  ;;  %14311 = vmatpush3.msra.mxu0 %v21515_v59 }
 0x255   :  { %14354 = vmatpush3.msra.mxu1 %v21516_v8  ;;  %14312 = vmatprep.subr.mxu0 %v21174_v51  ;;  %v21521_v8 = vld [vmem:[#allocation162_spill] sm:$0xff] }
 0x256   :  { %14355 = vmatprep.subr.mxu1 %v21174_v51  ;;  %14313 = vmatpush3.msra.mxu0 %v21517_v13 }
 0x257   :  { %14356 = vmatpush3.msra.mxu1 %v21518_v57  ;;  %14314 = vmatprep.subr.mxu0 %v21174_v51  ;;  %v21523_v57 = vld [vmem:[#allocation166_spill] sm:$0xff] }
 0x258   :  { %14357 = vmatprep.subr.mxu1 %v21174_v51  ;;  %14315 = vmatpush3.msra.mxu0 %v21519_v53 }
 0x259   :  { %14358 = vmatpush3.msra.mxu1 %v21520_v20  ;;  %14316 = vmatprep.subr.mxu0 %v21174_v51  ;;  %v21525_v20 = vld [vmem:[#allocation170_spill] sm:$0xff] }
 0x25a   :  { %14359 = vmatprep.subr.mxu1 %v21174_v51  ;;  %14317 = vmatpush3.msra.mxu0 %v21521_v8 }
 0x25b   :  { %14360 = vmatpush3.msra.mxu1 %v21522_v44  ;;  %14318 = vmatprep.subr.mxu0 %v21174_v51  ;;  %v21527_v44 = vld [vmem:[#allocation174_spill] sm:$0xff] }
 0x25c   :  { %14361 = vmatprep.subr.mxu1 %v21174_v51  ;;  %14319 = vmatpush3.msra.mxu0 %v21523_v57 }
 0x25d   :  { %14362 = vmatpush3.msra.mxu1 %v21524_v24  ;;  %14320 = vmatprep.subr.mxu0 %v21174_v51  ;;  %v21528_v24 = vld [vmem:[#allocation179_spill] sm:$0xff] }
 0x25e   :  { %14363 = vmatprep.subr.mxu1 %v21174_v51  ;;  %14321 = vmatpush3.msra.mxu0 %v21525_v20 }
 0x25f   :  { %14364 = vmatpush3.msra.mxu1 %v21526_v54  ;;  %14365 = vmatprep.mubr.msk.f32.mxu1 %vm16060_vm1, %v21174_v51  ;;  %v21529_v54 = vld [vmem:[#allocation183_spill] sm:$0xff] }
 0x260   :  { %14322 = vmatprep.subr.mxu0 %v21174_v51  ;;  %14366 = vmatmul.mubr.f32.vlgmr.msra.gmra.mxu1 %v17453_v14 }
 0x261   :  { %14403 = vmatprep.subr.mxu1 %v21174_v51  ;;  %14323 = vmatpush3.msra.mxu0 %v21527_v44 }
 0x262   :  { %14404 = vmatpush3.msra.mxu1 %v21503_v3  ;;  %14324 = vmatprep.subr.mxu0 %v21174_v51 }
 0x263   :  { %14405 = vmatprep.subr.mxu1 %v21174_v51  ;;  %14325 = vmatpush3.msra.mxu0 %v21528_v24 }
 0x264   :  { %14406 = vmatpush3.msra.mxu1 %v21505_v26  ;;  %14326 = vmatprep.subr.mxu0 %v21174_v51 }
 0x265   :  { %14407 = vmatprep.subr.mxu1 %v21174_v51  ;;  %14327 = vmatpush3.msra.mxu0 %v21529_v54 }
 0x266   :  { %14408 = vmatpush3.msra.mxu1 %v21507_v46  ;;  %14328 = vmatprep.subr.mxu0 %v21174_v51 }
 0x267   :  { %14409 = vmatprep.subr.mxu1 %v21174_v51  ;;  %14329 = vmatpush3.msra.mxu0 %v21530_v30 }
 0x268   :  { %14330 = vmatprep.mubr.msk.f32.mxu0 %vm16060_vm1, %v21174_v51  ;;  %14410 = vmatpush3.msra.mxu1 %v21509_v25 }
 0x269   :  { %14331 = vmatmul.mubr.f32.vlgmr.msra.gmra.mxu0 %v17472_v43  ;;  %14368 = vmatprep.subr.mxu0 %v21174_v51  ;;  %v21533_v43 = vld [vmem:[#allocation146_spill] sm:$0xff] }
 0x26a   :  { %14411 = vmatprep.subr.mxu1 %v21174_v51  ;;  %14369 = vmatpush3.msra.mxu0 %v21531_v61  ;;  %v21534_v61 = vld [vmem:[#allocation147_spill] sm:$0xff] }
 0x26b   :  { %14412 = vmatpush3.msra.mxu1 %v21511_v60  ;;  %14370 = vmatprep.subr.mxu0 %v21174_v51 }
 0x26c   :  { %14413 = vmatprep.subr.mxu1 %v21174_v51  ;;  %14371 = vmatpush3.msra.mxu0 %v21532_v7  ;;  %v21535_v7 = vld [vmem:[#allocation150_spill] sm:$0xff] }
 0x26d   :  { %14414 = vmatpush3.msra.mxu1 %v21513_v49  ;;  %14372 = vmatprep.subr.mxu0 %v21174_v51 }
 0x26e   :  { %14415 = vmatprep.subr.mxu1 %v21174_v51  ;;  %14373 = vmatpush3.msra.mxu0 %v21533_v43  ;;  %v21536_v43 = vld [vmem:[#allocation155_spill] sm:$0xff] }
 0x26f   :  { %14416 = vmatpush3.msra.mxu1 %v21515_v59  ;;  %14374 = vmatprep.subr.mxu0 %v21174_v51 }
 0x270   :  { %14417 = vmatprep.subr.mxu1 %v21174_v51  ;;  %14375 = vmatpush3.msra.mxu0 %v21534_v61  ;;  %v21537_v61 = vld [vmem:[#allocation159_spill] sm:$0xff] }
 0x271   :  { %14418 = vmatpush3.msra.mxu1 %v21517_v13  ;;  %14376 = vmatprep.subr.mxu0 %v21174_v51 }
 0x272   :  { %14419 = vmatprep.subr.mxu1 %v21174_v51  ;;  %14377 = vmatpush3.msra.mxu0 %v21535_v7  ;;  %v21538_v7 = vld [vmem:[#allocation163_spill] sm:$0xff] }
 0x273   :  { %14420 = vmatpush3.msra.mxu1 %v21519_v53  ;;  %14378 = vmatprep.subr.mxu0 %v21174_v51 }
 0x274   :  { %14421 = vmatprep.subr.mxu1 %v21174_v51  ;;  %14379 = vmatpush3.msra.mxu0 %v21536_v43  ;;  %v21539_v43 = vld [vmem:[#allocation167_spill] sm:$0xff] }
 0x275   :  { %14422 = vmatpush3.msra.mxu1 %v21521_v8  ;;  %14380 = vmatprep.subr.mxu0 %v21174_v51 }
 0x276   :  { %14423 = vmatprep.subr.mxu1 %v21174_v51  ;;  %14381 = vmatpush3.msra.mxu0 %v21537_v61  ;;  %v21540_v61 = vld [vmem:[#allocation171_spill] sm:$0xff] }
 0x277   :  { %14424 = vmatpush3.msra.mxu1 %v21523_v57  ;;  %14382 = vmatprep.subr.mxu0 %v21174_v51 }
 0x278   :  { %14425 = vmatprep.subr.mxu1 %v21174_v51  ;;  %14383 = vmatpush3.msra.mxu0 %v21538_v7  ;;  %v21541_v7 = vld [vmem:[#allocation175_spill] sm:$0xff] }
 0x279   :  { %14426 = vmatpush3.msra.mxu1 %v21525_v20  ;;  %14384 = vmatprep.subr.mxu0 %v21174_v51 }
 0x27a   :  { %14427 = vmatprep.subr.mxu1 %v21174_v51  ;;  %14385 = vmatpush3.msra.mxu0 %v21539_v43  ;;  %v21542_v43 = vld [vmem:[#allocation178_spill] sm:$0xff] }
 0x27b   :  { %14428 = vmatpush3.msra.mxu1 %v21527_v44  ;;  %14386 = vmatprep.subr.mxu0 %v21174_v51 }
 0x27c   :  { %14429 = vmatprep.subr.mxu1 %v21174_v51  ;;  %14387 = vmatpush3.msra.mxu0 %v21540_v61  ;;  %v21545_v61 = vld [vmem:[#allocation190_spill] sm:$0xff] }
 0x27d   :  { %14430 = vmatpush3.msra.mxu1 %v21528_v24  ;;  %14388 = vmatprep.subr.mxu0 %v21174_v51 }
 0x27e   :  { %14431 = vmatprep.subr.mxu1 %v21174_v51  ;;  %14389 = vmatpush3.msra.mxu0 %v21541_v7  ;;  %v21543_v7 = vld [vmem:[#allocation182_spill] sm:$0xff] }
 0x27f   :  { %14432 = vmatpush3.msra.mxu1 %v21529_v54  ;;  %14390 = vmatprep.subr.mxu0 %v21174_v51 }
 0x280   :  { %14433 = vmatprep.subr.mxu1 %v21174_v51  ;;  %14391 = vmatpush3.msra.mxu0 %v21542_v43  ;;  %v21544_v43 = vld [vmem:[#allocation187_spill] sm:$0xff] }
 0x281   :  { %14434 = vmatpush3.msra.mxu1 %v21530_v30  ;;  %14435 = vmatprep.mubr.msk.f32.mxu1 %vm16060_vm1, %v21174_v51 }
 0x282   :  { %14392 = vmatprep.subr.mxu0 %v21174_v51  ;;  %14436 = vmatmul.mubr.f32.vlgmr.msra.gmra.mxu1 %v17464_v27  ;;  %v21546_v27 = vld [vmem:[#allocation193_spill] sm:$0xff] }
 0x283   :  { %14473 = vmatprep.subr.mxu1 %v21174_v51  ;;  %14393 = vmatpush3.msra.mxu0 %v21543_v7  ;;  %v21563_v7 = vld [vmem:[#allocation37_spill] sm:$0xff] }
 0x284   :  { %14474 = vmatpush3.msra.mxu1 %v21503_v3  ;;  %14394 = vmatprep.subr.mxu0 %v21174_v51 }
 0x285   :  { %14475 = vmatprep.subr.mxu1 %v21174_v51  ;;  %14395 = vmatpush3.msra.mxu0 %v21544_v43  ;;  %v21561_v43 = vld [vmem:[#allocation192_spill] sm:$0xff] }
 0x286   :  { %14476 = vmatpush3.msra.mxu1 %v21505_v26  ;;  %14396 = vmatprep.subr.mxu0 %v21174_v51 }
 0x287   :  { %14477 = vmatprep.subr.mxu1 %v21174_v51  ;;  %14397 = vmatpush3.msra.mxu0 %v21545_v61  ;;  %v21547_v61 = vld [vmem:[#allocation145_spill] sm:$0xff] }
 0x288   :  { %14478 = vmatpush3.msra.mxu1 %v21507_v46  ;;  %14398 = vmatprep.subr.mxu0 %v21174_v51 }
 0x289   :  { %14479 = vmatprep.subr.mxu1 %v21174_v51  ;;  %14399 = vmatpush3.msra.mxu0 %v21546_v27  ;;  %v21548_v27 = vld [vmem:[#allocation148_spill] sm:$0xff] }
 0x28a   :  { %14400 = vmatprep.mubr.msk.f32.mxu0 %vm16060_vm1, %v21174_v51  ;;  %14480 = vmatpush3.msra.mxu1 %v21509_v25 }
 0x28b   :  { %14401 = vmatmul.mubr.f32.vlgmr.msra.gmra.mxu0 %v17458_v45  ;;  %14438 = vmatprep.subr.mxu0 %v21174_v51  ;;  %v21549_v45 = vld [vmem:[#allocation151_spill] sm:$0xff] }
 0x28c   :  { %14481 = vmatprep.subr.mxu1 %v21174_v51  ;;  %14439 = vmatpush3.msra.mxu0 %v21547_v61  ;;  %v21550_v61 = vld [vmem:[#allocation153_spill] sm:$0xff] }
 0x28d   :  { %14482 = vmatpush3.msra.mxu1 %v21511_v60  ;;  %14440 = vmatprep.subr.mxu0 %v21174_v51  ;;  %v21596_v60 = vld [vmem:[#allocation206_spill] sm:$0xff] }
 0x28e   :  { %14483 = vmatprep.subr.mxu1 %v21174_v51  ;;  %14441 = vmatpush3.msra.mxu0 %v21548_v27  ;;  %v21551_v27 = vld [vmem:[#allocation156_spill] sm:$0xff]  ;;  %v225_v25 = vadd.f32 %v21596_v60, %v17438_v42 }
 0x28f   :  { %14484 = vmatpush3.msra.mxu1 %v21513_v49  ;;  %14442 = vmatprep.subr.mxu0 %v21174_v51 }
 0x290   :  { %14485 = vmatprep.subr.mxu1 %v21174_v51  ;;  %14443 = vmatpush3.msra.mxu0 %v21549_v45  ;;  %v21552_v45 = vld [vmem:[#allocation161_spill] sm:$0xff] }
 0x291   :  { %14486 = vmatpush3.msra.mxu1 %v21515_v59  ;;  %14444 = vmatprep.subr.mxu0 %v21174_v51 }
 0x292   :  { %14487 = vmatprep.subr.mxu1 %v21174_v51  ;;  %14445 = vmatpush3.msra.mxu0 %v21550_v61  ;;  %v21553_v61 = vld [vmem:[#allocation165_spill] sm:$0xff] }
 0x293   :  { %14488 = vmatpush3.msra.mxu1 %v21517_v13  ;;  %14446 = vmatprep.subr.mxu0 %v21174_v51 }
 0x294   :  { %14489 = vmatprep.subr.mxu1 %v21174_v51  ;;  %14447 = vmatpush3.msra.mxu0 %v21551_v27  ;;  %v21554_v27 = vld [vmem:[#allocation169_spill] sm:$0xff] }
 0x295   :  { %14490 = vmatpush3.msra.mxu1 %v21519_v53  ;;  %14448 = vmatprep.subr.mxu0 %v21174_v51 }
 0x296   :  { %14491 = vmatprep.subr.mxu1 %v21174_v51  ;;  %14449 = vmatpush3.msra.mxu0 %v21552_v45  ;;  %v21555_v45 = vld [vmem:[#allocation173_spill] sm:$0xff] }
 0x297   :  { %14492 = vmatpush3.msra.mxu1 %v21521_v8  ;;  %14450 = vmatprep.subr.mxu0 %v21174_v51 }
 0x298   :  { %14493 = vmatprep.subr.mxu1 %v21174_v51  ;;  %14451 = vmatpush3.msra.mxu0 %v21553_v61  ;;  %v21556_v61 = vld [vmem:[#allocation177_spill] sm:$0xff] }
 0x299   :  { %14494 = vmatpush3.msra.mxu1 %v21523_v57  ;;  %14452 = vmatprep.subr.mxu0 %v21174_v51 }
 0x29a   :  { %14495 = vmatprep.subr.mxu1 %v21174_v51  ;;  %14453 = vmatpush3.msra.mxu0 %v21554_v27  ;;  %v21557_v27 = vld [vmem:[#allocation181_spill] sm:$0xff] }
 0x29b   :  { %14496 = vmatpush3.msra.mxu1 %v21525_v20  ;;  %14454 = vmatprep.subr.mxu0 %v21174_v51 }
 0x29c   :  { %14497 = vmatprep.subr.mxu1 %v21174_v51  ;;  %14455 = vmatpush3.msra.mxu0 %v21555_v45  ;;  %v21558_v45 = vld [vmem:[#allocation185_spill] sm:$0xff] }
 0x29d   :  { %14498 = vmatpush3.msra.mxu1 %v21527_v44  ;;  %14456 = vmatprep.subr.mxu0 %v21174_v51  ;;  %v21568_v44 = vld [vmem:[#allocation49_spill] sm:$0xff] }
 0x29e   :  { %14499 = vmatprep.subr.mxu1 %v21174_v51  ;;  %14457 = vmatpush3.msra.mxu0 %v21556_v61  ;;  %v21559_v61 = vld [vmem:[#allocation189_spill] sm:$0xff] }
 0x29f   :  { %14500 = vmatpush3.msra.mxu1 %v21528_v24  ;;  %14458 = vmatprep.subr.mxu0 %v21174_v51  ;;  %v21567_v24 = vld [vmem:[#allocation197_spill] sm:$0xff] }
 0x2a0   :  { %14501 = vmatprep.subr.mxu1 %v21174_v51  ;;  %14459 = vmatpush3.msra.mxu0 %v21557_v27  ;;  %v21560_v27 = vld [vmem:[#allocation33_spill] sm:$0xff] }
 0x2a1   :  { %14502 = vmatpush3.msra.mxu1 %v21529_v54  ;;  %14460 = vmatprep.subr.mxu0 %v21174_v51  ;;  %v21565_v54 = vld [vmem:[#allocation40_spill] sm:$0xff] }
 0x2a2   :  { %14503 = vmatprep.subr.mxu1 %v21174_v51  ;;  %14461 = vmatpush3.msra.mxu0 %v21558_v45  ;;  %v21562_v45 = vld [vmem:[#allocation36_spill] sm:$0xff] }
 0x2a3   :  { %14504 = vmatpush3.msra.mxu1 %v21530_v30  ;;  %14505 = vmatprep.mubr.msk.f32.mxu1 %vm16060_vm1, %v21174_v51  ;;  %v21564_v30 = vld [vmem:[#allocation195_spill] sm:$0xff] }
 0x2a4   :  { %14462 = vmatprep.subr.mxu0 %v21174_v51  ;;  %14506 = vmatmul.mubr.f32.vlgmr.msra.gmra.mxu1 %v17453_v14 }
 0x2a5   :  { %14463 = vmatpush3.msra.mxu0 %v21559_v61  ;;  %14470 = vmatprep.mubr.msk.f32.mxu0 %vm16060_vm1, %v21174_v51  ;;  %v21566_v61 = vld [vmem:[#allocation46_spill] sm:$0xff] }
 0x2a6   :  { %14464 = vmatprep.subr.mxu0 %v21174_v51  ;;  %3593 = vmatprep.subr.mxu1 %v21560_v27 }
 0x2a7   :  { %14465 = vmatpush3.msra.mxu0 %v21561_v43  ;;  %3599 = vmatpush1.msra.mxu1 %v21562_v45  ;;  %v21569_v43 = vld [vmem:[#allocation53_spill] sm:$0xff]  ;;  %v21570_v45 = vld [vmem:[#allocation59_spill] sm:$0xff] }
 0x2a8   :  { %14466 = vmatprep.subr.mxu0 %v21174_v51  ;;  %3605 = vmatprep.subr.mxu1 %v21563_v7  ;;  %v21571_v7 = vld [vmem:[#allocation62_spill] sm:$0xff] }
 0x2a9   :  { %14467 = vmatpush3.msra.mxu0 %v21564_v30  ;;  %3611 = vmatpush1.msra.mxu1 %v21565_v54  ;;  %v21572_v54 = vld [vmem:[#allocation65_spill] sm:$0xff] }
 0x2aa   :  { %14468 = vmatprep.subr.mxu0 %v21174_v51  ;;  %3617 = vmatprep.subr.mxu1 %v21566_v61  ;;  %v21573_v61 = vld [vmem:[#allocation69_spill] sm:$0xff] }
 0x2ab   :  { %14469 = vmatpush3.msra.mxu0 %v21567_v24  ;;  %3623 = vmatpush1.msra.mxu1 %v21568_v44  ;;  %v21574_v44 = vld [vmem:[#allocation75_spill] sm:$0xff] }
 0x2ac   :  { %14471 = vmatmul.mubr.f32.vlgmr.msra.gmra.mxu0 %v17453_v14  ;;  %3629 = vmatprep.subr.mxu1 %v21569_v43  ;;  %v21575_v14 = vld [vmem:[#allocation78_spill] sm:$0xff] }
 0x2ad   :  { %3635 = vmatpush1.msra.mxu1 %v21570_v45  ;;  %3481 = vmatprep.subr.mxu0 %v21459_v56  ;;  %v21576_v45 = vld [vmem:[#allocation81_spill] sm:$0xff] }
 0x2ae   :  { %3641 = vmatprep.subr.mxu1 %v21571_v7  ;;  %3483 = vmatpush1.msra.mxu0 %v16162_v11  ;;  %v21577_v7 = vld [vmem:[#allocation85_spill] sm:$0xff] }
 0x2af   :  { %3647 = vmatpush1.msra.mxu1 %v21572_v54  ;;  %3485 = vmatprep.subr.mxu0 %v16164_v12  ;;  %v21578_v54 = vld [vmem:[#allocation91_spill] sm:$0xff] }
 0x2b0   :  { %3653 = vmatprep.subr.mxu1 %v21573_v61  ;;  %3487 = vmatpush1.msra.mxu0 %v16169_v16  ;;  %v21579_v61 = vld [vmem:[#allocation94_spill] sm:$0xff] }
 0x2b1   :  { %3659 = vmatpush1.msra.mxu1 %v21574_v44  ;;  %3489 = vmatprep.subr.mxu0 %v16171_v17  ;;  %v21580_v44 = vld [vmem:[#allocation97_spill] sm:$0xff] }
 0x2b2   :  { %3665 = vmatprep.subr.mxu1 %v21575_v14  ;;  %3491 = vmatpush1.msra.mxu0 %v16181_v22  ;;  %v21581_v14 = vld [vmem:[#allocation101_spill] sm:$0xff] }
 0x2b3   :  { %3671 = vmatpush1.msra.mxu1 %v21576_v45  ;;  %3493 = vmatprep.subr.mxu0 %v16183_v23  ;;  %v21582_v45 = vld [vmem:[#allocation107_spill] sm:$0xff] }
 0x2b4   :  { %3677 = vmatprep.subr.mxu1 %v21577_v7  ;;  %3495 = vmatpush1.msra.mxu0 %v16195_v29  ;;  %v21583_v7 = vld [vmem:[#allocation110_spill] sm:$0xff] }
 0x2b5   :  { %3683 = vmatpush1.msra.mxu1 %v21578_v54  ;;  %3497 = vmatprep.subr.mxu0 %v21366_v32  ;;  %v21584_v54 = vld [vmem:[#allocation113_spill] sm:$0xff] }
 0x2b6   :  { %3689 = vmatprep.subr.mxu1 %v21579_v61  ;;  %3499 = vmatpush1.msra.mxu0 %v21370_v15  ;;  %v21585_v61 = vld [vmem:[#allocation117_spill] sm:$0xff] }
 0x2b7   :  { %3695 = vmatpush1.msra.mxu1 %v21580_v44  ;;  %3501 = vmatprep.subr.mxu0 %v21374_v5  ;;  %v21586_v44 = vld [vmem:[#allocation123_spill] sm:$0xff] }
 0x2b8   :  { %3701 = vmatprep.subr.mxu1 %v21581_v14  ;;  %3503 = vmatpush1.msra.mxu0 %v21376_v38  ;;  %v21587_v14 = vld [vmem:[#allocation126_spill] sm:$0xff] }
 0x2b9   :  { %3707 = vmatpush1.msra.mxu1 %v21582_v45  ;;  %3505 = vmatprep.subr.mxu0 %v21378_v58  ;;  %v21588_v45 = vld [vmem:[#allocation128_spill] sm:$0xff] }
 0x2ba   :  { %3713 = vmatprep.subr.mxu1 %v21583_v7  ;;  %3507 = vmatpush1.msra.mxu0 %v21380_v37  ;;  %v21589_v7 = vld [vmem:[#allocation131_spill] sm:$0xff] }
 0x2bb   :  { %3719 = vmatpush1.msra.mxu1 %v21584_v54  ;;  %3509 = vmatprep.subr.mxu0 %v21382_v6  ;;  %v21590_v54 = vld [vmem:[#allocation133_spill] sm:$0xff] }
 0x2bc   :  { %3725 = vmatprep.subr.mxu1 %v21585_v61  ;;  %3511 = vmatpush1.msra.mxu0 %v21386_v34  ;;  %v21591_v61 = vld [vmem:[#allocation134_spill] sm:$0xff] }
 0x2bd   :  { %3731 = vmatpush1.msra.mxu1 %v21586_v44  ;;  %3513 = vmatprep.subr.mxu0 %v21389_v9  ;;  %v21592_v44 = vld [vmem:[#allocation135_spill] sm:$0xff] }
 0x2be   :  { %3737 = vmatprep.subr.mxu1 %v21587_v14  ;;  %3515 = vmatpush1.msra.mxu0 %v21391_v28  ;;  %v21593_v14 = vld [vmem:[#allocation136_spill] sm:$0xff] }
 0x2bf   :  { %3743 = vmatpush1.msra.mxu1 %v21588_v45  ;;  %3517 = vmatprep.subr.mxu0 %v21393_v31  ;;  %v21594_v45 = vld [vmem:[#allocation137_spill] sm:$0xff] }
 0x2c0   :  { %3749 = vmatprep.subr.mxu1 %v21589_v7  ;;  %3519 = vmatpush1.msra.mxu0 %v21395_v36 }
 0x2c1   :  { %3755 = vmatpush1.msra.mxu1 %v21590_v54  ;;  %3521 = vmatprep.subr.mxu0 %v21397_v55 }
 0x2c2   :  { %3761 = vmatprep.subr.mxu1 %v21591_v61  ;;  %3523 = vmatpush1.msra.mxu0 %v21400_v63 }
 0x2c3   :  { %3767 = vmatpush1.msra.mxu1 %v21592_v44  ;;  %3525 = vmatprep.subr.mxu0 %v21402_v33 }
 0x2c4   :  { %3773 = vmatprep.subr.mxu1 %v21593_v14  ;;  %3527 = vmatpush1.msra.mxu0 %v21404_v1  ;;  %v2288_v14 = vpop.f32.mrf.mxu1  ;;  %v2056_v44 = vpop.f32.mrf.mxu0 }
 0x2c5   :  { %3779 = vmatpush1.msra.mxu1 %v21594_v45  ;;  %3529 = vmatprep.subr.mxu0 %v21406_v41  ;;  %v21595_v45 = vld [vmem:[#allocation18_spill] sm:$0xff] }
 0x2c6   :  { %3812 = vmatprep.mubr.f32.mxu1 %v21174_v51  ;;  %3958 = vmatprep.subr.mxu1 %v21459_v56  ;;  %v2290_v61 = vpop.f32.mrf.mxu1  ;;  %v2058_v54 = vpop.f32.mrf.mxu0 }
 0x2c7   :  { %3531 = vmatpush1.msra.mxu0 %v21409_v19  ;;  %3576 = vmatprep.mubr.f32.mxu0 %v21174_v51  ;;  %v2291_v24 = vadd.f32 %v2290_v61, %v2058_v54 }
 0x2c8   :  { %3533 = vmatprep.subr.mxu0 %v21447_v10 }
 0x2c9   :  { %3535 = vmatpush1.msra.mxu0 %v21449_v4 }
 0x2ca   :  { %3537 = vmatprep.subr.mxu0 %v21451_v39 }
 0x2cb   :  { %3539 = vmatpush1.msra.mxu0 %v21453_v50  ;;  %v21597_v50 = vld [vmem:[#allocation204_spill] sm:$0xff] }
 0x2cc   :  { %3541 = vmatprep.subr.mxu0 %v21455_v2  ;;  %v2289_v2 = vadd.f32 %v2288_v14, %v2056_v44  ;;  %v21598_v14 = vld [vmem:[#allocation205_spill] sm:$0xff] }
 0x2cd   :  { %3543 = vmatpush1.msra.mxu0 %v21457_v18 }
 0x2ce   :  { %3822 = vmatprep.subr.mxu0 %v21595_v45 }
 0x2dc   :  { %v2531_v7 = vpop.f32.mrf.mxu1 }
 0x2de   :  { %v2533_v20 = vpop.f32.mrf.mxu1 }
 0x2e5   :  { %v2425_v43 = vpop.f32.mrf.mxu0 }
 0x2e6   :  { %v2426_v61 = vadd.f32 %v2425_v43, %v2289_v2 }
 0x2e7   :  { %v2427_v30 = vpop.f32.mrf.mxu0 }
 0x2e8   :  { %v2428_v27 = vadd.f32 %v2427_v30, %v2291_v24  ;;  %v2532_v54 = vadd.f32 %v2531_v7, %v2426_v61 }
 0x2ea   :  { %v2534_v57 = vadd.f32 %v2533_v20, %v2428_v27 }
 0x2fe   :  { %v2803_v8 = vpop.f32.mrf.mxu1 }
 0x300   :  { %v2805_v49 = vpop.f32.mrf.mxu1 }
 0x307   :  { %v2699_v53 = vpop.f32.mrf.mxu0 }
 0x308   :  { %v2700_v30 = vadd.f32 %v2699_v53, %v2532_v54 }
 0x309   :  { %v2701_v13 = vpop.f32.mrf.mxu0 }
 0x30a   :  { %v2702_v59 = vadd.f32 %v2701_v13, %v2534_v57  ;;  %v2804_v27 = vadd.f32 %v2803_v8, %v2700_v30 }
 0x30c   :  { %v2806_v45 = vadd.f32 %v2805_v49, %v2702_v59  ;;  %v3449_v39 = vadd.f32 %v2804_v27, %v21597_v50 }
 0x30e   :  { %v3450_v46 = vadd.f32 %v2806_v45, %v225_v25  ;;  %v13150_v13 = vmul.f32 -1.442695, %v3449_v39 }
 0x310   :  { %15867 = vpow2.f32 %v13150_v13  ;;  %v13151_v60 = vmul.f32 -1.442695, %v3450_v46 }
 0x312   :  { %15869 = vpow2.f32 %v13151_v60 }
 0x31d   :  { %v15868_v49 = vpop.eup %15867 }
 0x31e   :  { %v3457_v59 = vadd.f32 1.0, %v15868_v49  ;;  %v21600_v49 = vld [vmem:[#allocation42_spill] sm:$0xff] }
 0x31f   :  { %v15870_v53 = vpop.eup %15869 }
 0x320   :  { %v3046_v26 = vpop.f32.mrf.mxu1  ;;  %15871 = vrcp.f32 %v3457_v59  ;;  %v3458_v45 = vadd.f32 1.0, %v15870_v53  ;;  %v21601_v59 = vld [vmem:[#allocation44_spill] sm:$0xff] }
 0x321   :  { %v21607_v53 = vld [vmem:[#allocation68_spill] sm:$0xff] }
 0x322   :  { %v14367_v3 = vpop.f32.mrf.mxu1  ;;  %15873 = vrcp.f32 %v3458_v45  ;;  %v21611_v45 = vld [vmem:[#allocation84_spill] sm:$0xff] }
 0x329   :  { %v2895_v56 = vpop.f32.mrf.mxu0 }
 0x32b   :  { %v14332_v18 = vpop.f32.mrf.mxu0 }
 0x32c   :  { %v3047_v18 = vadd.f32 %v3046_v26, %v2895_v56 }
 0x342   :  { %v3239_v24 = vpop.f32.mrf.mxu1 }
 0x344   :  { %v14437_v20 = vpop.f32.mrf.mxu1 }
 0x34b   :  { %v3150_v57 = vpop.f32.mrf.mxu0 }
 0x34c   :  { %v3151_v2 = vadd.f32 %v3150_v57, %v3047_v18  ;;  %v21603_v18 = vld [vmem:[#allocation52_spill] sm:$0xff] }
 0x34d   :  { %v14402_v4 = vpop.f32.mrf.mxu0 }
 0x34e   :  { %v3240_v7 = vadd.f32 %v3239_v24, %v3151_v2  ;;  %v15872_v4 = vpop.eup %15871  ;;  %v21605_v2 = vld [vmem:[#allocation60_spill] sm:$0xff] }
 0x34f   :  { %v15874_v54 = vpop.eup %15873 }
 0x350   :  { %v3467_v30 = vsub.f32 1.0, %v15874_v54  ;;  %v3469_v26 = vmul.f32 %v15874_v54, %v17450_v40  ;;  %v21618_v54 = vld [vmem:[#allocation100_spill] sm:$0xff] }
 0x351   :  { %v21624_v40 = vld [vmem:[#allocation112_spill] sm:$0xff] }
 0x364   :  { %v3445_v3 = vpop.f32.mrf.mxu1 }
 0x366   :  { %v14507_v44 = vpop.f32.mrf.mxu1 }
 0x367   :  { %v21604_v44 = vld [vmem:[#allocation57_spill] sm:$0xff] }
 0x36c   :  { %v3358_v25 = vpop.f32.mrf.mxu0 }
 0x36d   :  { %v3359_v43 = vadd.f32 %v3358_v25, %v3240_v7  ;;  %v21606_v7 = vld [vmem:[#allocation64_spill] sm:$0xff]  ;;  %v21608_v25 = vld [vmem:[#allocation73_spill] sm:$0xff] }
 0x36e   :  { %v14472_v8 = vpop.f32.mrf.mxu0 }
 0x36f   :  { %v3446_v50 = vadd.f32 %v3445_v3, %v3359_v43  ;;  %v21602_v3 = vld [vmem:[#allocation48_spill] sm:$0xff] }
 0x370   :  { %v21609_v43 = vld [vmem:[#allocation76_spill] sm:$0xff] }
 0x371   :  { %v3463_v39 = vadd.f32 %v17445_v35, %v3446_v50  ;;  %v21610_v8 = vld [vmem:[#allocation80_spill] sm:$0xff]  ;;  %v21612_v50 = vld [vmem:[#allocation89_spill] sm:$0xff] }
 0x373   :  { %v3464_v46 = vmul.f32 %v15872_v4, %v3463_v39  ;;  %v21613_v39 = vld [vmem:[#allocation93_spill] sm:$0xff]  ;;  %v21614_v4 = vld [vmem:[#allocation92_spill] sm:$0xff] }
 0x375   :  { %v3465_v61 = vadd.f32 %v3464_v46, %v21598_v14  ;;  %v21615_v46 = vld [vmem:[#allocation99_spill] sm:$0xff]  ;;  %v21616_v14 = vld [vmem:[#allocation96_spill] sm:$0xff] }
 0x377   :  { %15875 = vtanh.f32 %v3465_v61  ;;  %v21617_v61 = vld [vmem:[#allocation103_spill] sm:$0xff] }
 0x384   :  { %v15876_v56 = vpop.eup %15875 }
 0x385   :  { %v3468_v24 = vmul.f32 %v15876_v56, %v3467_v30  ;;  %v21619_v30 = vld [vmem:[#allocation106_spill] sm:$0xff]  ;;  %v21620_v56 = vld [vmem:[#allocation105_spill] sm:$0xff] }
 0x387   :  { %v17886_v20 = vadd.f32 %v3469_v26, %v3468_v24  ;;  %v21621_v26 = vld [vmem:[#allocation109_spill] sm:$0xff]  ;;  %v21622_v24 = vld [vmem:[#allocation108_spill] sm:$0xff] }
 0x389   :  { %21599 = vst [vmem:[#allocation55_spill] sm:$0xff] %v17886_v20  ;;  %v17889_v27 = vand.u32 4294901760, %v17886_v20 }
 0x38b   :  { %3814 = vmatmul.mubr.f32.vlgmr.msra.gmra.mxu1 %v17889_v27  ;;  %v17894_v35 = vsub.f32 %v17886_v20, %v17889_v27 }
 0x38c   :  { %3960 = vmatpush1.msra.mxu1 %v16162_v11  ;;  %4053 = vmatprep.mubr.f32.mxu1 %v21174_v51 }
 0x38d   :  { %3962 = vmatprep.subr.mxu1 %v16164_v12  ;;  %v17900_v57 = vand.u32 4294901760, %v17894_v35 }
 0x38e   :  { %3964 = vmatpush1.msra.mxu1 %v16169_v16 }
 0x38f   :  { %3966 = vmatprep.subr.mxu1 %v16171_v17  ;;  %v3580_v13 = vsub.f32 %v17894_v35, %v17900_v57 }
 0x390   :  { %3968 = vmatpush1.msra.mxu1 %v16181_v22 }
 0x391   :  { %3970 = vmatprep.subr.mxu1 %v16183_v23  ;;  %v17908_v60 = vand.u32 4294901760, %v3580_v13  ;;  %v21623_v13 = vld [vmem:[#allocation17_spill] sm:$0xff] }
 0x392   :  { %3972 = vmatpush1.msra.mxu1 %v16195_v29 }
 0x393   :  { %3974 = vmatprep.subr.mxu1 %v21366_v32  ;;  %3582 = vmatmul.mubr.f32.vlgmr.msra.gmra.mxu0 %v17908_v60 }
 0x394   :  { %3825 = vmatpush1.msra.mxu0 %v21429_v47  ;;  %3976 = vmatpush1.msra.mxu1 %v21370_v15 }
 0x395   :  { %3828 = vmatprep.subr.mxu0 %v21430_v0  ;;  %3978 = vmatprep.subr.mxu1 %v21374_v5 }
 0x396   :  { %3831 = vmatpush1.msra.mxu0 %v21431_v52  ;;  %3980 = vmatpush1.msra.mxu1 %v21376_v38 }
 0x397   :  { %3834 = vmatprep.subr.mxu0 %v21432_v48  ;;  %3982 = vmatprep.subr.mxu1 %v21378_v58 }
 0x398   :  { %3837 = vmatpush1.msra.mxu0 %v21433_v62  ;;  %3984 = vmatpush1.msra.mxu1 %v21380_v37 }
 0x399   :  { %3840 = vmatprep.subr.mxu0 %v21434_v21  ;;  %3986 = vmatprep.subr.mxu1 %v21382_v6 }
 0x39a   :  { %3843 = vmatpush1.msra.mxu0 %v21600_v49  ;;  %3988 = vmatpush1.msra.mxu1 %v21386_v34 }
 0x39b   :  { %3846 = vmatprep.subr.mxu0 %v21601_v59  ;;  %3990 = vmatprep.subr.mxu1 %v21389_v9  ;;  %v21696_v59 = vld [vmem:[#allocation143_spill] sm:$0xff] }
 0x39c   :  { %3849 = vmatpush1.msra.mxu0 %v21602_v3  ;;  %3992 = vmatpush1.msra.mxu1 %v21391_v28  ;;  %v21695_v3 = vld [vmem:[#allocation141_spill] sm:$0xff] }
 0x39d   :  { %3852 = vmatprep.subr.mxu0 %v21603_v18  ;;  %3994 = vmatprep.subr.mxu1 %v21393_v31  ;;  %v21694_v18 = vld [vmem:[#allocation186_spill] sm:$0xff] }
 0x39e   :  { %3855 = vmatpush1.msra.mxu0 %v21604_v44  ;;  %3996 = vmatpush1.msra.mxu1 %v21395_v36  ;;  %v21690_v44 = vld [vmem:[#allocation201_spill] sm:$0xff] }
 0x39f   :  { %3858 = vmatprep.subr.mxu0 %v21605_v2  ;;  %3998 = vmatprep.subr.mxu1 %v21397_v55  ;;  %v21688_v2 = vld [vmem:[#allocation200_spill] sm:$0xff] }
 0x3a0   :  { %3861 = vmatpush1.msra.mxu0 %v21606_v7  ;;  %4000 = vmatpush1.msra.mxu1 %v21400_v63  ;;  %v21686_v7 = vld [vmem:[#allocation199_spill] sm:$0xff] }
 0x3a1   :  { %3864 = vmatprep.subr.mxu0 %v21607_v53  ;;  %4002 = vmatprep.subr.mxu1 %v21402_v33  ;;  %v21684_v53 = vld [vmem:[#allocation198_spill] sm:$0xff] }
 0x3a2   :  { %3867 = vmatpush1.msra.mxu0 %v21608_v25  ;;  %4004 = vmatpush1.msra.mxu1 %v21404_v1  ;;  %v21682_v25 = vld [vmem:[#allocation196_spill] sm:$0xff] }
 0x3a3   :  { %3870 = vmatprep.subr.mxu0 %v21609_v43  ;;  %4006 = vmatprep.subr.mxu1 %v21406_v41  ;;  %v21680_v43 = vld [vmem:[#allocation194_spill] sm:$0xff] }
 0x3a4   :  { %3873 = vmatpush1.msra.mxu0 %v21610_v8  ;;  %4008 = vmatpush1.msra.mxu1 %v21409_v19  ;;  %v21664_v8 = vld [vmem:[#allocation129_spill] sm:$0xff] }
 0x3a5   :  { %3876 = vmatprep.subr.mxu0 %v21611_v45  ;;  %4010 = vmatprep.subr.mxu1 %v21447_v10  ;;  %v21663_v45 = vld [vmem:[#allocation164_spill] sm:$0xff] }
 0x3a6   :  { %3879 = vmatpush1.msra.mxu0 %v21612_v50  ;;  %4012 = vmatpush1.msra.mxu1 %v21613_v39  ;;  %v21661_v50 = vld [vmem:[#allocation124_spill] sm:$0xff] }
 0x3a7   :  { %3882 = vmatprep.subr.mxu0 %v21614_v4  ;;  %4014 = vmatprep.subr.mxu1 %v21615_v46  ;;  %v21629_v4 = vld [vmem:[#allocation125_spill] sm:$0xff] }
 0x3a8   :  { %3885 = vmatpush1.msra.mxu0 %v21616_v14  ;;  %4016 = vmatpush1.msra.mxu1 %v21617_v61  ;;  %v21625_v14 = vld [vmem:[#allocation115_spill] sm:$0xff] }
 0x3a9   :  { %3888 = vmatprep.subr.mxu0 %v21618_v54  ;;  %4018 = vmatprep.subr.mxu1 %v21619_v30  ;;  %v21626_v54 = vld [vmem:[#allocation116_spill] sm:$0xff] }
 0x3aa   :  { %3891 = vmatpush1.msra.mxu0 %v21620_v56  ;;  %4020 = vmatpush1.msra.mxu1 %v21621_v26  ;;  %v21627_v56 = vld [vmem:[#allocation119_spill] sm:$0xff] }
 0x3ab   :  { %3894 = vmatprep.subr.mxu0 %v21622_v24  ;;  %4057 = vmatmul.mubr.f32.vlgmr.msra.gmra.mxu1 %v17900_v57  ;;  %v21628_v24 = vld [vmem:[#allocation122_spill] sm:$0xff] }
 0x3ac   :  { %4232 = vmatprep.subr.mxu1 %v21623_v13  ;;  %3897 = vmatpush1.msra.mxu0 %v21624_v40  ;;  %v21630_v40 = vld [vmem:[#allocation130_spill] sm:$0xff] }
 0x3ad   :  { %4234 = vmatpush1.msra.mxu1 %v16162_v11  ;;  %3900 = vmatprep.subr.mxu0 %v21625_v14  ;;  %v21636_v14 = vld [vmem:[#allocation38_spill] sm:$0xff] }
 0x3ae   :  { %4236 = vmatprep.subr.mxu1 %v16164_v12  ;;  %3903 = vmatpush1.msra.mxu0 %v21626_v54  ;;  %v21631_v54 = vld [vmem:[#allocation21_spill] sm:$0xff] }
 0x3af   :  { %4238 = vmatpush1.msra.mxu1 %v16169_v16  ;;  %3906 = vmatprep.subr.mxu0 %v21627_v56  ;;  %v21632_v56 = vld [vmem:[#allocation24_spill] sm:$0xff] }
 0x3b0   :  { %4240 = vmatprep.subr.mxu1 %v16171_v17  ;;  %3909 = vmatpush1.msra.mxu0 %v21628_v24  ;;  %v21633_v24 = vld [vmem:[#allocation25_spill] sm:$0xff] }
 0x3b1   :  { %4242 = vmatpush1.msra.mxu1 %v16181_v22  ;;  %3912 = vmatprep.subr.mxu0 %v21629_v4  ;;  %v21634_v4 = vld [vmem:[#allocation28_spill] sm:$0xff] }
 0x3b2   :  { %4244 = vmatprep.subr.mxu1 %v16183_v23  ;;  %3915 = vmatpush1.msra.mxu0 %v21630_v40  ;;  %v21635_v40 = vld [vmem:[#allocation34_spill] sm:$0xff] }
 0x3b3   :  { %3948 = vmatprep.mubr.f32.mxu0 %v21174_v51  ;;  %4246 = vmatpush1.msra.mxu1 %v16195_v29 }
 0x3b4   :  { %3951 = vmatmul.mubr.f32.vlgmr.msra.gmra.mxu0 %v17894_v35  ;;  %4066 = vmatprep.subr.mxu0 %v21631_v54  ;;  %v21637_v54 = vld [vmem:[#allocation41_spill] sm:$0xff] }
 0x3b5   :  { %4248 = vmatprep.subr.mxu1 %v21366_v32  ;;  %4070 = vmatpush1.msra.mxu0 %v21632_v56  ;;  %v21638_v56 = vld [vmem:[#allocation47_spill] sm:$0xff] }
 0x3b6   :  { %4250 = vmatpush1.msra.mxu1 %v21370_v15  ;;  %4074 = vmatprep.subr.mxu0 %v21633_v24  ;;  %v21639_v24 = vld [vmem:[#allocation50_spill] sm:$0xff] }
 0x3b7   :  { %4252 = vmatprep.subr.mxu1 %v21374_v5  ;;  %4078 = vmatpush1.msra.mxu0 %v21634_v4  ;;  %v21640_v4 = vld [vmem:[#allocation54_spill] sm:$0xff] }
 0x3b8   :  { %4254 = vmatpush1.msra.mxu1 %v21376_v38  ;;  %4082 = vmatprep.subr.mxu0 %v21635_v40  ;;  %v21641_v40 = vld [vmem:[#allocation56_spill] sm:$0xff] }
 0x3b9   :  { %4256 = vmatprep.subr.mxu1 %v21378_v58  ;;  %4086 = vmatpush1.msra.mxu0 %v21636_v14  ;;  %v21642_v14 = vld [vmem:[#allocation63_spill] sm:$0xff] }
 0x3ba   :  { %4258 = vmatpush1.msra.mxu1 %v21380_v37  ;;  %4090 = vmatprep.subr.mxu0 %v21637_v54  ;;  %v21643_v54 = vld [vmem:[#allocation66_spill] sm:$0xff] }
 0x3bb   :  { %4260 = vmatprep.subr.mxu1 %v21382_v6  ;;  %4094 = vmatpush1.msra.mxu0 %v21638_v56  ;;  %v21644_v56 = vld [vmem:[#allocation70_spill] sm:$0xff] }
 0x3bc   :  { %4262 = vmatpush1.msra.mxu1 %v21386_v34  ;;  %4098 = vmatprep.subr.mxu0 %v21639_v24  ;;  %v21645_v24 = vld [vmem:[#allocation72_spill] sm:$0xff] }
 0x3bd   :  { %4264 = vmatprep.subr.mxu1 %v21389_v9  ;;  %4102 = vmatpush1.msra.mxu0 %v21640_v4  ;;  %v21646_v4 = vld [vmem:[#allocation79_spill] sm:$0xff] }
 0x3be   :  { %4266 = vmatpush1.msra.mxu1 %v21391_v28  ;;  %4106 = vmatprep.subr.mxu0 %v21641_v40  ;;  %v21647_v40 = vld [vmem:[#allocation82_spill] sm:$0xff] }
 0x3bf   :  { %4268 = vmatprep.subr.mxu1 %v21393_v31  ;;  %4110 = vmatpush1.msra.mxu0 %v21642_v14  ;;  %v21648_v14 = vld [vmem:[#allocation86_spill] sm:$0xff] }
 0x3c0   :  { %4270 = vmatpush1.msra.mxu1 %v21395_v36  ;;  %4114 = vmatprep.subr.mxu0 %v21643_v54  ;;  %v21649_v54 = vld [vmem:[#allocation88_spill] sm:$0xff] }
 0x3c1   :  { %4272 = vmatprep.subr.mxu1 %v21397_v55  ;;  %4118 = vmatpush1.msra.mxu0 %v21644_v56  ;;  %v21650_v56 = vld [vmem:[#allocation95_spill] sm:$0xff] }
 0x3c2   :  { %4274 = vmatpush1.msra.mxu1 %v21400_v63  ;;  %4122 = vmatprep.subr.mxu0 %v21645_v24  ;;  %v21651_v24 = vld [vmem:[#allocation98_spill] sm:$0xff] }
 0x3c3   :  { %4276 = vmatprep.subr.mxu1 %v21402_v33  ;;  %4126 = vmatpush1.msra.mxu0 %v21646_v4  ;;  %v21652_v4 = vld [vmem:[#allocation102_spill] sm:$0xff] }
 0x3c4   :  { %4278 = vmatpush1.msra.mxu1 %v21404_v1  ;;  %4130 = vmatprep.subr.mxu0 %v21647_v40  ;;  %v21653_v40 = vld [vmem:[#allocation104_spill] sm:$0xff] }
 0x3c5   :  { %4280 = vmatprep.subr.mxu1 %v21406_v41  ;;  %4134 = vmatpush1.msra.mxu0 %v21648_v14  ;;  %v21654_v14 = vld [vmem:[#allocation111_spill] sm:$0xff] }
 0x3c6   :  { %4282 = vmatpush1.msra.mxu1 %v21409_v19  ;;  %4138 = vmatprep.subr.mxu0 %v21649_v54  ;;  %v21658_v54 = vld [vmem:[#allocation120_spill] sm:$0xff] }
 0x3c7   :  { %4284 = vmatprep.subr.mxu1 %v21447_v10  ;;  %4142 = vmatpush1.msra.mxu0 %v21650_v56  ;;  %v21655_v56 = vld [vmem:[#allocation114_spill] sm:$0xff] }
 0x3c8   :  { %4286 = vmatpush1.msra.mxu1 %v21613_v39  ;;  %4146 = vmatprep.subr.mxu0 %v21651_v24  ;;  %v21656_v24 = vld [vmem:[#allocation118_spill] sm:$0xff] }
 0x3c9   :  { %4288 = vmatprep.subr.mxu1 %v21615_v46  ;;  %4150 = vmatpush1.msra.mxu0 %v21652_v4  ;;  %v21657_v4 = vld [vmem:[#allocation157_spill] sm:$0xff] }
 0x3ca   :  { %4290 = vmatpush1.msra.mxu1 %v21617_v61  ;;  %4154 = vmatprep.subr.mxu0 %v21653_v40  ;;  %v21659_v40 = vld [vmem:[#allocation121_spill] sm:$0xff] }
 0x3cb   :  { %4292 = vmatprep.subr.mxu1 %v21619_v30  ;;  %4158 = vmatpush1.msra.mxu0 %v21654_v14  ;;  %v21660_v14 = vld [vmem:[#allocation160_spill] sm:$0xff] }
 0x3cc   :  { %4294 = vmatpush1.msra.mxu1 %v21621_v26  ;;  %4327 = vmatprep.mubr.f32.mxu1 %v21174_v51 }
 0x3cd   :  { %4162 = vmatprep.subr.mxu0 %v21655_v56  ;;  %4329 = vmatmul.mubr.f32.vlgmr.msra.gmra.mxu1 %v17889_v27  ;;  %v21662_v56 = vld [vmem:[#allocation127_spill] sm:$0xff] }
 0x3ce   :  { %14543 = vmatprep.subr.mxu1 %v21174_v51  ;;  %4166 = vmatpush1.msra.mxu0 %v21656_v24  ;;  %v21678_v24 = vld [vmem:[#allocation191_spill] sm:$0xff] }
 0x3cf   :  { %14544 = vmatpush3.msra.mxu1 %v21657_v4  ;;  %4170 = vmatprep.subr.mxu0 %v21658_v54  ;;  %v21665_v4 = vld [vmem:[#allocation132_spill] sm:$0xff] }
 0x3d0   :  { %14545 = vmatprep.subr.mxu1 %v21174_v51  ;;  %4174 = vmatpush1.msra.mxu0 %v21659_v40  ;;  %v21666_v54 = vld [vmem:[#allocation168_spill] sm:$0xff] }
 0x3d1   :  { %14546 = vmatpush3.msra.mxu1 %v21660_v14  ;;  %4178 = vmatprep.subr.mxu0 %v21661_v50  ;;  %v21667_v50 = vld [vmem:[#allocation138_spill] sm:$0xff]  ;;  %v21674_v14 = vld [vmem:[#allocation184_spill] sm:$0xff] }
 0x3d2   :  { %14547 = vmatprep.subr.mxu1 %v21174_v51  ;;  %4182 = vmatpush1.msra.mxu0 %v21662_v56  ;;  %v21668_v56 = vld [vmem:[#allocation172_spill] sm:$0xff] }
 0x3d3   :  { %14548 = vmatpush3.msra.mxu1 %v21663_v45  ;;  %4186 = vmatprep.subr.mxu0 %v21664_v8  ;;  %v21669_v8 = vld [vmem:[#allocation139_spill] sm:$0xff]  ;;  %v21672_v45 = vld [vmem:[#allocation180_spill] sm:$0xff] }
 0x3d4   :  { %14549 = vmatprep.subr.mxu1 %v21174_v51  ;;  %4190 = vmatpush1.msra.mxu0 %v21665_v4  ;;  %v21670_v4 = vld [vmem:[#allocation176_spill] sm:$0xff] }
 0x3d5   :  { %4223 = vmatprep.mubr.f32.mxu0 %v21174_v51  ;;  %14550 = vmatpush3.msra.mxu1 %v21666_v54  ;;  %v21671_v54 = vld [vmem:[#allocation140_spill] sm:$0xff] }
 0x3d6   :  { %4225 = vmatmul.mubr.f32.vlgmr.msra.gmra.mxu0 %v17889_v27  ;;  %14508 = vmatprep.subr.mxu0 %v21174_v51  ;;  %v21676_v40 = vld [vmem:[#allocation188_spill] sm:$0xff] }
 0x3d7   :  { %14551 = vmatprep.subr.mxu1 %v21174_v51  ;;  %14509 = vmatpush3.msra.mxu0 %v21667_v50 }
 0x3d8   :  { %14552 = vmatpush3.msra.mxu1 %v21668_v56  ;;  %14510 = vmatprep.subr.mxu0 %v21174_v51  ;;  %v21673_v56 = vld [vmem:[#allocation142_spill] sm:$0xff] }
 0x3d9   :  { %14553 = vmatprep.subr.mxu1 %v21174_v51  ;;  %14511 = vmatpush3.msra.mxu0 %v21669_v8 }
 0x3da   :  { %14554 = vmatpush3.msra.mxu1 %v21670_v4  ;;  %14512 = vmatprep.subr.mxu0 %v21174_v51  ;;  %v21675_v4 = vld [vmem:[#allocation144_spill] sm:$0xff] }
 0x3db   :  { %14555 = vmatprep.subr.mxu1 %v21174_v51  ;;  %14513 = vmatpush3.msra.mxu0 %v21671_v54 }
 0x3dc   :  { %14556 = vmatpush3.msra.mxu1 %v21672_v45  ;;  %14514 = vmatprep.subr.mxu0 %v21174_v51  ;;  %v21677_v45 = vld [vmem:[#allocation149_spill] sm:$0xff] }
 0x3dd   :  { %14557 = vmatprep.subr.mxu1 %v21174_v51  ;;  %14515 = vmatpush3.msra.mxu0 %v21673_v56 }
 0x3de   :  { %14558 = vmatpush3.msra.mxu1 %v21674_v14  ;;  %14516 = vmatprep.subr.mxu0 %v21174_v51  ;;  %v21679_v14 = vld [vmem:[#allocation152_spill] sm:$0xff] }
 0x3df   :  { %14559 = vmatprep.subr.mxu1 %v21174_v51  ;;  %14517 = vmatpush3.msra.mxu0 %v21675_v4 }
 0x3e0   :  { %14560 = vmatpush3.msra.mxu1 %v21676_v40  ;;  %14518 = vmatprep.subr.mxu0 %v21174_v51  ;;  %v21681_v40 = vld [vmem:[#allocation154_spill] sm:$0xff] }
 0x3e1   :  { %14561 = vmatprep.subr.mxu1 %v21174_v51  ;;  %14519 = vmatpush3.msra.mxu0 %v21677_v45 }
 0x3e2   :  { %14562 = vmatpush3.msra.mxu1 %v21678_v24  ;;  %14520 = vmatprep.subr.mxu0 %v21174_v51  ;;  %v21683_v24 = vld [vmem:[#allocation158_spill] sm:$0xff] }
 0x3e3   :  { %14563 = vmatprep.subr.mxu1 %v21174_v51  ;;  %14521 = vmatpush3.msra.mxu0 %v21679_v14 }
 0x3e4   :  { %14564 = vmatpush3.msra.mxu1 %v21680_v43  ;;  %14522 = vmatprep.subr.mxu0 %v21174_v51  ;;  %v21685_v43 = vld [vmem:[#allocation162_spill] sm:$0xff] }
 0x3e5   :  { %14565 = vmatprep.subr.mxu1 %v21174_v51  ;;  %14523 = vmatpush3.msra.mxu0 %v21681_v40 }
 0x3e6   :  { %14566 = vmatpush3.msra.mxu1 %v21682_v25  ;;  %14524 = vmatprep.subr.mxu0 %v21174_v51  ;;  %v21687_v25 = vld [vmem:[#allocation166_spill] sm:$0xff] }
 0x3e7   :  { %14567 = vmatprep.subr.mxu1 %v21174_v51  ;;  %14525 = vmatpush3.msra.mxu0 %v21683_v24 }
 0x3e8   :  { %14568 = vmatpush3.msra.mxu1 %v21684_v53  ;;  %14526 = vmatprep.subr.mxu0 %v21174_v51  ;;  %v21689_v53 = vld [vmem:[#allocation170_spill] sm:$0xff] }
 0x3e9   :  { %14569 = vmatprep.subr.mxu1 %v21174_v51  ;;  %14527 = vmatpush3.msra.mxu0 %v21685_v43 }
 0x3ea   :  { %14570 = vmatpush3.msra.mxu1 %v21686_v7  ;;  %14528 = vmatprep.subr.mxu0 %v21174_v51  ;;  %v21691_v7 = vld [vmem:[#allocation174_spill] sm:$0xff] }
 0x3eb   :  { %14571 = vmatprep.subr.mxu1 %v21174_v51  ;;  %14529 = vmatpush3.msra.mxu0 %v21687_v25 }
 0x3ec   :  { %14572 = vmatpush3.msra.mxu1 %v21688_v2  ;;  %14530 = vmatprep.subr.mxu0 %v21174_v51  ;;  %v21692_v2 = vld [vmem:[#allocation179_spill] sm:$0xff] }
 0x3ed   :  { %14573 = vmatprep.subr.mxu1 %v21174_v51  ;;  %14531 = vmatpush3.msra.mxu0 %v21689_v53 }
 0x3ee   :  { %14574 = vmatpush3.msra.mxu1 %v21690_v44  ;;  %14575 = vmatprep.mubr.msk.f32.mxu1 %vm16060_vm1, %v21174_v51  ;;  %v21693_v44 = vld [vmem:[#allocation183_spill] sm:$0xff] }
 0x3ef   :  { %14532 = vmatprep.subr.mxu0 %v21174_v51  ;;  %14576 = vmatmul.mubr.f32.vlgmr.msra.gmra.mxu1 %v17889_v27 }
 0x3f0   :  { %14613 = vmatprep.subr.mxu1 %v21174_v51  ;;  %14533 = vmatpush3.msra.mxu0 %v21691_v7 }
 0x3f1   :  { %14614 = vmatpush3.msra.mxu1 %v21667_v50  ;;  %14534 = vmatprep.subr.mxu0 %v21174_v51 }
 0x3f2   :  { %14615 = vmatprep.subr.mxu1 %v21174_v51  ;;  %14535 = vmatpush3.msra.mxu0 %v21692_v2 }
 0x3f3   :  { %14616 = vmatpush3.msra.mxu1 %v21669_v8  ;;  %14536 = vmatprep.subr.mxu0 %v21174_v51 }
 0x3f4   :  { %14617 = vmatprep.subr.mxu1 %v21174_v51  ;;  %14537 = vmatpush3.msra.mxu0 %v21693_v44 }
 0x3f5   :  { %14618 = vmatpush3.msra.mxu1 %v21671_v54  ;;  %14538 = vmatprep.subr.mxu0 %v21174_v51 }
 0x3f6   :  { %14619 = vmatprep.subr.mxu1 %v21174_v51  ;;  %14539 = vmatpush3.msra.mxu0 %v21694_v18 }
 0x3f7   :  { %14540 = vmatprep.mubr.msk.f32.mxu0 %vm16060_vm1, %v21174_v51  ;;  %14620 = vmatpush3.msra.mxu1 %v21673_v56 }
 0x3f8   :  { %14541 = vmatmul.mubr.f32.vlgmr.msra.gmra.mxu0 %v17908_v60  ;;  %14578 = vmatprep.subr.mxu0 %v21174_v51  ;;  %v21697_v60 = vld [vmem:[#allocation146_spill] sm:$0xff] }
 0x3f9   :  { %14621 = vmatprep.subr.mxu1 %v21174_v51  ;;  %14579 = vmatpush3.msra.mxu0 %v21695_v3  ;;  %v21698_v3 = vld [vmem:[#allocation147_spill] sm:$0xff] }
 0x3fa   :  { %14622 = vmatpush3.msra.mxu1 %v21675_v4  ;;  %14580 = vmatprep.subr.mxu0 %v21174_v51 }
 0x3fb   :  { %14623 = vmatprep.subr.mxu1 %v21174_v51  ;;  %14581 = vmatpush3.msra.mxu0 %v21696_v59  ;;  %v21699_v59 = vld [vmem:[#allocation150_spill] sm:$0xff] }
 0x3fc   :  { %14624 = vmatpush3.msra.mxu1 %v21677_v45  ;;  %14582 = vmatprep.subr.mxu0 %v21174_v51 }
 0x3fd   :  { %14625 = vmatprep.subr.mxu1 %v21174_v51  ;;  %14583 = vmatpush3.msra.mxu0 %v21697_v60  ;;  %v21700_v60 = vld [vmem:[#allocation155_spill] sm:$0xff] }
 0x3fe   :  { %14626 = vmatpush3.msra.mxu1 %v21679_v14  ;;  %14584 = vmatprep.subr.mxu0 %v21174_v51 }
 0x3ff   :  { %14627 = vmatprep.subr.mxu1 %v21174_v51  ;;  %14585 = vmatpush3.msra.mxu0 %v21698_v3  ;;  %v21701_v3 = vld [vmem:[#allocation159_spill] sm:$0xff] }
 0x400   :  { %14628 = vmatpush3.msra.mxu1 %v21681_v40  ;;  %14586 = vmatprep.subr.mxu0 %v21174_v51 }
 0x401   :  { %14629 = vmatprep.subr.mxu1 %v21174_v51  ;;  %14587 = vmatpush3.msra.mxu0 %v21699_v59  ;;  %v21702_v59 = vld [vmem:[#allocation163_spill] sm:$0xff] }
 0x402   :  { %14630 = vmatpush3.msra.mxu1 %v21683_v24  ;;  %14588 = vmatprep.subr.mxu0 %v21174_v51 }
 0x403   :  { %14631 = vmatprep.subr.mxu1 %v21174_v51  ;;  %14589 = vmatpush3.msra.mxu0 %v21700_v60  ;;  %v21703_v60 = vld [vmem:[#allocation167_spill] sm:$0xff] }
 0x404   :  { %14632 = vmatpush3.msra.mxu1 %v21685_v43  ;;  %14590 = vmatprep.subr.mxu0 %v21174_v51 }
 0x405   :  { %14633 = vmatprep.subr.mxu1 %v21174_v51  ;;  %14591 = vmatpush3.msra.mxu0 %v21701_v3  ;;  %v21704_v3 = vld [vmem:[#allocation171_spill] sm:$0xff] }
 0x406   :  { %14634 = vmatpush3.msra.mxu1 %v21687_v25  ;;  %14592 = vmatprep.subr.mxu0 %v21174_v51 }
 0x407   :  { %14635 = vmatprep.subr.mxu1 %v21174_v51  ;;  %14593 = vmatpush3.msra.mxu0 %v21702_v59  ;;  %v21705_v59 = vld [vmem:[#allocation175_spill] sm:$0xff] }
 0x408   :  { %14636 = vmatpush3.msra.mxu1 %v21689_v53  ;;  %14594 = vmatprep.subr.mxu0 %v21174_v51 }
 0x409   :  { %14637 = vmatprep.subr.mxu1 %v21174_v51  ;;  %14595 = vmatpush3.msra.mxu0 %v21703_v60  ;;  %v21706_v60 = vld [vmem:[#allocation178_spill] sm:$0xff] }
 0x40a   :  { %14638 = vmatpush3.msra.mxu1 %v21691_v7  ;;  %14596 = vmatprep.subr.mxu0 %v21174_v51 }
 0x40b   :  { %14639 = vmatprep.subr.mxu1 %v21174_v51  ;;  %14597 = vmatpush3.msra.mxu0 %v21704_v3  ;;  %v21709_v3 = vld [vmem:[#allocation190_spill] sm:$0xff] }
 0x40c   :  { %14640 = vmatpush3.msra.mxu1 %v21692_v2  ;;  %14598 = vmatprep.subr.mxu0 %v21174_v51 }
 0x40d   :  { %14641 = vmatprep.subr.mxu1 %v21174_v51  ;;  %14599 = vmatpush3.msra.mxu0 %v21705_v59  ;;  %v21707_v59 = vld [vmem:[#allocation182_spill] sm:$0xff] }
 0x40e   :  { %14642 = vmatpush3.msra.mxu1 %v21693_v44  ;;  %14600 = vmatprep.subr.mxu0 %v21174_v51 }
 0x40f   :  { %14643 = vmatprep.subr.mxu1 %v21174_v51  ;;  %14601 = vmatpush3.msra.mxu0 %v21706_v60  ;;  %v21708_v60 = vld [vmem:[#allocation187_spill] sm:$0xff] }
 0x410   :  { %14644 = vmatpush3.msra.mxu1 %v21694_v18  ;;  %14645 = vmatprep.mubr.msk.f32.mxu1 %vm16060_vm1, %v21174_v51 }
 0x411   :  { %14602 = vmatprep.subr.mxu0 %v21174_v51  ;;  %14646 = vmatmul.mubr.f32.vlgmr.msra.gmra.mxu1 %v17900_v57  ;;  %v21710_v57 = vld [vmem:[#allocation193_spill] sm:$0xff] }
 0x412   :  { %14683 = vmatprep.subr.mxu1 %v21174_v51  ;;  %14603 = vmatpush3.msra.mxu0 %v21707_v59  ;;  %v21727_v59 = vld [vmem:[#allocation37_spill] sm:$0xff] }
 0x413   :  { %14684 = vmatpush3.msra.mxu1 %v21667_v50  ;;  %14604 = vmatprep.subr.mxu0 %v21174_v51 }
 0x414   :  { %14685 = vmatprep.subr.mxu1 %v21174_v51  ;;  %14605 = vmatpush3.msra.mxu0 %v21708_v60  ;;  %v21725_v60 = vld [vmem:[#allocation192_spill] sm:$0xff] }
 0x415   :  { %14686 = vmatpush3.msra.mxu1 %v21669_v8  ;;  %14606 = vmatprep.subr.mxu0 %v21174_v51 }
 0x416   :  { %14687 = vmatprep.subr.mxu1 %v21174_v51  ;;  %14607 = vmatpush3.msra.mxu0 %v21709_v3  ;;  %v21711_v3 = vld [vmem:[#allocation145_spill] sm:$0xff] }
 0x417   :  { %14688 = vmatpush3.msra.mxu1 %v21671_v54  ;;  %14608 = vmatprep.subr.mxu0 %v21174_v51 }
 0x418   :  { %14689 = vmatprep.subr.mxu1 %v21174_v51  ;;  %14609 = vmatpush3.msra.mxu0 %v21710_v57  ;;  %v21712_v57 = vld [vmem:[#allocation148_spill] sm:$0xff] }
 0x419   :  { %14610 = vmatprep.mubr.msk.f32.mxu0 %vm16060_vm1, %v21174_v51  ;;  %14690 = vmatpush3.msra.mxu1 %v21673_v56 }
 0x41a   :  { %14611 = vmatmul.mubr.f32.vlgmr.msra.gmra.mxu0 %v17894_v35  ;;  %14648 = vmatprep.subr.mxu0 %v21174_v51  ;;  %v21713_v35 = vld [vmem:[#allocation151_spill] sm:$0xff] }
 0x41b   :  { %14691 = vmatprep.subr.mxu1 %v21174_v51  ;;  %14649 = vmatpush3.msra.mxu0 %v21711_v3  ;;  %v21714_v3 = vld [vmem:[#allocation153_spill] sm:$0xff] }
 0x41c   :  { %14692 = vmatpush3.msra.mxu1 %v21675_v4  ;;  %14650 = vmatprep.subr.mxu0 %v21174_v51  ;;  %v21760_v4 = vld [vmem:[#allocation208_spill] sm:$0xff] }
 0x41d   :  { %14693 = vmatprep.subr.mxu1 %v21174_v51  ;;  %14651 = vmatpush3.msra.mxu0 %v21712_v57  ;;  %v21715_v57 = vld [vmem:[#allocation156_spill] sm:$0xff]  ;;  %v231_v56 = vadd.f32 %v21760_v4, %v17438_v42 }
 0x41e   :  { %14694 = vmatpush3.msra.mxu1 %v21677_v45  ;;  %14652 = vmatprep.subr.mxu0 %v21174_v51 }
 0x41f   :  { %14695 = vmatprep.subr.mxu1 %v21174_v51  ;;  %14653 = vmatpush3.msra.mxu0 %v21713_v35  ;;  %v21716_v35 = vld [vmem:[#allocation161_spill] sm:$0xff] }
 0x420   :  { %14696 = vmatpush3.msra.mxu1 %v21679_v14  ;;  %14654 = vmatprep.subr.mxu0 %v21174_v51 }
 0x421   :  { %14697 = vmatprep.subr.mxu1 %v21174_v51  ;;  %14655 = vmatpush3.msra.mxu0 %v21714_v3  ;;  %v21717_v3 = vld [vmem:[#allocation165_spill] sm:$0xff] }
 0x422   :  { %14698 = vmatpush3.msra.mxu1 %v21681_v40  ;;  %14656 = vmatprep.subr.mxu0 %v21174_v51 }
 0x423   :  { %14699 = vmatprep.subr.mxu1 %v21174_v51  ;;  %14657 = vmatpush3.msra.mxu0 %v21715_v57  ;;  %v21718_v57 = vld [vmem:[#allocation169_spill] sm:$0xff] }
 0x424   :  { %14700 = vmatpush3.msra.mxu1 %v21683_v24  ;;  %14658 = vmatprep.subr.mxu0 %v21174_v51 }
 0x425   :  { %14701 = vmatprep.subr.mxu1 %v21174_v51  ;;  %14659 = vmatpush3.msra.mxu0 %v21716_v35  ;;  %v21719_v35 = vld [vmem:[#allocation173_spill] sm:$0xff] }
 0x426   :  { %14702 = vmatpush3.msra.mxu1 %v21685_v43  ;;  %14660 = vmatprep.subr.mxu0 %v21174_v51 }
 0x427   :  { %14703 = vmatprep.subr.mxu1 %v21174_v51  ;;  %14661 = vmatpush3.msra.mxu0 %v21717_v3  ;;  %v21720_v3 = vld [vmem:[#allocation177_spill] sm:$0xff] }
 0x428   :  { %14704 = vmatpush3.msra.mxu1 %v21687_v25  ;;  %14662 = vmatprep.subr.mxu0 %v21174_v51 }
 0x429   :  { %14705 = vmatprep.subr.mxu1 %v21174_v51  ;;  %14663 = vmatpush3.msra.mxu0 %v21718_v57  ;;  %v21721_v57 = vld [vmem:[#allocation181_spill] sm:$0xff] }
 0x42a   :  { %14706 = vmatpush3.msra.mxu1 %v21689_v53  ;;  %14664 = vmatprep.subr.mxu0 %v21174_v51 }
 0x42b   :  { %14707 = vmatprep.subr.mxu1 %v21174_v51  ;;  %14665 = vmatpush3.msra.mxu0 %v21719_v35  ;;  %v21722_v35 = vld [vmem:[#allocation185_spill] sm:$0xff] }
 0x42c   :  { %14708 = vmatpush3.msra.mxu1 %v21691_v7  ;;  %14666 = vmatprep.subr.mxu0 %v21174_v51  ;;  %v21732_v7 = vld [vmem:[#allocation49_spill] sm:$0xff] }
 0x42d   :  { %14709 = vmatprep.subr.mxu1 %v21174_v51  ;;  %14667 = vmatpush3.msra.mxu0 %v21720_v3  ;;  %v21723_v3 = vld [vmem:[#allocation189_spill] sm:$0xff] }
 0x42e   :  { %14710 = vmatpush3.msra.mxu1 %v21692_v2  ;;  %14668 = vmatprep.subr.mxu0 %v21174_v51  ;;  %v21731_v2 = vld [vmem:[#allocation197_spill] sm:$0xff] }
 0x42f   :  { %14711 = vmatprep.subr.mxu1 %v21174_v51  ;;  %14669 = vmatpush3.msra.mxu0 %v21721_v57  ;;  %v21724_v57 = vld [vmem:[#allocation33_spill] sm:$0xff] }
 0x430   :  { %14712 = vmatpush3.msra.mxu1 %v21693_v44  ;;  %14670 = vmatprep.subr.mxu0 %v21174_v51  ;;  %v21729_v44 = vld [vmem:[#allocation40_spill] sm:$0xff] }
 0x431   :  { %14713 = vmatprep.subr.mxu1 %v21174_v51  ;;  %14671 = vmatpush3.msra.mxu0 %v21722_v35  ;;  %v21726_v35 = vld [vmem:[#allocation36_spill] sm:$0xff] }
 0x432   :  { %14714 = vmatpush3.msra.mxu1 %v21694_v18  ;;  %14715 = vmatprep.mubr.msk.f32.mxu1 %vm16060_vm1, %v21174_v51  ;;  %v21728_v18 = vld [vmem:[#allocation195_spill] sm:$0xff] }
 0x433   :  { %14672 = vmatprep.subr.mxu0 %v21174_v51  ;;  %14716 = vmatmul.mubr.f32.vlgmr.msra.gmra.mxu1 %v17889_v27 }
 0x434   :  { %14673 = vmatpush3.msra.mxu0 %v21723_v3  ;;  %14680 = vmatprep.mubr.msk.f32.mxu0 %vm16060_vm1, %v21174_v51  ;;  %v21730_v3 = vld [vmem:[#allocation46_spill] sm:$0xff] }
 0x435   :  { %14674 = vmatprep.subr.mxu0 %v21174_v51  ;;  %5120 = vmatprep.subr.mxu1 %v21724_v57 }
 0x436   :  { %14675 = vmatpush3.msra.mxu0 %v21725_v60  ;;  %5126 = vmatpush1.msra.mxu1 %v21726_v35  ;;  %v21733_v60 = vld [vmem:[#allocation53_spill] sm:$0xff]  ;;  %v21734_v35 = vld [vmem:[#allocation59_spill] sm:$0xff] }
 0x437   :  { %14676 = vmatprep.subr.mxu0 %v21174_v51  ;;  %5132 = vmatprep.subr.mxu1 %v21727_v59  ;;  %v21735_v59 = vld [vmem:[#allocation62_spill] sm:$0xff] }
 0x438   :  { %14677 = vmatpush3.msra.mxu0 %v21728_v18  ;;  %5138 = vmatpush1.msra.mxu1 %v21729_v44  ;;  %v21736_v44 = vld [vmem:[#allocation65_spill] sm:$0xff] }
 0x439   :  { %14678 = vmatprep.subr.mxu0 %v21174_v51  ;;  %5144 = vmatprep.subr.mxu1 %v21730_v3  ;;  %v21737_v3 = vld [vmem:[#allocation69_spill] sm:$0xff] }
 0x43a   :  { %14679 = vmatpush3.msra.mxu0 %v21731_v2  ;;  %5150 = vmatpush1.msra.mxu1 %v21732_v7  ;;  %v21738_v7 = vld [vmem:[#allocation75_spill] sm:$0xff] }
 0x43b   :  { %14681 = vmatmul.mubr.f32.vlgmr.msra.gmra.mxu0 %v17889_v27  ;;  %5156 = vmatprep.subr.mxu1 %v21733_v60  ;;  %v21739_v27 = vld [vmem:[#allocation78_spill] sm:$0xff] }
 0x43c   :  { %5162 = vmatpush1.msra.mxu1 %v21734_v35  ;;  %5008 = vmatprep.subr.mxu0 %v21623_v13  ;;  %v21740_v35 = vld [vmem:[#allocation81_spill] sm:$0xff] }
 0x43d   :  { %5168 = vmatprep.subr.mxu1 %v21735_v59  ;;  %5010 = vmatpush1.msra.mxu0 %v16162_v11  ;;  %v21741_v59 = vld [vmem:[#allocation85_spill] sm:$0xff] }
 0x43e   :  { %5174 = vmatpush1.msra.mxu1 %v21736_v44  ;;  %5012 = vmatprep.subr.mxu0 %v16164_v12  ;;  %v21742_v44 = vld [vmem:[#allocation91_spill] sm:$0xff] }
 0x43f   :  { %5180 = vmatprep.subr.mxu1 %v21737_v3  ;;  %5014 = vmatpush1.msra.mxu0 %v16169_v16  ;;  %v21743_v3 = vld [vmem:[#allocation94_spill] sm:$0xff] }
 0x440   :  { %5186 = vmatpush1.msra.mxu1 %v21738_v7  ;;  %5016 = vmatprep.subr.mxu0 %v16171_v17  ;;  %v21744_v7 = vld [vmem:[#allocation97_spill] sm:$0xff] }
 0x441   :  { %5192 = vmatprep.subr.mxu1 %v21739_v27  ;;  %5018 = vmatpush1.msra.mxu0 %v16181_v22  ;;  %v21745_v27 = vld [vmem:[#allocation101_spill] sm:$0xff] }
 0x442   :  { %5198 = vmatpush1.msra.mxu1 %v21740_v35  ;;  %5020 = vmatprep.subr.mxu0 %v16183_v23  ;;  %v21746_v35 = vld [vmem:[#allocation107_spill] sm:$0xff] }
 0x443   :  { %5204 = vmatprep.subr.mxu1 %v21741_v59  ;;  %5022 = vmatpush1.msra.mxu0 %v16195_v29  ;;  %v21747_v59 = vld [vmem:[#allocation110_spill] sm:$0xff] }
 0x444   :  { %5210 = vmatpush1.msra.mxu1 %v21742_v44  ;;  %5024 = vmatprep.subr.mxu0 %v21366_v32  ;;  %v21748_v44 = vld [vmem:[#allocation113_spill] sm:$0xff] }
 0x445   :  { %5216 = vmatprep.subr.mxu1 %v21743_v3  ;;  %5026 = vmatpush1.msra.mxu0 %v21370_v15  ;;  %v21749_v3 = vld [vmem:[#allocation117_spill] sm:$0xff] }
 0x446   :  { %5222 = vmatpush1.msra.mxu1 %v21744_v7  ;;  %5028 = vmatprep.subr.mxu0 %v21374_v5  ;;  %v21750_v7 = vld [vmem:[#allocation123_spill] sm:$0xff] }
 0x447   :  { %5228 = vmatprep.subr.mxu1 %v21745_v27  ;;  %5030 = vmatpush1.msra.mxu0 %v21376_v38  ;;  %v21751_v27 = vld [vmem:[#allocation126_spill] sm:$0xff] }
 0x448   :  { %5234 = vmatpush1.msra.mxu1 %v21746_v35  ;;  %5032 = vmatprep.subr.mxu0 %v21378_v58  ;;  %v21752_v35 = vld [vmem:[#allocation128_spill] sm:$0xff] }
 0x449   :  { %5240 = vmatprep.subr.mxu1 %v21747_v59  ;;  %5034 = vmatpush1.msra.mxu0 %v21380_v37  ;;  %v21753_v59 = vld [vmem:[#allocation131_spill] sm:$0xff] }
 0x44a   :  { %5246 = vmatpush1.msra.mxu1 %v21748_v44  ;;  %5036 = vmatprep.subr.mxu0 %v21382_v6  ;;  %v21754_v44 = vld [vmem:[#allocation133_spill] sm:$0xff] }
 0x44b   :  { %5252 = vmatprep.subr.mxu1 %v21749_v3  ;;  %5038 = vmatpush1.msra.mxu0 %v21386_v34  ;;  %v21755_v3 = vld [vmem:[#allocation134_spill] sm:$0xff] }
 0x44c   :  { %5258 = vmatpush1.msra.mxu1 %v21750_v7  ;;  %5040 = vmatprep.subr.mxu0 %v21389_v9  ;;  %v21756_v7 = vld [vmem:[#allocation135_spill] sm:$0xff] }
 0x44d   :  { %5264 = vmatprep.subr.mxu1 %v21751_v27  ;;  %5042 = vmatpush1.msra.mxu0 %v21391_v28  ;;  %v21757_v27 = vld [vmem:[#allocation136_spill] sm:$0xff] }
 0x44e   :  { %5270 = vmatpush1.msra.mxu1 %v21752_v35  ;;  %5044 = vmatprep.subr.mxu0 %v21393_v31  ;;  %v21758_v35 = vld [vmem:[#allocation137_spill] sm:$0xff] }
 0x44f   :  { %5276 = vmatprep.subr.mxu1 %v21753_v59  ;;  %5046 = vmatpush1.msra.mxu0 %v21395_v36 }
 0x450   :  { %5282 = vmatpush1.msra.mxu1 %v21754_v44  ;;  %5048 = vmatprep.subr.mxu0 %v21397_v55 }
 0x451   :  { %5288 = vmatprep.subr.mxu1 %v21755_v3  ;;  %5050 = vmatpush1.msra.mxu0 %v21400_v63 }
 0x452   :  { %5294 = vmatpush1.msra.mxu1 %v21756_v7  ;;  %5052 = vmatprep.subr.mxu0 %v21402_v33 }
 0x453   :  { %5300 = vmatprep.subr.mxu1 %v21757_v27  ;;  %5054 = vmatpush1.msra.mxu0 %v21404_v1  ;;  %v3815_v27 = vpop.f32.mrf.mxu1  ;;  %v3583_v7 = vpop.f32.mrf.mxu0 }
 0x454   :  { %5306 = vmatpush1.msra.mxu1 %v21758_v35  ;;  %5056 = vmatprep.subr.mxu0 %v21406_v41  ;;  %v21759_v35 = vld [vmem:[#allocation18_spill] sm:$0xff] }
 0x455   :  { %5339 = vmatprep.mubr.f32.mxu1 %v21174_v51  ;;  %5485 = vmatprep.subr.mxu1 %v21623_v13  ;;  %v3817_v3 = vpop.f32.mrf.mxu1  ;;  %v3585_v44 = vpop.f32.mrf.mxu0 }
 0x456   :  { %5058 = vmatpush1.msra.mxu0 %v21409_v19  ;;  %5103 = vmatprep.mubr.f32.mxu0 %v21174_v51  ;;  %v3818_v2 = vadd.f32 %v3817_v3, %v3585_v44 }
 0x457   :  { %5060 = vmatprep.subr.mxu0 %v21447_v10 }
 0x458   :  { %5062 = vmatpush1.msra.mxu0 %v21613_v39 }
 0x459   :  { %5064 = vmatprep.subr.mxu0 %v21615_v46 }
 0x45a   :  { %5066 = vmatpush1.msra.mxu0 %v21617_v61  ;;  %v21761_v61 = vld [vmem:[#allocation207_spill] sm:$0xff] }
 0x45b   :  { %5068 = vmatprep.subr.mxu0 %v21619_v30  ;;  %v3816_v30 = vadd.f32 %v3815_v27, %v3583_v7  ;;  %v21762_v27 = vld [vmem:[#allocation203_spill] sm:$0xff] }
 0x45c   :  { %5070 = vmatpush1.msra.mxu0 %v21621_v26 }
 0x45d   :  { %5349 = vmatprep.subr.mxu0 %v21759_v35 }
 0x46b   :  { %v4058_v59 = vpop.f32.mrf.mxu1 }
 0x46d   :  { %v4060_v53 = vpop.f32.mrf.mxu1 }
 0x474   :  { %v3952_v60 = vpop.f32.mrf.mxu0 }
 0x475   :  { %v3953_v3 = vadd.f32 %v3952_v60, %v3816_v30 }
 0x476   :  { %v3954_v18 = vpop.f32.mrf.mxu0 }
 0x477   :  { %v3955_v57 = vadd.f32 %v3954_v18, %v3818_v2  ;;  %v4059_v44 = vadd.f32 %v4058_v59, %v3953_v3  ;;  %v21763_v3 = vld [vmem:[#allocation26_spill] sm:$0xff] }
 0x479   :  { %v4061_v25 = vadd.f32 %v4060_v53, %v3955_v57 }
 0x48d   :  { %v4330_v43 = vpop.f32.mrf.mxu1 }
 0x48f   :  { %v4332_v45 = vpop.f32.mrf.mxu1 }
 0x496   :  { %v4226_v24 = vpop.f32.mrf.mxu0 }
 0x497   :  { %v4227_v18 = vadd.f32 %v4226_v24, %v4059_v44 }
 0x498   :  { %v4228_v40 = vpop.f32.mrf.mxu0 }
 0x499   :  { %v4229_v14 = vadd.f32 %v4228_v40, %v4061_v25  ;;  %v4331_v57 = vadd.f32 %v4330_v43, %v4227_v18 }
 0x49b   :  { %v4333_v35 = vadd.f32 %v4332_v45, %v4229_v14  ;;  %v4976_v46 = vadd.f32 %v4331_v57, %v21761_v61 }
 0x49d   :  { %v4977_v54 = vadd.f32 %v4333_v35, %v231_v56  ;;  %v13152_v25 = vmul.f32 -1.442695, %v4976_v46 }
 0x49f   :  { %15877 = vpow2.f32 %v13152_v25  ;;  %v13153_v4 = vmul.f32 -1.442695, %v4977_v54 }
 0x4a1   :  { %15879 = vpow2.f32 %v13153_v4 }
 0x4ac   :  { %v15878_v45 = vpop.eup %15877 }
 0x4ad   :  { %v4984_v14 = vadd.f32 1.0, %v15878_v45 }
 0x4af   :  { %v4573_v8 = vpop.f32.mrf.mxu1  ;;  %15881 = vrcp.f32 %v4984_v14 }
 0x4b1   :  { %v14577_v50 = vpop.f32.mrf.mxu1 }
 0x4b8   :  { %v4422_v13 = vpop.f32.mrf.mxu0 }
 0x4b9   :  { %v4574_v56 = vadd.f32 %v4573_v8, %v4422_v13  ;;  %v340_v8 = vadd.f32 %v21763_v3, %v21762_v27  ;;  %v21776_v3 = vld [vmem:[#allocation89_spill] sm:$0xff] }
 0x4ba   :  { %v14542_v26 = vpop.f32.mrf.mxu0  ;;  %v21787_v27 = vld [vmem:[#allocation17_spill] sm:$0xff] }
 0x4bb   :  { %v15880_v26 = vpop.eup %15879 }
 0x4bc   :  { %v4985_v35 = vadd.f32 1.0, %v15880_v26  ;;  %v15882_v54 = vpop.eup %15881  ;;  %v21768_v26 = vld [vmem:[#allocation57_spill] sm:$0xff] }
 0x4be   :  { %15883 = vrcp.f32 %v4985_v35  ;;  %v21772_v35 = vld [vmem:[#allocation73_spill] sm:$0xff] }
 0x4cb   :  { %v15884_v18 = vpop.eup %15883 }
 0x4cc   :  { %v4996_v57 = vmul.f32 %v15884_v18, %v17886_v20  ;;  %v21786_v20 = vld [vmem:[#allocation108_spill] sm:$0xff] }
 0x4d1   :  { %v4766_v2 = vpop.f32.mrf.mxu1 }
 0x4d3   :  { %v14647_v53 = vpop.f32.mrf.mxu1 }
 0x4da   :  { %v4677_v40 = vpop.f32.mrf.mxu0 }
 0x4db   :  { %v4678_v30 = vadd.f32 %v4677_v40, %v4574_v56 }
 0x4dc   :  { %v14612_v39 = vpop.f32.mrf.mxu0 }
 0x4dd   :  { %v4767_v59 = vadd.f32 %v4766_v2, %v4678_v30  ;;  %v18322_v39 = vld [vmem:[%s20577_s4] ss:$0 sm:$0xff]  ;;  %v4994_v2 = vsub.f32 1.0, %v15884_v18  ;;  %v21766_v30 = vld [vmem:[#allocation48_spill] sm:$0xff] }
 0x4de   :  { %v21780_v18 = vld [vmem:[#allocation96_spill] sm:$0xff] }
 0x4f3   :  { %v4972_v50 = vpop.f32.mrf.mxu1 }
 0x4f5   :  { %v14717_v7 = vpop.f32.mrf.mxu1 }
 0x4f6   :  { %v21765_v7 = vld [vmem:[#allocation44_spill] sm:$0xff] }
 0x4fb   :  { %v4885_v24 = vpop.f32.mrf.mxu0 }
 0x4fc   :  { %v4886_v60 = vadd.f32 %v4885_v24, %v4767_v59  ;;  %v21767_v59 = vld [vmem:[#allocation52_spill] sm:$0xff] }
 0x4fd   :  { %v14682_v43 = vpop.f32.mrf.mxu0  ;;  %v21769_v24 = vld [vmem:[#allocation60_spill] sm:$0xff] }
 0x4fe   :  { %v4973_v61 = vadd.f32 %v4972_v50, %v4886_v60  ;;  %v21770_v60 = vld [vmem:[#allocation64_spill] sm:$0xff] }
 0x4ff   :  { %v21771_v43 = vld [vmem:[#allocation68_spill] sm:$0xff] }
 0x500   :  { %v4990_v46 = vadd.f32 %v18322_v39, %v4973_v61  ;;  %v21773_v61 = vld [vmem:[#allocation76_spill] sm:$0xff] }
 0x502   :  { %v4991_v13 = vmul.f32 %v15882_v54, %v4990_v46  ;;  %v21774_v46 = vld [vmem:[#allocation80_spill] sm:$0xff] }
 0x503   :  { %v21775_v54 = vld [vmem:[#allocation84_spill] sm:$0xff] }
 0x504   :  { %v4992_v44 = vadd.f32 %v4991_v13, %v340_v8  ;;  %v21777_v8 = vld [vmem:[#allocation93_spill] sm:$0xff]  ;;  %v21778_v13 = vld [vmem:[#allocation92_spill] sm:$0xff] }
 0x506   :  { %15885 = vtanh.f32 %v4992_v44  ;;  %v21779_v44 = vld [vmem:[#allocation99_spill] sm:$0xff] }
 0x513   :  { %v15886_v53 = vpop.eup %15885 }
 0x514   :  { %v4995_v40 = vmul.f32 %v15886_v53, %v4994_v2  ;;  %v21781_v2 = vld [vmem:[#allocation103_spill] sm:$0xff]  ;;  %v21782_v53 = vld [vmem:[#allocation100_spill] sm:$0xff] }
 0x516   :  { %v18328_v25 = vadd.f32 %v4996_v57, %v4995_v40  ;;  %v21783_v57 = vld [vmem:[#allocation106_spill] sm:$0xff]  ;;  %v21784_v40 = vld [vmem:[#allocation105_spill] sm:$0xff] }
 0x518   :  { %21764 = vst [vmem:[#allocation58_spill] sm:$0xff] %v18328_v25  ;;  %v18331_v4 = vand.u32 4294901760, %v18328_v25 }
 0x51a   :  { %5341 = vmatmul.mubr.f32.vlgmr.msra.gmra.mxu1 %v18331_v4  ;;  %v18336_v45 = vsub.f32 %v18328_v25, %v18331_v4 }
 0x51b   :  { %5487 = vmatpush1.msra.mxu1 %v16162_v11  ;;  %5580 = vmatprep.mubr.f32.mxu1 %v21174_v51 }
 0x51c   :  { %5489 = vmatprep.subr.mxu1 %v16164_v12  ;;  %v18342_v14 = vand.u32 4294901760, %v18336_v45 }
 0x51d   :  { %5491 = vmatpush1.msra.mxu1 %v16169_v16 }
 0x51e   :  { %5493 = vmatprep.subr.mxu1 %v16171_v17  ;;  %v5107_v50 = vsub.f32 %v18336_v45, %v18342_v14 }
 0x51f   :  { %5495 = vmatpush1.msra.mxu1 %v16181_v22 }
 0x520   :  { %5497 = vmatprep.subr.mxu1 %v16183_v23  ;;  %v18350_v56 = vand.u32 4294901760, %v5107_v50  ;;  %v21785_v50 = vld [vmem:[#allocation109_spill] sm:$0xff] }
 0x521   :  { %5499 = vmatpush1.msra.mxu1 %v16195_v29 }
 0x522   :  { %5501 = vmatprep.subr.mxu1 %v21366_v32  ;;  %5109 = vmatmul.mubr.f32.vlgmr.msra.gmra.mxu0 %v18350_v56 }
 0x523   :  { %5352 = vmatpush1.msra.mxu0 %v21429_v47  ;;  %5503 = vmatpush1.msra.mxu1 %v21370_v15 }
 0x524   :  { %5355 = vmatprep.subr.mxu0 %v21430_v0  ;;  %5505 = vmatprep.subr.mxu1 %v21374_v5 }
 0x525   :  { %5358 = vmatpush1.msra.mxu0 %v21431_v52  ;;  %5507 = vmatpush1.msra.mxu1 %v21376_v38 }
 0x526   :  { %5361 = vmatprep.subr.mxu0 %v21432_v48  ;;  %5509 = vmatprep.subr.mxu1 %v21378_v58 }
 0x527   :  { %5364 = vmatpush1.msra.mxu0 %v21433_v62  ;;  %5511 = vmatpush1.msra.mxu1 %v21380_v37 }
 0x528   :  { %5367 = vmatprep.subr.mxu0 %v21434_v21  ;;  %5513 = vmatprep.subr.mxu1 %v21382_v6 }
 0x529   :  { %5370 = vmatpush1.msra.mxu0 %v21600_v49  ;;  %5515 = vmatpush1.msra.mxu1 %v21386_v34  ;;  %v21860_v49 = vld [vmem:[#allocation143_spill] sm:$0xff] }
 0x52a   :  { %5373 = vmatprep.subr.mxu0 %v21765_v7  ;;  %5517 = vmatprep.subr.mxu1 %v21389_v9  ;;  %v21859_v7 = vld [vmem:[#allocation141_spill] sm:$0xff] }
 0x52b   :  { %5376 = vmatpush1.msra.mxu0 %v21766_v30  ;;  %5519 = vmatpush1.msra.mxu1 %v21391_v28  ;;  %v21858_v30 = vld [vmem:[#allocation186_spill] sm:$0xff] }
 0x52c   :  { %5379 = vmatprep.subr.mxu0 %v21767_v59  ;;  %5521 = vmatprep.subr.mxu1 %v21393_v31  ;;  %v21854_v59 = vld [vmem:[#allocation201_spill] sm:$0xff] }
 0x52d   :  { %5382 = vmatpush1.msra.mxu0 %v21768_v26  ;;  %5523 = vmatpush1.msra.mxu1 %v21395_v36  ;;  %v21852_v26 = vld [vmem:[#allocation200_spill] sm:$0xff] }
 0x52e   :  { %5385 = vmatprep.subr.mxu0 %v21769_v24  ;;  %5525 = vmatprep.subr.mxu1 %v21397_v55  ;;  %v21850_v24 = vld [vmem:[#allocation199_spill] sm:$0xff] }
 0x52f   :  { %5388 = vmatpush1.msra.mxu0 %v21770_v60  ;;  %5527 = vmatpush1.msra.mxu1 %v21400_v63  ;;  %v21848_v60 = vld [vmem:[#allocation198_spill] sm:$0xff] }
 0x530   :  { %5391 = vmatprep.subr.mxu0 %v21771_v43  ;;  %5529 = vmatprep.subr.mxu1 %v21402_v33  ;;  %v21846_v43 = vld [vmem:[#allocation196_spill] sm:$0xff] }
 0x531   :  { %5394 = vmatpush1.msra.mxu0 %v21772_v35  ;;  %5531 = vmatpush1.msra.mxu1 %v21404_v1  ;;  %v21844_v35 = vld [vmem:[#allocation194_spill] sm:$0xff] }
 0x532   :  { %5397 = vmatprep.subr.mxu0 %v21773_v61  ;;  %5533 = vmatprep.subr.mxu1 %v21406_v41  ;;  %v21828_v61 = vld [vmem:[#allocation129_spill] sm:$0xff] }
 0x533   :  { %5400 = vmatpush1.msra.mxu0 %v21774_v46  ;;  %5535 = vmatpush1.msra.mxu1 %v21409_v19  ;;  %v21827_v46 = vld [vmem:[#allocation164_spill] sm:$0xff] }
 0x534   :  { %5403 = vmatprep.subr.mxu0 %v21775_v54  ;;  %5537 = vmatprep.subr.mxu1 %v21447_v10  ;;  %v21825_v54 = vld [vmem:[#allocation124_spill] sm:$0xff] }
 0x535   :  { %5406 = vmatpush1.msra.mxu0 %v21776_v3  ;;  %5539 = vmatpush1.msra.mxu1 %v21777_v8  ;;  %v21793_v3 = vld [vmem:[#allocation125_spill] sm:$0xff] }
 0x536   :  { %5409 = vmatprep.subr.mxu0 %v21778_v13  ;;  %5541 = vmatprep.subr.mxu1 %v21779_v44  ;;  %v21788_v13 = vld [vmem:[#allocation112_spill] sm:$0xff] }
 0x537   :  { %5412 = vmatpush1.msra.mxu0 %v21780_v18  ;;  %5543 = vmatpush1.msra.mxu1 %v21781_v2  ;;  %v21789_v18 = vld [vmem:[#allocation115_spill] sm:$0xff] }
 0x538   :  { %5415 = vmatprep.subr.mxu0 %v21782_v53  ;;  %5545 = vmatprep.subr.mxu1 %v21783_v57  ;;  %v21790_v53 = vld [vmem:[#allocation116_spill] sm:$0xff] }
 0x539   :  { %5418 = vmatpush1.msra.mxu0 %v21784_v40  ;;  %5547 = vmatpush1.msra.mxu1 %v21785_v50  ;;  %v21791_v40 = vld [vmem:[#allocation119_spill] sm:$0xff] }
 0x53a   :  { %5421 = vmatprep.subr.mxu0 %v21786_v20  ;;  %5584 = vmatmul.mubr.f32.vlgmr.msra.gmra.mxu1 %v18342_v14  ;;  %v21792_v20 = vld [vmem:[#allocation122_spill] sm:$0xff] }
 0x53b   :  { %5759 = vmatprep.subr.mxu1 %v21787_v27  ;;  %5424 = vmatpush1.msra.mxu0 %v21788_v13  ;;  %v21794_v13 = vld [vmem:[#allocation130_spill] sm:$0xff] }
 0x53c   :  { %5761 = vmatpush1.msra.mxu1 %v16162_v11  ;;  %5427 = vmatprep.subr.mxu0 %v21789_v18  ;;  %v21800_v18 = vld [vmem:[#allocation38_spill] sm:$0xff] }
 0x53d   :  { %5763 = vmatprep.subr.mxu1 %v16164_v12  ;;  %5430 = vmatpush1.msra.mxu0 %v21790_v53  ;;  %v21795_v53 = vld [vmem:[#allocation21_spill] sm:$0xff] }
 0x53e   :  { %5765 = vmatpush1.msra.mxu1 %v16169_v16  ;;  %5433 = vmatprep.subr.mxu0 %v21791_v40  ;;  %v21796_v40 = vld [vmem:[#allocation24_spill] sm:$0xff] }
 0x53f   :  { %5767 = vmatprep.subr.mxu1 %v16171_v17  ;;  %5436 = vmatpush1.msra.mxu0 %v21792_v20  ;;  %v21797_v20 = vld [vmem:[#allocation25_spill] sm:$0xff] }
 0x540   :  { %5769 = vmatpush1.msra.mxu1 %v16181_v22  ;;  %5439 = vmatprep.subr.mxu0 %v21793_v3  ;;  %v21798_v3 = vld [vmem:[#allocation28_spill] sm:$0xff] }
 0x541   :  { %5771 = vmatprep.subr.mxu1 %v16183_v23  ;;  %5442 = vmatpush1.msra.mxu0 %v21794_v13  ;;  %v21799_v13 = vld [vmem:[#allocation34_spill] sm:$0xff] }
 0x542   :  { %5475 = vmatprep.mubr.f32.mxu0 %v21174_v51  ;;  %5773 = vmatpush1.msra.mxu1 %v16195_v29 }
 0x543   :  { %5478 = vmatmul.mubr.f32.vlgmr.msra.gmra.mxu0 %v18336_v45  ;;  %5593 = vmatprep.subr.mxu0 %v21795_v53  ;;  %v21801_v53 = vld [vmem:[#allocation41_spill] sm:$0xff] }
 0x544   :  { %5775 = vmatprep.subr.mxu1 %v21366_v32  ;;  %5597 = vmatpush1.msra.mxu0 %v21796_v40  ;;  %v21802_v40 = vld [vmem:[#allocation47_spill] sm:$0xff] }
 0x545   :  { %5777 = vmatpush1.msra.mxu1 %v21370_v15  ;;  %5601 = vmatprep.subr.mxu0 %v21797_v20  ;;  %v21803_v20 = vld [vmem:[#allocation50_spill] sm:$0xff] }
 0x546   :  { %5779 = vmatprep.subr.mxu1 %v21374_v5  ;;  %5605 = vmatpush1.msra.mxu0 %v21798_v3  ;;  %v21804_v3 = vld [vmem:[#allocation54_spill] sm:$0xff] }
 0x547   :  { %5781 = vmatpush1.msra.mxu1 %v21376_v38  ;;  %5609 = vmatprep.subr.mxu0 %v21799_v13  ;;  %v21805_v13 = vld [vmem:[#allocation56_spill] sm:$0xff] }
 0x548   :  { %5783 = vmatprep.subr.mxu1 %v21378_v58  ;;  %5613 = vmatpush1.msra.mxu0 %v21800_v18  ;;  %v21806_v18 = vld [vmem:[#allocation63_spill] sm:$0xff] }
 0x549   :  { %5785 = vmatpush1.msra.mxu1 %v21380_v37  ;;  %5617 = vmatprep.subr.mxu0 %v21801_v53  ;;  %v21807_v53 = vld [vmem:[#allocation66_spill] sm:$0xff] }
 0x54a   :  { %5787 = vmatprep.subr.mxu1 %v21382_v6  ;;  %5621 = vmatpush1.msra.mxu0 %v21802_v40  ;;  %v21808_v40 = vld [vmem:[#allocation70_spill] sm:$0xff] }
 0x54b   :  { %5789 = vmatpush1.msra.mxu1 %v21386_v34  ;;  %5625 = vmatprep.subr.mxu0 %v21803_v20  ;;  %v21809_v20 = vld [vmem:[#allocation72_spill] sm:$0xff] }
 0x54c   :  { %5791 = vmatprep.subr.mxu1 %v21389_v9  ;;  %5629 = vmatpush1.msra.mxu0 %v21804_v3  ;;  %v21810_v3 = vld [vmem:[#allocation79_spill] sm:$0xff] }
 0x54d   :  { %5793 = vmatpush1.msra.mxu1 %v21391_v28  ;;  %5633 = vmatprep.subr.mxu0 %v21805_v13  ;;  %v21811_v13 = vld [vmem:[#allocation82_spill] sm:$0xff] }
 0x54e   :  { %5795 = vmatprep.subr.mxu1 %v21393_v31  ;;  %5637 = vmatpush1.msra.mxu0 %v21806_v18  ;;  %v21812_v18 = vld [vmem:[#allocation86_spill] sm:$0xff] }
 0x54f   :  { %5797 = vmatpush1.msra.mxu1 %v21395_v36  ;;  %5641 = vmatprep.subr.mxu0 %v21807_v53  ;;  %v21813_v53 = vld [vmem:[#allocation88_spill] sm:$0xff] }
 0x550   :  { %5799 = vmatprep.subr.mxu1 %v21397_v55  ;;  %5645 = vmatpush1.msra.mxu0 %v21808_v40  ;;  %v21814_v40 = vld [vmem:[#allocation95_spill] sm:$0xff] }
 0x551   :  { %5801 = vmatpush1.msra.mxu1 %v21400_v63  ;;  %5649 = vmatprep.subr.mxu0 %v21809_v20  ;;  %v21815_v20 = vld [vmem:[#allocation98_spill] sm:$0xff] }
 0x552   :  { %5803 = vmatprep.subr.mxu1 %v21402_v33  ;;  %5653 = vmatpush1.msra.mxu0 %v21810_v3  ;;  %v21816_v3 = vld [vmem:[#allocation102_spill] sm:$0xff] }
 0x553   :  { %5805 = vmatpush1.msra.mxu1 %v21404_v1  ;;  %5657 = vmatprep.subr.mxu0 %v21811_v13  ;;  %v21817_v13 = vld [vmem:[#allocation104_spill] sm:$0xff] }
 0x554   :  { %5807 = vmatprep.subr.mxu1 %v21406_v41  ;;  %5661 = vmatpush1.msra.mxu0 %v21812_v18  ;;  %v21818_v18 = vld [vmem:[#allocation111_spill] sm:$0xff] }
 0x555   :  { %5809 = vmatpush1.msra.mxu1 %v21409_v19  ;;  %5665 = vmatprep.subr.mxu0 %v21813_v53  ;;  %v21822_v53 = vld [vmem:[#allocation120_spill] sm:$0xff] }
 0x556   :  { %5811 = vmatprep.subr.mxu1 %v21447_v10  ;;  %5669 = vmatpush1.msra.mxu0 %v21814_v40  ;;  %v21819_v40 = vld [vmem:[#allocation114_spill] sm:$0xff] }
 0x557   :  { %5813 = vmatpush1.msra.mxu1 %v21777_v8  ;;  %5673 = vmatprep.subr.mxu0 %v21815_v20  ;;  %v21820_v20 = vld [vmem:[#allocation118_spill] sm:$0xff] }
 0x558   :  { %5815 = vmatprep.subr.mxu1 %v21779_v44  ;;  %5677 = vmatpush1.msra.mxu0 %v21816_v3  ;;  %v21821_v3 = vld [vmem:[#allocation157_spill] sm:$0xff] }
 0x559   :  { %5817 = vmatpush1.msra.mxu1 %v21781_v2  ;;  %5681 = vmatprep.subr.mxu0 %v21817_v13  ;;  %v21823_v13 = vld [vmem:[#allocation121_spill] sm:$0xff] }
 0x55a   :  { %5819 = vmatprep.subr.mxu1 %v21783_v57  ;;  %5685 = vmatpush1.msra.mxu0 %v21818_v18  ;;  %v21824_v18 = vld [vmem:[#allocation160_spill] sm:$0xff] }
 0x55b   :  { %5821 = vmatpush1.msra.mxu1 %v21785_v50  ;;  %5854 = vmatprep.mubr.f32.mxu1 %v21174_v51 }
 0x55c   :  { %5689 = vmatprep.subr.mxu0 %v21819_v40  ;;  %5856 = vmatmul.mubr.f32.vlgmr.msra.gmra.mxu1 %v18331_v4  ;;  %v21826_v40 = vld [vmem:[#allocation127_spill] sm:$0xff] }
 0x55d   :  { %14753 = vmatprep.subr.mxu1 %v21174_v51  ;;  %5693 = vmatpush1.msra.mxu0 %v21820_v20  ;;  %v21842_v20 = vld [vmem:[#allocation191_spill] sm:$0xff] }
 0x55e   :  { %14754 = vmatpush3.msra.mxu1 %v21821_v3  ;;  %5697 = vmatprep.subr.mxu0 %v21822_v53  ;;  %v21829_v3 = vld [vmem:[#allocation132_spill] sm:$0xff] }
 0x55f   :  { %14755 = vmatprep.subr.mxu1 %v21174_v51  ;;  %5701 = vmatpush1.msra.mxu0 %v21823_v13  ;;  %v21830_v53 = vld [vmem:[#allocation168_spill] sm:$0xff] }
 0x560   :  { %14756 = vmatpush3.msra.mxu1 %v21824_v18  ;;  %5705 = vmatprep.subr.mxu0 %v21825_v54  ;;  %v21831_v54 = vld [vmem:[#allocation138_spill] sm:$0xff]  ;;  %v21838_v18 = vld [vmem:[#allocation184_spill] sm:$0xff] }
 0x561   :  { %14757 = vmatprep.subr.mxu1 %v21174_v51  ;;  %5709 = vmatpush1.msra.mxu0 %v21826_v40  ;;  %v21832_v40 = vld [vmem:[#allocation172_spill] sm:$0xff] }
 0x562   :  { %14758 = vmatpush3.msra.mxu1 %v21827_v46  ;;  %5713 = vmatprep.subr.mxu0 %v21828_v61  ;;  %v21833_v61 = vld [vmem:[#allocation139_spill] sm:$0xff]  ;;  %v21836_v46 = vld [vmem:[#allocation180_spill] sm:$0xff] }
 0x563   :  { %14759 = vmatprep.subr.mxu1 %v21174_v51  ;;  %5717 = vmatpush1.msra.mxu0 %v21829_v3  ;;  %v21834_v3 = vld [vmem:[#allocation176_spill] sm:$0xff] }
 0x564   :  { %5750 = vmatprep.mubr.f32.mxu0 %v21174_v51  ;;  %14760 = vmatpush3.msra.mxu1 %v21830_v53  ;;  %v21835_v53 = vld [vmem:[#allocation140_spill] sm:$0xff] }
 0x565   :  { %5752 = vmatmul.mubr.f32.vlgmr.msra.gmra.mxu0 %v18331_v4  ;;  %14718 = vmatprep.subr.mxu0 %v21174_v51  ;;  %v21840_v13 = vld [vmem:[#allocation188_spill] sm:$0xff] }
 0x566   :  { %14761 = vmatprep.subr.mxu1 %v21174_v51  ;;  %14719 = vmatpush3.msra.mxu0 %v21831_v54 }
 0x567   :  { %14762 = vmatpush3.msra.mxu1 %v21832_v40  ;;  %14720 = vmatprep.subr.mxu0 %v21174_v51  ;;  %v21837_v40 = vld [vmem:[#allocation142_spill] sm:$0xff] }
 0x568   :  { %14763 = vmatprep.subr.mxu1 %v21174_v51  ;;  %14721 = vmatpush3.msra.mxu0 %v21833_v61 }
 0x569   :  { %14764 = vmatpush3.msra.mxu1 %v21834_v3  ;;  %14722 = vmatprep.subr.mxu0 %v21174_v51  ;;  %v21839_v3 = vld [vmem:[#allocation144_spill] sm:$0xff] }
 0x56a   :  { %14765 = vmatprep.subr.mxu1 %v21174_v51  ;;  %14723 = vmatpush3.msra.mxu0 %v21835_v53 }
 0x56b   :  { %14766 = vmatpush3.msra.mxu1 %v21836_v46  ;;  %14724 = vmatprep.subr.mxu0 %v21174_v51  ;;  %v21841_v46 = vld [vmem:[#allocation149_spill] sm:$0xff] }
 0x56c   :  { %14767 = vmatprep.subr.mxu1 %v21174_v51  ;;  %14725 = vmatpush3.msra.mxu0 %v21837_v40 }
 0x56d   :  { %14768 = vmatpush3.msra.mxu1 %v21838_v18  ;;  %14726 = vmatprep.subr.mxu0 %v21174_v51  ;;  %v21843_v18 = vld [vmem:[#allocation152_spill] sm:$0xff] }
 0x56e   :  { %14769 = vmatprep.subr.mxu1 %v21174_v51  ;;  %14727 = vmatpush3.msra.mxu0 %v21839_v3 }
 0x56f   :  { %14770 = vmatpush3.msra.mxu1 %v21840_v13  ;;  %14728 = vmatprep.subr.mxu0 %v21174_v51  ;;  %v21845_v13 = vld [vmem:[#allocation154_spill] sm:$0xff] }
 0x570   :  { %14771 = vmatprep.subr.mxu1 %v21174_v51  ;;  %14729 = vmatpush3.msra.mxu0 %v21841_v46 }
 0x571   :  { %14772 = vmatpush3.msra.mxu1 %v21842_v20  ;;  %14730 = vmatprep.subr.mxu0 %v21174_v51  ;;  %v21847_v20 = vld [vmem:[#allocation158_spill] sm:$0xff] }
 0x572   :  { %14773 = vmatprep.subr.mxu1 %v21174_v51  ;;  %14731 = vmatpush3.msra.mxu0 %v21843_v18 }
 0x573   :  { %14774 = vmatpush3.msra.mxu1 %v21844_v35  ;;  %14732 = vmatprep.subr.mxu0 %v21174_v51  ;;  %v21849_v35 = vld [vmem:[#allocation162_spill] sm:$0xff] }
 0x574   :  { %14775 = vmatprep.subr.mxu1 %v21174_v51  ;;  %14733 = vmatpush3.msra.mxu0 %v21845_v13 }
 0x575   :  { %14776 = vmatpush3.msra.mxu1 %v21846_v43  ;;  %14734 = vmatprep.subr.mxu0 %v21174_v51  ;;  %v21851_v43 = vld [vmem:[#allocation166_spill] sm:$0xff] }
 0x576   :  { %14777 = vmatprep.subr.mxu1 %v21174_v51  ;;  %14735 = vmatpush3.msra.mxu0 %v21847_v20 }
 0x577   :  { %14778 = vmatpush3.msra.mxu1 %v21848_v60  ;;  %14736 = vmatprep.subr.mxu0 %v21174_v51  ;;  %v21853_v60 = vld [vmem:[#allocation170_spill] sm:$0xff] }
 0x578   :  { %14779 = vmatprep.subr.mxu1 %v21174_v51  ;;  %14737 = vmatpush3.msra.mxu0 %v21849_v35 }
 0x579   :  { %14780 = vmatpush3.msra.mxu1 %v21850_v24  ;;  %14738 = vmatprep.subr.mxu0 %v21174_v51  ;;  %v21855_v24 = vld [vmem:[#allocation174_spill] sm:$0xff] }
 0x57a   :  { %14781 = vmatprep.subr.mxu1 %v21174_v51  ;;  %14739 = vmatpush3.msra.mxu0 %v21851_v43 }
 0x57b   :  { %14782 = vmatpush3.msra.mxu1 %v21852_v26  ;;  %14740 = vmatprep.subr.mxu0 %v21174_v51  ;;  %v21856_v26 = vld [vmem:[#allocation179_spill] sm:$0xff] }
 0x57c   :  { %14783 = vmatprep.subr.mxu1 %v21174_v51  ;;  %14741 = vmatpush3.msra.mxu0 %v21853_v60 }
 0x57d   :  { %14784 = vmatpush3.msra.mxu1 %v21854_v59  ;;  %14785 = vmatprep.mubr.msk.f32.mxu1 %vm16060_vm1, %v21174_v51  ;;  %v21857_v59 = vld [vmem:[#allocation183_spill] sm:$0xff] }
 0x57e   :  { %14742 = vmatprep.subr.mxu0 %v21174_v51  ;;  %14786 = vmatmul.mubr.f32.vlgmr.msra.gmra.mxu1 %v18331_v4 }
 0x57f   :  { %14823 = vmatprep.subr.mxu1 %v21174_v51  ;;  %14743 = vmatpush3.msra.mxu0 %v21855_v24 }
 0x580   :  { %14824 = vmatpush3.msra.mxu1 %v21831_v54  ;;  %14744 = vmatprep.subr.mxu0 %v21174_v51 }
 0x581   :  { %14825 = vmatprep.subr.mxu1 %v21174_v51  ;;  %14745 = vmatpush3.msra.mxu0 %v21856_v26 }
 0x582   :  { %14826 = vmatpush3.msra.mxu1 %v21833_v61  ;;  %14746 = vmatprep.subr.mxu0 %v21174_v51 }
 0x583   :  { %14827 = vmatprep.subr.mxu1 %v21174_v51  ;;  %14747 = vmatpush3.msra.mxu0 %v21857_v59 }
 0x584   :  { %14828 = vmatpush3.msra.mxu1 %v21835_v53  ;;  %14748 = vmatprep.subr.mxu0 %v21174_v51 }
 0x585   :  { %14829 = vmatprep.subr.mxu1 %v21174_v51  ;;  %14749 = vmatpush3.msra.mxu0 %v21858_v30 }
 0x586   :  { %14750 = vmatprep.mubr.msk.f32.mxu0 %vm16060_vm1, %v21174_v51  ;;  %14830 = vmatpush3.msra.mxu1 %v21837_v40 }
 0x587   :  { %14751 = vmatmul.mubr.f32.vlgmr.msra.gmra.mxu0 %v18350_v56  ;;  %14788 = vmatprep.subr.mxu0 %v21174_v51  ;;  %v21861_v56 = vld [vmem:[#allocation146_spill] sm:$0xff] }
 0x588   :  { %14831 = vmatprep.subr.mxu1 %v21174_v51  ;;  %14789 = vmatpush3.msra.mxu0 %v21859_v7  ;;  %v21862_v7 = vld [vmem:[#allocation147_spill] sm:$0xff] }
 0x589   :  { %14832 = vmatpush3.msra.mxu1 %v21839_v3  ;;  %14790 = vmatprep.subr.mxu0 %v21174_v51 }
 0x58a   :  { %14833 = vmatprep.subr.mxu1 %v21174_v51  ;;  %14791 = vmatpush3.msra.mxu0 %v21860_v49  ;;  %v21863_v49 = vld [vmem:[#allocation150_spill] sm:$0xff] }
 0x58b   :  { %14834 = vmatpush3.msra.mxu1 %v21841_v46  ;;  %14792 = vmatprep.subr.mxu0 %v21174_v51 }
 0x58c   :  { %14835 = vmatprep.subr.mxu1 %v21174_v51  ;;  %14793 = vmatpush3.msra.mxu0 %v21861_v56  ;;  %v21864_v56 = vld [vmem:[#allocation155_spill] sm:$0xff] }
 0x58d   :  { %14836 = vmatpush3.msra.mxu1 %v21843_v18  ;;  %14794 = vmatprep.subr.mxu0 %v21174_v51 }
 0x58e   :  { %14837 = vmatprep.subr.mxu1 %v21174_v51  ;;  %14795 = vmatpush3.msra.mxu0 %v21862_v7  ;;  %v21865_v7 = vld [vmem:[#allocation159_spill] sm:$0xff] }
 0x58f   :  { %14838 = vmatpush3.msra.mxu1 %v21845_v13  ;;  %14796 = vmatprep.subr.mxu0 %v21174_v51 }
 0x590   :  { %14839 = vmatprep.subr.mxu1 %v21174_v51  ;;  %14797 = vmatpush3.msra.mxu0 %v21863_v49  ;;  %v21866_v49 = vld [vmem:[#allocation163_spill] sm:$0xff] }
 0x591   :  { %14840 = vmatpush3.msra.mxu1 %v21847_v20  ;;  %14798 = vmatprep.subr.mxu0 %v21174_v51 }
 0x592   :  { %14841 = vmatprep.subr.mxu1 %v21174_v51  ;;  %14799 = vmatpush3.msra.mxu0 %v21864_v56  ;;  %v21867_v56 = vld [vmem:[#allocation167_spill] sm:$0xff] }
 0x593   :  { %14842 = vmatpush3.msra.mxu1 %v21849_v35  ;;  %14800 = vmatprep.subr.mxu0 %v21174_v51 }
 0x594   :  { %14843 = vmatprep.subr.mxu1 %v21174_v51  ;;  %14801 = vmatpush3.msra.mxu0 %v21865_v7  ;;  %v21868_v7 = vld [vmem:[#allocation171_spill] sm:$0xff] }
 0x595   :  { %14844 = vmatpush3.msra.mxu1 %v21851_v43  ;;  %14802 = vmatprep.subr.mxu0 %v21174_v51 }
 0x596   :  { %14845 = vmatprep.subr.mxu1 %v21174_v51  ;;  %14803 = vmatpush3.msra.mxu0 %v21866_v49  ;;  %v21869_v49 = vld [vmem:[#allocation175_spill] sm:$0xff] }
 0x597   :  { %14846 = vmatpush3.msra.mxu1 %v21853_v60  ;;  %14804 = vmatprep.subr.mxu0 %v21174_v51 }
 0x598   :  { %14847 = vmatprep.subr.mxu1 %v21174_v51  ;;  %14805 = vmatpush3.msra.mxu0 %v21867_v56  ;;  %v21870_v56 = vld [vmem:[#allocation178_spill] sm:$0xff] }
 0x599   :  { %14848 = vmatpush3.msra.mxu1 %v21855_v24  ;;  %14806 = vmatprep.subr.mxu0 %v21174_v51 }
 0x59a   :  { %14849 = vmatprep.subr.mxu1 %v21174_v51  ;;  %14807 = vmatpush3.msra.mxu0 %v21868_v7  ;;  %v21873_v7 = vld [vmem:[#allocation190_spill] sm:$0xff] }
 0x59b   :  { %14850 = vmatpush3.msra.mxu1 %v21856_v26  ;;  %14808 = vmatprep.subr.mxu0 %v21174_v51 }
 0x59c   :  { %14851 = vmatprep.subr.mxu1 %v21174_v51  ;;  %14809 = vmatpush3.msra.mxu0 %v21869_v49  ;;  %v21871_v49 = vld [vmem:[#allocation182_spill] sm:$0xff] }
 0x59d   :  { %14852 = vmatpush3.msra.mxu1 %v21857_v59  ;;  %14810 = vmatprep.subr.mxu0 %v21174_v51 }
 0x59e   :  { %14853 = vmatprep.subr.mxu1 %v21174_v51  ;;  %14811 = vmatpush3.msra.mxu0 %v21870_v56  ;;  %v21872_v56 = vld [vmem:[#allocation187_spill] sm:$0xff] }
 0x59f   :  { %14854 = vmatpush3.msra.mxu1 %v21858_v30  ;;  %14855 = vmatprep.mubr.msk.f32.mxu1 %vm16060_vm1, %v21174_v51 }
 0x5a0   :  { %14812 = vmatprep.subr.mxu0 %v21174_v51  ;;  %14856 = vmatmul.mubr.f32.vlgmr.msra.gmra.mxu1 %v18342_v14  ;;  %v21874_v14 = vld [vmem:[#allocation193_spill] sm:$0xff] }
 0x5a1   :  { %14893 = vmatprep.subr.mxu1 %v21174_v51  ;;  %14813 = vmatpush3.msra.mxu0 %v21871_v49  ;;  %v21891_v49 = vld [vmem:[#allocation37_spill] sm:$0xff] }
 0x5a2   :  { %14894 = vmatpush3.msra.mxu1 %v21831_v54  ;;  %14814 = vmatprep.subr.mxu0 %v21174_v51 }
 0x5a3   :  { %14895 = vmatprep.subr.mxu1 %v21174_v51  ;;  %14815 = vmatpush3.msra.mxu0 %v21872_v56  ;;  %v21889_v56 = vld [vmem:[#allocation192_spill] sm:$0xff] }
 0x5a4   :  { %14896 = vmatpush3.msra.mxu1 %v21833_v61  ;;  %14816 = vmatprep.subr.mxu0 %v21174_v51 }
 0x5a5   :  { %14897 = vmatprep.subr.mxu1 %v21174_v51  ;;  %14817 = vmatpush3.msra.mxu0 %v21873_v7  ;;  %v21875_v7 = vld [vmem:[#allocation145_spill] sm:$0xff] }
 0x5a6   :  { %14898 = vmatpush3.msra.mxu1 %v21835_v53  ;;  %14818 = vmatprep.subr.mxu0 %v21174_v51 }
 0x5a7   :  { %14899 = vmatprep.subr.mxu1 %v21174_v51  ;;  %14819 = vmatpush3.msra.mxu0 %v21874_v14  ;;  %v21876_v14 = vld [vmem:[#allocation148_spill] sm:$0xff] }
 0x5a8   :  { %14820 = vmatprep.mubr.msk.f32.mxu0 %vm16060_vm1, %v21174_v51  ;;  %14900 = vmatpush3.msra.mxu1 %v21837_v40 }
 0x5a9   :  { %14821 = vmatmul.mubr.f32.vlgmr.msra.gmra.mxu0 %v18336_v45  ;;  %14858 = vmatprep.subr.mxu0 %v21174_v51  ;;  %v21877_v45 = vld [vmem:[#allocation151_spill] sm:$0xff] }
 0x5aa   :  { %14901 = vmatprep.subr.mxu1 %v21174_v51  ;;  %14859 = vmatpush3.msra.mxu0 %v21875_v7  ;;  %v21878_v7 = vld [vmem:[#allocation153_spill] sm:$0xff] }
 0x5ab   :  { %14902 = vmatpush3.msra.mxu1 %v21839_v3  ;;  %14860 = vmatprep.subr.mxu0 %v21174_v51  ;;  %v21924_v3 = vld [vmem:[#allocation210_spill] sm:$0xff] }
 0x5ac   :  { %14903 = vmatprep.subr.mxu1 %v21174_v51  ;;  %14861 = vmatpush3.msra.mxu0 %v21876_v14  ;;  %v21879_v14 = vld [vmem:[#allocation156_spill] sm:$0xff]  ;;  %v237_v40 = vadd.f32 %v21924_v3, %v17438_v42 }
 0x5ad   :  { %14904 = vmatpush3.msra.mxu1 %v21841_v46  ;;  %14862 = vmatprep.subr.mxu0 %v21174_v51 }
 0x5ae   :  { %14905 = vmatprep.subr.mxu1 %v21174_v51  ;;  %14863 = vmatpush3.msra.mxu0 %v21877_v45  ;;  %v21880_v45 = vld [vmem:[#allocation161_spill] sm:$0xff] }
 0x5af   :  { %14906 = vmatpush3.msra.mxu1 %v21843_v18  ;;  %14864 = vmatprep.subr.mxu0 %v21174_v51 }
 0x5b0   :  { %14907 = vmatprep.subr.mxu1 %v21174_v51  ;;  %14865 = vmatpush3.msra.mxu0 %v21878_v7  ;;  %v21881_v7 = vld [vmem:[#allocation165_spill] sm:$0xff] }
 0x5b1   :  { %14908 = vmatpush3.msra.mxu1 %v21845_v13  ;;  %14866 = vmatprep.subr.mxu0 %v21174_v51 }
 0x5b2   :  { %14909 = vmatprep.subr.mxu1 %v21174_v51  ;;  %14867 = vmatpush3.msra.mxu0 %v21879_v14  ;;  %v21882_v14 = vld [vmem:[#allocation169_spill] sm:$0xff] }
 0x5b3   :  { %14910 = vmatpush3.msra.mxu1 %v21847_v20  ;;  %14868 = vmatprep.subr.mxu0 %v21174_v51 }
 0x5b4   :  { %14911 = vmatprep.subr.mxu1 %v21174_v51  ;;  %14869 = vmatpush3.msra.mxu0 %v21880_v45  ;;  %v21883_v45 = vld [vmem:[#allocation173_spill] sm:$0xff] }
 0x5b5   :  { %14912 = vmatpush3.msra.mxu1 %v21849_v35  ;;  %14870 = vmatprep.subr.mxu0 %v21174_v51 }
 0x5b6   :  { %14913 = vmatprep.subr.mxu1 %v21174_v51  ;;  %14871 = vmatpush3.msra.mxu0 %v21881_v7  ;;  %v21884_v7 = vld [vmem:[#allocation177_spill] sm:$0xff] }
 0x5b7   :  { %14914 = vmatpush3.msra.mxu1 %v21851_v43  ;;  %14872 = vmatprep.subr.mxu0 %v21174_v51 }
 0x5b8   :  { %14915 = vmatprep.subr.mxu1 %v21174_v51  ;;  %14873 = vmatpush3.msra.mxu0 %v21882_v14  ;;  %v21885_v14 = vld [vmem:[#allocation181_spill] sm:$0xff] }
 0x5b9   :  { %14916 = vmatpush3.msra.mxu1 %v21853_v60  ;;  %14874 = vmatprep.subr.mxu0 %v21174_v51 }
 0x5ba   :  { %14917 = vmatprep.subr.mxu1 %v21174_v51  ;;  %14875 = vmatpush3.msra.mxu0 %v21883_v45  ;;  %v21886_v45 = vld [vmem:[#allocation185_spill] sm:$0xff] }
 0x5bb   :  { %14918 = vmatpush3.msra.mxu1 %v21855_v24  ;;  %14876 = vmatprep.subr.mxu0 %v21174_v51  ;;  %v21896_v24 = vld [vmem:[#allocation49_spill] sm:$0xff] }
 0x5bc   :  { %14919 = vmatprep.subr.mxu1 %v21174_v51  ;;  %14877 = vmatpush3.msra.mxu0 %v21884_v7  ;;  %v21887_v7 = vld [vmem:[#allocation189_spill] sm:$0xff] }
 0x5bd   :  { %14920 = vmatpush3.msra.mxu1 %v21856_v26  ;;  %14878 = vmatprep.subr.mxu0 %v21174_v51  ;;  %v21895_v26 = vld [vmem:[#allocation197_spill] sm:$0xff] }
 0x5be   :  { %14921 = vmatprep.subr.mxu1 %v21174_v51  ;;  %14879 = vmatpush3.msra.mxu0 %v21885_v14  ;;  %v21888_v14 = vld [vmem:[#allocation33_spill] sm:$0xff] }
 0x5bf   :  { %14922 = vmatpush3.msra.mxu1 %v21857_v59  ;;  %14880 = vmatprep.subr.mxu0 %v21174_v51  ;;  %v21893_v59 = vld [vmem:[#allocation40_spill] sm:$0xff] }
 0x5c0   :  { %14923 = vmatprep.subr.mxu1 %v21174_v51  ;;  %14881 = vmatpush3.msra.mxu0 %v21886_v45  ;;  %v21890_v45 = vld [vmem:[#allocation36_spill] sm:$0xff] }
 0x5c1   :  { %14924 = vmatpush3.msra.mxu1 %v21858_v30  ;;  %14925 = vmatprep.mubr.msk.f32.mxu1 %vm16060_vm1, %v21174_v51  ;;  %v21892_v30 = vld [vmem:[#allocation195_spill] sm:$0xff] }
 0x5c2   :  { %14882 = vmatprep.subr.mxu0 %v21174_v51  ;;  %14926 = vmatmul.mubr.f32.vlgmr.msra.gmra.mxu1 %v18331_v4 }
 0x5c3   :  { %14883 = vmatpush3.msra.mxu0 %v21887_v7  ;;  %14890 = vmatprep.mubr.msk.f32.mxu0 %vm16060_vm1, %v21174_v51  ;;  %v21894_v7 = vld [vmem:[#allocation46_spill] sm:$0xff] }
 0x5c4   :  { %14884 = vmatprep.subr.mxu0 %v21174_v51  ;;  %6647 = vmatprep.subr.mxu1 %v21888_v14 }
 0x5c5   :  { %14885 = vmatpush3.msra.mxu0 %v21889_v56  ;;  %6653 = vmatpush1.msra.mxu1 %v21890_v45  ;;  %v21897_v56 = vld [vmem:[#allocation53_spill] sm:$0xff]  ;;  %v21898_v45 = vld [vmem:[#allocation59_spill] sm:$0xff] }
 0x5c6   :  { %14886 = vmatprep.subr.mxu0 %v21174_v51  ;;  %6659 = vmatprep.subr.mxu1 %v21891_v49  ;;  %v21899_v49 = vld [vmem:[#allocation62_spill] sm:$0xff] }
 0x5c7   :  { %14887 = vmatpush3.msra.mxu0 %v21892_v30  ;;  %6665 = vmatpush1.msra.mxu1 %v21893_v59  ;;  %v21900_v59 = vld [vmem:[#allocation65_spill] sm:$0xff] }
 0x5c8   :  { %14888 = vmatprep.subr.mxu0 %v21174_v51  ;;  %6671 = vmatprep.subr.mxu1 %v21894_v7  ;;  %v21901_v7 = vld [vmem:[#allocation69_spill] sm:$0xff] }
 0x5c9   :  { %14889 = vmatpush3.msra.mxu0 %v21895_v26  ;;  %6677 = vmatpush1.msra.mxu1 %v21896_v24  ;;  %v21902_v24 = vld [vmem:[#allocation75_spill] sm:$0xff] }
 0x5ca   :  { %14891 = vmatmul.mubr.f32.vlgmr.msra.gmra.mxu0 %v18331_v4  ;;  %6683 = vmatprep.subr.mxu1 %v21897_v56  ;;  %v21903_v4 = vld [vmem:[#allocation78_spill] sm:$0xff] }
 0x5cb   :  { %6689 = vmatpush1.msra.mxu1 %v21898_v45  ;;  %6535 = vmatprep.subr.mxu0 %v21787_v27  ;;  %v21904_v45 = vld [vmem:[#allocation81_spill] sm:$0xff] }
 0x5cc   :  { %6695 = vmatprep.subr.mxu1 %v21899_v49  ;;  %6537 = vmatpush1.msra.mxu0 %v16162_v11  ;;  %v21905_v49 = vld [vmem:[#allocation85_spill] sm:$0xff] }
 0x5cd   :  { %6701 = vmatpush1.msra.mxu1 %v21900_v59  ;;  %6539 = vmatprep.subr.mxu0 %v16164_v12  ;;  %v21906_v59 = vld [vmem:[#allocation91_spill] sm:$0xff] }
 0x5ce   :  { %6707 = vmatprep.subr.mxu1 %v21901_v7  ;;  %6541 = vmatpush1.msra.mxu0 %v16169_v16  ;;  %v21907_v7 = vld [vmem:[#allocation94_spill] sm:$0xff] }
 0x5cf   :  { %6713 = vmatpush1.msra.mxu1 %v21902_v24  ;;  %6543 = vmatprep.subr.mxu0 %v16171_v17  ;;  %v21908_v24 = vld [vmem:[#allocation97_spill] sm:$0xff] }
 0x5d0   :  { %6719 = vmatprep.subr.mxu1 %v21903_v4  ;;  %6545 = vmatpush1.msra.mxu0 %v16181_v22  ;;  %v21909_v4 = vld [vmem:[#allocation101_spill] sm:$0xff] }
 0x5d1   :  { %6725 = vmatpush1.msra.mxu1 %v21904_v45  ;;  %6547 = vmatprep.subr.mxu0 %v16183_v23  ;;  %v21910_v45 = vld [vmem:[#allocation107_spill] sm:$0xff] }
 0x5d2   :  { %6731 = vmatprep.subr.mxu1 %v21905_v49  ;;  %6549 = vmatpush1.msra.mxu0 %v16195_v29  ;;  %v21911_v49 = vld [vmem:[#allocation110_spill] sm:$0xff] }
 0x5d3   :  { %6737 = vmatpush1.msra.mxu1 %v21906_v59  ;;  %6551 = vmatprep.subr.mxu0 %v21366_v32  ;;  %v21912_v59 = vld [vmem:[#allocation113_spill] sm:$0xff] }
 0x5d4   :  { %6743 = vmatprep.subr.mxu1 %v21907_v7  ;;  %6553 = vmatpush1.msra.mxu0 %v21370_v15  ;;  %v21913_v7 = vld [vmem:[#allocation117_spill] sm:$0xff] }
 0x5d5   :  { %6749 = vmatpush1.msra.mxu1 %v21908_v24  ;;  %6555 = vmatprep.subr.mxu0 %v21374_v5  ;;  %v21914_v24 = vld [vmem:[#allocation123_spill] sm:$0xff] }
 0x5d6   :  { %6755 = vmatprep.subr.mxu1 %v21909_v4  ;;  %6557 = vmatpush1.msra.mxu0 %v21376_v38  ;;  %v21915_v4 = vld [vmem:[#allocation126_spill] sm:$0xff] }
 0x5d7   :  { %6761 = vmatpush1.msra.mxu1 %v21910_v45  ;;  %6559 = vmatprep.subr.mxu0 %v21378_v58  ;;  %v21916_v45 = vld [vmem:[#allocation128_spill] sm:$0xff] }
 0x5d8   :  { %6767 = vmatprep.subr.mxu1 %v21911_v49  ;;  %6561 = vmatpush1.msra.mxu0 %v21380_v37  ;;  %v21917_v49 = vld [vmem:[#allocation131_spill] sm:$0xff] }
 0x5d9   :  { %6773 = vmatpush1.msra.mxu1 %v21912_v59  ;;  %6563 = vmatprep.subr.mxu0 %v21382_v6  ;;  %v21918_v59 = vld [vmem:[#allocation133_spill] sm:$0xff] }
 0x5da   :  { %6779 = vmatprep.subr.mxu1 %v21913_v7  ;;  %6565 = vmatpush1.msra.mxu0 %v21386_v34  ;;  %v21919_v7 = vld [vmem:[#allocation134_spill] sm:$0xff] }
 0x5db   :  { %6785 = vmatpush1.msra.mxu1 %v21914_v24  ;;  %6567 = vmatprep.subr.mxu0 %v21389_v9  ;;  %v21920_v24 = vld [vmem:[#allocation135_spill] sm:$0xff] }
 0x5dc   :  { %6791 = vmatprep.subr.mxu1 %v21915_v4  ;;  %6569 = vmatpush1.msra.mxu0 %v21391_v28  ;;  %v21921_v4 = vld [vmem:[#allocation136_spill] sm:$0xff] }
 0x5dd   :  { %6797 = vmatpush1.msra.mxu1 %v21916_v45  ;;  %6571 = vmatprep.subr.mxu0 %v21393_v31  ;;  %v21922_v45 = vld [vmem:[#allocation137_spill] sm:$0xff] }
 0x5de   :  { %6803 = vmatprep.subr.mxu1 %v21917_v49  ;;  %6573 = vmatpush1.msra.mxu0 %v21395_v36 }
 0x5df   :  { %6809 = vmatpush1.msra.mxu1 %v21918_v59  ;;  %6575 = vmatprep.subr.mxu0 %v21397_v55 }
 0x5e0   :  { %6815 = vmatprep.subr.mxu1 %v21919_v7  ;;  %6577 = vmatpush1.msra.mxu0 %v21400_v63 }
 0x5e1   :  { %6821 = vmatpush1.msra.mxu1 %v21920_v24  ;;  %6579 = vmatprep.subr.mxu0 %v21402_v33 }
 0x5e2   :  { %6827 = vmatprep.subr.mxu1 %v21921_v4  ;;  %6581 = vmatpush1.msra.mxu0 %v21404_v1  ;;  %v5342_v4 = vpop.f32.mrf.mxu1  ;;  %v5110_v24 = vpop.f32.mrf.mxu0 }
 0x5e3   :  { %6833 = vmatpush1.msra.mxu1 %v21922_v45  ;;  %6583 = vmatprep.subr.mxu0 %v21406_v41  ;;  %v21923_v45 = vld [vmem:[#allocation18_spill] sm:$0xff] }
 0x5e4   :  { %6866 = vmatprep.mubr.f32.mxu1 %v21174_v51  ;;  %7012 = vmatprep.subr.mxu1 %v21787_v27  ;;  %v5344_v7 = vpop.f32.mrf.mxu1  ;;  %v5112_v59 = vpop.f32.mrf.mxu0 }
 0x5e5   :  { %6585 = vmatpush1.msra.mxu0 %v21409_v19  ;;  %6630 = vmatprep.mubr.f32.mxu0 %v21174_v51  ;;  %v5345_v26 = vadd.f32 %v5344_v7, %v5112_v59 }
 0x5e6   :  { %6587 = vmatprep.subr.mxu0 %v21447_v10 }
 0x5e7   :  { %6589 = vmatpush1.msra.mxu0 %v21777_v8 }
 0x5e8   :  { %6591 = vmatprep.subr.mxu0 %v21779_v44 }
 0x5e9   :  { %6593 = vmatpush1.msra.mxu0 %v21781_v2  ;;  %v21925_v2 = vld [vmem:[#allocation209_spill] sm:$0xff] }
 0x5ea   :  { %6595 = vmatprep.subr.mxu0 %v21783_v57  ;;  %v5343_v57 = vadd.f32 %v5342_v4, %v5110_v24  ;;  %v21926_v4 = vld [vmem:[#allocation22_spill] sm:$0xff] }
 0x5eb   :  { %6597 = vmatpush1.msra.mxu0 %v21785_v50 }
 0x5ec   :  { %6876 = vmatprep.subr.mxu0 %v21923_v45 }
 0x5fa   :  { %v5585_v49 = vpop.f32.mrf.mxu1 }
 0x5fc   :  { %v5587_v60 = vpop.f32.mrf.mxu1 }
 0x603   :  { %v5479_v56 = vpop.f32.mrf.mxu0 }
 0x604   :  { %v5480_v7 = vadd.f32 %v5479_v56, %v5343_v57 }
 0x605   :  { %v5481_v30 = vpop.f32.mrf.mxu0 }
 0x606   :  { %v5482_v14 = vadd.f32 %v5481_v30, %v5345_v26  ;;  %v5586_v59 = vadd.f32 %v5585_v49, %v5480_v7 }
 0x608   :  { %v5588_v43 = vadd.f32 %v5587_v60, %v5482_v14 }
 0x61c   :  { %v5857_v35 = vpop.f32.mrf.mxu1 }
 0x61e   :  { %v5859_v46 = vpop.f32.mrf.mxu1 }
 0x625   :  { %v5753_v20 = vpop.f32.mrf.mxu0 }
 0x626   :  { %v5754_v30 = vadd.f32 %v5753_v20, %v5586_v59 }
 0x627   :  { %v5755_v13 = vpop.f32.mrf.mxu0 }
 0x628   :  { %v5756_v18 = vadd.f32 %v5755_v13, %v5588_v43  ;;  %v5858_v14 = vadd.f32 %v5857_v35, %v5754_v30 }
 0x62a   :  { %v5860_v45 = vadd.f32 %v5859_v46, %v5756_v18  ;;  %v6503_v44 = vadd.f32 %v5858_v14, %v21925_v2 }
 0x62c   :  { %v6504_v53 = vadd.f32 %v5860_v45, %v237_v40  ;;  %v13154_v13 = vmul.f32 -1.442695, %v6503_v44 }
 0x62e   :  { %15887 = vpow2.f32 %v13154_v13  ;;  %v13155_v3 = vmul.f32 -1.442695, %v6504_v53 }
 0x630   :  { %15889 = vpow2.f32 %v13155_v3 }
 0x63b   :  { %v15888_v46 = vpop.eup %15887 }
 0x63c   :  { %v6511_v18 = vadd.f32 1.0, %v15888_v46  ;;  %v21928_v46 = vld [vmem:[#allocation42_spill] sm:$0xff] }
 0x63d   :  { %v15890_v20 = vpop.eup %15889 }
 0x63e   :  { %v6100_v61 = vpop.f32.mrf.mxu1  ;;  %15891 = vrcp.f32 %v6511_v18  ;;  %v6512_v45 = vadd.f32 1.0, %v15890_v20  ;;  %v21929_v18 = vld [vmem:[#allocation44_spill] sm:$0xff] }
 0x63f   :  { %v21935_v20 = vld [vmem:[#allocation68_spill] sm:$0xff] }
 0x640   :  { %v14787_v54 = vpop.f32.mrf.mxu1  ;;  %15893 = vrcp.f32 %v6512_v45  ;;  %v21939_v45 = vld [vmem:[#allocation84_spill] sm:$0xff] }
 0x647   :  { %v5949_v27 = vpop.f32.mrf.mxu0 }
 0x648   :  { %v6101_v40 = vadd.f32 %v6100_v61, %v5949_v27 }
 0x649   :  { %v14752_v50 = vpop.f32.mrf.mxu0 }
 0x660   :  { %v6293_v26 = vpop.f32.mrf.mxu1 }
 0x662   :  { %v14857_v60 = vpop.f32.mrf.mxu1 }
 0x669   :  { %v6204_v43 = vpop.f32.mrf.mxu0 }
 0x66a   :  { %v6205_v57 = vadd.f32 %v6204_v43, %v6101_v40  ;;  %v21931_v40 = vld [vmem:[#allocation52_spill] sm:$0xff] }
 0x66b   :  { %v14822_v8 = vpop.f32.mrf.mxu0 }
 0x66c   :  { %v6294_v49 = vadd.f32 %v6293_v26, %v6205_v57  ;;  %v15892_v8 = vpop.eup %15891  ;;  %v21933_v57 = vld [vmem:[#allocation60_spill] sm:$0xff] }
 0x66d   :  { %v15894_v59 = vpop.eup %15893 }
 0x66e   :  { %v6521_v30 = vsub.f32 1.0, %v15894_v59  ;;  %v6523_v61 = vmul.f32 %v15894_v59, %v18328_v25  ;;  %v21946_v59 = vld [vmem:[#allocation100_spill] sm:$0xff] }
 0x66f   :  { %v21952_v25 = vld [vmem:[#allocation112_spill] sm:$0xff] }
 0x682   :  { %v6499_v54 = vpop.f32.mrf.mxu1 }
 0x684   :  { %v14927_v24 = vpop.f32.mrf.mxu1 }
 0x685   :  { %v21932_v24 = vld [vmem:[#allocation57_spill] sm:$0xff] }
 0x68a   :  { %v6412_v50 = vpop.f32.mrf.mxu0 }
 0x68b   :  { %v6413_v56 = vadd.f32 %v6412_v50, %v6294_v49  ;;  %v21934_v49 = vld [vmem:[#allocation64_spill] sm:$0xff]  ;;  %v21936_v50 = vld [vmem:[#allocation73_spill] sm:$0xff] }
 0x68c   :  { %v14892_v35 = vpop.f32.mrf.mxu0 }
 0x68d   :  { %v6500_v2 = vadd.f32 %v6499_v54, %v6413_v56  ;;  %v21930_v54 = vld [vmem:[#allocation48_spill] sm:$0xff] }
 0x68e   :  { %v21937_v56 = vld [vmem:[#allocation76_spill] sm:$0xff] }
 0x68f   :  { %v6517_v44 = vadd.f32 %v18322_v39, %v6500_v2  ;;  %v21938_v35 = vld [vmem:[#allocation80_spill] sm:$0xff]  ;;  %v21940_v2 = vld [vmem:[#allocation89_spill] sm:$0xff] }
 0x691   :  { %v6518_v53 = vmul.f32 %v15892_v8, %v6517_v44  ;;  %v21941_v44 = vld [vmem:[#allocation93_spill] sm:$0xff]  ;;  %v21942_v8 = vld [vmem:[#allocation92_spill] sm:$0xff] }
 0x693   :  { %v6519_v7 = vadd.f32 %v6518_v53, %v21926_v4  ;;  %v21943_v53 = vld [vmem:[#allocation99_spill] sm:$0xff]  ;;  %v21944_v4 = vld [vmem:[#allocation96_spill] sm:$0xff] }
 0x695   :  { %15895 = vtanh.f32 %v6519_v7  ;;  %v21945_v7 = vld [vmem:[#allocation103_spill] sm:$0xff] }
 0x6a2   :  { %v15896_v27 = vpop.eup %15895 }
 0x6a3   :  { %v6522_v26 = vmul.f32 %v15896_v27, %v6521_v30  ;;  %v21947_v30 = vld [vmem:[#allocation106_spill] sm:$0xff]  ;;  %v21948_v27 = vld [vmem:[#allocation105_spill] sm:$0xff] }
 0x6a5   :  { %v18764_v60 = vadd.f32 %v6523_v61, %v6522_v26  ;;  %v21949_v61 = vld [vmem:[#allocation109_spill] sm:$0xff]  ;;  %v21950_v26 = vld [vmem:[#allocation108_spill] sm:$0xff] }
 0x6a7   :  { %21927 = vst [vmem:[#allocation61_spill] sm:$0xff] %v18764_v60  ;;  %v18767_v14 = vand.u32 4294901760, %v18764_v60 }
 0x6a9   :  { %6868 = vmatmul.mubr.f32.vlgmr.msra.gmra.mxu1 %v18767_v14  ;;  %v18772_v39 = vsub.f32 %v18764_v60, %v18767_v14 }
 0x6aa   :  { %7014 = vmatpush1.msra.mxu1 %v16162_v11  ;;  %7107 = vmatprep.mubr.f32.mxu1 %v21174_v51 }
 0x6ab   :  { %7016 = vmatprep.subr.mxu1 %v16164_v12  ;;  %v18778_v43 = vand.u32 4294901760, %v18772_v39 }
 0x6ac   :  { %7018 = vmatpush1.msra.mxu1 %v16169_v16 }
 0x6ad   :  { %7020 = vmatprep.subr.mxu1 %v16171_v17  ;;  %v6634_v13 = vsub.f32 %v18772_v39, %v18778_v43 }
 0x6ae   :  { %7022 = vmatpush1.msra.mxu1 %v16181_v22 }
 0x6af   :  { %7024 = vmatprep.subr.mxu1 %v16183_v23  ;;  %v18786_v3 = vand.u32 4294901760, %v6634_v13  ;;  %v21951_v13 = vld [vmem:[#allocation17_spill] sm:$0xff] }
 0x6b0   :  { %7026 = vmatpush1.msra.mxu1 %v16195_v29 }
 0x6b1   :  { %7028 = vmatprep.subr.mxu1 %v21366_v32  ;;  %6636 = vmatmul.mubr.f32.vlgmr.msra.gmra.mxu0 %v18786_v3 }
 0x6b2   :  { %6879 = vmatpush1.msra.mxu0 %v21429_v47  ;;  %7030 = vmatpush1.msra.mxu1 %v21370_v15 }
 0x6b3   :  { %6882 = vmatprep.subr.mxu0 %v21430_v0  ;;  %7032 = vmatprep.subr.mxu1 %v21374_v5 }
 0x6b4   :  { %6885 = vmatpush1.msra.mxu0 %v21431_v52  ;;  %7034 = vmatpush1.msra.mxu1 %v21376_v38 }
 0x6b5   :  { %6888 = vmatprep.subr.mxu0 %v21432_v48  ;;  %7036 = vmatprep.subr.mxu1 %v21378_v58 }
 0x6b6   :  { %6891 = vmatpush1.msra.mxu0 %v21433_v62  ;;  %7038 = vmatpush1.msra.mxu1 %v21380_v37 }
 0x6b7   :  { %6894 = vmatprep.subr.mxu0 %v21434_v21  ;;  %7040 = vmatprep.subr.mxu1 %v21382_v6 }
 0x6b8   :  { %6897 = vmatpush1.msra.mxu0 %v21928_v46  ;;  %7042 = vmatpush1.msra.mxu1 %v21386_v34 }
 0x6b9   :  { %6900 = vmatprep.subr.mxu0 %v21929_v18  ;;  %7044 = vmatprep.subr.mxu1 %v21389_v9  ;;  %v22024_v18 = vld [vmem:[#allocation143_spill] sm:$0xff] }
 0x6ba   :  { %6903 = vmatpush1.msra.mxu0 %v21930_v54  ;;  %7046 = vmatpush1.msra.mxu1 %v21391_v28  ;;  %v22023_v54 = vld [vmem:[#allocation141_spill] sm:$0xff] }
 0x6bb   :  { %6906 = vmatprep.subr.mxu0 %v21931_v40  ;;  %7048 = vmatprep.subr.mxu1 %v21393_v31  ;;  %v22022_v40 = vld [vmem:[#allocation186_spill] sm:$0xff] }
 0x6bc   :  { %6909 = vmatpush1.msra.mxu0 %v21932_v24  ;;  %7050 = vmatpush1.msra.mxu1 %v21395_v36  ;;  %v22018_v24 = vld [vmem:[#allocation201_spill] sm:$0xff] }
 0x6bd   :  { %6912 = vmatprep.subr.mxu0 %v21933_v57  ;;  %7052 = vmatprep.subr.mxu1 %v21397_v55  ;;  %v22016_v57 = vld [vmem:[#allocation200_spill] sm:$0xff] }
 0x6be   :  { %6915 = vmatpush1.msra.mxu0 %v21934_v49  ;;  %7054 = vmatpush1.msra.mxu1 %v21400_v63  ;;  %v22014_v49 = vld [vmem:[#allocation199_spill] sm:$0xff] }
 0x6bf   :  { %6918 = vmatprep.subr.mxu0 %v21935_v20  ;;  %7056 = vmatprep.subr.mxu1 %v21402_v33  ;;  %v22012_v20 = vld [vmem:[#allocation198_spill] sm:$0xff] }
 0x6c0   :  { %6921 = vmatpush1.msra.mxu0 %v21936_v50  ;;  %7058 = vmatpush1.msra.mxu1 %v21404_v1  ;;  %v22010_v50 = vld [vmem:[#allocation196_spill] sm:$0xff] }
 0x6c1   :  { %6924 = vmatprep.subr.mxu0 %v21937_v56  ;;  %7060 = vmatprep.subr.mxu1 %v21406_v41  ;;  %v22008_v56 = vld [vmem:[#allocation194_spill] sm:$0xff] }
 0x6c2   :  { %6927 = vmatpush1.msra.mxu0 %v21938_v35  ;;  %7062 = vmatpush1.msra.mxu1 %v21409_v19  ;;  %v21992_v35 = vld [vmem:[#allocation129_spill] sm:$0xff] }
 0x6c3   :  { %6930 = vmatprep.subr.mxu0 %v21939_v45  ;;  %7064 = vmatprep.subr.mxu1 %v21447_v10  ;;  %v21991_v45 = vld [vmem:[#allocation164_spill] sm:$0xff] }
 0x6c4   :  { %6933 = vmatpush1.msra.mxu0 %v21940_v2  ;;  %7066 = vmatpush1.msra.mxu1 %v21941_v44  ;;  %v21989_v2 = vld [vmem:[#allocation124_spill] sm:$0xff] }
 0x6c5   :  { %6936 = vmatprep.subr.mxu0 %v21942_v8  ;;  %7068 = vmatprep.subr.mxu1 %v21943_v53  ;;  %v21957_v8 = vld [vmem:[#allocation125_spill] sm:$0xff] }
 0x6c6   :  { %6939 = vmatpush1.msra.mxu0 %v21944_v4  ;;  %7070 = vmatpush1.msra.mxu1 %v21945_v7  ;;  %v21953_v4 = vld [vmem:[#allocation115_spill] sm:$0xff] }
 0x6c7   :  { %6942 = vmatprep.subr.mxu0 %v21946_v59  ;;  %7072 = vmatprep.subr.mxu1 %v21947_v30  ;;  %v21954_v59 = vld [vmem:[#allocation116_spill] sm:$0xff] }
 0x6c8   :  { %6945 = vmatpush1.msra.mxu0 %v21948_v27  ;;  %7074 = vmatpush1.msra.mxu1 %v21949_v61  ;;  %v21955_v27 = vld [vmem:[#allocation119_spill] sm:$0xff] }
 0x6c9   :  { %6948 = vmatprep.subr.mxu0 %v21950_v26  ;;  %7111 = vmatmul.mubr.f32.vlgmr.msra.gmra.mxu1 %v18778_v43  ;;  %v21956_v26 = vld [vmem:[#allocation122_spill] sm:$0xff] }
 0x6ca   :  { %7286 = vmatprep.subr.mxu1 %v21951_v13  ;;  %6951 = vmatpush1.msra.mxu0 %v21952_v25  ;;  %v21958_v25 = vld [vmem:[#allocation130_spill] sm:$0xff] }
 0x6cb   :  { %7288 = vmatpush1.msra.mxu1 %v16162_v11  ;;  %6954 = vmatprep.subr.mxu0 %v21953_v4  ;;  %v21964_v4 = vld [vmem:[#allocation38_spill] sm:$0xff] }
 0x6cc   :  { %7290 = vmatprep.subr.mxu1 %v16164_v12  ;;  %6957 = vmatpush1.msra.mxu0 %v21954_v59  ;;  %v21959_v59 = vld [vmem:[#allocation21_spill] sm:$0xff] }
 0x6cd   :  { %7292 = vmatpush1.msra.mxu1 %v16169_v16  ;;  %6960 = vmatprep.subr.mxu0 %v21955_v27  ;;  %v21960_v27 = vld [vmem:[#allocation24_spill] sm:$0xff] }
 0x6ce   :  { %7294 = vmatprep.subr.mxu1 %v16171_v17  ;;  %6963 = vmatpush1.msra.mxu0 %v21956_v26  ;;  %v21961_v26 = vld [vmem:[#allocation25_spill] sm:$0xff] }
 0x6cf   :  { %7296 = vmatpush1.msra.mxu1 %v16181_v22  ;;  %6966 = vmatprep.subr.mxu0 %v21957_v8  ;;  %v21962_v8 = vld [vmem:[#allocation28_spill] sm:$0xff] }
 0x6d0   :  { %7298 = vmatprep.subr.mxu1 %v16183_v23  ;;  %6969 = vmatpush1.msra.mxu0 %v21958_v25  ;;  %v21963_v25 = vld [vmem:[#allocation34_spill] sm:$0xff] }
 0x6d1   :  { %7002 = vmatprep.mubr.f32.mxu0 %v21174_v51  ;;  %7300 = vmatpush1.msra.mxu1 %v16195_v29 }
 0x6d2   :  { %7005 = vmatmul.mubr.f32.vlgmr.msra.gmra.mxu0 %v18772_v39  ;;  %7120 = vmatprep.subr.mxu0 %v21959_v59  ;;  %v21965_v59 = vld [vmem:[#allocation41_spill] sm:$0xff] }
 0x6d3   :  { %7302 = vmatprep.subr.mxu1 %v21366_v32  ;;  %7124 = vmatpush1.msra.mxu0 %v21960_v27  ;;  %v21966_v27 = vld [vmem:[#allocation47_spill] sm:$0xff] }
 0x6d4   :  { %7304 = vmatpush1.msra.mxu1 %v21370_v15  ;;  %7128 = vmatprep.subr.mxu0 %v21961_v26  ;;  %v21967_v26 = vld [vmem:[#allocation50_spill] sm:$0xff] }
 0x6d5   :  { %7306 = vmatprep.subr.mxu1 %v21374_v5  ;;  %7132 = vmatpush1.msra.mxu0 %v21962_v8  ;;  %v21968_v8 = vld [vmem:[#allocation54_spill] sm:$0xff] }
 0x6d6   :  { %7308 = vmatpush1.msra.mxu1 %v21376_v38  ;;  %7136 = vmatprep.subr.mxu0 %v21963_v25  ;;  %v21969_v25 = vld [vmem:[#allocation56_spill] sm:$0xff] }
 0x6d7   :  { %7310 = vmatprep.subr.mxu1 %v21378_v58  ;;  %7140 = vmatpush1.msra.mxu0 %v21964_v4  ;;  %v21970_v4 = vld [vmem:[#allocation63_spill] sm:$0xff] }
 0x6d8   :  { %7312 = vmatpush1.msra.mxu1 %v21380_v37  ;;  %7144 = vmatprep.subr.mxu0 %v21965_v59  ;;  %v21971_v59 = vld [vmem:[#allocation66_spill] sm:$0xff] }
 0x6d9   :  { %7314 = vmatprep.subr.mxu1 %v21382_v6  ;;  %7148 = vmatpush1.msra.mxu0 %v21966_v27  ;;  %v21972_v27 = vld [vmem:[#allocation70_spill] sm:$0xff] }
 0x6da   :  { %7316 = vmatpush1.msra.mxu1 %v21386_v34  ;;  %7152 = vmatprep.subr.mxu0 %v21967_v26  ;;  %v21973_v26 = vld [vmem:[#allocation72_spill] sm:$0xff] }
 0x6db   :  { %7318 = vmatprep.subr.mxu1 %v21389_v9  ;;  %7156 = vmatpush1.msra.mxu0 %v21968_v8  ;;  %v21974_v8 = vld [vmem:[#allocation79_spill] sm:$0xff] }
 0x6dc   :  { %7320 = vmatpush1.msra.mxu1 %v21391_v28  ;;  %7160 = vmatprep.subr.mxu0 %v21969_v25  ;;  %v21975_v25 = vld [vmem:[#allocation82_spill] sm:$0xff] }
 0x6dd   :  { %7322 = vmatprep.subr.mxu1 %v21393_v31  ;;  %7164 = vmatpush1.msra.mxu0 %v21970_v4  ;;  %v21976_v4 = vld [vmem:[#allocation86_spill] sm:$0xff] }
 0x6de   :  { %7324 = vmatpush1.msra.mxu1 %v21395_v36  ;;  %7168 = vmatprep.subr.mxu0 %v21971_v59  ;;  %v21977_v59 = vld [vmem:[#allocation88_spill] sm:$0xff] }
 0x6df   :  { %7326 = vmatprep.subr.mxu1 %v21397_v55  ;;  %7172 = vmatpush1.msra.mxu0 %v21972_v27  ;;  %v21978_v27 = vld [vmem:[#allocation95_spill] sm:$0xff] }
 0x6e0   :  { %7328 = vmatpush1.msra.mxu1 %v21400_v63  ;;  %7176 = vmatprep.subr.mxu0 %v21973_v26  ;;  %v21979_v26 = vld [vmem:[#allocation98_spill] sm:$0xff] }
 0x6e1   :  { %7330 = vmatprep.subr.mxu1 %v21402_v33  ;;  %7180 = vmatpush1.msra.mxu0 %v21974_v8  ;;  %v21980_v8 = vld [vmem:[#allocation102_spill] sm:$0xff] }
 0x6e2   :  { %7332 = vmatpush1.msra.mxu1 %v21404_v1  ;;  %7184 = vmatprep.subr.mxu0 %v21975_v25  ;;  %v21981_v25 = vld [vmem:[#allocation104_spill] sm:$0xff] }
 0x6e3   :  { %7334 = vmatprep.subr.mxu1 %v21406_v41  ;;  %7188 = vmatpush1.msra.mxu0 %v21976_v4  ;;  %v21982_v4 = vld [vmem:[#allocation111_spill] sm:$0xff] }
 0x6e4   :  { %7336 = vmatpush1.msra.mxu1 %v21409_v19  ;;  %7192 = vmatprep.subr.mxu0 %v21977_v59  ;;  %v21986_v59 = vld [vmem:[#allocation120_spill] sm:$0xff] }
 0x6e5   :  { %7338 = vmatprep.subr.mxu1 %v21447_v10  ;;  %7196 = vmatpush1.msra.mxu0 %v21978_v27  ;;  %v21983_v27 = vld [vmem:[#allocation114_spill] sm:$0xff] }
 0x6e6   :  { %7340 = vmatpush1.msra.mxu1 %v21941_v44  ;;  %7200 = vmatprep.subr.mxu0 %v21979_v26  ;;  %v21984_v26 = vld [vmem:[#allocation118_spill] sm:$0xff] }
 0x6e7   :  { %7342 = vmatprep.subr.mxu1 %v21943_v53  ;;  %7204 = vmatpush1.msra.mxu0 %v21980_v8  ;;  %v21985_v8 = vld [vmem:[#allocation157_spill] sm:$0xff] }
 0x6e8   :  { %7344 = vmatpush1.msra.mxu1 %v21945_v7  ;;  %7208 = vmatprep.subr.mxu0 %v21981_v25  ;;  %v21987_v25 = vld [vmem:[#allocation121_spill] sm:$0xff] }
 0x6e9   :  { %7346 = vmatprep.subr.mxu1 %v21947_v30  ;;  %7212 = vmatpush1.msra.mxu0 %v21982_v4  ;;  %v21988_v4 = vld [vmem:[#allocation160_spill] sm:$0xff] }
 0x6ea   :  { %7348 = vmatpush1.msra.mxu1 %v21949_v61  ;;  %7381 = vmatprep.mubr.f32.mxu1 %v21174_v51 }
 0x6eb   :  { %7216 = vmatprep.subr.mxu0 %v21983_v27  ;;  %7383 = vmatmul.mubr.f32.vlgmr.msra.gmra.mxu1 %v18767_v14  ;;  %v21990_v27 = vld [vmem:[#allocation127_spill] sm:$0xff] }
 0x6ec   :  { %14963 = vmatprep.subr.mxu1 %v21174_v51  ;;  %7220 = vmatpush1.msra.mxu0 %v21984_v26  ;;  %v22006_v26 = vld [vmem:[#allocation191_spill] sm:$0xff] }
 0x6ed   :  { %14964 = vmatpush3.msra.mxu1 %v21985_v8  ;;  %7224 = vmatprep.subr.mxu0 %v21986_v59  ;;  %v21993_v8 = vld [vmem:[#allocation132_spill] sm:$0xff] }
 0x6ee   :  { %14965 = vmatprep.subr.mxu1 %v21174_v51  ;;  %7228 = vmatpush1.msra.mxu0 %v21987_v25  ;;  %v21994_v59 = vld [vmem:[#allocation168_spill] sm:$0xff] }
 0x6ef   :  { %14966 = vmatpush3.msra.mxu1 %v21988_v4  ;;  %7232 = vmatprep.subr.mxu0 %v21989_v2  ;;  %v21995_v2 = vld [vmem:[#allocation138_spill] sm:$0xff]  ;;  %v22002_v4 = vld [vmem:[#allocation184_spill] sm:$0xff] }
 0x6f0   :  { %14967 = vmatprep.subr.mxu1 %v21174_v51  ;;  %7236 = vmatpush1.msra.mxu0 %v21990_v27  ;;  %v21996_v27 = vld [vmem:[#allocation172_spill] sm:$0xff] }
 0x6f1   :  { %14968 = vmatpush3.msra.mxu1 %v21991_v45  ;;  %7240 = vmatprep.subr.mxu0 %v21992_v35  ;;  %v21997_v35 = vld [vmem:[#allocation139_spill] sm:$0xff]  ;;  %v22000_v45 = vld [vmem:[#allocation180_spill] sm:$0xff] }
 0x6f2   :  { %14969 = vmatprep.subr.mxu1 %v21174_v51  ;;  %7244 = vmatpush1.msra.mxu0 %v21993_v8  ;;  %v21998_v8 = vld [vmem:[#allocation176_spill] sm:$0xff] }
 0x6f3   :  { %7277 = vmatprep.mubr.f32.mxu0 %v21174_v51  ;;  %14970 = vmatpush3.msra.mxu1 %v21994_v59  ;;  %v21999_v59 = vld [vmem:[#allocation140_spill] sm:$0xff] }
 0x6f4   :  { %7279 = vmatmul.mubr.f32.vlgmr.msra.gmra.mxu0 %v18767_v14  ;;  %14928 = vmatprep.subr.mxu0 %v21174_v51  ;;  %v22004_v25 = vld [vmem:[#allocation188_spill] sm:$0xff] }
 0x6f5   :  { %14971 = vmatprep.subr.mxu1 %v21174_v51  ;;  %14929 = vmatpush3.msra.mxu0 %v21995_v2 }
 0x6f6   :  { %14972 = vmatpush3.msra.mxu1 %v21996_v27  ;;  %14930 = vmatprep.subr.mxu0 %v21174_v51  ;;  %v22001_v27 = vld [vmem:[#allocation142_spill] sm:$0xff] }
 0x6f7   :  { %14973 = vmatprep.subr.mxu1 %v21174_v51  ;;  %14931 = vmatpush3.msra.mxu0 %v21997_v35 }
 0x6f8   :  { %14974 = vmatpush3.msra.mxu1 %v21998_v8  ;;  %14932 = vmatprep.subr.mxu0 %v21174_v51  ;;  %v22003_v8 = vld [vmem:[#allocation144_spill] sm:$0xff] }
 0x6f9   :  { %14975 = vmatprep.subr.mxu1 %v21174_v51  ;;  %14933 = vmatpush3.msra.mxu0 %v21999_v59 }
 0x6fa   :  { %14976 = vmatpush3.msra.mxu1 %v22000_v45  ;;  %14934 = vmatprep.subr.mxu0 %v21174_v51  ;;  %v22005_v45 = vld [vmem:[#allocation149_spill] sm:$0xff] }
 0x6fb   :  { %14977 = vmatprep.subr.mxu1 %v21174_v51  ;;  %14935 = vmatpush3.msra.mxu0 %v22001_v27 }
 0x6fc   :  { %14978 = vmatpush3.msra.mxu1 %v22002_v4  ;;  %14936 = vmatprep.subr.mxu0 %v21174_v51  ;;  %v22007_v4 = vld [vmem:[#allocation152_spill] sm:$0xff] }
 0x6fd   :  { %14979 = vmatprep.subr.mxu1 %v21174_v51  ;;  %14937 = vmatpush3.msra.mxu0 %v22003_v8 }
 0x6fe   :  { %14980 = vmatpush3.msra.mxu1 %v22004_v25  ;;  %14938 = vmatprep.subr.mxu0 %v21174_v51  ;;  %v22009_v25 = vld [vmem:[#allocation154_spill] sm:$0xff] }
 0x6ff   :  { %14981 = vmatprep.subr.mxu1 %v21174_v51  ;;  %14939 = vmatpush3.msra.mxu0 %v22005_v45 }
 0x700   :  { %14982 = vmatpush3.msra.mxu1 %v22006_v26  ;;  %14940 = vmatprep.subr.mxu0 %v21174_v51  ;;  %v22011_v26 = vld [vmem:[#allocation158_spill] sm:$0xff] }
 0x701   :  { %14983 = vmatprep.subr.mxu1 %v21174_v51  ;;  %14941 = vmatpush3.msra.mxu0 %v22007_v4 }
 0x702   :  { %14984 = vmatpush3.msra.mxu1 %v22008_v56  ;;  %14942 = vmatprep.subr.mxu0 %v21174_v51  ;;  %v22013_v56 = vld [vmem:[#allocation162_spill] sm:$0xff] }
 0x703   :  { %14985 = vmatprep.subr.mxu1 %v21174_v51  ;;  %14943 = vmatpush3.msra.mxu0 %v22009_v25 }
 0x704   :  { %14986 = vmatpush3.msra.mxu1 %v22010_v50  ;;  %14944 = vmatprep.subr.mxu0 %v21174_v51  ;;  %v22015_v50 = vld [vmem:[#allocation166_spill] sm:$0xff] }
 0x705   :  { %14987 = vmatprep.subr.mxu1 %v21174_v51  ;;  %14945 = vmatpush3.msra.mxu0 %v22011_v26 }
 0x706   :  { %14988 = vmatpush3.msra.mxu1 %v22012_v20  ;;  %14946 = vmatprep.subr.mxu0 %v21174_v51  ;;  %v22017_v20 = vld [vmem:[#allocation170_spill] sm:$0xff] }
 0x707   :  { %14989 = vmatprep.subr.mxu1 %v21174_v51  ;;  %14947 = vmatpush3.msra.mxu0 %v22013_v56 }
 0x708   :  { %14990 = vmatpush3.msra.mxu1 %v22014_v49  ;;  %14948 = vmatprep.subr.mxu0 %v21174_v51  ;;  %v22019_v49 = vld [vmem:[#allocation174_spill] sm:$0xff] }
 0x709   :  { %14991 = vmatprep.subr.mxu1 %v21174_v51  ;;  %14949 = vmatpush3.msra.mxu0 %v22015_v50 }
 0x70a   :  { %14992 = vmatpush3.msra.mxu1 %v22016_v57  ;;  %14950 = vmatprep.subr.mxu0 %v21174_v51  ;;  %v22020_v57 = vld [vmem:[#allocation179_spill] sm:$0xff] }
 0x70b   :  { %14993 = vmatprep.subr.mxu1 %v21174_v51  ;;  %14951 = vmatpush3.msra.mxu0 %v22017_v20 }
 0x70c   :  { %14994 = vmatpush3.msra.mxu1 %v22018_v24  ;;  %14995 = vmatprep.mubr.msk.f32.mxu1 %vm16060_vm1, %v21174_v51  ;;  %v22021_v24 = vld [vmem:[#allocation183_spill] sm:$0xff] }
 0x70d   :  { %14952 = vmatprep.subr.mxu0 %v21174_v51  ;;  %14996 = vmatmul.mubr.f32.vlgmr.msra.gmra.mxu1 %v18767_v14 }
 0x70e   :  { %15033 = vmatprep.subr.mxu1 %v21174_v51  ;;  %14953 = vmatpush3.msra.mxu0 %v22019_v49 }
 0x70f   :  { %15034 = vmatpush3.msra.mxu1 %v21995_v2  ;;  %14954 = vmatprep.subr.mxu0 %v21174_v51 }
 0x710   :  { %15035 = vmatprep.subr.mxu1 %v21174_v51  ;;  %14955 = vmatpush3.msra.mxu0 %v22020_v57 }
 0x711   :  { %15036 = vmatpush3.msra.mxu1 %v21997_v35  ;;  %14956 = vmatprep.subr.mxu0 %v21174_v51 }
 0x712   :  { %15037 = vmatprep.subr.mxu1 %v21174_v51  ;;  %14957 = vmatpush3.msra.mxu0 %v22021_v24 }
 0x713   :  { %15038 = vmatpush3.msra.mxu1 %v21999_v59  ;;  %14958 = vmatprep.subr.mxu0 %v21174_v51 }
 0x714   :  { %15039 = vmatprep.subr.mxu1 %v21174_v51  ;;  %14959 = vmatpush3.msra.mxu0 %v22022_v40 }
 0x715   :  { %14960 = vmatprep.mubr.msk.f32.mxu0 %vm16060_vm1, %v21174_v51  ;;  %15040 = vmatpush3.msra.mxu1 %v22001_v27 }
 0x716   :  { %14961 = vmatmul.mubr.f32.vlgmr.msra.gmra.mxu0 %v18786_v3  ;;  %14998 = vmatprep.subr.mxu0 %v21174_v51  ;;  %v22025_v3 = vld [vmem:[#allocation146_spill] sm:$0xff] }
 0x717   :  { %15041 = vmatprep.subr.mxu1 %v21174_v51  ;;  %14999 = vmatpush3.msra.mxu0 %v22023_v54  ;;  %v22026_v54 = vld [vmem:[#allocation147_spill] sm:$0xff] }
 0x718   :  { %15042 = vmatpush3.msra.mxu1 %v22003_v8  ;;  %15000 = vmatprep.subr.mxu0 %v21174_v51 }
 0x719   :  { %15043 = vmatprep.subr.mxu1 %v21174_v51  ;;  %15001 = vmatpush3.msra.mxu0 %v22024_v18  ;;  %v22027_v18 = vld [vmem:[#allocation150_spill] sm:$0xff] }
 0x71a   :  { %15044 = vmatpush3.msra.mxu1 %v22005_v45  ;;  %15002 = vmatprep.subr.mxu0 %v21174_v51 }
 0x71b   :  { %15045 = vmatprep.subr.mxu1 %v21174_v51  ;;  %15003 = vmatpush3.msra.mxu0 %v22025_v3  ;;  %v22028_v3 = vld [vmem:[#allocation155_spill] sm:$0xff] }
 0x71c   :  { %15046 = vmatpush3.msra.mxu1 %v22007_v4  ;;  %15004 = vmatprep.subr.mxu0 %v21174_v51 }
 0x71d   :  { %15047 = vmatprep.subr.mxu1 %v21174_v51  ;;  %15005 = vmatpush3.msra.mxu0 %v22026_v54  ;;  %v22029_v54 = vld [vmem:[#allocation159_spill] sm:$0xff] }
 0x71e   :  { %15048 = vmatpush3.msra.mxu1 %v22009_v25  ;;  %15006 = vmatprep.subr.mxu0 %v21174_v51 }
 0x71f   :  { %15049 = vmatprep.subr.mxu1 %v21174_v51  ;;  %15007 = vmatpush3.msra.mxu0 %v22027_v18  ;;  %v22030_v18 = vld [vmem:[#allocation163_spill] sm:$0xff] }
 0x720   :  { %15050 = vmatpush3.msra.mxu1 %v22011_v26  ;;  %15008 = vmatprep.subr.mxu0 %v21174_v51 }
 0x721   :  { %15051 = vmatprep.subr.mxu1 %v21174_v51  ;;  %15009 = vmatpush3.msra.mxu0 %v22028_v3  ;;  %v22031_v3 = vld [vmem:[#allocation167_spill] sm:$0xff] }
 0x722   :  { %15052 = vmatpush3.msra.mxu1 %v22013_v56  ;;  %15010 = vmatprep.subr.mxu0 %v21174_v51 }
 0x723   :  { %15053 = vmatprep.subr.mxu1 %v21174_v51  ;;  %15011 = vmatpush3.msra.mxu0 %v22029_v54  ;;  %v22032_v54 = vld [vmem:[#allocation171_spill] sm:$0xff] }
 0x724   :  { %15054 = vmatpush3.msra.mxu1 %v22015_v50  ;;  %15012 = vmatprep.subr.mxu0 %v21174_v51 }
 0x725   :  { %15055 = vmatprep.subr.mxu1 %v21174_v51  ;;  %15013 = vmatpush3.msra.mxu0 %v22030_v18  ;;  %v22033_v18 = vld [vmem:[#allocation175_spill] sm:$0xff] }
 0x726   :  { %15056 = vmatpush3.msra.mxu1 %v22017_v20  ;;  %15014 = vmatprep.subr.mxu0 %v21174_v51 }
 0x727   :  { %15057 = vmatprep.subr.mxu1 %v21174_v51  ;;  %15015 = vmatpush3.msra.mxu0 %v22031_v3  ;;  %v22034_v3 = vld [vmem:[#allocation178_spill] sm:$0xff] }
 0x728   :  { %15058 = vmatpush3.msra.mxu1 %v22019_v49  ;;  %15016 = vmatprep.subr.mxu0 %v21174_v51 }
 0x729   :  { %15059 = vmatprep.subr.mxu1 %v21174_v51  ;;  %15017 = vmatpush3.msra.mxu0 %v22032_v54  ;;  %v22037_v54 = vld [vmem:[#allocation190_spill] sm:$0xff] }
 0x72a   :  { %15060 = vmatpush3.msra.mxu1 %v22020_v57  ;;  %15018 = vmatprep.subr.mxu0 %v21174_v51 }
 0x72b   :  { %15061 = vmatprep.subr.mxu1 %v21174_v51  ;;  %15019 = vmatpush3.msra.mxu0 %v22033_v18  ;;  %v22035_v18 = vld [vmem:[#allocation182_spill] sm:$0xff] }
 0x72c   :  { %15062 = vmatpush3.msra.mxu1 %v22021_v24  ;;  %15020 = vmatprep.subr.mxu0 %v21174_v51 }
 0x72d   :  { %15063 = vmatprep.subr.mxu1 %v21174_v51  ;;  %15021 = vmatpush3.msra.mxu0 %v22034_v3  ;;  %v22036_v3 = vld [vmem:[#allocation187_spill] sm:$0xff] }
 0x72e   :  { %15064 = vmatpush3.msra.mxu1 %v22022_v40  ;;  %15065 = vmatprep.mubr.msk.f32.mxu1 %vm16060_vm1, %v21174_v51 }
 0x72f   :  { %15022 = vmatprep.subr.mxu0 %v21174_v51  ;;  %15066 = vmatmul.mubr.f32.vlgmr.msra.gmra.mxu1 %v18778_v43  ;;  %v22038_v43 = vld [vmem:[#allocation193_spill] sm:$0xff] }
 0x730   :  { %15103 = vmatprep.subr.mxu1 %v21174_v51  ;;  %15023 = vmatpush3.msra.mxu0 %v22035_v18  ;;  %v22055_v18 = vld [vmem:[#allocation37_spill] sm:$0xff] }
 0x731   :  { %15104 = vmatpush3.msra.mxu1 %v21995_v2  ;;  %15024 = vmatprep.subr.mxu0 %v21174_v51 }
 0x732   :  { %15105 = vmatprep.subr.mxu1 %v21174_v51  ;;  %15025 = vmatpush3.msra.mxu0 %v22036_v3  ;;  %v22053_v3 = vld [vmem:[#allocation192_spill] sm:$0xff] }
 0x733   :  { %15106 = vmatpush3.msra.mxu1 %v21997_v35  ;;  %15026 = vmatprep.subr.mxu0 %v21174_v51 }
 0x734   :  { %15107 = vmatprep.subr.mxu1 %v21174_v51  ;;  %15027 = vmatpush3.msra.mxu0 %v22037_v54  ;;  %v22039_v54 = vld [vmem:[#allocation145_spill] sm:$0xff] }
 0x735   :  { %15108 = vmatpush3.msra.mxu1 %v21999_v59  ;;  %15028 = vmatprep.subr.mxu0 %v21174_v51 }
 0x736   :  { %15109 = vmatprep.subr.mxu1 %v21174_v51  ;;  %15029 = vmatpush3.msra.mxu0 %v22038_v43  ;;  %v22040_v43 = vld [vmem:[#allocation148_spill] sm:$0xff] }
 0x737   :  { %15030 = vmatprep.mubr.msk.f32.mxu0 %vm16060_vm1, %v21174_v51  ;;  %15110 = vmatpush3.msra.mxu1 %v22001_v27 }
 0x738   :  { %15031 = vmatmul.mubr.f32.vlgmr.msra.gmra.mxu0 %v18772_v39  ;;  %15068 = vmatprep.subr.mxu0 %v21174_v51  ;;  %v22041_v39 = vld [vmem:[#allocation151_spill] sm:$0xff] }
 0x739   :  { %15111 = vmatprep.subr.mxu1 %v21174_v51  ;;  %15069 = vmatpush3.msra.mxu0 %v22039_v54  ;;  %v22042_v54 = vld [vmem:[#allocation153_spill] sm:$0xff] }
 0x73a   :  { %15112 = vmatpush3.msra.mxu1 %v22003_v8  ;;  %15070 = vmatprep.subr.mxu0 %v21174_v51  ;;  %v22088_v8 = vld [vmem:[#allocation212_spill] sm:$0xff] }
 0x73b   :  { %15113 = vmatprep.subr.mxu1 %v21174_v51  ;;  %15071 = vmatpush3.msra.mxu0 %v22040_v43  ;;  %v22043_v43 = vld [vmem:[#allocation156_spill] sm:$0xff]  ;;  %v243_v27 = vadd.f32 %v22088_v8, %v17438_v42 }
 0x73c   :  { %15114 = vmatpush3.msra.mxu1 %v22005_v45  ;;  %15072 = vmatprep.subr.mxu0 %v21174_v51 }
 0x73d   :  { %15115 = vmatprep.subr.mxu1 %v21174_v51  ;;  %15073 = vmatpush3.msra.mxu0 %v22041_v39  ;;  %v22044_v39 = vld [vmem:[#allocation161_spill] sm:$0xff] }
 0x73e   :  { %15116 = vmatpush3.msra.mxu1 %v22007_v4  ;;  %15074 = vmatprep.subr.mxu0 %v21174_v51 }
 0x73f   :  { %15117 = vmatprep.subr.mxu1 %v21174_v51  ;;  %15075 = vmatpush3.msra.mxu0 %v22042_v54  ;;  %v22045_v54 = vld [vmem:[#allocation165_spill] sm:$0xff] }
 0x740   :  { %15118 = vmatpush3.msra.mxu1 %v22009_v25  ;;  %15076 = vmatprep.subr.mxu0 %v21174_v51 }
 0x741   :  { %15119 = vmatprep.subr.mxu1 %v21174_v51  ;;  %15077 = vmatpush3.msra.mxu0 %v22043_v43  ;;  %v22046_v43 = vld [vmem:[#allocation169_spill] sm:$0xff] }
 0x742   :  { %15120 = vmatpush3.msra.mxu1 %v22011_v26  ;;  %15078 = vmatprep.subr.mxu0 %v21174_v51 }
 0x743   :  { %15121 = vmatprep.subr.mxu1 %v21174_v51  ;;  %15079 = vmatpush3.msra.mxu0 %v22044_v39  ;;  %v22047_v39 = vld [vmem:[#allocation173_spill] sm:$0xff] }
 0x744   :  { %15122 = vmatpush3.msra.mxu1 %v22013_v56  ;;  %15080 = vmatprep.subr.mxu0 %v21174_v51 }
 0x745   :  { %15123 = vmatprep.subr.mxu1 %v21174_v51  ;;  %15081 = vmatpush3.msra.mxu0 %v22045_v54  ;;  %v22048_v54 = vld [vmem:[#allocation177_spill] sm:$0xff] }
 0x746   :  { %15124 = vmatpush3.msra.mxu1 %v22015_v50  ;;  %15082 = vmatprep.subr.mxu0 %v21174_v51 }
 0x747   :  { %15125 = vmatprep.subr.mxu1 %v21174_v51  ;;  %15083 = vmatpush3.msra.mxu0 %v22046_v43  ;;  %v22049_v43 = vld [vmem:[#allocation181_spill] sm:$0xff] }
 0x748   :  { %15126 = vmatpush3.msra.mxu1 %v22017_v20  ;;  %15084 = vmatprep.subr.mxu0 %v21174_v51 }
 0x749   :  { %15127 = vmatprep.subr.mxu1 %v21174_v51  ;;  %15085 = vmatpush3.msra.mxu0 %v22047_v39  ;;  %v22050_v39 = vld [vmem:[#allocation185_spill] sm:$0xff] }
 0x74a   :  { %15128 = vmatpush3.msra.mxu1 %v22019_v49  ;;  %15086 = vmatprep.subr.mxu0 %v21174_v51  ;;  %v22060_v49 = vld [vmem:[#allocation49_spill] sm:$0xff] }
 0x74b   :  { %15129 = vmatprep.subr.mxu1 %v21174_v51  ;;  %15087 = vmatpush3.msra.mxu0 %v22048_v54  ;;  %v22051_v54 = vld [vmem:[#allocation189_spill] sm:$0xff] }
 0x74c   :  { %15130 = vmatpush3.msra.mxu1 %v22020_v57  ;;  %15088 = vmatprep.subr.mxu0 %v21174_v51  ;;  %v22059_v57 = vld [vmem:[#allocation197_spill] sm:$0xff] }
 0x74d   :  { %15131 = vmatprep.subr.mxu1 %v21174_v51  ;;  %15089 = vmatpush3.msra.mxu0 %v22049_v43  ;;  %v22052_v43 = vld [vmem:[#allocation33_spill] sm:$0xff] }
 0x74e   :  { %15132 = vmatpush3.msra.mxu1 %v22021_v24  ;;  %15090 = vmatprep.subr.mxu0 %v21174_v51  ;;  %v22057_v24 = vld [vmem:[#allocation40_spill] sm:$0xff] }
 0x74f   :  { %15133 = vmatprep.subr.mxu1 %v21174_v51  ;;  %15091 = vmatpush3.msra.mxu0 %v22050_v39  ;;  %v22054_v39 = vld [vmem:[#allocation36_spill] sm:$0xff] }
 0x750   :  { %15134 = vmatpush3.msra.mxu1 %v22022_v40  ;;  %15135 = vmatprep.mubr.msk.f32.mxu1 %vm16060_vm1, %v21174_v51  ;;  %v22056_v40 = vld [vmem:[#allocation195_spill] sm:$0xff] }
 0x751   :  { %15092 = vmatprep.subr.mxu0 %v21174_v51  ;;  %15136 = vmatmul.mubr.f32.vlgmr.msra.gmra.mxu1 %v18767_v14 }
 0x752   :  { %15093 = vmatpush3.msra.mxu0 %v22051_v54  ;;  %15100 = vmatprep.mubr.msk.f32.mxu0 %vm16060_vm1, %v21174_v51  ;;  %v22058_v54 = vld [vmem:[#allocation46_spill] sm:$0xff] }
 0x753   :  { %15094 = vmatprep.subr.mxu0 %v21174_v51  ;;  %8174 = vmatprep.subr.mxu1 %v22052_v43 }
 0x754   :  { %15095 = vmatpush3.msra.mxu0 %v22053_v3  ;;  %8180 = vmatpush1.msra.mxu1 %v22054_v39  ;;  %v22061_v3 = vld [vmem:[#allocation53_spill] sm:$0xff]  ;;  %v22062_v39 = vld [vmem:[#allocation59_spill] sm:$0xff] }
 0x755   :  { %15096 = vmatprep.subr.mxu0 %v21174_v51  ;;  %8186 = vmatprep.subr.mxu1 %v22055_v18  ;;  %v22063_v18 = vld [vmem:[#allocation62_spill] sm:$0xff] }
 0x756   :  { %15097 = vmatpush3.msra.mxu0 %v22056_v40  ;;  %8192 = vmatpush1.msra.mxu1 %v22057_v24  ;;  %v22064_v24 = vld [vmem:[#allocation65_spill] sm:$0xff] }
 0x757   :  { %15098 = vmatprep.subr.mxu0 %v21174_v51  ;;  %8198 = vmatprep.subr.mxu1 %v22058_v54  ;;  %v22065_v54 = vld [vmem:[#allocation69_spill] sm:$0xff] }
 0x758   :  { %15099 = vmatpush3.msra.mxu0 %v22059_v57  ;;  %8204 = vmatpush1.msra.mxu1 %v22060_v49  ;;  %v22066_v49 = vld [vmem:[#allocation75_spill] sm:$0xff] }
 0x759   :  { %15101 = vmatmul.mubr.f32.vlgmr.msra.gmra.mxu0 %v18767_v14  ;;  %8210 = vmatprep.subr.mxu1 %v22061_v3  ;;  %v22067_v14 = vld [vmem:[#allocation78_spill] sm:$0xff] }
 0x75a   :  { %8216 = vmatpush1.msra.mxu1 %v22062_v39  ;;  %8062 = vmatprep.subr.mxu0 %v21951_v13  ;;  %v22068_v39 = vld [vmem:[#allocation81_spill] sm:$0xff] }
 0x75b   :  { %8222 = vmatprep.subr.mxu1 %v22063_v18  ;;  %8064 = vmatpush1.msra.mxu0 %v16162_v11  ;;  %v22069_v18 = vld [vmem:[#allocation85_spill] sm:$0xff] }
 0x75c   :  { %8228 = vmatpush1.msra.mxu1 %v22064_v24  ;;  %8066 = vmatprep.subr.mxu0 %v16164_v12  ;;  %v22070_v24 = vld [vmem:[#allocation91_spill] sm:$0xff] }
 0x75d   :  { %8234 = vmatprep.subr.mxu1 %v22065_v54  ;;  %8068 = vmatpush1.msra.mxu0 %v16169_v16  ;;  %v22071_v54 = vld [vmem:[#allocation94_spill] sm:$0xff] }
 0x75e   :  { %8240 = vmatpush1.msra.mxu1 %v22066_v49  ;;  %8070 = vmatprep.subr.mxu0 %v16171_v17  ;;  %v22072_v49 = vld [vmem:[#allocation97_spill] sm:$0xff] }
 0x75f   :  { %8246 = vmatprep.subr.mxu1 %v22067_v14  ;;  %8072 = vmatpush1.msra.mxu0 %v16181_v22  ;;  %v22073_v14 = vld [vmem:[#allocation101_spill] sm:$0xff] }
 0x760   :  { %8252 = vmatpush1.msra.mxu1 %v22068_v39  ;;  %8074 = vmatprep.subr.mxu0 %v16183_v23  ;;  %v22074_v39 = vld [vmem:[#allocation107_spill] sm:$0xff] }
 0x761   :  { %8258 = vmatprep.subr.mxu1 %v22069_v18  ;;  %8076 = vmatpush1.msra.mxu0 %v16195_v29  ;;  %v22075_v18 = vld [vmem:[#allocation110_spill] sm:$0xff] }
 0x762   :  { %8264 = vmatpush1.msra.mxu1 %v22070_v24  ;;  %8078 = vmatprep.subr.mxu0 %v21366_v32  ;;  %v22076_v24 = vld [vmem:[#allocation113_spill] sm:$0xff] }
 0x763   :  { %8270 = vmatprep.subr.mxu1 %v22071_v54  ;;  %8080 = vmatpush1.msra.mxu0 %v21370_v15  ;;  %v22077_v54 = vld [vmem:[#allocation117_spill] sm:$0xff] }
 0x764   :  { %8276 = vmatpush1.msra.mxu1 %v22072_v49  ;;  %8082 = vmatprep.subr.mxu0 %v21374_v5  ;;  %v22078_v49 = vld [vmem:[#allocation123_spill] sm:$0xff] }
 0x765   :  { %8282 = vmatprep.subr.mxu1 %v22073_v14  ;;  %8084 = vmatpush1.msra.mxu0 %v21376_v38  ;;  %v22079_v14 = vld [vmem:[#allocation126_spill] sm:$0xff] }
 0x766   :  { %8288 = vmatpush1.msra.mxu1 %v22074_v39  ;;  %8086 = vmatprep.subr.mxu0 %v21378_v58  ;;  %v22080_v39 = vld [vmem:[#allocation128_spill] sm:$0xff] }
 0x767   :  { %8294 = vmatprep.subr.mxu1 %v22075_v18  ;;  %8088 = vmatpush1.msra.mxu0 %v21380_v37  ;;  %v22081_v18 = vld [vmem:[#allocation131_spill] sm:$0xff] }
 0x768   :  { %8300 = vmatpush1.msra.mxu1 %v22076_v24  ;;  %8090 = vmatprep.subr.mxu0 %v21382_v6  ;;  %v22082_v24 = vld [vmem:[#allocation133_spill] sm:$0xff] }
 0x769   :  { %8306 = vmatprep.subr.mxu1 %v22077_v54  ;;  %8092 = vmatpush1.msra.mxu0 %v21386_v34  ;;  %v22083_v54 = vld [vmem:[#allocation134_spill] sm:$0xff] }
 0x76a   :  { %8312 = vmatpush1.msra.mxu1 %v22078_v49  ;;  %8094 = vmatprep.subr.mxu0 %v21389_v9  ;;  %v22084_v49 = vld [vmem:[#allocation135_spill] sm:$0xff] }
 0x76b   :  { %8318 = vmatprep.subr.mxu1 %v22079_v14  ;;  %8096 = vmatpush1.msra.mxu0 %v21391_v28  ;;  %v22085_v14 = vld [vmem:[#allocation136_spill] sm:$0xff] }
 0x76c   :  { %8324 = vmatpush1.msra.mxu1 %v22080_v39  ;;  %8098 = vmatprep.subr.mxu0 %v21393_v31  ;;  %v22086_v39 = vld [vmem:[#allocation137_spill] sm:$0xff] }
 0x76d   :  { %8330 = vmatprep.subr.mxu1 %v22081_v18  ;;  %8100 = vmatpush1.msra.mxu0 %v21395_v36 }
 0x76e   :  { %8336 = vmatpush1.msra.mxu1 %v22082_v24  ;;  %8102 = vmatprep.subr.mxu0 %v21397_v55 }
 0x76f   :  { %8342 = vmatprep.subr.mxu1 %v22083_v54  ;;  %8104 = vmatpush1.msra.mxu0 %v21400_v63 }
 0x770   :  { %8348 = vmatpush1.msra.mxu1 %v22084_v49  ;;  %8106 = vmatprep.subr.mxu0 %v21402_v33 }
 0x771   :  { %8354 = vmatprep.subr.mxu1 %v22085_v14  ;;  %8108 = vmatpush1.msra.mxu0 %v21404_v1  ;;  %v6869_v14 = vpop.f32.mrf.mxu1  ;;  %v6637_v49 = vpop.f32.mrf.mxu0 }
 0x772   :  { %8360 = vmatpush1.msra.mxu1 %v22086_v39  ;;  %8110 = vmatprep.subr.mxu0 %v21406_v41  ;;  %v22087_v39 = vld [vmem:[#allocation18_spill] sm:$0xff] }
 0x773   :  { %8393 = vmatprep.mubr.f32.mxu1 %v21174_v51  ;;  %8539 = vmatprep.subr.mxu1 %v21951_v13  ;;  %v6871_v54 = vpop.f32.mrf.mxu1  ;;  %v6639_v24 = vpop.f32.mrf.mxu0 }
 0x774   :  { %8112 = vmatpush1.msra.mxu0 %v21409_v19  ;;  %8157 = vmatprep.mubr.f32.mxu0 %v21174_v51  ;;  %v6872_v57 = vadd.f32 %v6871_v54, %v6639_v24 }
 0x775   :  { %8114 = vmatprep.subr.mxu0 %v21447_v10 }
 0x776   :  { %8116 = vmatpush1.msra.mxu0 %v21941_v44 }
 0x777   :  { %8118 = vmatprep.subr.mxu0 %v21943_v53 }
 0x778   :  { %8120 = vmatpush1.msra.mxu0 %v21945_v7  ;;  %v22089_v7 = vld [vmem:[#allocation211_spill] sm:$0xff] }
 0x779   :  { %8122 = vmatprep.subr.mxu0 %v21947_v30  ;;  %v6870_v30 = vadd.f32 %v6869_v14, %v6637_v49  ;;  %v22090_v14 = vld [vmem:[#allocation203_spill] sm:$0xff] }
 0x77a   :  { %8124 = vmatpush1.msra.mxu0 %v21949_v61 }
 0x77b   :  { %8403 = vmatprep.subr.mxu0 %v22087_v39 }
 0x789   :  { %v7112_v18 = vpop.f32.mrf.mxu1 }
 0x78b   :  { %v7114_v20 = vpop.f32.mrf.mxu1 }
 0x792   :  { %v7006_v3 = vpop.f32.mrf.mxu0 }
 0x793   :  { %v7007_v54 = vadd.f32 %v7006_v3, %v6870_v30 }
 0x794   :  { %v7008_v40 = vpop.f32.mrf.mxu0 }
 0x795   :  { %v7009_v43 = vadd.f32 %v7008_v40, %v6872_v57  ;;  %v7113_v24 = vadd.f32 %v7112_v18, %v7007_v54  ;;  %v22091_v54 = vld [vmem:[#allocation32_spill] sm:$0xff] }
 0x797   :  { %v7115_v50 = vadd.f32 %v7114_v20, %v7009_v43 }
 0x7ab   :  { %v7384_v56 = vpop.f32.mrf.mxu1 }
 0x7ad   :  { %v7386_v45 = vpop.f32.mrf.mxu1 }
 0x7b4   :  { %v7280_v26 = vpop.f32.mrf.mxu0 }
 0x7b5   :  { %v7281_v40 = vadd.f32 %v7280_v26, %v7113_v24 }
 0x7b6   :  { %v7282_v25 = vpop.f32.mrf.mxu0 }
 0x7b7   :  { %v7283_v4 = vadd.f32 %v7282_v25, %v7115_v50  ;;  %v7385_v43 = vadd.f32 %v7384_v56, %v7281_v40 }
 0x7b9   :  { %v7387_v39 = vadd.f32 %v7386_v45, %v7283_v4  ;;  %v8030_v53 = vadd.f32 %v7385_v43, %v22089_v7 }
 0x7bb   :  { %v8031_v59 = vadd.f32 %v7387_v39, %v243_v27  ;;  %v13156_v50 = vmul.f32 -1.442695, %v8030_v53 }
 0x7bd   :  { %15897 = vpow2.f32 %v13156_v50  ;;  %v13157_v8 = vmul.f32 -1.442695, %v8031_v59 }
 0x7bf   :  { %15899 = vpow2.f32 %v13157_v8 }
 0x7ca   :  { %v15898_v45 = vpop.eup %15897 }
 0x7cb   :  { %v8038_v4 = vadd.f32 1.0, %v15898_v45 }
 0x7cd   :  { %v7627_v35 = vpop.f32.mrf.mxu1  ;;  %15901 = vrcp.f32 %v8038_v4 }
 0x7cf   :  { %v14997_v2 = vpop.f32.mrf.mxu1 }
 0x7d6   :  { %v7476_v13 = vpop.f32.mrf.mxu0 }
 0x7d7   :  { %v7628_v27 = vadd.f32 %v7627_v35, %v7476_v13  ;;  %v350_v35 = vadd.f32 %v22091_v54, %v22090_v14  ;;  %v22104_v54 = vld [vmem:[#allocation89_spill] sm:$0xff] }
 0x7d8   :  { %v14962_v61 = vpop.f32.mrf.mxu0  ;;  %v22115_v14 = vld [vmem:[#allocation17_spill] sm:$0xff] }
 0x7d9   :  { %v15900_v61 = vpop.eup %15899 }
 0x7da   :  { %v8039_v39 = vadd.f32 1.0, %v15900_v61  ;;  %v15902_v59 = vpop.eup %15901  ;;  %v22096_v61 = vld [vmem:[#allocation57_spill] sm:$0xff] }
 0x7dc   :  { %15903 = vrcp.f32 %v8039_v39  ;;  %v22100_v39 = vld [vmem:[#allocation73_spill] sm:$0xff] }
 0x7e9   :  { %v15904_v40 = vpop.eup %15903 }
 0x7ea   :  { %v8050_v43 = vmul.f32 %v15904_v40, %v18764_v60  ;;  %v22114_v60 = vld [vmem:[#allocation108_spill] sm:$0xff] }
 0x7ef   :  { %v7820_v57 = vpop.f32.mrf.mxu1 }
 0x7f1   :  { %v15067_v20 = vpop.f32.mrf.mxu1 }
 0x7f8   :  { %v7731_v25 = vpop.f32.mrf.mxu0 }
 0x7f9   :  { %v7732_v30 = vadd.f32 %v7731_v25, %v7628_v27 }
 0x7fa   :  { %v15032_v44 = vpop.f32.mrf.mxu0 }
 0x7fb   :  { %v7821_v18 = vadd.f32 %v7820_v57, %v7732_v30  ;;  %v19200_v44 = vld [vmem:[%s20577_s4] ss:$0 sm:$0xff]  ;;  %v8048_v57 = vsub.f32 1.0, %v15904_v40  ;;  %v22094_v30 = vld [vmem:[#allocation48_spill] sm:$0xff] }
 0x7fc   :  { %v22108_v40 = vld [vmem:[#allocation96_spill] sm:$0xff] }
 0x811   :  { %v8026_v2 = vpop.f32.mrf.mxu1 }
 0x813   :  { %v15137_v49 = vpop.f32.mrf.mxu1 }
 0x814   :  { %v22093_v49 = vld [vmem:[#allocation44_spill] sm:$0xff] }
 0x819   :  { %v7939_v26 = vpop.f32.mrf.mxu0 }
 0x81a   :  { %v7940_v3 = vadd.f32 %v7939_v26, %v7821_v18  ;;  %v22095_v18 = vld [vmem:[#allocation52_spill] sm:$0xff] }
 0x81b   :  { %v15102_v56 = vpop.f32.mrf.mxu0  ;;  %v22097_v26 = vld [vmem:[#allocation60_spill] sm:$0xff] }
 0x81c   :  { %v8027_v7 = vadd.f32 %v8026_v2, %v7940_v3  ;;  %v22098_v3 = vld [vmem:[#allocation64_spill] sm:$0xff] }
 0x81d   :  { %v22099_v56 = vld [vmem:[#allocation68_spill] sm:$0xff] }
 0x81e   :  { %v8044_v53 = vadd.f32 %v19200_v44, %v8027_v7  ;;  %v22101_v7 = vld [vmem:[#allocation76_spill] sm:$0xff] }
 0x820   :  { %v8045_v13 = vmul.f32 %v15902_v59, %v8044_v53  ;;  %v22102_v53 = vld [vmem:[#allocation80_spill] sm:$0xff] }
 0x821   :  { %v22103_v59 = vld [vmem:[#allocation84_spill] sm:$0xff] }
 0x822   :  { %v8046_v24 = vadd.f32 %v8045_v13, %v350_v35  ;;  %v22105_v35 = vld [vmem:[#allocation93_spill] sm:$0xff]  ;;  %v22106_v13 = vld [vmem:[#allocation92_spill] sm:$0xff] }
 0x824   :  { %15905 = vtanh.f32 %v8046_v24  ;;  %v22107_v24 = vld [vmem:[#allocation99_spill] sm:$0xff] }
 0x831   :  { %v15906_v20 = vpop.eup %15905 }
 0x832   :  { %v8049_v25 = vmul.f32 %v15906_v20, %v8048_v57  ;;  %v22109_v57 = vld [vmem:[#allocation103_spill] sm:$0xff]  ;;  %v22110_v20 = vld [vmem:[#allocation100_spill] sm:$0xff] }
 0x834   :  { %v19206_v50 = vadd.f32 %v8050_v43, %v8049_v25  ;;  %v22111_v43 = vld [vmem:[#allocation106_spill] sm:$0xff]  ;;  %v22112_v25 = vld [vmem:[#allocation105_spill] sm:$0xff] }
 0x836   :  { %22092 = vst [vmem:[#allocation67_spill] sm:$0xff] %v19206_v50  ;;  %v19209_v8 = vand.u32 4294901760, %v19206_v50 }
 0x838   :  { %8395 = vmatmul.mubr.f32.vlgmr.msra.gmra.mxu1 %v19209_v8  ;;  %v19214_v45 = vsub.f32 %v19206_v50, %v19209_v8 }
 0x839   :  { %8541 = vmatpush1.msra.mxu1 %v16162_v11  ;;  %8634 = vmatprep.mubr.f32.mxu1 %v21174_v51 }
 0x83a   :  { %8543 = vmatprep.subr.mxu1 %v16164_v12  ;;  %v19220_v4 = vand.u32 4294901760, %v19214_v45 }
 0x83b   :  { %8545 = vmatpush1.msra.mxu1 %v16169_v16 }
 0x83c   :  { %8547 = vmatprep.subr.mxu1 %v16171_v17  ;;  %v8161_v2 = vsub.f32 %v19214_v45, %v19220_v4 }
 0x83d   :  { %8549 = vmatpush1.msra.mxu1 %v16181_v22 }
 0x83e   :  { %8551 = vmatprep.subr.mxu1 %v16183_v23  ;;  %v19228_v27 = vand.u32 4294901760, %v8161_v2  ;;  %v22113_v2 = vld [vmem:[#allocation109_spill] sm:$0xff] }
 0x83f   :  { %8553 = vmatpush1.msra.mxu1 %v16195_v29 }
 0x840   :  { %8555 = vmatprep.subr.mxu1 %v21366_v32  ;;  %8163 = vmatmul.mubr.f32.vlgmr.msra.gmra.mxu0 %v19228_v27 }
 0x841   :  { %8406 = vmatpush1.msra.mxu0 %v21429_v47  ;;  %8557 = vmatpush1.msra.mxu1 %v21370_v15 }
 0x842   :  { %8409 = vmatprep.subr.mxu0 %v21430_v0  ;;  %8559 = vmatprep.subr.mxu1 %v21374_v5 }
 0x843   :  { %8412 = vmatpush1.msra.mxu0 %v21431_v52  ;;  %8561 = vmatpush1.msra.mxu1 %v21376_v38 }
 0x844   :  { %8415 = vmatprep.subr.mxu0 %v21432_v48  ;;  %8563 = vmatprep.subr.mxu1 %v21378_v58 }
 0x845   :  { %8418 = vmatpush1.msra.mxu0 %v21433_v62  ;;  %8565 = vmatpush1.msra.mxu1 %v21380_v37 }
 0x846   :  { %8421 = vmatprep.subr.mxu0 %v21434_v21  ;;  %8567 = vmatprep.subr.mxu1 %v21382_v6 }
 0x847   :  { %8424 = vmatpush1.msra.mxu0 %v21928_v46  ;;  %8569 = vmatpush1.msra.mxu1 %v21386_v34  ;;  %v22188_v46 = vld [vmem:[#allocation143_spill] sm:$0xff] }
 0x848   :  { %8427 = vmatprep.subr.mxu0 %v22093_v49  ;;  %8571 = vmatprep.subr.mxu1 %v21389_v9  ;;  %v22187_v49 = vld [vmem:[#allocation141_spill] sm:$0xff] }
 0x849   :  { %8430 = vmatpush1.msra.mxu0 %v22094_v30  ;;  %8573 = vmatpush1.msra.mxu1 %v21391_v28  ;;  %v22186_v30 = vld [vmem:[#allocation186_spill] sm:$0xff] }
 0x84a   :  { %8433 = vmatprep.subr.mxu0 %v22095_v18  ;;  %8575 = vmatprep.subr.mxu1 %v21393_v31  ;;  %v22182_v18 = vld [vmem:[#allocation201_spill] sm:$0xff] }
 0x84b   :  { %8436 = vmatpush1.msra.mxu0 %v22096_v61  ;;  %8577 = vmatpush1.msra.mxu1 %v21395_v36  ;;  %v22180_v61 = vld [vmem:[#allocation200_spill] sm:$0xff] }
 0x84c   :  { %8439 = vmatprep.subr.mxu0 %v22097_v26  ;;  %8579 = vmatprep.subr.mxu1 %v21397_v55  ;;  %v22178_v26 = vld [vmem:[#allocation199_spill] sm:$0xff] }
 0x84d   :  { %8442 = vmatpush1.msra.mxu0 %v22098_v3  ;;  %8581 = vmatpush1.msra.mxu1 %v21400_v63  ;;  %v22176_v3 = vld [vmem:[#allocation198_spill] sm:$0xff] }
 0x84e   :  { %8445 = vmatprep.subr.mxu0 %v22099_v56  ;;  %8583 = vmatprep.subr.mxu1 %v21402_v33  ;;  %v22174_v56 = vld [vmem:[#allocation196_spill] sm:$0xff] }
 0x84f   :  { %8448 = vmatpush1.msra.mxu0 %v22100_v39  ;;  %8585 = vmatpush1.msra.mxu1 %v21404_v1  ;;  %v22172_v39 = vld [vmem:[#allocation194_spill] sm:$0xff] }
 0x850   :  { %8451 = vmatprep.subr.mxu0 %v22101_v7  ;;  %8587 = vmatprep.subr.mxu1 %v21406_v41  ;;  %v22156_v7 = vld [vmem:[#allocation129_spill] sm:$0xff] }
 0x851   :  { %8454 = vmatpush1.msra.mxu0 %v22102_v53  ;;  %8589 = vmatpush1.msra.mxu1 %v21409_v19  ;;  %v22155_v53 = vld [vmem:[#allocation164_spill] sm:$0xff] }
 0x852   :  { %8457 = vmatprep.subr.mxu0 %v22103_v59  ;;  %8591 = vmatprep.subr.mxu1 %v21447_v10  ;;  %v22153_v59 = vld [vmem:[#allocation124_spill] sm:$0xff] }
 0x853   :  { %8460 = vmatpush1.msra.mxu0 %v22104_v54  ;;  %8593 = vmatpush1.msra.mxu1 %v22105_v35  ;;  %v22121_v54 = vld [vmem:[#allocation125_spill] sm:$0xff] }
 0x854   :  { %8463 = vmatprep.subr.mxu0 %v22106_v13  ;;  %8595 = vmatprep.subr.mxu1 %v22107_v24  ;;  %v22116_v13 = vld [vmem:[#allocation112_spill] sm:$0xff] }
 0x855   :  { %8466 = vmatpush1.msra.mxu0 %v22108_v40  ;;  %8597 = vmatpush1.msra.mxu1 %v22109_v57  ;;  %v22117_v40 = vld [vmem:[#allocation115_spill] sm:$0xff] }
 0x856   :  { %8469 = vmatprep.subr.mxu0 %v22110_v20  ;;  %8599 = vmatprep.subr.mxu1 %v22111_v43  ;;  %v22118_v20 = vld [vmem:[#allocation116_spill] sm:$0xff] }
 0x857   :  { %8472 = vmatpush1.msra.mxu0 %v22112_v25  ;;  %8601 = vmatpush1.msra.mxu1 %v22113_v2  ;;  %v22119_v25 = vld [vmem:[#allocation119_spill] sm:$0xff] }
 0x858   :  { %8475 = vmatprep.subr.mxu0 %v22114_v60  ;;  %8638 = vmatmul.mubr.f32.vlgmr.msra.gmra.mxu1 %v19220_v4  ;;  %v22120_v60 = vld [vmem:[#allocation122_spill] sm:$0xff] }
 0x859   :  { %8813 = vmatprep.subr.mxu1 %v22115_v14  ;;  %8478 = vmatpush1.msra.mxu0 %v22116_v13  ;;  %v22122_v13 = vld [vmem:[#allocation130_spill] sm:$0xff] }
 0x85a   :  { %8815 = vmatpush1.msra.mxu1 %v16162_v11  ;;  %8481 = vmatprep.subr.mxu0 %v22117_v40  ;;  %v22128_v40 = vld [vmem:[#allocation38_spill] sm:$0xff] }
 0x85b   :  { %8817 = vmatprep.subr.mxu1 %v16164_v12  ;;  %8484 = vmatpush1.msra.mxu0 %v22118_v20  ;;  %v22123_v20 = vld [vmem:[#allocation21_spill] sm:$0xff] }
 0x85c   :  { %8819 = vmatpush1.msra.mxu1 %v16169_v16  ;;  %8487 = vmatprep.subr.mxu0 %v22119_v25  ;;  %v22124_v25 = vld [vmem:[#allocation24_spill] sm:$0xff] }
 0x85d   :  { %8821 = vmatprep.subr.mxu1 %v16171_v17  ;;  %8490 = vmatpush1.msra.mxu0 %v22120_v60  ;;  %v22125_v60 = vld [vmem:[#allocation25_spill] sm:$0xff] }
 0x85e   :  { %8823 = vmatpush1.msra.mxu1 %v16181_v22  ;;  %8493 = vmatprep.subr.mxu0 %v22121_v54  ;;  %v22126_v54 = vld [vmem:[#allocation28_spill] sm:$0xff] }
 0x85f   :  { %8825 = vmatprep.subr.mxu1 %v16183_v23  ;;  %8496 = vmatpush1.msra.mxu0 %v22122_v13  ;;  %v22127_v13 = vld [vmem:[#allocation34_spill] sm:$0xff] }
 0x860   :  { %8529 = vmatprep.mubr.f32.mxu0 %v21174_v51  ;;  %8827 = vmatpush1.msra.mxu1 %v16195_v29 }
 0x861   :  { %8532 = vmatmul.mubr.f32.vlgmr.msra.gmra.mxu0 %v19214_v45  ;;  %8647 = vmatprep.subr.mxu0 %v22123_v20  ;;  %v22129_v20 = vld [vmem:[#allocation41_spill] sm:$0xff] }
 0x862   :  { %8829 = vmatprep.subr.mxu1 %v21366_v32  ;;  %8651 = vmatpush1.msra.mxu0 %v22124_v25  ;;  %v22130_v25 = vld [vmem:[#allocation47_spill] sm:$0xff] }
 0x863   :  { %8831 = vmatpush1.msra.mxu1 %v21370_v15  ;;  %8655 = vmatprep.subr.mxu0 %v22125_v60  ;;  %v22131_v60 = vld [vmem:[#allocation50_spill] sm:$0xff] }
 0x864   :  { %8833 = vmatprep.subr.mxu1 %v21374_v5  ;;  %8659 = vmatpush1.msra.mxu0 %v22126_v54  ;;  %v22132_v54 = vld [vmem:[#allocation54_spill] sm:$0xff] }
 0x865   :  { %8835 = vmatpush1.msra.mxu1 %v21376_v38  ;;  %8663 = vmatprep.subr.mxu0 %v22127_v13  ;;  %v22133_v13 = vld [vmem:[#allocation56_spill] sm:$0xff] }
 0x866   :  { %8837 = vmatprep.subr.mxu1 %v21378_v58  ;;  %8667 = vmatpush1.msra.mxu0 %v22128_v40  ;;  %v22134_v40 = vld [vmem:[#allocation63_spill] sm:$0xff] }
 0x867   :  { %8839 = vmatpush1.msra.mxu1 %v21380_v37  ;;  %8671 = vmatprep.subr.mxu0 %v22129_v20  ;;  %v22135_v20 = vld [vmem:[#allocation66_spill] sm:$0xff] }
 0x868   :  { %8841 = vmatprep.subr.mxu1 %v21382_v6  ;;  %8675 = vmatpush1.msra.mxu0 %v22130_v25  ;;  %v22136_v25 = vld [vmem:[#allocation70_spill] sm:$0xff] }
 0x869   :  { %8843 = vmatpush1.msra.mxu1 %v21386_v34  ;;  %8679 = vmatprep.subr.mxu0 %v22131_v60  ;;  %v22137_v60 = vld [vmem:[#allocation72_spill] sm:$0xff] }
 0x86a   :  { %8845 = vmatprep.subr.mxu1 %v21389_v9  ;;  %8683 = vmatpush1.msra.mxu0 %v22132_v54  ;;  %v22138_v54 = vld [vmem:[#allocation79_spill] sm:$0xff] }
 0x86b   :  { %8847 = vmatpush1.msra.mxu1 %v21391_v28  ;;  %8687 = vmatprep.subr.mxu0 %v22133_v13  ;;  %v22139_v13 = vld [vmem:[#allocation82_spill] sm:$0xff] }
 0x86c   :  { %8849 = vmatprep.subr.mxu1 %v21393_v31  ;;  %8691 = vmatpush1.msra.mxu0 %v22134_v40  ;;  %v22140_v40 = vld [vmem:[#allocation86_spill] sm:$0xff] }
 0x86d   :  { %8851 = vmatpush1.msra.mxu1 %v21395_v36  ;;  %8695 = vmatprep.subr.mxu0 %v22135_v20  ;;  %v22141_v20 = vld [vmem:[#allocation88_spill] sm:$0xff] }
 0x86e   :  { %8853 = vmatprep.subr.mxu1 %v21397_v55  ;;  %8699 = vmatpush1.msra.mxu0 %v22136_v25  ;;  %v22142_v25 = vld [vmem:[#allocation95_spill] sm:$0xff] }
 0x86f   :  { %8855 = vmatpush1.msra.mxu1 %v21400_v63  ;;  %8703 = vmatprep.subr.mxu0 %v22137_v60  ;;  %v22143_v60 = vld [vmem:[#allocation98_spill] sm:$0xff] }
 0x870   :  { %8857 = vmatprep.subr.mxu1 %v21402_v33  ;;  %8707 = vmatpush1.msra.mxu0 %v22138_v54  ;;  %v22144_v54 = vld [vmem:[#allocation102_spill] sm:$0xff] }
 0x871   :  { %8859 = vmatpush1.msra.mxu1 %v21404_v1  ;;  %8711 = vmatprep.subr.mxu0 %v22139_v13  ;;  %v22145_v13 = vld [vmem:[#allocation104_spill] sm:$0xff] }
 0x872   :  { %8861 = vmatprep.subr.mxu1 %v21406_v41  ;;  %8715 = vmatpush1.msra.mxu0 %v22140_v40  ;;  %v22146_v40 = vld [vmem:[#allocation111_spill] sm:$0xff] }
 0x873   :  { %8863 = vmatpush1.msra.mxu1 %v21409_v19  ;;  %8719 = vmatprep.subr.mxu0 %v22141_v20  ;;  %v22150_v20 = vld [vmem:[#allocation120_spill] sm:$0xff] }
 0x874   :  { %8865 = vmatprep.subr.mxu1 %v21447_v10  ;;  %8723 = vmatpush1.msra.mxu0 %v22142_v25  ;;  %v22147_v25 = vld [vmem:[#allocation114_spill] sm:$0xff] }
 0x875   :  { %8867 = vmatpush1.msra.mxu1 %v22105_v35  ;;  %8727 = vmatprep.subr.mxu0 %v22143_v60  ;;  %v22148_v60 = vld [vmem:[#allocation118_spill] sm:$0xff] }
 0x876   :  { %8869 = vmatprep.subr.mxu1 %v22107_v24  ;;  %8731 = vmatpush1.msra.mxu0 %v22144_v54  ;;  %v22149_v54 = vld [vmem:[#allocation157_spill] sm:$0xff] }
 0x877   :  { %8871 = vmatpush1.msra.mxu1 %v22109_v57  ;;  %8735 = vmatprep.subr.mxu0 %v22145_v13  ;;  %v22151_v13 = vld [vmem:[#allocation121_spill] sm:$0xff] }
 0x878   :  { %8873 = vmatprep.subr.mxu1 %v22111_v43  ;;  %8739 = vmatpush1.msra.mxu0 %v22146_v40  ;;  %v22152_v40 = vld [vmem:[#allocation160_spill] sm:$0xff] }
 0x879   :  { %8875 = vmatpush1.msra.mxu1 %v22113_v2  ;;  %8908 = vmatprep.mubr.f32.mxu1 %v21174_v51 }
 0x87a   :  { %8743 = vmatprep.subr.mxu0 %v22147_v25  ;;  %8910 = vmatmul.mubr.f32.vlgmr.msra.gmra.mxu1 %v19209_v8  ;;  %v22154_v25 = vld [vmem:[#allocation127_spill] sm:$0xff] }
 0x87b   :  { %15173 = vmatprep.subr.mxu1 %v21174_v51  ;;  %8747 = vmatpush1.msra.mxu0 %v22148_v60  ;;  %v22170_v60 = vld [vmem:[#allocation191_spill] sm:$0xff] }
 0x87c   :  { %15174 = vmatpush3.msra.mxu1 %v22149_v54  ;;  %8751 = vmatprep.subr.mxu0 %v22150_v20  ;;  %v22157_v54 = vld [vmem:[#allocation132_spill] sm:$0xff] }
 0x87d   :  { %15175 = vmatprep.subr.mxu1 %v21174_v51  ;;  %8755 = vmatpush1.msra.mxu0 %v22151_v13  ;;  %v22158_v20 = vld [vmem:[#allocation168_spill] sm:$0xff] }
 0x87e   :  { %15176 = vmatpush3.msra.mxu1 %v22152_v40  ;;  %8759 = vmatprep.subr.mxu0 %v22153_v59  ;;  %v22159_v59 = vld [vmem:[#allocation138_spill] sm:$0xff]  ;;  %v22166_v40 = vld [vmem:[#allocation184_spill] sm:$0xff] }
 0x87f   :  { %15177 = vmatprep.subr.mxu1 %v21174_v51  ;;  %8763 = vmatpush1.msra.mxu0 %v22154_v25  ;;  %v22160_v25 = vld [vmem:[#allocation172_spill] sm:$0xff] }
 0x880   :  { %15178 = vmatpush3.msra.mxu1 %v22155_v53  ;;  %8767 = vmatprep.subr.mxu0 %v22156_v7  ;;  %v22161_v7 = vld [vmem:[#allocation139_spill] sm:$0xff]  ;;  %v22164_v53 = vld [vmem:[#allocation180_spill] sm:$0xff] }
 0x881   :  { %15179 = vmatprep.subr.mxu1 %v21174_v51  ;;  %8771 = vmatpush1.msra.mxu0 %v22157_v54  ;;  %v22162_v54 = vld [vmem:[#allocation176_spill] sm:$0xff] }
 0x882   :  { %8804 = vmatprep.mubr.f32.mxu0 %v21174_v51  ;;  %15180 = vmatpush3.msra.mxu1 %v22158_v20  ;;  %v22163_v20 = vld [vmem:[#allocation140_spill] sm:$0xff] }
 0x883   :  { %8806 = vmatmul.mubr.f32.vlgmr.msra.gmra.mxu0 %v19209_v8  ;;  %15138 = vmatprep.subr.mxu0 %v21174_v51  ;;  %v22168_v13 = vld [vmem:[#allocation188_spill] sm:$0xff] }
 0x884   :  { %15181 = vmatprep.subr.mxu1 %v21174_v51  ;;  %15139 = vmatpush3.msra.mxu0 %v22159_v59 }
 0x885   :  { %15182 = vmatpush3.msra.mxu1 %v22160_v25  ;;  %15140 = vmatprep.subr.mxu0 %v21174_v51  ;;  %v22165_v25 = vld [vmem:[#allocation142_spill] sm:$0xff] }
 0x886   :  { %15183 = vmatprep.subr.mxu1 %v21174_v51  ;;  %15141 = vmatpush3.msra.mxu0 %v22161_v7 }
 0x887   :  { %15184 = vmatpush3.msra.mxu1 %v22162_v54  ;;  %15142 = vmatprep.subr.mxu0 %v21174_v51  ;;  %v22167_v54 = vld [vmem:[#allocation144_spill] sm:$0xff] }
 0x888   :  { %15185 = vmatprep.subr.mxu1 %v21174_v51  ;;  %15143 = vmatpush3.msra.mxu0 %v22163_v20 }
 0x889   :  { %15186 = vmatpush3.msra.mxu1 %v22164_v53  ;;  %15144 = vmatprep.subr.mxu0 %v21174_v51  ;;  %v22169_v53 = vld [vmem:[#allocation149_spill] sm:$0xff] }
 0x88a   :  { %15187 = vmatprep.subr.mxu1 %v21174_v51  ;;  %15145 = vmatpush3.msra.mxu0 %v22165_v25 }
 0x88b   :  { %15188 = vmatpush3.msra.mxu1 %v22166_v40  ;;  %15146 = vmatprep.subr.mxu0 %v21174_v51  ;;  %v22171_v40 = vld [vmem:[#allocation152_spill] sm:$0xff] }
 0x88c   :  { %15189 = vmatprep.subr.mxu1 %v21174_v51  ;;  %15147 = vmatpush3.msra.mxu0 %v22167_v54 }
 0x88d   :  { %15190 = vmatpush3.msra.mxu1 %v22168_v13  ;;  %15148 = vmatprep.subr.mxu0 %v21174_v51  ;;  %v22173_v13 = vld [vmem:[#allocation154_spill] sm:$0xff] }
 0x88e   :  { %15191 = vmatprep.subr.mxu1 %v21174_v51  ;;  %15149 = vmatpush3.msra.mxu0 %v22169_v53 }
 0x88f   :  { %15192 = vmatpush3.msra.mxu1 %v22170_v60  ;;  %15150 = vmatprep.subr.mxu0 %v21174_v51  ;;  %v22175_v60 = vld [vmem:[#allocation158_spill] sm:$0xff] }
 0x890   :  { %15193 = vmatprep.subr.mxu1 %v21174_v51  ;;  %15151 = vmatpush3.msra.mxu0 %v22171_v40 }
 0x891   :  { %15194 = vmatpush3.msra.mxu1 %v22172_v39  ;;  %15152 = vmatprep.subr.mxu0 %v21174_v51  ;;  %v22177_v39 = vld [vmem:[#allocation162_spill] sm:$0xff] }
 0x892   :  { %15195 = vmatprep.subr.mxu1 %v21174_v51  ;;  %15153 = vmatpush3.msra.mxu0 %v22173_v13 }
 0x893   :  { %15196 = vmatpush3.msra.mxu1 %v22174_v56  ;;  %15154 = vmatprep.subr.mxu0 %v21174_v51  ;;  %v22179_v56 = vld [vmem:[#allocation166_spill] sm:$0xff] }
 0x894   :  { %15197 = vmatprep.subr.mxu1 %v21174_v51  ;;  %15155 = vmatpush3.msra.mxu0 %v22175_v60 }
 0x895   :  { %15198 = vmatpush3.msra.mxu1 %v22176_v3  ;;  %15156 = vmatprep.subr.mxu0 %v21174_v51  ;;  %v22181_v3 = vld [vmem:[#allocation170_spill] sm:$0xff] }
 0x896   :  { %15199 = vmatprep.subr.mxu1 %v21174_v51  ;;  %15157 = vmatpush3.msra.mxu0 %v22177_v39 }
 0x897   :  { %15200 = vmatpush3.msra.mxu1 %v22178_v26  ;;  %15158 = vmatprep.subr.mxu0 %v21174_v51  ;;  %v22183_v26 = vld [vmem:[#allocation174_spill] sm:$0xff] }
 0x898   :  { %15201 = vmatprep.subr.mxu1 %v21174_v51  ;;  %15159 = vmatpush3.msra.mxu0 %v22179_v56 }
 0x899   :  { %15202 = vmatpush3.msra.mxu1 %v22180_v61  ;;  %15160 = vmatprep.subr.mxu0 %v21174_v51  ;;  %v22184_v61 = vld [vmem:[#allocation179_spill] sm:$0xff] }
 0x89a   :  { %15203 = vmatprep.subr.mxu1 %v21174_v51  ;;  %15161 = vmatpush3.msra.mxu0 %v22181_v3 }
 0x89b   :  { %15204 = vmatpush3.msra.mxu1 %v22182_v18  ;;  %15205 = vmatprep.mubr.msk.f32.mxu1 %vm16060_vm1, %v21174_v51  ;;  %v22185_v18 = vld [vmem:[#allocation183_spill] sm:$0xff] }
 0x89c   :  { %15162 = vmatprep.subr.mxu0 %v21174_v51  ;;  %15206 = vmatmul.mubr.f32.vlgmr.msra.gmra.mxu1 %v19209_v8 }
 0x89d   :  { %15243 = vmatprep.subr.mxu1 %v21174_v51  ;;  %15163 = vmatpush3.msra.mxu0 %v22183_v26 }
 0x89e   :  { %15244 = vmatpush3.msra.mxu1 %v22159_v59  ;;  %15164 = vmatprep.subr.mxu0 %v21174_v51 }
 0x89f   :  { %15245 = vmatprep.subr.mxu1 %v21174_v51  ;;  %15165 = vmatpush3.msra.mxu0 %v22184_v61 }
 0x8a0   :  { %15246 = vmatpush3.msra.mxu1 %v22161_v7  ;;  %15166 = vmatprep.subr.mxu0 %v21174_v51 }
 0x8a1   :  { %15247 = vmatprep.subr.mxu1 %v21174_v51  ;;  %15167 = vmatpush3.msra.mxu0 %v22185_v18 }
 0x8a2   :  { %15248 = vmatpush3.msra.mxu1 %v22163_v20  ;;  %15168 = vmatprep.subr.mxu0 %v21174_v51 }
 0x8a3   :  { %15249 = vmatprep.subr.mxu1 %v21174_v51  ;;  %15169 = vmatpush3.msra.mxu0 %v22186_v30 }
 0x8a4   :  { %15170 = vmatprep.mubr.msk.f32.mxu0 %vm16060_vm1, %v21174_v51  ;;  %15250 = vmatpush3.msra.mxu1 %v22165_v25 }
 0x8a5   :  { %15171 = vmatmul.mubr.f32.vlgmr.msra.gmra.mxu0 %v19228_v27  ;;  %15208 = vmatprep.subr.mxu0 %v21174_v51  ;;  %v22189_v27 = vld [vmem:[#allocation146_spill] sm:$0xff] }
 0x8a6   :  { %15251 = vmatprep.subr.mxu1 %v21174_v51  ;;  %15209 = vmatpush3.msra.mxu0 %v22187_v49  ;;  %v22190_v49 = vld [vmem:[#allocation147_spill] sm:$0xff] }
 0x8a7   :  { %15252 = vmatpush3.msra.mxu1 %v22167_v54  ;;  %15210 = vmatprep.subr.mxu0 %v21174_v51 }
 0x8a8   :  { %15253 = vmatprep.subr.mxu1 %v21174_v51  ;;  %15211 = vmatpush3.msra.mxu0 %v22188_v46  ;;  %v22191_v46 = vld [vmem:[#allocation150_spill] sm:$0xff] }
 0x8a9   :  { %15254 = vmatpush3.msra.mxu1 %v22169_v53  ;;  %15212 = vmatprep.subr.mxu0 %v21174_v51 }
 0x8aa   :  { %15255 = vmatprep.subr.mxu1 %v21174_v51  ;;  %15213 = vmatpush3.msra.mxu0 %v22189_v27  ;;  %v22192_v27 = vld [vmem:[#allocation155_spill] sm:$0xff] }
 0x8ab   :  { %15256 = vmatpush3.msra.mxu1 %v22171_v40  ;;  %15214 = vmatprep.subr.mxu0 %v21174_v51 }
 0x8ac   :  { %15257 = vmatprep.subr.mxu1 %v21174_v51  ;;  %15215 = vmatpush3.msra.mxu0 %v22190_v49  ;;  %v22193_v49 = vld [vmem:[#allocation159_spill] sm:$0xff] }
 0x8ad   :  { %15258 = vmatpush3.msra.mxu1 %v22173_v13  ;;  %15216 = vmatprep.subr.mxu0 %v21174_v51 }
 0x8ae   :  { %15259 = vmatprep.subr.mxu1 %v21174_v51  ;;  %15217 = vmatpush3.msra.mxu0 %v22191_v46  ;;  %v22194_v46 = vld [vmem:[#allocation163_spill] sm:$0xff] }
 0x8af   :  { %15260 = vmatpush3.msra.mxu1 %v22175_v60  ;;  %15218 = vmatprep.subr.mxu0 %v21174_v51 }
 0x8b0   :  { %15261 = vmatprep.subr.mxu1 %v21174_v51  ;;  %15219 = vmatpush3.msra.mxu0 %v22192_v27  ;;  %v22195_v27 = vld [vmem:[#allocation167_spill] sm:$0xff] }
 0x8b1   :  { %15262 = vmatpush3.msra.mxu1 %v22177_v39  ;;  %15220 = vmatprep.subr.mxu0 %v21174_v51 }
 0x8b2   :  { %15263 = vmatprep.subr.mxu1 %v21174_v51  ;;  %15221 = vmatpush3.msra.mxu0 %v22193_v49  ;;  %v22196_v49 = vld [vmem:[#allocation171_spill] sm:$0xff] }
 0x8b3   :  { %15264 = vmatpush3.msra.mxu1 %v22179_v56  ;;  %15222 = vmatprep.subr.mxu0 %v21174_v51 }
 0x8b4   :  { %15265 = vmatprep.subr.mxu1 %v21174_v51  ;;  %15223 = vmatpush3.msra.mxu0 %v22194_v46  ;;  %v22197_v46 = vld [vmem:[#allocation175_spill] sm:$0xff] }
 0x8b5   :  { %15266 = vmatpush3.msra.mxu1 %v22181_v3  ;;  %15224 = vmatprep.subr.mxu0 %v21174_v51 }
 0x8b6   :  { %15267 = vmatprep.subr.mxu1 %v21174_v51  ;;  %15225 = vmatpush3.msra.mxu0 %v22195_v27  ;;  %v22198_v27 = vld [vmem:[#allocation178_spill] sm:$0xff] }
 0x8b7   :  { %15268 = vmatpush3.msra.mxu1 %v22183_v26  ;;  %15226 = vmatprep.subr.mxu0 %v21174_v51 }
 0x8b8   :  { %15269 = vmatprep.subr.mxu1 %v21174_v51  ;;  %15227 = vmatpush3.msra.mxu0 %v22196_v49  ;;  %v22201_v49 = vld [vmem:[#allocation190_spill] sm:$0xff] }
 0x8b9   :  { %15270 = vmatpush3.msra.mxu1 %v22184_v61  ;;  %15228 = vmatprep.subr.mxu0 %v21174_v51 }
 0x8ba   :  { %15271 = vmatprep.subr.mxu1 %v21174_v51  ;;  %15229 = vmatpush3.msra.mxu0 %v22197_v46  ;;  %v22199_v46 = vld [vmem:[#allocation182_spill] sm:$0xff] }
 0x8bb   :  { %15272 = vmatpush3.msra.mxu1 %v22185_v18  ;;  %15230 = vmatprep.subr.mxu0 %v21174_v51 }
 0x8bc   :  { %15273 = vmatprep.subr.mxu1 %v21174_v51  ;;  %15231 = vmatpush3.msra.mxu0 %v22198_v27  ;;  %v22200_v27 = vld [vmem:[#allocation187_spill] sm:$0xff] }
 0x8bd   :  { %15274 = vmatpush3.msra.mxu1 %v22186_v30  ;;  %15275 = vmatprep.mubr.msk.f32.mxu1 %vm16060_vm1, %v21174_v51 }
 0x8be   :  { %15232 = vmatprep.subr.mxu0 %v21174_v51  ;;  %15276 = vmatmul.mubr.f32.vlgmr.msra.gmra.mxu1 %v19220_v4  ;;  %v22202_v4 = vld [vmem:[#allocation193_spill] sm:$0xff] }
 0x8bf   :  { %15313 = vmatprep.subr.mxu1 %v21174_v51  ;;  %15233 = vmatpush3.msra.mxu0 %v22199_v46  ;;  %v22219_v46 = vld [vmem:[#allocation37_spill] sm:$0xff] }
 0x8c0   :  { %15314 = vmatpush3.msra.mxu1 %v22159_v59  ;;  %15234 = vmatprep.subr.mxu0 %v21174_v51 }
 0x8c1   :  { %15315 = vmatprep.subr.mxu1 %v21174_v51  ;;  %15235 = vmatpush3.msra.mxu0 %v22200_v27  ;;  %v22217_v27 = vld [vmem:[#allocation192_spill] sm:$0xff] }
 0x8c2   :  { %15316 = vmatpush3.msra.mxu1 %v22161_v7  ;;  %15236 = vmatprep.subr.mxu0 %v21174_v51 }
 0x8c3   :  { %15317 = vmatprep.subr.mxu1 %v21174_v51  ;;  %15237 = vmatpush3.msra.mxu0 %v22201_v49  ;;  %v22203_v49 = vld [vmem:[#allocation145_spill] sm:$0xff] }
 0x8c4   :  { %15318 = vmatpush3.msra.mxu1 %v22163_v20  ;;  %15238 = vmatprep.subr.mxu0 %v21174_v51 }
 0x8c5   :  { %15319 = vmatprep.subr.mxu1 %v21174_v51  ;;  %15239 = vmatpush3.msra.mxu0 %v22202_v4  ;;  %v22204_v4 = vld [vmem:[#allocation148_spill] sm:$0xff] }
 0x8c6   :  { %15240 = vmatprep.mubr.msk.f32.mxu0 %vm16060_vm1, %v21174_v51  ;;  %15320 = vmatpush3.msra.mxu1 %v22165_v25 }
 0x8c7   :  { %15241 = vmatmul.mubr.f32.vlgmr.msra.gmra.mxu0 %v19214_v45  ;;  %15278 = vmatprep.subr.mxu0 %v21174_v51  ;;  %v22205_v45 = vld [vmem:[#allocation151_spill] sm:$0xff] }
 0x8c8   :  { %15321 = vmatprep.subr.mxu1 %v21174_v51  ;;  %15279 = vmatpush3.msra.mxu0 %v22203_v49  ;;  %v22206_v49 = vld [vmem:[#allocation153_spill] sm:$0xff] }
 0x8c9   :  { %15322 = vmatpush3.msra.mxu1 %v22167_v54  ;;  %15280 = vmatprep.subr.mxu0 %v21174_v51  ;;  %v22252_v54 = vld [vmem:[#allocation214_spill] sm:$0xff] }
 0x8ca   :  { %15323 = vmatprep.subr.mxu1 %v21174_v51  ;;  %15281 = vmatpush3.msra.mxu0 %v22204_v4  ;;  %v22207_v4 = vld [vmem:[#allocation156_spill] sm:$0xff]  ;;  %v249_v25 = vadd.f32 %v22252_v54, %v17438_v42 }
 0x8cb   :  { %15324 = vmatpush3.msra.mxu1 %v22169_v53  ;;  %15282 = vmatprep.subr.mxu0 %v21174_v51 }
 0x8cc   :  { %15325 = vmatprep.subr.mxu1 %v21174_v51  ;;  %15283 = vmatpush3.msra.mxu0 %v22205_v45  ;;  %v22208_v45 = vld [vmem:[#allocation161_spill] sm:$0xff] }
 0x8cd   :  { %15326 = vmatpush3.msra.mxu1 %v22171_v40  ;;  %15284 = vmatprep.subr.mxu0 %v21174_v51 }
 0x8ce   :  { %15327 = vmatprep.subr.mxu1 %v21174_v51  ;;  %15285 = vmatpush3.msra.mxu0 %v22206_v49  ;;  %v22209_v49 = vld [vmem:[#allocation165_spill] sm:$0xff] }
 0x8cf   :  { %15328 = vmatpush3.msra.mxu1 %v22173_v13  ;;  %15286 = vmatprep.subr.mxu0 %v21174_v51 }
 0x8d0   :  { %15329 = vmatprep.subr.mxu1 %v21174_v51  ;;  %15287 = vmatpush3.msra.mxu0 %v22207_v4  ;;  %v22210_v4 = vld [vmem:[#allocation169_spill] sm:$0xff] }
 0x8d1   :  { %15330 = vmatpush3.msra.mxu1 %v22175_v60  ;;  %15288 = vmatprep.subr.mxu0 %v21174_v51 }
 0x8d2   :  { %15331 = vmatprep.subr.mxu1 %v21174_v51  ;;  %15289 = vmatpush3.msra.mxu0 %v22208_v45  ;;  %v22211_v45 = vld [vmem:[#allocation173_spill] sm:$0xff] }
 0x8d3   :  { %15332 = vmatpush3.msra.mxu1 %v22177_v39  ;;  %15290 = vmatprep.subr.mxu0 %v21174_v51 }
 0x8d4   :  { %15333 = vmatprep.subr.mxu1 %v21174_v51  ;;  %15291 = vmatpush3.msra.mxu0 %v22209_v49  ;;  %v22212_v49 = vld [vmem:[#allocation177_spill] sm:$0xff] }
 0x8d5   :  { %15334 = vmatpush3.msra.mxu1 %v22179_v56  ;;  %15292 = vmatprep.subr.mxu0 %v21174_v51 }
 0x8d6   :  { %15335 = vmatprep.subr.mxu1 %v21174_v51  ;;  %15293 = vmatpush3.msra.mxu0 %v22210_v4  ;;  %v22213_v4 = vld [vmem:[#allocation181_spill] sm:$0xff] }
 0x8d7   :  { %15336 = vmatpush3.msra.mxu1 %v22181_v3  ;;  %15294 = vmatprep.subr.mxu0 %v21174_v51 }
 0x8d8   :  { %15337 = vmatprep.subr.mxu1 %v21174_v51  ;;  %15295 = vmatpush3.msra.mxu0 %v22211_v45  ;;  %v22214_v45 = vld [vmem:[#allocation185_spill] sm:$0xff] }
 0x8d9   :  { %15338 = vmatpush3.msra.mxu1 %v22183_v26  ;;  %15296 = vmatprep.subr.mxu0 %v21174_v51  ;;  %v22224_v26 = vld [vmem:[#allocation49_spill] sm:$0xff] }
 0x8da   :  { %15339 = vmatprep.subr.mxu1 %v21174_v51  ;;  %15297 = vmatpush3.msra.mxu0 %v22212_v49  ;;  %v22215_v49 = vld [vmem:[#allocation189_spill] sm:$0xff] }
 0x8db   :  { %15340 = vmatpush3.msra.mxu1 %v22184_v61  ;;  %15298 = vmatprep.subr.mxu0 %v21174_v51  ;;  %v22223_v61 = vld [vmem:[#allocation197_spill] sm:$0xff] }
 0x8dc   :  { %15341 = vmatprep.subr.mxu1 %v21174_v51  ;;  %15299 = vmatpush3.msra.mxu0 %v22213_v4  ;;  %v22216_v4 = vld [vmem:[#allocation33_spill] sm:$0xff] }
 0x8dd   :  { %15342 = vmatpush3.msra.mxu1 %v22185_v18  ;;  %15300 = vmatprep.subr.mxu0 %v21174_v51  ;;  %v22221_v18 = vld [vmem:[#allocation40_spill] sm:$0xff] }
 0x8de   :  { %15343 = vmatprep.subr.mxu1 %v21174_v51  ;;  %15301 = vmatpush3.msra.mxu0 %v22214_v45  ;;  %v22218_v45 = vld [vmem:[#allocation36_spill] sm:$0xff] }
 0x8df   :  { %15344 = vmatpush3.msra.mxu1 %v22186_v30  ;;  %15345 = vmatprep.mubr.msk.f32.mxu1 %vm16060_vm1, %v21174_v51  ;;  %v22220_v30 = vld [vmem:[#allocation195_spill] sm:$0xff] }
 0x8e0   :  { %15302 = vmatprep.subr.mxu0 %v21174_v51  ;;  %15346 = vmatmul.mubr.f32.vlgmr.msra.gmra.mxu1 %v19209_v8 }
 0x8e1   :  { %15303 = vmatpush3.msra.mxu0 %v22215_v49  ;;  %15310 = vmatprep.mubr.msk.f32.mxu0 %vm16060_vm1, %v21174_v51  ;;  %v22222_v49 = vld [vmem:[#allocation46_spill] sm:$0xff] }
 0x8e2   :  { %15304 = vmatprep.subr.mxu0 %v21174_v51  ;;  %9701 = vmatprep.subr.mxu1 %v22216_v4 }
 0x8e3   :  { %15305 = vmatpush3.msra.mxu0 %v22217_v27  ;;  %9707 = vmatpush1.msra.mxu1 %v22218_v45  ;;  %v22225_v27 = vld [vmem:[#allocation53_spill] sm:$0xff]  ;;  %v22226_v45 = vld [vmem:[#allocation59_spill] sm:$0xff] }
 0x8e4   :  { %15306 = vmatprep.subr.mxu0 %v21174_v51  ;;  %9713 = vmatprep.subr.mxu1 %v22219_v46  ;;  %v22227_v46 = vld [vmem:[#allocation62_spill] sm:$0xff] }
 0x8e5   :  { %15307 = vmatpush3.msra.mxu0 %v22220_v30  ;;  %9719 = vmatpush1.msra.mxu1 %v22221_v18  ;;  %v22228_v18 = vld [vmem:[#allocation65_spill] sm:$0xff] }
 0x8e6   :  { %15308 = vmatprep.subr.mxu0 %v21174_v51  ;;  %9725 = vmatprep.subr.mxu1 %v22222_v49  ;;  %v22229_v49 = vld [vmem:[#allocation69_spill] sm:$0xff] }
 0x8e7   :  { %15309 = vmatpush3.msra.mxu0 %v22223_v61  ;;  %9731 = vmatpush1.msra.mxu1 %v22224_v26  ;;  %v22230_v26 = vld [vmem:[#allocation75_spill] sm:$0xff] }
 0x8e8   :  { %15311 = vmatmul.mubr.f32.vlgmr.msra.gmra.mxu0 %v19209_v8  ;;  %9737 = vmatprep.subr.mxu1 %v22225_v27  ;;  %v22231_v8 = vld [vmem:[#allocation78_spill] sm:$0xff] }
 0x8e9   :  { %9743 = vmatpush1.msra.mxu1 %v22226_v45  ;;  %9589 = vmatprep.subr.mxu0 %v22115_v14  ;;  %v22232_v45 = vld [vmem:[#allocation81_spill] sm:$0xff] }
 0x8ea   :  { %9749 = vmatprep.subr.mxu1 %v22227_v46  ;;  %9591 = vmatpush1.msra.mxu0 %v16162_v11  ;;  %v22233_v46 = vld [vmem:[#allocation85_spill] sm:$0xff] }
 0x8eb   :  { %9755 = vmatpush1.msra.mxu1 %v22228_v18  ;;  %9593 = vmatprep.subr.mxu0 %v16164_v12  ;;  %v22234_v18 = vld [vmem:[#allocation91_spill] sm:$0xff] }
 0x8ec   :  { %9761 = vmatprep.subr.mxu1 %v22229_v49  ;;  %9595 = vmatpush1.msra.mxu0 %v16169_v16  ;;  %v22235_v49 = vld [vmem:[#allocation94_spill] sm:$0xff] }
 0x8ed   :  { %9767 = vmatpush1.msra.mxu1 %v22230_v26  ;;  %9597 = vmatprep.subr.mxu0 %v16171_v17  ;;  %v22236_v26 = vld [vmem:[#allocation97_spill] sm:$0xff] }
 0x8ee   :  { %9773 = vmatprep.subr.mxu1 %v22231_v8  ;;  %9599 = vmatpush1.msra.mxu0 %v16181_v22  ;;  %v22237_v8 = vld [vmem:[#allocation101_spill] sm:$0xff] }
 0x8ef   :  { %9779 = vmatpush1.msra.mxu1 %v22232_v45  ;;  %9601 = vmatprep.subr.mxu0 %v16183_v23  ;;  %v22238_v45 = vld [vmem:[#allocation107_spill] sm:$0xff] }
 0x8f0   :  { %9785 = vmatprep.subr.mxu1 %v22233_v46  ;;  %9603 = vmatpush1.msra.mxu0 %v16195_v29  ;;  %v22239_v46 = vld [vmem:[#allocation110_spill] sm:$0xff] }
 0x8f1   :  { %9791 = vmatpush1.msra.mxu1 %v22234_v18  ;;  %9605 = vmatprep.subr.mxu0 %v21366_v32  ;;  %v22240_v18 = vld [vmem:[#allocation113_spill] sm:$0xff] }
 0x8f2   :  { %9797 = vmatprep.subr.mxu1 %v22235_v49  ;;  %9607 = vmatpush1.msra.mxu0 %v21370_v15  ;;  %v22241_v49 = vld [vmem:[#allocation117_spill] sm:$0xff] }
 0x8f3   :  { %9803 = vmatpush1.msra.mxu1 %v22236_v26  ;;  %9609 = vmatprep.subr.mxu0 %v21374_v5  ;;  %v22242_v26 = vld [vmem:[#allocation123_spill] sm:$0xff] }
 0x8f4   :  { %9809 = vmatprep.subr.mxu1 %v22237_v8  ;;  %9611 = vmatpush1.msra.mxu0 %v21376_v38  ;;  %v22243_v8 = vld [vmem:[#allocation126_spill] sm:$0xff] }
 0x8f5   :  { %9815 = vmatpush1.msra.mxu1 %v22238_v45  ;;  %9613 = vmatprep.subr.mxu0 %v21378_v58  ;;  %v22244_v45 = vld [vmem:[#allocation128_spill] sm:$0xff] }
 0x8f6   :  { %9821 = vmatprep.subr.mxu1 %v22239_v46  ;;  %9615 = vmatpush1.msra.mxu0 %v21380_v37  ;;  %v22245_v46 = vld [vmem:[#allocation131_spill] sm:$0xff] }
 0x8f7   :  { %9827 = vmatpush1.msra.mxu1 %v22240_v18  ;;  %9617 = vmatprep.subr.mxu0 %v21382_v6  ;;  %v22246_v18 = vld [vmem:[#allocation133_spill] sm:$0xff] }
 0x8f8   :  { %9833 = vmatprep.subr.mxu1 %v22241_v49  ;;  %9619 = vmatpush1.msra.mxu0 %v21386_v34  ;;  %v22247_v49 = vld [vmem:[#allocation134_spill] sm:$0xff] }
 0x8f9   :  { %9839 = vmatpush1.msra.mxu1 %v22242_v26  ;;  %9621 = vmatprep.subr.mxu0 %v21389_v9  ;;  %v22248_v26 = vld [vmem:[#allocation135_spill] sm:$0xff] }
 0x8fa   :  { %9845 = vmatprep.subr.mxu1 %v22243_v8  ;;  %9623 = vmatpush1.msra.mxu0 %v21391_v28  ;;  %v22249_v8 = vld [vmem:[#allocation136_spill] sm:$0xff] }
 0x8fb   :  { %9851 = vmatpush1.msra.mxu1 %v22244_v45  ;;  %9625 = vmatprep.subr.mxu0 %v21393_v31  ;;  %v22250_v45 = vld [vmem:[#allocation137_spill] sm:$0xff] }
 0x8fc   :  { %9857 = vmatprep.subr.mxu1 %v22245_v46  ;;  %9627 = vmatpush1.msra.mxu0 %v21395_v36 }
 0x8fd   :  { %9863 = vmatpush1.msra.mxu1 %v22246_v18  ;;  %9629 = vmatprep.subr.mxu0 %v21397_v55 }
 0x8fe   :  { %9869 = vmatprep.subr.mxu1 %v22247_v49  ;;  %9631 = vmatpush1.msra.mxu0 %v21400_v63 }
 0x8ff   :  { %9875 = vmatpush1.msra.mxu1 %v22248_v26  ;;  %9633 = vmatprep.subr.mxu0 %v21402_v33 }
 0x900   :  { %9881 = vmatprep.subr.mxu1 %v22249_v8  ;;  %9635 = vmatpush1.msra.mxu0 %v21404_v1  ;;  %v8396_v8 = vpop.f32.mrf.mxu1  ;;  %v8164_v26 = vpop.f32.mrf.mxu0 }
 0x901   :  { %9887 = vmatpush1.msra.mxu1 %v22250_v45  ;;  %9637 = vmatprep.subr.mxu0 %v21406_v41  ;;  %v22251_v45 = vld [vmem:[#allocation18_spill] sm:$0xff] }
 0x902   :  { %9920 = vmatprep.mubr.f32.mxu1 %v21174_v51  ;;  %10066 = vmatprep.subr.mxu1 %v22115_v14  ;;  %v8398_v49 = vpop.f32.mrf.mxu1  ;;  %v8166_v18 = vpop.f32.mrf.mxu0 }
 0x903   :  { %9639 = vmatpush1.msra.mxu0 %v21409_v19  ;;  %9684 = vmatprep.mubr.f32.mxu0 %v21174_v51  ;;  %v8399_v61 = vadd.f32 %v8398_v49, %v8166_v18 }
 0x904   :  { %9641 = vmatprep.subr.mxu0 %v21447_v10 }
 0x905   :  { %9643 = vmatpush1.msra.mxu0 %v22105_v35 }
 0x906   :  { %9645 = vmatprep.subr.mxu0 %v22107_v24 }
 0x907   :  { %9647 = vmatpush1.msra.mxu0 %v22109_v57  ;;  %v22253_v57 = vld [vmem:[#allocation213_spill] sm:$0xff] }
 0x908   :  { %9649 = vmatprep.subr.mxu0 %v22111_v43  ;;  %v8397_v43 = vadd.f32 %v8396_v8, %v8164_v26  ;;  %v22254_v8 = vld [vmem:[#allocation27_spill] sm:$0xff] }
 0x909   :  { %9651 = vmatpush1.msra.mxu0 %v22113_v2 }
 0x90a   :  { %9930 = vmatprep.subr.mxu0 %v22251_v45 }
 0x918   :  { %v8639_v46 = vpop.f32.mrf.mxu1 }
 0x91a   :  { %v8641_v3 = vpop.f32.mrf.mxu1 }
 0x921   :  { %v8533_v27 = vpop.f32.mrf.mxu0 }
 0x922   :  { %v8534_v49 = vadd.f32 %v8533_v27, %v8397_v43 }
 0x923   :  { %v8535_v30 = vpop.f32.mrf.mxu0 }
 0x924   :  { %v8536_v4 = vadd.f32 %v8535_v30, %v8399_v61  ;;  %v8640_v18 = vadd.f32 %v8639_v46, %v8534_v49 }
 0x926   :  { %v8642_v56 = vadd.f32 %v8641_v3, %v8536_v4 }
 0x93a   :  { %v8911_v39 = vpop.f32.mrf.mxu1 }
 0x93c   :  { %v8913_v53 = vpop.f32.mrf.mxu1 }
 0x943   :  { %v8807_v60 = vpop.f32.mrf.mxu0 }
 0x944   :  { %v8808_v30 = vadd.f32 %v8807_v60, %v8640_v18 }
 0x945   :  { %v8809_v13 = vpop.f32.mrf.mxu0 }
 0x946   :  { %v8810_v40 = vadd.f32 %v8809_v13, %v8642_v56  ;;  %v8912_v4 = vadd.f32 %v8911_v39, %v8808_v30 }
 0x948   :  { %v8914_v45 = vadd.f32 %v8913_v53, %v8810_v40  ;;  %v9557_v24 = vadd.f32 %v8912_v4, %v22253_v57 }
 0x94a   :  { %v9558_v20 = vadd.f32 %v8914_v45, %v249_v25  ;;  %v13158_v13 = vmul.f32 -1.442695, %v9557_v24 }
 0x94c   :  { %15907 = vpow2.f32 %v13158_v13  ;;  %v13159_v54 = vmul.f32 -1.442695, %v9558_v20 }
 0x94e   :  { %15909 = vpow2.f32 %v13159_v54 }
 0x959   :  { %v15908_v53 = vpop.eup %15907 }
 0x95a   :  { %v9565_v40 = vadd.f32 1.0, %v15908_v53  ;;  %v22255_v53 = vld [vmem:[#allocation42_spill] sm:$0xff] }
 0x95b   :  { %v15910_v60 = vpop.eup %15909 }
 0x95c   :  { %v9154_v7 = vpop.f32.mrf.mxu1  ;;  %15911 = vrcp.f32 %v9565_v40  ;;  %v9566_v45 = vadd.f32 1.0, %v15910_v60  ;;  %v22256_v40 = vld [vmem:[#allocation44_spill] sm:$0xff] }
 0x95d   :  { %v22262_v60 = vld [vmem:[#allocation68_spill] sm:$0xff] }
 0x95e   :  { %v15207_v59 = vpop.f32.mrf.mxu1  ;;  %15913 = vrcp.f32 %v9566_v45  ;;  %v22266_v45 = vld [vmem:[#allocation84_spill] sm:$0xff] }
 0x965   :  { %v9003_v14 = vpop.f32.mrf.mxu0 }
 0x966   :  { %v9155_v25 = vadd.f32 %v9154_v7, %v9003_v14 }
 0x967   :  { %v15172_v2 = vpop.f32.mrf.mxu0 }
 0x97e   :  { %v9347_v61 = vpop.f32.mrf.mxu1 }
 0x980   :  { %v15277_v3 = vpop.f32.mrf.mxu1 }
 0x987   :  { %v9258_v56 = vpop.f32.mrf.mxu0 }
 0x988   :  { %v9259_v43 = vadd.f32 %v9258_v56, %v9155_v25  ;;  %v22258_v25 = vld [vmem:[#allocation52_spill] sm:$0xff] }
 0x989   :  { %v15242_v35 = vpop.f32.mrf.mxu0 }
 0x98a   :  { %v9348_v46 = vadd.f32 %v9347_v61, %v9259_v43  ;;  %v15912_v35 = vpop.eup %15911  ;;  %v22260_v43 = vld [vmem:[#allocation60_spill] sm:$0xff] }
 0x98b   :  { %v15914_v18 = vpop.eup %15913 }
 0x98c   :  { %v9575_v30 = vsub.f32 1.0, %v15914_v18  ;;  %v9577_v7 = vmul.f32 %v15914_v18, %v19206_v50  ;;  %v22273_v18 = vld [vmem:[#allocation100_spill] sm:$0xff] }
 0x98d   :  { %v22279_v50 = vld [vmem:[#allocation112_spill] sm:$0xff] }
 0x9a0   :  { %v9553_v59 = vpop.f32.mrf.mxu1 }
 0x9a2   :  { %v15347_v26 = vpop.f32.mrf.mxu1 }
 0x9a3   :  { %v22259_v26 = vld [vmem:[#allocation57_spill] sm:$0xff] }
 0x9a8   :  { %v9466_v2 = vpop.f32.mrf.mxu0 }
 0x9a9   :  { %v9467_v27 = vadd.f32 %v9466_v2, %v9348_v46  ;;  %v22261_v46 = vld [vmem:[#allocation64_spill] sm:$0xff]  ;;  %v22263_v2 = vld [vmem:[#allocation73_spill] sm:$0xff] }
 0x9aa   :  { %v15312_v39 = vpop.f32.mrf.mxu0 }
 0x9ab   :  { %v9554_v57 = vadd.f32 %v9553_v59, %v9467_v27  ;;  %v22257_v59 = vld [vmem:[#allocation48_spill] sm:$0xff] }
 0x9ac   :  { %v22264_v27 = vld [vmem:[#allocation76_spill] sm:$0xff] }
 0x9ad   :  { %v9571_v24 = vadd.f32 %v19200_v44, %v9554_v57  ;;  %v22265_v39 = vld [vmem:[#allocation80_spill] sm:$0xff]  ;;  %v22267_v57 = vld [vmem:[#allocation89_spill] sm:$0xff] }
 0x9af   :  { %v9572_v20 = vmul.f32 %v15912_v35, %v9571_v24  ;;  %v22268_v24 = vld [vmem:[#allocation93_spill] sm:$0xff]  ;;  %v22269_v35 = vld [vmem:[#allocation92_spill] sm:$0xff] }
 0x9b1   :  { %v9573_v49 = vadd.f32 %v9572_v20, %v22254_v8  ;;  %v22270_v20 = vld [vmem:[#allocation99_spill] sm:$0xff]  ;;  %v22271_v8 = vld [vmem:[#allocation96_spill] sm:$0xff] }
 0x9b3   :  { %15915 = vtanh.f32 %v9573_v49  ;;  %v22272_v49 = vld [vmem:[#allocation103_spill] sm:$0xff] }
 0x9c0   :  { %v15916_v14 = vpop.eup %15915 }
 0x9c1   :  { %v9576_v61 = vmul.f32 %v15916_v14, %v9575_v30  ;;  %v22274_v30 = vld [vmem:[#allocation106_spill] sm:$0xff]  ;;  %v22275_v14 = vld [vmem:[#allocation105_spill] sm:$0xff] }
 0x9c3   :  { %v19642_v3 = vadd.f32 %v9577_v7, %v9576_v61  ;;  %v22276_v7 = vld [vmem:[#allocation109_spill] sm:$0xff]  ;;  %v22277_v61 = vld [vmem:[#allocation108_spill] sm:$0xff] }
 0x9c5   :  { %v19645_v4 = vand.u32 4294901760, %v19642_v3 }
 0x9c7   :  { %9922 = vmatmul.mubr.f32.vlgmr.msra.gmra.mxu1 %v19645_v4  ;;  %v19650_v44 = vsub.f32 %v19642_v3, %v19645_v4 }
 0x9c8   :  { %10068 = vmatpush1.msra.mxu1 %v16162_v11  ;;  %10161 = vmatprep.mubr.f32.mxu1 %v21174_v51 }
 0x9c9   :  { %10070 = vmatprep.subr.mxu1 %v16164_v12  ;;  %v19656_v56 = vand.u32 4294901760, %v19650_v44 }
 0x9ca   :  { %10072 = vmatpush1.msra.mxu1 %v16169_v16 }
 0x9cb   :  { %10074 = vmatprep.subr.mxu1 %v16171_v17  ;;  %v9688_v13 = vsub.f32 %v19650_v44, %v19656_v56 }
 0x9cc   :  { %10076 = vmatpush1.msra.mxu1 %v16181_v22 }
 0x9cd   :  { %10078 = vmatprep.subr.mxu1 %v16183_v23  ;;  %v19664_v54 = vand.u32 4294901760, %v9688_v13  ;;  %v22278_v13 = vld [vmem:[#allocation17_spill] sm:$0xff] }
 0x9ce   :  { %10080 = vmatpush1.msra.mxu1 %v16195_v29 }
 0x9cf   :  { %10082 = vmatprep.subr.mxu1 %v21366_v32  ;;  %9690 = vmatmul.mubr.f32.vlgmr.msra.gmra.mxu0 %v19664_v54 }
 0x9d0   :  { %9933 = vmatpush1.msra.mxu0 %v21429_v47  ;;  %10084 = vmatpush1.msra.mxu1 %v21370_v15 }
 0x9d1   :  { %9936 = vmatprep.subr.mxu0 %v21430_v0  ;;  %10086 = vmatprep.subr.mxu1 %v21374_v5 }
 0x9d2   :  { %9939 = vmatpush1.msra.mxu0 %v21431_v52  ;;  %10088 = vmatpush1.msra.mxu1 %v21376_v38 }
 0x9d3   :  { %9942 = vmatprep.subr.mxu0 %v21432_v48  ;;  %10090 = vmatprep.subr.mxu1 %v21378_v58 }
 0x9d4   :  { %9945 = vmatpush1.msra.mxu0 %v21433_v62  ;;  %10092 = vmatpush1.msra.mxu1 %v21380_v37 }
 0x9d5   :  { %9948 = vmatprep.subr.mxu0 %v21434_v21  ;;  %10094 = vmatprep.subr.mxu1 %v21382_v6 }
 0x9d6   :  { %9951 = vmatpush1.msra.mxu0 %v22255_v53  ;;  %10096 = vmatpush1.msra.mxu1 %v21386_v34 }
 0x9d7   :  { %9954 = vmatprep.subr.mxu0 %v22256_v40  ;;  %10098 = vmatprep.subr.mxu1 %v21389_v9  ;;  %v22351_v40 = vld [vmem:[#allocation143_spill] sm:$0xff] }
 0x9d8   :  { %9957 = vmatpush1.msra.mxu0 %v22257_v59  ;;  %10100 = vmatpush1.msra.mxu1 %v21391_v28  ;;  %v22350_v59 = vld [vmem:[#allocation141_spill] sm:$0xff] }
 0x9d9   :  { %9960 = vmatprep.subr.mxu0 %v22258_v25  ;;  %10102 = vmatprep.subr.mxu1 %v21393_v31  ;;  %v22349_v25 = vld [vmem:[#allocation186_spill] sm:$0xff] }
 0x9da   :  { %9963 = vmatpush1.msra.mxu0 %v22259_v26  ;;  %10104 = vmatpush1.msra.mxu1 %v21395_v36  ;;  %v22345_v26 = vld [vmem:[#allocation201_spill] sm:$0xff] }
 0x9db   :  { %9966 = vmatprep.subr.mxu0 %v22260_v43  ;;  %10106 = vmatprep.subr.mxu1 %v21397_v55  ;;  %v22343_v43 = vld [vmem:[#allocation200_spill] sm:$0xff] }
 0x9dc   :  { %9969 = vmatpush1.msra.mxu0 %v22261_v46  ;;  %10108 = vmatpush1.msra.mxu1 %v21400_v63  ;;  %v22341_v46 = vld [vmem:[#allocation199_spill] sm:$0xff] }
 0x9dd   :  { %9972 = vmatprep.subr.mxu0 %v22262_v60  ;;  %10110 = vmatprep.subr.mxu1 %v21402_v33  ;;  %v22339_v60 = vld [vmem:[#allocation198_spill] sm:$0xff] }
 0x9de   :  { %9975 = vmatpush1.msra.mxu0 %v22263_v2  ;;  %10112 = vmatpush1.msra.mxu1 %v21404_v1  ;;  %v22337_v2 = vld [vmem:[#allocation196_spill] sm:$0xff] }
 0x9df   :  { %9978 = vmatprep.subr.mxu0 %v22264_v27  ;;  %10114 = vmatprep.subr.mxu1 %v21406_v41  ;;  %v22335_v27 = vld [vmem:[#allocation194_spill] sm:$0xff] }
 0x9e0   :  { %9981 = vmatpush1.msra.mxu0 %v22265_v39  ;;  %10116 = vmatpush1.msra.mxu1 %v21409_v19  ;;  %v22319_v39 = vld [vmem:[#allocation129_spill] sm:$0xff] }
 0x9e1   :  { %9984 = vmatprep.subr.mxu0 %v22266_v45  ;;  %10118 = vmatprep.subr.mxu1 %v21447_v10  ;;  %v22318_v45 = vld [vmem:[#allocation164_spill] sm:$0xff] }
 0x9e2   :  { %9987 = vmatpush1.msra.mxu0 %v22267_v57  ;;  %10120 = vmatpush1.msra.mxu1 %v22268_v24  ;;  %v22316_v57 = vld [vmem:[#allocation124_spill] sm:$0xff] }
 0x9e3   :  { %9990 = vmatprep.subr.mxu0 %v22269_v35  ;;  %10122 = vmatprep.subr.mxu1 %v22270_v20  ;;  %v22284_v35 = vld [vmem:[#allocation125_spill] sm:$0xff] }
 0x9e4   :  { %9993 = vmatpush1.msra.mxu0 %v22271_v8  ;;  %10124 = vmatpush1.msra.mxu1 %v22272_v49  ;;  %v22280_v8 = vld [vmem:[#allocation115_spill] sm:$0xff] }
 0x9e5   :  { %9996 = vmatprep.subr.mxu0 %v22273_v18  ;;  %10126 = vmatprep.subr.mxu1 %v22274_v30  ;;  %v22281_v18 = vld [vmem:[#allocation116_spill] sm:$0xff] }
 0x9e6   :  { %9999 = vmatpush1.msra.mxu0 %v22275_v14  ;;  %10128 = vmatpush1.msra.mxu1 %v22276_v7  ;;  %v22282_v14 = vld [vmem:[#allocation119_spill] sm:$0xff] }
 0x9e7   :  { %10002 = vmatprep.subr.mxu0 %v22277_v61  ;;  %10165 = vmatmul.mubr.f32.vlgmr.msra.gmra.mxu1 %v19656_v56  ;;  %v22283_v61 = vld [vmem:[#allocation122_spill] sm:$0xff] }
 0x9e8   :  { %10340 = vmatprep.subr.mxu1 %v22278_v13  ;;  %10005 = vmatpush1.msra.mxu0 %v22279_v50  ;;  %v22285_v50 = vld [vmem:[#allocation130_spill] sm:$0xff] }
 0x9e9   :  { %10342 = vmatpush1.msra.mxu1 %v16162_v11  ;;  %10008 = vmatprep.subr.mxu0 %v22280_v8  ;;  %v22291_v8 = vld [vmem:[#allocation38_spill] sm:$0xff] }
 0x9ea   :  { %10344 = vmatprep.subr.mxu1 %v16164_v12  ;;  %10011 = vmatpush1.msra.mxu0 %v22281_v18  ;;  %v22286_v18 = vld [vmem:[#allocation21_spill] sm:$0xff] }
 0x9eb   :  { %10346 = vmatpush1.msra.mxu1 %v16169_v16  ;;  %10014 = vmatprep.subr.mxu0 %v22282_v14  ;;  %v22287_v14 = vld [vmem:[#allocation24_spill] sm:$0xff] }
 0x9ec   :  { %10348 = vmatprep.subr.mxu1 %v16171_v17  ;;  %10017 = vmatpush1.msra.mxu0 %v22283_v61  ;;  %v22288_v61 = vld [vmem:[#allocation25_spill] sm:$0xff] }
 0x9ed   :  { %10350 = vmatpush1.msra.mxu1 %v16181_v22  ;;  %10020 = vmatprep.subr.mxu0 %v22284_v35  ;;  %v22289_v35 = vld [vmem:[#allocation28_spill] sm:$0xff] }
 0x9ee   :  { %10352 = vmatprep.subr.mxu1 %v16183_v23  ;;  %10023 = vmatpush1.msra.mxu0 %v22285_v50  ;;  %v22290_v50 = vld [vmem:[#allocation34_spill] sm:$0xff] }
 0x9ef   :  { %10056 = vmatprep.mubr.f32.mxu0 %v21174_v51  ;;  %10354 = vmatpush1.msra.mxu1 %v16195_v29 }
 0x9f0   :  { %10059 = vmatmul.mubr.f32.vlgmr.msra.gmra.mxu0 %v19650_v44  ;;  %10174 = vmatprep.subr.mxu0 %v22286_v18  ;;  %v22292_v18 = vld [vmem:[#allocation41_spill] sm:$0xff] }
 0x9f1   :  { %10356 = vmatprep.subr.mxu1 %v21366_v32  ;;  %10178 = vmatpush1.msra.mxu0 %v22287_v14  ;;  %v22293_v14 = vld [vmem:[#allocation47_spill] sm:$0xff] }
 0x9f2   :  { %10358 = vmatpush1.msra.mxu1 %v21370_v15  ;;  %10182 = vmatprep.subr.mxu0 %v22288_v61  ;;  %v22294_v61 = vld [vmem:[#allocation50_spill] sm:$0xff] }
 0x9f3   :  { %10360 = vmatprep.subr.mxu1 %v21374_v5  ;;  %10186 = vmatpush1.msra.mxu0 %v22289_v35  ;;  %v22295_v35 = vld [vmem:[#allocation54_spill] sm:$0xff] }
 0x9f4   :  { %10362 = vmatpush1.msra.mxu1 %v21376_v38  ;;  %10190 = vmatprep.subr.mxu0 %v22290_v50  ;;  %v22296_v50 = vld [vmem:[#allocation56_spill] sm:$0xff] }
 0x9f5   :  { %10364 = vmatprep.subr.mxu1 %v21378_v58  ;;  %10194 = vmatpush1.msra.mxu0 %v22291_v8  ;;  %v22297_v8 = vld [vmem:[#allocation63_spill] sm:$0xff] }
 0x9f6   :  { %10366 = vmatpush1.msra.mxu1 %v21380_v37  ;;  %10198 = vmatprep.subr.mxu0 %v22292_v18  ;;  %v22298_v18 = vld [vmem:[#allocation66_spill] sm:$0xff] }
 0x9f7   :  { %10368 = vmatprep.subr.mxu1 %v21382_v6  ;;  %10202 = vmatpush1.msra.mxu0 %v22293_v14  ;;  %v22299_v14 = vld [vmem:[#allocation70_spill] sm:$0xff] }
 0x9f8   :  { %10370 = vmatpush1.msra.mxu1 %v21386_v34  ;;  %10206 = vmatprep.subr.mxu0 %v22294_v61  ;;  %v22300_v61 = vld [vmem:[#allocation72_spill] sm:$0xff] }
 0x9f9   :  { %10372 = vmatprep.subr.mxu1 %v21389_v9  ;;  %10210 = vmatpush1.msra.mxu0 %v22295_v35  ;;  %v22301_v35 = vld [vmem:[#allocation79_spill] sm:$0xff] }
 0x9fa   :  { %10374 = vmatpush1.msra.mxu1 %v21391_v28  ;;  %10214 = vmatprep.subr.mxu0 %v22296_v50  ;;  %v22302_v50 = vld [vmem:[#allocation82_spill] sm:$0xff] }
 0x9fb   :  { %10376 = vmatprep.subr.mxu1 %v21393_v31  ;;  %10218 = vmatpush1.msra.mxu0 %v22297_v8  ;;  %v22303_v8 = vld [vmem:[#allocation86_spill] sm:$0xff] }
 0x9fc   :  { %10378 = vmatpush1.msra.mxu1 %v21395_v36  ;;  %10222 = vmatprep.subr.mxu0 %v22298_v18  ;;  %v22304_v18 = vld [vmem:[#allocation88_spill] sm:$0xff] }
 0x9fd   :  { %10380 = vmatprep.subr.mxu1 %v21397_v55  ;;  %10226 = vmatpush1.msra.mxu0 %v22299_v14  ;;  %v22305_v14 = vld [vmem:[#allocation95_spill] sm:$0xff] }
 0x9fe   :  { %10382 = vmatpush1.msra.mxu1 %v21400_v63  ;;  %10230 = vmatprep.subr.mxu0 %v22300_v61  ;;  %v22306_v61 = vld [vmem:[#allocation98_spill] sm:$0xff] }
 0x9ff   :  { %10384 = vmatprep.subr.mxu1 %v21402_v33  ;;  %10234 = vmatpush1.msra.mxu0 %v22301_v35  ;;  %v22307_v35 = vld [vmem:[#allocation102_spill] sm:$0xff] }
 0xa00   :  { %10386 = vmatpush1.msra.mxu1 %v21404_v1  ;;  %10238 = vmatprep.subr.mxu0 %v22302_v50  ;;  %v22308_v50 = vld [vmem:[#allocation104_spill] sm:$0xff] }
 0xa01   :  { %10388 = vmatprep.subr.mxu1 %v21406_v41  ;;  %10242 = vmatpush1.msra.mxu0 %v22303_v8  ;;  %v22309_v8 = vld [vmem:[#allocation111_spill] sm:$0xff] }
 0xa02   :  { %10390 = vmatpush1.msra.mxu1 %v21409_v19  ;;  %10246 = vmatprep.subr.mxu0 %v22304_v18  ;;  %v22313_v18 = vld [vmem:[#allocation120_spill] sm:$0xff] }
 0xa03   :  { %10392 = vmatprep.subr.mxu1 %v21447_v10  ;;  %10250 = vmatpush1.msra.mxu0 %v22305_v14  ;;  %v22310_v14 = vld [vmem:[#allocation114_spill] sm:$0xff] }
 0xa04   :  { %10394 = vmatpush1.msra.mxu1 %v22268_v24  ;;  %10254 = vmatprep.subr.mxu0 %v22306_v61  ;;  %v22311_v61 = vld [vmem:[#allocation118_spill] sm:$0xff] }
 0xa05   :  { %10396 = vmatprep.subr.mxu1 %v22270_v20  ;;  %10258 = vmatpush1.msra.mxu0 %v22307_v35  ;;  %v22312_v35 = vld [vmem:[#allocation157_spill] sm:$0xff] }
 0xa06   :  { %10398 = vmatpush1.msra.mxu1 %v22272_v49  ;;  %10262 = vmatprep.subr.mxu0 %v22308_v50  ;;  %v22314_v50 = vld [vmem:[#allocation121_spill] sm:$0xff] }
 0xa07   :  { %10400 = vmatprep.subr.mxu1 %v22274_v30  ;;  %10266 = vmatpush1.msra.mxu0 %v22309_v8  ;;  %v22315_v8 = vld [vmem:[#allocation160_spill] sm:$0xff] }
 0xa08   :  { %10402 = vmatpush1.msra.mxu1 %v22276_v7  ;;  %10435 = vmatprep.mubr.f32.mxu1 %v21174_v51 }
 0xa09   :  { %10270 = vmatprep.subr.mxu0 %v22310_v14  ;;  %10437 = vmatmul.mubr.f32.vlgmr.msra.gmra.mxu1 %v19645_v4  ;;  %v22317_v14 = vld [vmem:[#allocation127_spill] sm:$0xff] }
 0xa0a   :  { %15383 = vmatprep.subr.mxu1 %v21174_v51  ;;  %10274 = vmatpush1.msra.mxu0 %v22311_v61  ;;  %v22333_v61 = vld [vmem:[#allocation191_spill] sm:$0xff] }
 0xa0b   :  { %15384 = vmatpush3.msra.mxu1 %v22312_v35  ;;  %10278 = vmatprep.subr.mxu0 %v22313_v18  ;;  %v22320_v35 = vld [vmem:[#allocation132_spill] sm:$0xff] }
 0xa0c   :  { %15385 = vmatprep.subr.mxu1 %v21174_v51  ;;  %10282 = vmatpush1.msra.mxu0 %v22314_v50  ;;  %v22321_v18 = vld [vmem:[#allocation168_spill] sm:$0xff] }
 0xa0d   :  { %15386 = vmatpush3.msra.mxu1 %v22315_v8  ;;  %10286 = vmatprep.subr.mxu0 %v22316_v57  ;;  %v22322_v57 = vld [vmem:[#allocation138_spill] sm:$0xff]  ;;  %v22329_v8 = vld [vmem:[#allocation184_spill] sm:$0xff] }
 0xa0e   :  { %15387 = vmatprep.subr.mxu1 %v21174_v51  ;;  %10290 = vmatpush1.msra.mxu0 %v22317_v14  ;;  %v22323_v14 = vld [vmem:[#allocation172_spill] sm:$0xff] }
 0xa0f   :  { %15388 = vmatpush3.msra.mxu1 %v22318_v45  ;;  %10294 = vmatprep.subr.mxu0 %v22319_v39  ;;  %v22324_v39 = vld [vmem:[#allocation139_spill] sm:$0xff]  ;;  %v22327_v45 = vld [vmem:[#allocation180_spill] sm:$0xff] }
 0xa10   :  { %15389 = vmatprep.subr.mxu1 %v21174_v51  ;;  %10298 = vmatpush1.msra.mxu0 %v22320_v35  ;;  %v22325_v35 = vld [vmem:[#allocation176_spill] sm:$0xff] }
 0xa11   :  { %10331 = vmatprep.mubr.f32.mxu0 %v21174_v51  ;;  %15390 = vmatpush3.msra.mxu1 %v22321_v18  ;;  %v22326_v18 = vld [vmem:[#allocation140_spill] sm:$0xff] }
 0xa12   :  { %10333 = vmatmul.mubr.f32.vlgmr.msra.gmra.mxu0 %v19645_v4  ;;  %15348 = vmatprep.subr.mxu0 %v21174_v51  ;;  %v22331_v50 = vld [vmem:[#allocation188_spill] sm:$0xff] }
 0xa13   :  { %15391 = vmatprep.subr.mxu1 %v21174_v51  ;;  %15349 = vmatpush3.msra.mxu0 %v22322_v57 }
 0xa14   :  { %15392 = vmatpush3.msra.mxu1 %v22323_v14  ;;  %15350 = vmatprep.subr.mxu0 %v21174_v51  ;;  %v22328_v14 = vld [vmem:[#allocation142_spill] sm:$0xff] }
 0xa15   :  { %15393 = vmatprep.subr.mxu1 %v21174_v51  ;;  %15351 = vmatpush3.msra.mxu0 %v22324_v39 }
 0xa16   :  { %15394 = vmatpush3.msra.mxu1 %v22325_v35  ;;  %15352 = vmatprep.subr.mxu0 %v21174_v51  ;;  %v22330_v35 = vld [vmem:[#allocation144_spill] sm:$0xff] }
 0xa17   :  { %15395 = vmatprep.subr.mxu1 %v21174_v51  ;;  %15353 = vmatpush3.msra.mxu0 %v22326_v18 }
 0xa18   :  { %15396 = vmatpush3.msra.mxu1 %v22327_v45  ;;  %15354 = vmatprep.subr.mxu0 %v21174_v51  ;;  %v22332_v45 = vld [vmem:[#allocation149_spill] sm:$0xff] }
 0xa19   :  { %15397 = vmatprep.subr.mxu1 %v21174_v51  ;;  %15355 = vmatpush3.msra.mxu0 %v22328_v14 }
 0xa1a   :  { %15398 = vmatpush3.msra.mxu1 %v22329_v8  ;;  %15356 = vmatprep.subr.mxu0 %v21174_v51  ;;  %v22334_v8 = vld [vmem:[#allocation152_spill] sm:$0xff] }
 0xa1b   :  { %15399 = vmatprep.subr.mxu1 %v21174_v51  ;;  %15357 = vmatpush3.msra.mxu0 %v22330_v35 }
 0xa1c   :  { %15400 = vmatpush3.msra.mxu1 %v22331_v50  ;;  %15358 = vmatprep.subr.mxu0 %v21174_v51  ;;  %v22336_v50 = vld [vmem:[#allocation154_spill] sm:$0xff] }
 0xa1d   :  { %15401 = vmatprep.subr.mxu1 %v21174_v51  ;;  %15359 = vmatpush3.msra.mxu0 %v22332_v45 }
 0xa1e   :  { %15402 = vmatpush3.msra.mxu1 %v22333_v61  ;;  %15360 = vmatprep.subr.mxu0 %v21174_v51  ;;  %v22338_v61 = vld [vmem:[#allocation158_spill] sm:$0xff] }
 0xa1f   :  { %15403 = vmatprep.subr.mxu1 %v21174_v51  ;;  %15361 = vmatpush3.msra.mxu0 %v22334_v8 }
 0xa20   :  { %15404 = vmatpush3.msra.mxu1 %v22335_v27  ;;  %15362 = vmatprep.subr.mxu0 %v21174_v51  ;;  %v22340_v27 = vld [vmem:[#allocation162_spill] sm:$0xff] }
 0xa21   :  { %15405 = vmatprep.subr.mxu1 %v21174_v51  ;;  %15363 = vmatpush3.msra.mxu0 %v22336_v50 }
 0xa22   :  { %15406 = vmatpush3.msra.mxu1 %v22337_v2  ;;  %15364 = vmatprep.subr.mxu0 %v21174_v51  ;;  %v22342_v2 = vld [vmem:[#allocation166_spill] sm:$0xff] }
 0xa23   :  { %15407 = vmatprep.subr.mxu1 %v21174_v51  ;;  %15365 = vmatpush3.msra.mxu0 %v22338_v61 }
 0xa24   :  { %15408 = vmatpush3.msra.mxu1 %v22339_v60  ;;  %15366 = vmatprep.subr.mxu0 %v21174_v51  ;;  %v22344_v60 = vld [vmem:[#allocation170_spill] sm:$0xff] }
 0xa25   :  { %15409 = vmatprep.subr.mxu1 %v21174_v51  ;;  %15367 = vmatpush3.msra.mxu0 %v22340_v27 }
 0xa26   :  { %15410 = vmatpush3.msra.mxu1 %v22341_v46  ;;  %15368 = vmatprep.subr.mxu0 %v21174_v51  ;;  %v22346_v46 = vld [vmem:[#allocation174_spill] sm:$0xff] }
 0xa27   :  { %15411 = vmatprep.subr.mxu1 %v21174_v51  ;;  %15369 = vmatpush3.msra.mxu0 %v22342_v2 }
 0xa28   :  { %15412 = vmatpush3.msra.mxu1 %v22343_v43  ;;  %15370 = vmatprep.subr.mxu0 %v21174_v51  ;;  %v22347_v43 = vld [vmem:[#allocation179_spill] sm:$0xff] }
 0xa29   :  { %15413 = vmatprep.subr.mxu1 %v21174_v51  ;;  %15371 = vmatpush3.msra.mxu0 %v22344_v60 }
 0xa2a   :  { %15414 = vmatpush3.msra.mxu1 %v22345_v26  ;;  %15415 = vmatprep.mubr.msk.f32.mxu1 %vm16060_vm1, %v21174_v51  ;;  %v22348_v26 = vld [vmem:[#allocation183_spill] sm:$0xff] }
 0xa2b   :  { %15372 = vmatprep.subr.mxu0 %v21174_v51  ;;  %15416 = vmatmul.mubr.f32.vlgmr.msra.gmra.mxu1 %v19645_v4 }
 0xa2c   :  { %15453 = vmatprep.subr.mxu1 %v21174_v51  ;;  %15373 = vmatpush3.msra.mxu0 %v22346_v46 }
 0xa2d   :  { %15454 = vmatpush3.msra.mxu1 %v22322_v57  ;;  %15374 = vmatprep.subr.mxu0 %v21174_v51 }
 0xa2e   :  { %15455 = vmatprep.subr.mxu1 %v21174_v51  ;;  %15375 = vmatpush3.msra.mxu0 %v22347_v43 }
 0xa2f   :  { %15456 = vmatpush3.msra.mxu1 %v22324_v39  ;;  %15376 = vmatprep.subr.mxu0 %v21174_v51 }
 0xa30   :  { %15457 = vmatprep.subr.mxu1 %v21174_v51  ;;  %15377 = vmatpush3.msra.mxu0 %v22348_v26 }
 0xa31   :  { %15458 = vmatpush3.msra.mxu1 %v22326_v18  ;;  %15378 = vmatprep.subr.mxu0 %v21174_v51 }
 0xa32   :  { %15459 = vmatprep.subr.mxu1 %v21174_v51  ;;  %15379 = vmatpush3.msra.mxu0 %v22349_v25 }
 0xa33   :  { %15380 = vmatprep.mubr.msk.f32.mxu0 %vm16060_vm1, %v21174_v51  ;;  %15460 = vmatpush3.msra.mxu1 %v22328_v14 }
 0xa34   :  { %15381 = vmatmul.mubr.f32.vlgmr.msra.gmra.mxu0 %v19664_v54  ;;  %15418 = vmatprep.subr.mxu0 %v21174_v51  ;;  %v22352_v54 = vld [vmem:[#allocation146_spill] sm:$0xff] }
 0xa35   :  { %15461 = vmatprep.subr.mxu1 %v21174_v51  ;;  %15419 = vmatpush3.msra.mxu0 %v22350_v59  ;;  %v22353_v59 = vld [vmem:[#allocation147_spill] sm:$0xff] }
 0xa36   :  { %15462 = vmatpush3.msra.mxu1 %v22330_v35  ;;  %15420 = vmatprep.subr.mxu0 %v21174_v51 }
 0xa37   :  { %15463 = vmatprep.subr.mxu1 %v21174_v51  ;;  %15421 = vmatpush3.msra.mxu0 %v22351_v40  ;;  %v22354_v40 = vld [vmem:[#allocation150_spill] sm:$0xff] }
 0xa38   :  { %15464 = vmatpush3.msra.mxu1 %v22332_v45  ;;  %15422 = vmatprep.subr.mxu0 %v21174_v51 }
 0xa39   :  { %15465 = vmatprep.subr.mxu1 %v21174_v51  ;;  %15423 = vmatpush3.msra.mxu0 %v22352_v54  ;;  %v22355_v54 = vld [vmem:[#allocation155_spill] sm:$0xff] }
 0xa3a   :  { %15466 = vmatpush3.msra.mxu1 %v22334_v8  ;;  %15424 = vmatprep.subr.mxu0 %v21174_v51 }
 0xa3b   :  { %15467 = vmatprep.subr.mxu1 %v21174_v51  ;;  %15425 = vmatpush3.msra.mxu0 %v22353_v59  ;;  %v22356_v59 = vld [vmem:[#allocation159_spill] sm:$0xff] }
 0xa3c   :  { %15468 = vmatpush3.msra.mxu1 %v22336_v50  ;;  %15426 = vmatprep.subr.mxu0 %v21174_v51 }
 0xa3d   :  { %15469 = vmatprep.subr.mxu1 %v21174_v51  ;;  %15427 = vmatpush3.msra.mxu0 %v22354_v40  ;;  %v22357_v40 = vld [vmem:[#allocation163_spill] sm:$0xff] }
 0xa3e   :  { %15470 = vmatpush3.msra.mxu1 %v22338_v61  ;;  %15428 = vmatprep.subr.mxu0 %v21174_v51 }
 0xa3f   :  { %15471 = vmatprep.subr.mxu1 %v21174_v51  ;;  %15429 = vmatpush3.msra.mxu0 %v22355_v54  ;;  %v22358_v54 = vld [vmem:[#allocation167_spill] sm:$0xff] }
 0xa40   :  { %15472 = vmatpush3.msra.mxu1 %v22340_v27  ;;  %15430 = vmatprep.subr.mxu0 %v21174_v51 }
 0xa41   :  { %15473 = vmatprep.subr.mxu1 %v21174_v51  ;;  %15431 = vmatpush3.msra.mxu0 %v22356_v59  ;;  %v22359_v59 = vld [vmem:[#allocation171_spill] sm:$0xff] }
 0xa42   :  { %15474 = vmatpush3.msra.mxu1 %v22342_v2  ;;  %15432 = vmatprep.subr.mxu0 %v21174_v51 }
 0xa43   :  { %15475 = vmatprep.subr.mxu1 %v21174_v51  ;;  %15433 = vmatpush3.msra.mxu0 %v22357_v40  ;;  %v22360_v40 = vld [vmem:[#allocation175_spill] sm:$0xff] }
 0xa44   :  { %15476 = vmatpush3.msra.mxu1 %v22344_v60  ;;  %15434 = vmatprep.subr.mxu0 %v21174_v51 }
 0xa45   :  { %15477 = vmatprep.subr.mxu1 %v21174_v51  ;;  %15435 = vmatpush3.msra.mxu0 %v22358_v54  ;;  %v22361_v54 = vld [vmem:[#allocation178_spill] sm:$0xff] }
 0xa46   :  { %15478 = vmatpush3.msra.mxu1 %v22346_v46  ;;  %15436 = vmatprep.subr.mxu0 %v21174_v51 }
 0xa47   :  { %15479 = vmatprep.subr.mxu1 %v21174_v51  ;;  %15437 = vmatpush3.msra.mxu0 %v22359_v59  ;;  %v22364_v59 = vld [vmem:[#allocation190_spill] sm:$0xff] }
 0xa48   :  { %15480 = vmatpush3.msra.mxu1 %v22347_v43  ;;  %15438 = vmatprep.subr.mxu0 %v21174_v51 }
 0xa49   :  { %15481 = vmatprep.subr.mxu1 %v21174_v51  ;;  %15439 = vmatpush3.msra.mxu0 %v22360_v40  ;;  %v22362_v40 = vld [vmem:[#allocation182_spill] sm:$0xff] }
 0xa4a   :  { %15482 = vmatpush3.msra.mxu1 %v22348_v26  ;;  %15440 = vmatprep.subr.mxu0 %v21174_v51 }
 0xa4b   :  { %15483 = vmatprep.subr.mxu1 %v21174_v51  ;;  %15441 = vmatpush3.msra.mxu0 %v22361_v54  ;;  %v22363_v54 = vld [vmem:[#allocation187_spill] sm:$0xff] }
 0xa4c   :  { %15484 = vmatpush3.msra.mxu1 %v22349_v25  ;;  %15485 = vmatprep.mubr.msk.f32.mxu1 %vm16060_vm1, %v21174_v51 }
 0xa4d   :  { %15442 = vmatprep.subr.mxu0 %v21174_v51  ;;  %15486 = vmatmul.mubr.f32.vlgmr.msra.gmra.mxu1 %v19656_v56  ;;  %v22365_v56 = vld [vmem:[#allocation193_spill] sm:$0xff] }
 0xa4e   :  { %15523 = vmatprep.subr.mxu1 %v21174_v51  ;;  %15443 = vmatpush3.msra.mxu0 %v22362_v40  ;;  %v22382_v40 = vld [vmem:[#allocation37_spill] sm:$0xff] }
 0xa4f   :  { %15524 = vmatpush3.msra.mxu1 %v22322_v57  ;;  %15444 = vmatprep.subr.mxu0 %v21174_v51 }
 0xa50   :  { %15525 = vmatprep.subr.mxu1 %v21174_v51  ;;  %15445 = vmatpush3.msra.mxu0 %v22363_v54  ;;  %v22380_v54 = vld [vmem:[#allocation192_spill] sm:$0xff] }
 0xa51   :  { %15526 = vmatpush3.msra.mxu1 %v22324_v39  ;;  %15446 = vmatprep.subr.mxu0 %v21174_v51 }
 0xa52   :  { %15527 = vmatprep.subr.mxu1 %v21174_v51  ;;  %15447 = vmatpush3.msra.mxu0 %v22364_v59  ;;  %v22366_v59 = vld [vmem:[#allocation145_spill] sm:$0xff] }
 0xa53   :  { %15528 = vmatpush3.msra.mxu1 %v22326_v18  ;;  %15448 = vmatprep.subr.mxu0 %v21174_v51 }
 0xa54   :  { %15529 = vmatprep.subr.mxu1 %v21174_v51  ;;  %15449 = vmatpush3.msra.mxu0 %v22365_v56  ;;  %v22367_v56 = vld [vmem:[#allocation148_spill] sm:$0xff] }
 0xa55   :  { %15450 = vmatprep.mubr.msk.f32.mxu0 %vm16060_vm1, %v21174_v51  ;;  %15530 = vmatpush3.msra.mxu1 %v22328_v14 }
 0xa56   :  { %15451 = vmatmul.mubr.f32.vlgmr.msra.gmra.mxu0 %v19650_v44  ;;  %15488 = vmatprep.subr.mxu0 %v21174_v51  ;;  %v22368_v44 = vld [vmem:[#allocation151_spill] sm:$0xff] }
 0xa57   :  { %15531 = vmatprep.subr.mxu1 %v21174_v51  ;;  %15489 = vmatpush3.msra.mxu0 %v22366_v59  ;;  %v22369_v59 = vld [vmem:[#allocation153_spill] sm:$0xff] }
 0xa58   :  { %15532 = vmatpush3.msra.mxu1 %v22330_v35  ;;  %15490 = vmatprep.subr.mxu0 %v21174_v51  ;;  %v22415_v35 = vld [vmem:[#allocation216_spill] sm:$0xff] }
 0xa59   :  { %15533 = vmatprep.subr.mxu1 %v21174_v51  ;;  %15491 = vmatpush3.msra.mxu0 %v22367_v56  ;;  %v22370_v56 = vld [vmem:[#allocation156_spill] sm:$0xff]  ;;  %v255_v14 = vadd.f32 %v22415_v35, %v17438_v42 }
 0xa5a   :  { %15534 = vmatpush3.msra.mxu1 %v22332_v45  ;;  %15492 = vmatprep.subr.mxu0 %v21174_v51 }
 0xa5b   :  { %15535 = vmatprep.subr.mxu1 %v21174_v51  ;;  %15493 = vmatpush3.msra.mxu0 %v22368_v44  ;;  %v22371_v44 = vld [vmem:[#allocation161_spill] sm:$0xff] }
 0xa5c   :  { %15536 = vmatpush3.msra.mxu1 %v22334_v8  ;;  %15494 = vmatprep.subr.mxu0 %v21174_v51 }
 0xa5d   :  { %15537 = vmatprep.subr.mxu1 %v21174_v51  ;;  %15495 = vmatpush3.msra.mxu0 %v22369_v59  ;;  %v22372_v59 = vld [vmem:[#allocation165_spill] sm:$0xff] }
 0xa5e   :  { %15538 = vmatpush3.msra.mxu1 %v22336_v50  ;;  %15496 = vmatprep.subr.mxu0 %v21174_v51 }
 0xa5f   :  { %15539 = vmatprep.subr.mxu1 %v21174_v51  ;;  %15497 = vmatpush3.msra.mxu0 %v22370_v56  ;;  %v22373_v56 = vld [vmem:[#allocation169_spill] sm:$0xff] }
 0xa60   :  { %15540 = vmatpush3.msra.mxu1 %v22338_v61  ;;  %15498 = vmatprep.subr.mxu0 %v21174_v51 }
 0xa61   :  { %15541 = vmatprep.subr.mxu1 %v21174_v51  ;;  %15499 = vmatpush3.msra.mxu0 %v22371_v44  ;;  %v22374_v44 = vld [vmem:[#allocation173_spill] sm:$0xff] }
 0xa62   :  { %15542 = vmatpush3.msra.mxu1 %v22340_v27  ;;  %15500 = vmatprep.subr.mxu0 %v21174_v51 }
 0xa63   :  { %15543 = vmatprep.subr.mxu1 %v21174_v51  ;;  %15501 = vmatpush3.msra.mxu0 %v22372_v59  ;;  %v22375_v59 = vld [vmem:[#allocation177_spill] sm:$0xff] }
 0xa64   :  { %15544 = vmatpush3.msra.mxu1 %v22342_v2  ;;  %15502 = vmatprep.subr.mxu0 %v21174_v51 }
 0xa65   :  { %15545 = vmatprep.subr.mxu1 %v21174_v51  ;;  %15503 = vmatpush3.msra.mxu0 %v22373_v56  ;;  %v22376_v56 = vld [vmem:[#allocation181_spill] sm:$0xff] }
 0xa66   :  { %15546 = vmatpush3.msra.mxu1 %v22344_v60  ;;  %15504 = vmatprep.subr.mxu0 %v21174_v51 }
 0xa67   :  { %15547 = vmatprep.subr.mxu1 %v21174_v51  ;;  %15505 = vmatpush3.msra.mxu0 %v22374_v44  ;;  %v22377_v44 = vld [vmem:[#allocation185_spill] sm:$0xff] }
 0xa68   :  { %15548 = vmatpush3.msra.mxu1 %v22346_v46  ;;  %15506 = vmatprep.subr.mxu0 %v21174_v51  ;;  %v22387_v46 = vld [vmem:[#allocation49_spill] sm:$0xff] }
 0xa69   :  { %15549 = vmatprep.subr.mxu1 %v21174_v51  ;;  %15507 = vmatpush3.msra.mxu0 %v22375_v59  ;;  %v22378_v59 = vld [vmem:[#allocation189_spill] sm:$0xff] }
 0xa6a   :  { %15550 = vmatpush3.msra.mxu1 %v22347_v43  ;;  %15508 = vmatprep.subr.mxu0 %v21174_v51  ;;  %v22386_v43 = vld [vmem:[#allocation197_spill] sm:$0xff] }
 0xa6b   :  { %15551 = vmatprep.subr.mxu1 %v21174_v51  ;;  %15509 = vmatpush3.msra.mxu0 %v22376_v56  ;;  %v22379_v56 = vld [vmem:[#allocation33_spill] sm:$0xff] }
 0xa6c   :  { %15552 = vmatpush3.msra.mxu1 %v22348_v26  ;;  %15510 = vmatprep.subr.mxu0 %v21174_v51  ;;  %v22384_v26 = vld [vmem:[#allocation40_spill] sm:$0xff] }
 0xa6d   :  { %15553 = vmatprep.subr.mxu1 %v21174_v51  ;;  %15511 = vmatpush3.msra.mxu0 %v22377_v44  ;;  %v22381_v44 = vld [vmem:[#allocation36_spill] sm:$0xff] }
 0xa6e   :  { %15554 = vmatpush3.msra.mxu1 %v22349_v25  ;;  %15555 = vmatprep.mubr.msk.f32.mxu1 %vm16060_vm1, %v21174_v51  ;;  %v22383_v25 = vld [vmem:[#allocation195_spill] sm:$0xff] }
 0xa6f   :  { %15512 = vmatprep.subr.mxu0 %v21174_v51  ;;  %15556 = vmatmul.mubr.f32.vlgmr.msra.gmra.mxu1 %v19645_v4 }
 0xa70   :  { %15513 = vmatpush3.msra.mxu0 %v22378_v59  ;;  %15520 = vmatprep.mubr.msk.f32.mxu0 %vm16060_vm1, %v21174_v51  ;;  %v22385_v59 = vld [vmem:[#allocation46_spill] sm:$0xff] }
 0xa71   :  { %15514 = vmatprep.subr.mxu0 %v21174_v51  ;;  %11228 = vmatprep.subr.mxu1 %v22379_v56  ;;  %v22388_v56 = vld [vmem:[#allocation53_spill] sm:$0xff] }
 0xa72   :  { %15515 = vmatpush3.msra.mxu0 %v22380_v54  ;;  %11234 = vmatpush1.msra.mxu1 %v22381_v44  ;;  %v22389_v44 = vld [vmem:[#allocation59_spill] sm:$0xff] }
 0xa73   :  { %15516 = vmatprep.subr.mxu0 %v21174_v51  ;;  %11240 = vmatprep.subr.mxu1 %v22382_v40  ;;  %v22390_v40 = vld [vmem:[#allocation62_spill] sm:$0xff] }
 0xa74   :  { %15517 = vmatpush3.msra.mxu0 %v22383_v25  ;;  %11246 = vmatpush1.msra.mxu1 %v22384_v26  ;;  %v22391_v26 = vld [vmem:[#allocation65_spill] sm:$0xff] }
 0xa75   :  { %15518 = vmatprep.subr.mxu0 %v21174_v51  ;;  %11252 = vmatprep.subr.mxu1 %v22385_v59  ;;  %v22392_v59 = vld [vmem:[#allocation69_spill] sm:$0xff] }
 0xa76   :  { %15519 = vmatpush3.msra.mxu0 %v22386_v43  ;;  %11258 = vmatpush1.msra.mxu1 %v22387_v46  ;;  %v22393_v46 = vld [vmem:[#allocation75_spill] sm:$0xff] }
 0xa77   :  { %15521 = vmatmul.mubr.f32.vlgmr.msra.gmra.mxu0 %v19645_v4  ;;  %11264 = vmatprep.subr.mxu1 %v22388_v56  ;;  %v22394_v4 = vld [vmem:[#allocation78_spill] sm:$0xff]  ;;  %v22395_v56 = vld [vmem:[#allocation81_spill] sm:$0xff] }
 0xa78   :  { %11270 = vmatpush1.msra.mxu1 %v22389_v44  ;;  %11116 = vmatprep.subr.mxu0 %v22278_v13  ;;  %v22396_v44 = vld [vmem:[#allocation85_spill] sm:$0xff] }
 0xa79   :  { %11276 = vmatprep.subr.mxu1 %v22390_v40  ;;  %11118 = vmatpush1.msra.mxu0 %v16162_v11  ;;  %v22397_v40 = vld [vmem:[#allocation91_spill] sm:$0xff] }
 0xa7a   :  { %11282 = vmatpush1.msra.mxu1 %v22391_v26  ;;  %11120 = vmatprep.subr.mxu0 %v16164_v12  ;;  %v22398_v26 = vld [vmem:[#allocation94_spill] sm:$0xff] }
 0xa7b   :  { %11288 = vmatprep.subr.mxu1 %v22392_v59  ;;  %11122 = vmatpush1.msra.mxu0 %v16169_v16  ;;  %v22399_v59 = vld [vmem:[#allocation97_spill] sm:$0xff] }
 0xa7c   :  { %11294 = vmatpush1.msra.mxu1 %v22393_v46  ;;  %11124 = vmatprep.subr.mxu0 %v16171_v17  ;;  %v22400_v46 = vld [vmem:[#allocation101_spill] sm:$0xff] }
 0xa7d   :  { %11300 = vmatprep.subr.mxu1 %v22394_v4  ;;  %11126 = vmatpush1.msra.mxu0 %v16181_v22  ;;  %v22401_v4 = vld [vmem:[#allocation107_spill] sm:$0xff] }
 0xa7e   :  { %11306 = vmatpush1.msra.mxu1 %v22395_v56  ;;  %11128 = vmatprep.subr.mxu0 %v16183_v23  ;;  %v22402_v56 = vld [vmem:[#allocation110_spill] sm:$0xff] }
 0xa7f   :  { %11312 = vmatprep.subr.mxu1 %v22396_v44  ;;  %11130 = vmatpush1.msra.mxu0 %v16195_v29  ;;  %v22403_v44 = vld [vmem:[#allocation113_spill] sm:$0xff] }
 0xa80   :  { %11318 = vmatpush1.msra.mxu1 %v22397_v40  ;;  %11132 = vmatprep.subr.mxu0 %v21366_v32  ;;  %v22404_v40 = vld [vmem:[#allocation117_spill] sm:$0xff] }
 0xa81   :  { %11324 = vmatprep.subr.mxu1 %v22398_v26  ;;  %11134 = vmatpush1.msra.mxu0 %v21370_v15  ;;  %v22405_v26 = vld [vmem:[#allocation123_spill] sm:$0xff] }
 0xa82   :  { %11330 = vmatpush1.msra.mxu1 %v22399_v59  ;;  %11136 = vmatprep.subr.mxu0 %v21374_v5  ;;  %v22406_v59 = vld [vmem:[#allocation126_spill] sm:$0xff] }
 0xa83   :  { %11336 = vmatprep.subr.mxu1 %v22400_v46  ;;  %11138 = vmatpush1.msra.mxu0 %v21376_v38  ;;  %v22407_v46 = vld [vmem:[#allocation128_spill] sm:$0xff] }
 0xa84   :  { %11342 = vmatpush1.msra.mxu1 %v22401_v4  ;;  %11140 = vmatprep.subr.mxu0 %v21378_v58  ;;  %v22408_v4 = vld [vmem:[#allocation131_spill] sm:$0xff] }
 0xa85   :  { %11348 = vmatprep.subr.mxu1 %v22402_v56  ;;  %11142 = vmatpush1.msra.mxu0 %v21380_v37  ;;  %v22409_v56 = vld [vmem:[#allocation133_spill] sm:$0xff] }
 0xa86   :  { %11354 = vmatpush1.msra.mxu1 %v22403_v44  ;;  %11144 = vmatprep.subr.mxu0 %v21382_v6  ;;  %v22410_v44 = vld [vmem:[#allocation134_spill] sm:$0xff] }
 0xa87   :  { %11360 = vmatprep.subr.mxu1 %v22404_v40  ;;  %11146 = vmatpush1.msra.mxu0 %v21386_v34  ;;  %v22411_v40 = vld [vmem:[#allocation135_spill] sm:$0xff] }
 0xa88   :  { %11366 = vmatpush1.msra.mxu1 %v22405_v26  ;;  %11148 = vmatprep.subr.mxu0 %v21389_v9  ;;  %v22412_v26 = vld [vmem:[#allocation136_spill] sm:$0xff] }
 0xa89   :  { %11372 = vmatprep.subr.mxu1 %v22406_v59  ;;  %11150 = vmatpush1.msra.mxu0 %v21391_v28  ;;  %v22413_v59 = vld [vmem:[#allocation137_spill] sm:$0xff] }
 0xa8a   :  { %11378 = vmatpush1.msra.mxu1 %v22407_v46  ;;  %11152 = vmatprep.subr.mxu0 %v21393_v31  ;;  %v22414_v46 = vld [vmem:[#allocation18_spill] sm:$0xff] }
 0xa8b   :  { %11384 = vmatprep.subr.mxu1 %v22408_v4  ;;  %11154 = vmatpush1.msra.mxu0 %v21395_v36  ;;  %v9923_v4 = vpop.f32.mrf.mxu1 }
 0xa8c   :  { %11390 = vmatpush1.msra.mxu1 %v22409_v56  ;;  %11156 = vmatprep.subr.mxu0 %v21397_v55 }
 0xa8d   :  { %11396 = vmatprep.subr.mxu1 %v22410_v44  ;;  %11158 = vmatpush1.msra.mxu0 %v21400_v63  ;;  %v9925_v44 = vpop.f32.mrf.mxu1 }
 0xa8e   :  { %11402 = vmatpush1.msra.mxu1 %v22411_v40  ;;  %11160 = vmatprep.subr.mxu0 %v21402_v33 }
 0xa8f   :  { %11408 = vmatprep.subr.mxu1 %v22412_v26  ;;  %11162 = vmatpush1.msra.mxu0 %v21404_v1  ;;  %v9691_v56 = vpop.f32.mrf.mxu0 }
 0xa90   :  { %11414 = vmatpush1.msra.mxu1 %v22413_v59  ;;  %11164 = vmatprep.subr.mxu0 %v21406_v41 }
 0xa91   :  { %11447 = vmatprep.mubr.f32.mxu1 %v21174_v51  ;;  %11593 = vmatprep.subr.mxu1 %v22278_v13  ;;  %v9693_v40 = vpop.f32.mrf.mxu0 }
 0xa92   :  { %11166 = vmatpush1.msra.mxu0 %v21409_v19  ;;  %11211 = vmatprep.mubr.f32.mxu0 %v21174_v51  ;;  %v9926_v43 = vadd.f32 %v9925_v44, %v9693_v40 }
 0xa93   :  { %11168 = vmatprep.subr.mxu0 %v21447_v10 }
 0xa94   :  { %11170 = vmatpush1.msra.mxu0 %v22268_v24 }
 0xa95   :  { %11172 = vmatprep.subr.mxu0 %v22270_v20 }
 0xa96   :  { %11174 = vmatpush1.msra.mxu0 %v22272_v49  ;;  %v22416_v49 = vld [vmem:[#allocation215_spill] sm:$0xff] }
 0xa97   :  { %11176 = vmatprep.subr.mxu0 %v22274_v30  ;;  %v9924_v30 = vadd.f32 %v9923_v4, %v9691_v56 }
 0xa98   :  { %11178 = vmatpush1.msra.mxu0 %v22276_v7 }
 0xa99   :  { %11457 = vmatprep.subr.mxu0 %v22414_v46 }
 0xaa7   :  { %v10166_v26 = vpop.f32.mrf.mxu1 }
 0xaa9   :  { %v10168_v60 = vpop.f32.mrf.mxu1 }
 0xab0   :  { %v10060_v59 = vpop.f32.mrf.mxu0 }
 0xab1   :  { %v10061_v44 = vadd.f32 %v10060_v59, %v9924_v30 }
 0xab2   :  { %v10062_v25 = vpop.f32.mrf.mxu0 }
 0xab3   :  { %v10063_v54 = vadd.f32 %v10062_v25, %v9926_v43  ;;  %v10167_v40 = vadd.f32 %v10166_v26, %v10061_v44  ;;  %v22418_v44 = vld [vmem:[#allocation45_spill] sm:$0xff] }
 0xab5   :  { %v10169_v2 = vadd.f32 %v10168_v60, %v10063_v54 }
 0xac9   :  { %v10438_v27 = vpop.f32.mrf.mxu1 }
 0xacb   :  { %v10440_v45 = vpop.f32.mrf.mxu1 }
 0xad2   :  { %v10334_v61 = vpop.f32.mrf.mxu0 }
 0xad3   :  { %v10335_v25 = vadd.f32 %v10334_v61, %v10167_v40 }
 0xad4   :  { %v10336_v50 = vpop.f32.mrf.mxu0 }
 0xad5   :  { %v10337_v8 = vadd.f32 %v10336_v50, %v10169_v2  ;;  %v10439_v54 = vadd.f32 %v10438_v27, %v10335_v25 }
 0xad7   :  { %v10441_v46 = vadd.f32 %v10440_v45, %v10337_v8  ;;  %v11084_v20 = vadd.f32 %v10439_v54, %v22416_v49 }
 0xad9   :  { %v11085_v18 = vadd.f32 %v10441_v46, %v255_v14  ;;  %v13160_v2 = vmul.f32 -1.442695, %v11084_v20  ;;  %v22417_v46 = vld [vmem:[#allocation203_spill] sm:$0xff] }
 0xada   :  { %v360_v40 = vadd.f32 %v22418_v44, %v22417_v46  ;;  %v22438_v46 = vld [vmem:[#allocation105_spill] sm:$0xff] }
 0xadb   :  { %15917 = vpow2.f32 %v13160_v2  ;;  %v13161_v35 = vmul.f32 -1.442695, %v11085_v18  ;;  %v22439_v44 = vld [vmem:[#allocation109_spill] sm:$0xff] }
 0xadd   :  { %15919 = vpow2.f32 %v13161_v35 }
 0xae8   :  { %v15918_v45 = vpop.eup %15917 }
 0xae9   :  { %v11092_v8 = vadd.f32 1.0, %v15918_v45 }
 0xaea   :  { %v15920_v61 = vpop.eup %15919 }
 0xaeb   :  { %v10681_v39 = vpop.f32.mrf.mxu1  ;;  %15921 = vrcp.f32 %v11092_v8  ;;  %v11093_v59 = vadd.f32 1.0, %v15920_v61  ;;  %v22429_v61 = vld [vmem:[#allocation84_spill] sm:$0xff] }
 0xaed   :  { %v15417_v57 = vpop.f32.mrf.mxu1  ;;  %15923 = vrcp.f32 %v11093_v59  ;;  %v22433_v59 = vld [vmem:[#allocation99_spill] sm:$0xff] }
 0xaf4   :  { %v10530_v13 = vpop.f32.mrf.mxu0 }
 0xaf5   :  { %v10682_v14 = vadd.f32 %v10681_v39, %v10530_v13 }
 0xaf6   :  { %v15382_v7 = vpop.f32.mrf.mxu0 }
 0xaf8   :  { %v15922_v18 = vpop.eup %15921 }
 0xafa   :  { %v15924_v25 = vpop.eup %15923 }
 0xafb   :  { %v11104_v54 = vmul.f32 %v15924_v25, %v19642_v3 }
 0xb0d   :  { %v10874_v43 = vpop.f32.mrf.mxu1 }
 0xb0f   :  { %v15487_v60 = vpop.f32.mrf.mxu1 }
 0xb16   :  { %v10785_v50 = vpop.f32.mrf.mxu0 }
 0xb17   :  { %v10786_v30 = vadd.f32 %v10785_v50, %v10682_v14 }
 0xb18   :  { %v15452_v24 = vpop.f32.mrf.mxu0 }
 0xb19   :  { %v10875_v4 = vadd.f32 %v10874_v43, %v10786_v30  ;;  %v15939_v24 = vld [vmem:[%s20577_s4] ss:$0 sm:$0xff]  ;;  %v11102_v43 = vsub.f32 1.0, %v15924_v25  ;;  %v22427_v30 = vld [vmem:[#allocation76_spill] sm:$0xff]  ;;  %v22443_v25 = vld [vmem:[#allocation115_spill] sm:$0xff] }
 0xb2f   :  { %v11080_v57 = vpop.f32.mrf.mxu1 }
 0xb31   :  { %v15557_v7 = vpop.f32.mrf.mxu1 }
 0xb32   :  { %v22426_v7 = vld [vmem:[#allocation73_spill] sm:$0xff] }
 0xb37   :  { %v10993_v56 = vpop.f32.mrf.mxu0 }
 0xb38   :  { %v10994_v26 = vadd.f32 %v10993_v56, %v10875_v4  ;;  %v22428_v4 = vld [vmem:[#allocation80_spill] sm:$0xff]  ;;  %v22430_v56 = vld [vmem:[#allocation89_spill] sm:$0xff] }
 0xb39   :  { %v15522_v27 = vpop.f32.mrf.mxu0 }
 0xb3a   :  { %v11081_v49 = vadd.f32 %v11080_v57, %v10994_v26  ;;  %v22431_v26 = vld [vmem:[#allocation93_spill] sm:$0xff]  ;;  %v22432_v27 = vld [vmem:[#allocation92_spill] sm:$0xff] }
 0xb3c   :  { %v11098_v20 = vadd.f32 %v15939_v24, %v11081_v49  ;;  %v22434_v49 = vld [vmem:[#allocation96_spill] sm:$0xff]  ;;  %v22435_v24 = vld [vmem:[#allocation103_spill] sm:$0xff] }
 0xb3e   :  { %v11099_v39 = vmul.f32 %v15922_v18, %v11098_v20  ;;  %v22436_v20 = vld [vmem:[#allocation100_spill] sm:$0xff]  ;;  %v22437_v18 = vld [vmem:[#allocation106_spill] sm:$0xff] }
 0xb40   :  { %v11100_v13 = vadd.f32 %v11099_v39, %v360_v40  ;;  %v22440_v40 = vld [vmem:[#allocation108_spill] sm:$0xff]  ;;  %v22441_v39 = vld [vmem:[#allocation17_spill] sm:$0xff] }
 0xb42   :  { %15925 = vtanh.f32 %v11100_v13  ;;  %v22442_v13 = vld [vmem:[#allocation112_spill] sm:$0xff] }
 0xb4f   :  { %v15926_v60 = vpop.eup %15925 }
 0xb50   :  { %v11103_v50 = vmul.f32 %v15926_v60, %v11102_v43  ;;  %v22444_v43 = vld [vmem:[#allocation116_spill] sm:$0xff]  ;;  %v22445_v60 = vld [vmem:[#allocation119_spill] sm:$0xff] }
 0xb52   :  { %v20081_v2 = vadd.f32 %v11104_v54, %v11103_v50  ;;  %v22446_v54 = vld [vmem:[#allocation122_spill] sm:$0xff]  ;;  %v22447_v50 = vld [vmem:[#allocation125_spill] sm:$0xff] }
 0xb54   :  { %v20084_v35 = vand.u32 4294901760, %v20081_v2 }
 0xb56   :  { %11449 = vmatmul.mubr.f32.vlgmr.msra.gmra.mxu1 %v20084_v35  ;;  %v20089_v45 = vsub.f32 %v20081_v2, %v20084_v35 }
 0xb57   :  { %11595 = vmatpush1.msra.mxu1 %v16162_v11  ;;  %11688 = vmatprep.mubr.f32.mxu1 %v21174_v51 }
 0xb58   :  { %11597 = vmatprep.subr.mxu1 %v16164_v12  ;;  %v20095_v8 = vand.u32 4294901760, %v20089_v45 }
 0xb59   :  { %11599 = vmatpush1.msra.mxu1 %v16169_v16 }
 0xb5a   :  { %11601 = vmatprep.subr.mxu1 %v16171_v17  ;;  %v11215_v57 = vsub.f32 %v20089_v45, %v20095_v8 }
 0xb5b   :  { %11603 = vmatpush1.msra.mxu1 %v16181_v22 }
 0xb5c   :  { %11605 = vmatprep.subr.mxu1 %v16183_v23  ;;  %v20103_v14 = vand.u32 4294901760, %v11215_v57  ;;  %v22474_v57 = vld [vmem:[#allocation118_spill] sm:$0xff] }
 0xb5d   :  { %11607 = vmatpush1.msra.mxu1 %v16195_v29 }
 0xb5e   :  { %11609 = vmatprep.subr.mxu1 %v21366_v32  ;;  %11217 = vmatmul.mubr.f32.vlgmr.msra.gmra.mxu0 %v20103_v14 }
 0xb5f   :  { %11460 = vmatpush1.msra.mxu0 %v21429_v47  ;;  %11611 = vmatpush1.msra.mxu1 %v21370_v15  ;;  %v22419_v47 = vld [vmem:[#allocation44_spill] sm:$0xff] }
 0xb60   :  { %11463 = vmatprep.subr.mxu0 %v21430_v0  ;;  %11613 = vmatprep.subr.mxu1 %v21374_v5  ;;  %v22420_v0 = vld [vmem:[#allocation48_spill] sm:$0xff] }
 0xb61   :  { %11466 = vmatpush1.msra.mxu0 %v21431_v52  ;;  %11615 = vmatpush1.msra.mxu1 %v21376_v38  ;;  %v22421_v52 = vld [vmem:[#allocation52_spill] sm:$0xff] }
 0xb62   :  { %11469 = vmatprep.subr.mxu0 %v21432_v48  ;;  %11617 = vmatprep.subr.mxu1 %v21378_v58  ;;  %v22422_v48 = vld [vmem:[#allocation57_spill] sm:$0xff] }
 0xb63   :  { %11472 = vmatpush1.msra.mxu0 %v21433_v62  ;;  %11619 = vmatpush1.msra.mxu1 %v21380_v37  ;;  %v22423_v62 = vld [vmem:[#allocation60_spill] sm:$0xff] }
 0xb64   :  { %11475 = vmatprep.subr.mxu0 %v21434_v21  ;;  %11621 = vmatprep.subr.mxu1 %v21382_v6  ;;  %v22424_v21 = vld [vmem:[#allocation64_spill] sm:$0xff] }
 0xb65   :  { %11478 = vmatpush1.msra.mxu0 %v22255_v53  ;;  %11623 = vmatpush1.msra.mxu1 %v21386_v34  ;;  %v22425_v53 = vld [vmem:[#allocation68_spill] sm:$0xff] }
 0xb66   :  { %11481 = vmatprep.subr.mxu0 %v22419_v47  ;;  %11625 = vmatprep.subr.mxu1 %v21389_v9  ;;  %v22475_v47 = vld [vmem:[#allocation157_spill] sm:$0xff] }
 0xb67   :  { %11484 = vmatpush1.msra.mxu0 %v22420_v0  ;;  %11627 = vmatpush1.msra.mxu1 %v21391_v28  ;;  %v22476_v0 = vld [vmem:[#allocation120_spill] sm:$0xff] }
 0xb68   :  { %11487 = vmatprep.subr.mxu0 %v22421_v52  ;;  %11629 = vmatprep.subr.mxu1 %v21393_v31  ;;  %v22477_v52 = vld [vmem:[#allocation121_spill] sm:$0xff] }
 0xb69   :  { %11490 = vmatpush1.msra.mxu0 %v22422_v48  ;;  %11631 = vmatpush1.msra.mxu1 %v21395_v36  ;;  %v22478_v48 = vld [vmem:[#allocation160_spill] sm:$0xff] }
 0xb6a   :  { %11493 = vmatprep.subr.mxu0 %v22423_v62  ;;  %11633 = vmatprep.subr.mxu1 %v21397_v55  ;;  %v22479_v62 = vld [vmem:[#allocation124_spill] sm:$0xff] }
 0xb6b   :  { %11496 = vmatpush1.msra.mxu0 %v22424_v21  ;;  %11635 = vmatpush1.msra.mxu1 %v21400_v63  ;;  %v22480_v21 = vld [vmem:[#allocation127_spill] sm:$0xff] }
 0xb6c   :  { %11499 = vmatprep.subr.mxu0 %v22425_v53  ;;  %11637 = vmatprep.subr.mxu1 %v21402_v33  ;;  %v22481_v53 = vld [vmem:[#allocation164_spill] sm:$0xff] }
 0xb6d   :  { %11502 = vmatpush1.msra.mxu0 %v22426_v7  ;;  %11639 = vmatpush1.msra.mxu1 %v21404_v1  ;;  %v22482_v7 = vld [vmem:[#allocation129_spill] sm:$0xff] }
 0xb6e   :  { %11505 = vmatprep.subr.mxu0 %v22427_v30  ;;  %11641 = vmatprep.subr.mxu1 %v21406_v41  ;;  %v22483_v30 = vld [vmem:[#allocation132_spill] sm:$0xff] }
 0xb6f   :  { %11508 = vmatpush1.msra.mxu0 %v22428_v4  ;;  %11643 = vmatpush1.msra.mxu1 %v21409_v19  ;;  %v22484_v4 = vld [vmem:[#allocation168_spill] sm:$0xff] }
 0xb70   :  { %11511 = vmatprep.subr.mxu0 %v22429_v61  ;;  %11645 = vmatprep.subr.mxu1 %v21447_v10  ;;  %v22485_v61 = vld [vmem:[#allocation138_spill] sm:$0xff] }
 0xb71   :  { %11514 = vmatpush1.msra.mxu0 %v22430_v56  ;;  %11647 = vmatpush1.msra.mxu1 %v22431_v26  ;;  %v22486_v56 = vld [vmem:[#allocation172_spill] sm:$0xff] }
 0xb72   :  { %11517 = vmatprep.subr.mxu0 %v22432_v27  ;;  %11649 = vmatprep.subr.mxu1 %v22433_v59  ;;  %v22488_v27 = vld [vmem:[#allocation176_spill] sm:$0xff] }
 0xb73   :  { %11520 = vmatpush1.msra.mxu0 %v22434_v49  ;;  %11651 = vmatpush1.msra.mxu1 %v22435_v24  ;;  %v22490_v49 = vld [vmem:[#allocation180_spill] sm:$0xff] }
 0xb74   :  { %11523 = vmatprep.subr.mxu0 %v22436_v20  ;;  %11653 = vmatprep.subr.mxu1 %v22437_v18  ;;  %v22492_v20 = vld [vmem:[#allocation184_spill] sm:$0xff] }
 0xb75   :  { %11526 = vmatpush1.msra.mxu0 %v22438_v46  ;;  %11655 = vmatpush1.msra.mxu1 %v22439_v44  ;;  %v22494_v46 = vld [vmem:[#allocation188_spill] sm:$0xff] }
 0xb76   :  { %11529 = vmatprep.subr.mxu0 %v22440_v40  ;;  %11692 = vmatmul.mubr.f32.vlgmr.msra.gmra.mxu1 %v20095_v8  ;;  %v22496_v40 = vld [vmem:[#allocation191_spill] sm:$0xff] }
 0xb77   :  { %11867 = vmatprep.subr.mxu1 %v22441_v39  ;;  %11532 = vmatpush1.msra.mxu0 %v22442_v13  ;;  %v22497_v39 = vld [vmem:[#allocation152_spill] sm:$0xff]  ;;  %v22498_v13 = vld [vmem:[#allocation194_spill] sm:$0xff] }
 0xb78   :  { %11869 = vmatpush1.msra.mxu1 %v16162_v11  ;;  %11535 = vmatprep.subr.mxu0 %v22443_v25  ;;  %v22448_v11 = vld [vmem:[#allocation130_spill] sm:$0xff] }
 0xb79   :  { %11871 = vmatprep.subr.mxu1 %v16164_v12  ;;  %11538 = vmatpush1.msra.mxu0 %v22444_v43  ;;  %v22449_v12 = vld [vmem:[#allocation21_spill] sm:$0xff]  ;;  %v22499_v25 = vld [vmem:[#allocation154_spill] sm:$0xff]  ;;  %v22500_v43 = vld [vmem:[#allocation196_spill] sm:$0xff] }
 0xb7a   :  { %11873 = vmatpush1.msra.mxu1 %v16169_v16  ;;  %11541 = vmatprep.subr.mxu0 %v22445_v60  ;;  %v22450_v16 = vld [vmem:[#allocation24_spill] sm:$0xff]  ;;  %v22501_v60 = vld [vmem:[#allocation158_spill] sm:$0xff] }
 0xb7b   :  { %11875 = vmatprep.subr.mxu1 %v16171_v17  ;;  %11544 = vmatpush1.msra.mxu0 %v22446_v54  ;;  %v22451_v17 = vld [vmem:[#allocation25_spill] sm:$0xff]  ;;  %v22502_v54 = vld [vmem:[#allocation198_spill] sm:$0xff] }
 0xb7c   :  { %11877 = vmatpush1.msra.mxu1 %v16181_v22  ;;  %11547 = vmatprep.subr.mxu0 %v22447_v50  ;;  %v22452_v22 = vld [vmem:[#allocation28_spill] sm:$0xff]  ;;  %v22503_v50 = vld [vmem:[#allocation162_spill] sm:$0xff] }
 0xb7d   :  { %11879 = vmatprep.subr.mxu1 %v16183_v23  ;;  %11550 = vmatpush1.msra.mxu0 %v22448_v11  ;;  %v22453_v23 = vld [vmem:[#allocation34_spill] sm:$0xff]  ;;  %v22504_v11 = vld [vmem:[#allocation199_spill] sm:$0xff] }
 0xb7e   :  { %11583 = vmatprep.mubr.f32.mxu0 %v21174_v51  ;;  %11881 = vmatpush1.msra.mxu1 %v16195_v29  ;;  %v22454_v29 = vld [vmem:[#allocation38_spill] sm:$0xff] }
 0xb7f   :  { %11586 = vmatmul.mubr.f32.vlgmr.msra.gmra.mxu0 %v20089_v45  ;;  %11701 = vmatprep.subr.mxu0 %v22449_v12  ;;  %v22505_v12 = vld [vmem:[#allocation166_spill] sm:$0xff] }
 0xb80   :  { %11883 = vmatprep.subr.mxu1 %v21366_v32  ;;  %11705 = vmatpush1.msra.mxu0 %v22450_v16  ;;  %v22455_v32 = vld [vmem:[#allocation41_spill] sm:$0xff]  ;;  %v22506_v16 = vld [vmem:[#allocation200_spill] sm:$0xff] }
 0xb81   :  { %11885 = vmatpush1.msra.mxu1 %v21370_v15  ;;  %11709 = vmatprep.subr.mxu0 %v22451_v17  ;;  %v22456_v15 = vld [vmem:[#allocation47_spill] sm:$0xff]  ;;  %v22507_v17 = vld [vmem:[#allocation170_spill] sm:$0xff] }
 0xb82   :  { %11887 = vmatprep.subr.mxu1 %v21374_v5  ;;  %11713 = vmatpush1.msra.mxu0 %v22452_v22  ;;  %v22457_v5 = vld [vmem:[#allocation50_spill] sm:$0xff]  ;;  %v22508_v22 = vld [vmem:[#allocation201_spill] sm:$0xff] }
 0xb83   :  { %11889 = vmatpush1.msra.mxu1 %v21376_v38  ;;  %11717 = vmatprep.subr.mxu0 %v22453_v23  ;;  %v22458_v38 = vld [vmem:[#allocation54_spill] sm:$0xff] }
 0xb84   :  { %11891 = vmatprep.subr.mxu1 %v21378_v58  ;;  %11721 = vmatpush1.msra.mxu0 %v22454_v29  ;;  %v22459_v58 = vld [vmem:[#allocation56_spill] sm:$0xff]  ;;  %v22509_v23 = vld [vmem:[#allocation174_spill] sm:$0xff]  ;;  %v22510_v29 = vld [vmem:[#allocation179_spill] sm:$0xff] }
 0xb85   :  { %11893 = vmatpush1.msra.mxu1 %v21380_v37  ;;  %11725 = vmatprep.subr.mxu0 %v22455_v32  ;;  %v22460_v37 = vld [vmem:[#allocation63_spill] sm:$0xff] }
 0xb86   :  { %11895 = vmatprep.subr.mxu1 %v21382_v6  ;;  %11729 = vmatpush1.msra.mxu0 %v22456_v15  ;;  %v22461_v6 = vld [vmem:[#allocation66_spill] sm:$0xff]  ;;  %v22511_v32 = vld [vmem:[#allocation183_spill] sm:$0xff] }
 0xb87   :  { %11897 = vmatpush1.msra.mxu1 %v21386_v34  ;;  %11733 = vmatprep.subr.mxu0 %v22457_v5  ;;  %v22462_v34 = vld [vmem:[#allocation70_spill] sm:$0xff]  ;;  %v22513_v5 = vld [vmem:[#allocation141_spill] sm:$0xff] }
 0xb88   :  { %11899 = vmatprep.subr.mxu1 %v21389_v9  ;;  %11737 = vmatpush1.msra.mxu0 %v22458_v38  ;;  %v22463_v9 = vld [vmem:[#allocation72_spill] sm:$0xff]  ;;  %v22512_v15 = vld [vmem:[#allocation186_spill] sm:$0xff]  ;;  %v22514_v38 = vld [vmem:[#allocation143_spill] sm:$0xff] }
 0xb89   :  { %11901 = vmatpush1.msra.mxu1 %v21391_v28  ;;  %11741 = vmatprep.subr.mxu0 %v22459_v58  ;;  %v22464_v28 = vld [vmem:[#allocation79_spill] sm:$0xff] }
 0xb8a   :  { %11903 = vmatprep.subr.mxu1 %v21393_v31  ;;  %11745 = vmatpush1.msra.mxu0 %v22460_v37  ;;  %v22465_v31 = vld [vmem:[#allocation82_spill] sm:$0xff]  ;;  %v22516_v58 = vld [vmem:[#allocation147_spill] sm:$0xff] }
 0xb8b   :  { %11905 = vmatpush1.msra.mxu1 %v21395_v36  ;;  %11749 = vmatprep.subr.mxu0 %v22461_v6  ;;  %v22466_v36 = vld [vmem:[#allocation86_spill] sm:$0xff]  ;;  %v22518_v6 = vld [vmem:[#allocation155_spill] sm:$0xff] }
 0xb8c   :  { %11907 = vmatprep.subr.mxu1 %v21397_v55  ;;  %11753 = vmatpush1.msra.mxu0 %v22462_v34  ;;  %v22467_v55 = vld [vmem:[#allocation88_spill] sm:$0xff]  ;;  %v22517_v37 = vld [vmem:[#allocation150_spill] sm:$0xff]  ;;  %v22519_v34 = vld [vmem:[#allocation159_spill] sm:$0xff] }
 0xb8d   :  { %11909 = vmatpush1.msra.mxu1 %v21400_v63  ;;  %11757 = vmatprep.subr.mxu0 %v22463_v9  ;;  %v22468_v63 = vld [vmem:[#allocation95_spill] sm:$0xff] }
 0xb8e   :  { %11911 = vmatprep.subr.mxu1 %v21402_v33  ;;  %11761 = vmatpush1.msra.mxu0 %v22464_v28  ;;  %v22469_v33 = vld [vmem:[#allocation98_spill] sm:$0xff]  ;;  %v22520_v9 = vld [vmem:[#allocation163_spill] sm:$0xff] }
 0xb8f   :  { %11913 = vmatpush1.msra.mxu1 %v21404_v1  ;;  %11765 = vmatprep.subr.mxu0 %v22465_v31  ;;  %v22470_v1 = vld [vmem:[#allocation102_spill] sm:$0xff]  ;;  %v22521_v28 = vld [vmem:[#allocation167_spill] sm:$0xff] }
 0xb90   :  { %11915 = vmatprep.subr.mxu1 %v21406_v41  ;;  %11769 = vmatpush1.msra.mxu0 %v22466_v36  ;;  %v22471_v41 = vld [vmem:[#allocation104_spill] sm:$0xff]  ;;  %v22522_v31 = vld [vmem:[#allocation171_spill] sm:$0xff] }
 0xb91   :  { %11917 = vmatpush1.msra.mxu1 %v21409_v19  ;;  %11773 = vmatprep.subr.mxu0 %v22467_v55  ;;  %v22472_v19 = vld [vmem:[#allocation111_spill] sm:$0xff]  ;;  %v22524_v55 = vld [vmem:[#allocation178_spill] sm:$0xff] }
 0xb92   :  { %11919 = vmatprep.subr.mxu1 %v21447_v10  ;;  %11777 = vmatpush1.msra.mxu0 %v22468_v63  ;;  %v22473_v10 = vld [vmem:[#allocation114_spill] sm:$0xff]  ;;  %v22523_v36 = vld [vmem:[#allocation175_spill] sm:$0xff] }
 0xb93   :  { %11921 = vmatpush1.msra.mxu1 %v22431_v26  ;;  %11781 = vmatprep.subr.mxu0 %v22469_v33  ;;  %v22487_v26 = vld [vmem:[#allocation139_spill] sm:$0xff]  ;;  %v22525_v63 = vld [vmem:[#allocation182_spill] sm:$0xff] }
 0xb94   :  { %11923 = vmatprep.subr.mxu1 %v22433_v59  ;;  %11785 = vmatpush1.msra.mxu0 %v22470_v1  ;;  %v22489_v59 = vld [vmem:[#allocation140_spill] sm:$0xff]  ;;  %v22526_v33 = vld [vmem:[#allocation187_spill] sm:$0xff]  ;;  %v22527_v1 = vld [vmem:[#allocation190_spill] sm:$0xff] }
 0xb95   :  { %11925 = vmatpush1.msra.mxu1 %v22435_v24  ;;  %11789 = vmatprep.subr.mxu0 %v22471_v41  ;;  %v22491_v24 = vld [vmem:[#allocation142_spill] sm:$0xff]  ;;  %v22529_v41 = vld [vmem:[#allocation145_spill] sm:$0xff] }
 0xb96   :  { %11927 = vmatprep.subr.mxu1 %v22437_v18  ;;  %11793 = vmatpush1.msra.mxu0 %v22472_v19  ;;  %v22493_v18 = vld [vmem:[#allocation144_spill] sm:$0xff] }
 0xb97   :  { %11929 = vmatpush1.msra.mxu1 %v22439_v44  ;;  %11962 = vmatprep.mubr.f32.mxu1 %v21174_v51  ;;  %v22495_v44 = vld [vmem:[#allocation149_spill] sm:$0xff]  ;;  %v22530_v19 = vld [vmem:[#allocation148_spill] sm:$0xff] }
 0xb98   :  { %11797 = vmatprep.subr.mxu0 %v22473_v10  ;;  %11964 = vmatmul.mubr.f32.vlgmr.msra.gmra.mxu1 %v20084_v35  ;;  %v22532_v10 = vld [vmem:[#allocation153_spill] sm:$0xff] }
 0xb99   :  { %15593 = vmatprep.subr.mxu1 %v21174_v51  ;;  %11801 = vmatpush1.msra.mxu0 %v22474_v57  ;;  %v22533_v57 = vld [vmem:[#allocation156_spill] sm:$0xff] }
 0xb9a   :  { %15594 = vmatpush3.msra.mxu1 %v22475_v47  ;;  %11805 = vmatprep.subr.mxu0 %v22476_v0  ;;  %v22534_v47 = vld [vmem:[#allocation161_spill] sm:$0xff] }
 0xb9b   :  { %15595 = vmatprep.subr.mxu1 %v21174_v51  ;;  %11809 = vmatpush1.msra.mxu0 %v22477_v52  ;;  %v22535_v0 = vld [vmem:[#allocation165_spill] sm:$0xff] }
 0xb9c   :  { %15596 = vmatpush3.msra.mxu1 %v22478_v48  ;;  %11813 = vmatprep.subr.mxu0 %v22479_v62  ;;  %v22536_v52 = vld [vmem:[#allocation169_spill] sm:$0xff] }
 0xb9d   :  { %15597 = vmatprep.subr.mxu1 %v21174_v51  ;;  %11817 = vmatpush1.msra.mxu0 %v22480_v21  ;;  %v22537_v48 = vld [vmem:[#allocation173_spill] sm:$0xff] }
 0xb9e   :  { %15598 = vmatpush3.msra.mxu1 %v22481_v53  ;;  %11821 = vmatprep.subr.mxu0 %v22482_v7  ;;  %v22538_v62 = vld [vmem:[#allocation177_spill] sm:$0xff] }
 0xb9f   :  { %15599 = vmatprep.subr.mxu1 %v21174_v51  ;;  %11825 = vmatpush1.msra.mxu0 %v22483_v30  ;;  %v22539_v21 = vld [vmem:[#allocation181_spill] sm:$0xff]  ;;  %v22542_v30 = vld [vmem:[#allocation192_spill] sm:$0xff] }
 0xba0   :  { %11858 = vmatprep.mubr.f32.mxu0 %v21174_v51  ;;  %15600 = vmatpush3.msra.mxu1 %v22484_v4  ;;  %v22540_v53 = vld [vmem:[#allocation185_spill] sm:$0xff]  ;;  %v22543_v4 = vld [vmem:[#allocation195_spill] sm:$0xff] }
 0xba1   :  { %11860 = vmatmul.mubr.f32.vlgmr.msra.gmra.mxu0 %v20084_v35  ;;  %15558 = vmatprep.subr.mxu0 %v21174_v51  ;;  %v22541_v7 = vld [vmem:[#allocation189_spill] sm:$0xff] }
 0xba2   :  { %15601 = vmatprep.subr.mxu1 %v21174_v51  ;;  %15559 = vmatpush3.msra.mxu0 %v22485_v61 }
 0xba3   :  { %15602 = vmatpush3.msra.mxu1 %v22486_v56  ;;  %15560 = vmatprep.subr.mxu0 %v21174_v51  ;;  %v22544_v56 = vld [vmem:[#allocation197_spill] sm:$0xff] }
 0xba4   :  { %15603 = vmatprep.subr.mxu1 %v21174_v51  ;;  %15561 = vmatpush3.msra.mxu0 %v22487_v26 }
 0xba5   :  { %15604 = vmatpush3.msra.mxu1 %v22488_v27  ;;  %15562 = vmatprep.subr.mxu0 %v21174_v51 }
 0xba6   :  { %15605 = vmatprep.subr.mxu1 %v21174_v51  ;;  %15563 = vmatpush3.msra.mxu0 %v22489_v59 }
 0xba7   :  { %15606 = vmatpush3.msra.mxu1 %v22490_v49  ;;  %15564 = vmatprep.subr.mxu0 %v21174_v51  ;;  %v12649_v49 = vld [vmem:[#allocation7 + $0x68] sm:$0xff] }
 0xba8   :  { %15607 = vmatprep.subr.mxu1 %v21174_v51  ;;  %15565 = vmatpush3.msra.mxu0 %v22491_v24 }
 0xba9   :  { %15608 = vmatpush3.msra.mxu1 %v22492_v20  ;;  %15566 = vmatprep.subr.mxu0 %v21174_v51  ;;  %v12647_v20 = vld [vmem:[#allocation7 + $0x58] sm:$0xff] }
 0xbaa   :  { %15609 = vmatprep.subr.mxu1 %v21174_v51  ;;  %15567 = vmatpush3.msra.mxu0 %v22493_v18 }
 0xbab   :  { %15610 = vmatpush3.msra.mxu1 %v22494_v46  ;;  %15568 = vmatprep.subr.mxu0 %v21174_v51  ;;  %v12645_v46 = vld [vmem:[#allocation7 + $0x48] sm:$0xff] }
 0xbac   :  { %15611 = vmatprep.subr.mxu1 %v21174_v51  ;;  %15569 = vmatpush3.msra.mxu0 %v22495_v44 }
 0xbad   :  { %15612 = vmatpush3.msra.mxu1 %v22496_v40  ;;  %15570 = vmatprep.subr.mxu0 %v21174_v51  ;;  %v12642_v40 = vld [vmem:[#allocation7 + $0x30] sm:$0xff] }
 0xbae   :  { %15613 = vmatprep.subr.mxu1 %v21174_v51  ;;  %15571 = vmatpush3.msra.mxu0 %v22497_v39 }
 0xbaf   :  { %15614 = vmatpush3.msra.mxu1 %v22498_v13  ;;  %15572 = vmatprep.subr.mxu0 %v21174_v51  ;;  %v12640_v13 = vld [vmem:[#allocation7 + $0x20] sm:$0xff] }
 0xbb0   :  { %15615 = vmatprep.subr.mxu1 %v21174_v51  ;;  %15573 = vmatpush3.msra.mxu0 %v22499_v25 }
 0xbb1   :  { %15616 = vmatpush3.msra.mxu1 %v22500_v43  ;;  %15574 = vmatprep.subr.mxu0 %v21174_v51  ;;  %v12638_v43 = vld [vmem:[#allocation7 + $0x10] sm:$0xff] }
 0xbb2   :  { %15617 = vmatprep.subr.mxu1 %v21174_v51  ;;  %15575 = vmatpush3.msra.mxu0 %v22501_v60 }
 0xbb3   :  { %15618 = vmatpush3.msra.mxu1 %v22502_v54  ;;  %15576 = vmatprep.subr.mxu0 %v21174_v51  ;;  %v12636_v54 = vld [vmem:[#allocation7] sm:$0xff] }
 0xbb4   :  { %15619 = vmatprep.subr.mxu1 %v21174_v51  ;;  %15577 = vmatpush3.msra.mxu0 %v22503_v50 }
 0xbb5   :  { %15620 = vmatpush3.msra.mxu1 %v22504_v11  ;;  %15578 = vmatprep.subr.mxu0 %v21174_v51 }
 0xbb6   :  { %15621 = vmatprep.subr.mxu1 %v21174_v51  ;;  %15579 = vmatpush3.msra.mxu0 %v22505_v12 }
 0xbb7   :  { %15622 = vmatpush3.msra.mxu1 %v22506_v16  ;;  %15580 = vmatprep.subr.mxu0 %v21174_v51 }
 0xbb8   :  { %15623 = vmatprep.subr.mxu1 %v21174_v51  ;;  %15581 = vmatpush3.msra.mxu0 %v22507_v17 }
 0xbb9   :  { %15624 = vmatpush3.msra.mxu1 %v22508_v22  ;;  %15625 = vmatprep.mubr.msk.f32.mxu1 %vm16060_vm1, %v21174_v51 }
 0xbba   :  { %15582 = vmatprep.subr.mxu0 %v21174_v51  ;;  %15626 = vmatmul.mubr.f32.vlgmr.msra.gmra.mxu1 %v20084_v35 }
 0xbbb   :  { %15663 = vmatprep.subr.mxu1 %v21174_v51  ;;  %15583 = vmatpush3.msra.mxu0 %v22509_v23 }
 0xbbc   :  { %15664 = vmatpush3.msra.mxu1 %v22485_v61  ;;  %15584 = vmatprep.subr.mxu0 %v21174_v51 }
 0xbbd   :  { %15665 = vmatprep.subr.mxu1 %v21174_v51  ;;  %15585 = vmatpush3.msra.mxu0 %v22510_v29 }
 0xbbe   :  { %15666 = vmatpush3.msra.mxu1 %v22487_v26  ;;  %15586 = vmatprep.subr.mxu0 %v21174_v51 }
 0xbbf   :  { %15667 = vmatprep.subr.mxu1 %v21174_v51  ;;  %15587 = vmatpush3.msra.mxu0 %v22511_v32 }
 0xbc0   :  { %15668 = vmatpush3.msra.mxu1 %v22489_v59  ;;  %15588 = vmatprep.subr.mxu0 %v21174_v51 }
 0xbc1   :  { %15669 = vmatprep.subr.mxu1 %v21174_v51  ;;  %15589 = vmatpush3.msra.mxu0 %v22512_v15 }
 0xbc2   :  { %15590 = vmatprep.mubr.msk.f32.mxu0 %vm16060_vm1, %v21174_v51  ;;  %15670 = vmatpush3.msra.mxu1 %v22491_v24 }
 0xbc3   :  { %15591 = vmatmul.mubr.f32.vlgmr.msra.gmra.mxu0 %v20103_v14  ;;  %15628 = vmatprep.subr.mxu0 %v21174_v51  ;;  %v22515_v14 = vld [vmem:[#allocation146_spill] sm:$0xff] }
 0xbc4   :  { %15671 = vmatprep.subr.mxu1 %v21174_v51  ;;  %15629 = vmatpush3.msra.mxu0 %v22513_v5 }
 0xbc5   :  { %15672 = vmatpush3.msra.mxu1 %v22493_v18  ;;  %15630 = vmatprep.subr.mxu0 %v21174_v51 }
 0xbc6   :  { %15673 = vmatprep.subr.mxu1 %v21174_v51  ;;  %15631 = vmatpush3.msra.mxu0 %v22514_v38 }
 0xbc7   :  { %15674 = vmatpush3.msra.mxu1 %v22495_v44  ;;  %15632 = vmatprep.subr.mxu0 %v21174_v51 }
 0xbc8   :  { %15675 = vmatprep.subr.mxu1 %v21174_v51  ;;  %15633 = vmatpush3.msra.mxu0 %v22515_v14 }
 0xbc9   :  { %15676 = vmatpush3.msra.mxu1 %v22497_v39  ;;  %15634 = vmatprep.subr.mxu0 %v21174_v51 }
 0xbca   :  { %15677 = vmatprep.subr.mxu1 %v21174_v51  ;;  %15635 = vmatpush3.msra.mxu0 %v22516_v58 }
 0xbcb   :  { %15678 = vmatpush3.msra.mxu1 %v22499_v25  ;;  %15636 = vmatprep.subr.mxu0 %v21174_v51 }
 0xbcc   :  { %15679 = vmatprep.subr.mxu1 %v21174_v51  ;;  %15637 = vmatpush3.msra.mxu0 %v22517_v37 }
 0xbcd   :  { %15680 = vmatpush3.msra.mxu1 %v22501_v60  ;;  %15638 = vmatprep.subr.mxu0 %v21174_v51 }
 0xbce   :  { %15681 = vmatprep.subr.mxu1 %v21174_v51  ;;  %15639 = vmatpush3.msra.mxu0 %v22518_v6 }
 0xbcf   :  { %15682 = vmatpush3.msra.mxu1 %v22503_v50  ;;  %15640 = vmatprep.subr.mxu0 %v21174_v51 }
 0xbd0   :  { %15683 = vmatprep.subr.mxu1 %v21174_v51  ;;  %15641 = vmatpush3.msra.mxu0 %v22519_v34 }
 0xbd1   :  { %15684 = vmatpush3.msra.mxu1 %v22505_v12  ;;  %15642 = vmatprep.subr.mxu0 %v21174_v51 }
 0xbd2   :  { %15685 = vmatprep.subr.mxu1 %v21174_v51  ;;  %15643 = vmatpush3.msra.mxu0 %v22520_v9 }
 0xbd3   :  { %15686 = vmatpush3.msra.mxu1 %v22507_v17  ;;  %15644 = vmatprep.subr.mxu0 %v21174_v51 }
 0xbd4   :  { %15687 = vmatprep.subr.mxu1 %v21174_v51  ;;  %15645 = vmatpush3.msra.mxu0 %v22521_v28 }
 0xbd5   :  { %15688 = vmatpush3.msra.mxu1 %v22509_v23  ;;  %15646 = vmatprep.subr.mxu0 %v21174_v51 }
 0xbd6   :  { %15689 = vmatprep.subr.mxu1 %v21174_v51  ;;  %15647 = vmatpush3.msra.mxu0 %v22522_v31 }
 0xbd7   :  { %15690 = vmatpush3.msra.mxu1 %v22510_v29  ;;  %15648 = vmatprep.subr.mxu0 %v21174_v51 }
 0xbd8   :  { %15691 = vmatprep.subr.mxu1 %v21174_v51  ;;  %15649 = vmatpush3.msra.mxu0 %v22523_v36 }
 0xbd9   :  { %15692 = vmatpush3.msra.mxu1 %v22511_v32  ;;  %15650 = vmatprep.subr.mxu0 %v21174_v51 }
 0xbda   :  { %15693 = vmatprep.subr.mxu1 %v21174_v51  ;;  %15651 = vmatpush3.msra.mxu0 %v22524_v55  ;;  %v12683_v55 = vld [vmem:[#allocation9 + $0xf0] sm:$0xff] }
 0xbdb   :  { %15694 = vmatpush3.msra.mxu1 %v22512_v15  ;;  %15695 = vmatprep.mubr.msk.f32.mxu1 %vm16060_vm1, %v21174_v51 }
 0xbdc   :  { %15652 = vmatprep.subr.mxu0 %v21174_v51  ;;  %15696 = vmatmul.mubr.f32.vlgmr.msra.gmra.mxu1 %v20095_v8  ;;  %v22528_v8 = vld [vmem:[#allocation193_spill] sm:$0xff] }
 0xbdd   :  { %15733 = vmatprep.subr.mxu1 %v21174_v51  ;;  %15653 = vmatpush3.msra.mxu0 %v22525_v63  ;;  %v12682_v63 = vld [vmem:[#allocation9 + $0xe8] sm:$0xff] }
 0xbde   :  { %15734 = vmatpush3.msra.mxu1 %v22485_v61  ;;  %15654 = vmatprep.subr.mxu0 %v21174_v51  ;;  %v12651_v61 = vld [vmem:[#allocation7 + $0x78] sm:$0xff] }
 0xbdf   :  { %15735 = vmatprep.subr.mxu1 %v21174_v51  ;;  %15655 = vmatpush3.msra.mxu0 %v22526_v33  ;;  %v12681_v33 = vld [vmem:[#allocation9 + $0xe0] sm:$0xff] }
 0xbe0   :  { %15736 = vmatpush3.msra.mxu1 %v22487_v26  ;;  %15656 = vmatprep.subr.mxu0 %v21174_v51  ;;  %v22545_v26 = vld [vmem:[#allocation51_spill] sm:$0xff] }
 0xbe1   :  { %15737 = vmatprep.subr.mxu1 %v21174_v51  ;;  %15657 = vmatpush3.msra.mxu0 %v22527_v1  ;;  %v1945_v27 = vmax.f32 %v22545_v26, 0.0  ;;  %v12680_v1 = vld [vmem:[#allocation9 + $0xd8] sm:$0xff] }
 0xbe2   :  { %15738 = vmatpush3.msra.mxu1 %v22489_v59  ;;  %15658 = vmatprep.subr.mxu0 %v21174_v51  ;;  %v12650_v59 = vld [vmem:[#allocation7 + $0x70] sm:$0xff] }
 0xbe3   :  { %15739 = vmatprep.subr.mxu1 %v21174_v51  ;;  %15659 = vmatpush3.msra.mxu0 %v22528_v8  ;;  %v12679_v8 = vld [vmem:[#allocation9 + $0xd0] sm:$0xff] }
 0xbe4   :  { %15660 = vmatprep.mubr.msk.f32.mxu0 %vm16060_vm1, %v21174_v51  ;;  %15740 = vmatpush3.msra.mxu1 %v22491_v24  ;;  %v12648_v24 = vld [vmem:[#allocation7 + $0x60] sm:$0xff] }
 0xbe5   :  { %15661 = vmatmul.mubr.f32.vlgmr.msra.gmra.mxu0 %v20089_v45  ;;  %15698 = vmatprep.subr.mxu0 %v21174_v51  ;;  %v22531_v45 = vld [vmem:[#allocation151_spill] sm:$0xff] }
 0xbe6   :  { %15741 = vmatprep.subr.mxu1 %v21174_v51  ;;  %15699 = vmatpush3.msra.mxu0 %v22529_v41  ;;  %v12678_v41 = vld [vmem:[#allocation9 + $0xc8] sm:$0xff] }
 0xbe7   :  { %15742 = vmatpush3.msra.mxu1 %v22493_v18  ;;  %15700 = vmatprep.subr.mxu0 %v21174_v51  ;;  %v12646_v18 = vld [vmem:[#allocation7 + $0x50] sm:$0xff] }
 0xbe8   :  { %15743 = vmatprep.subr.mxu1 %v21174_v51  ;;  %15701 = vmatpush3.msra.mxu0 %v22530_v19  ;;  %v12677_v19 = vld [vmem:[#allocation9 + $0xc0] sm:$0xff] }
 0xbe9   :  { %15744 = vmatpush3.msra.mxu1 %v22495_v44  ;;  %15702 = vmatprep.subr.mxu0 %v21174_v51  ;;  %v12644_v44 = vld [vmem:[#allocation7 + $0x40] sm:$0xff] }
 0xbea   :  { %15745 = vmatprep.subr.mxu1 %v21174_v51  ;;  %15703 = vmatpush3.msra.mxu0 %v22531_v45  ;;  %v12676_v45 = vld [vmem:[#allocation9 + $0xb8] sm:$0xff] }
 0xbeb   :  { %15746 = vmatpush3.msra.mxu1 %v22497_v39  ;;  %15704 = vmatprep.subr.mxu0 %v21174_v51  ;;  %v12641_v39 = vld [vmem:[#allocation7 + $0x28] sm:$0xff] }
 0xbec   :  { %15747 = vmatprep.subr.mxu1 %v21174_v51  ;;  %15705 = vmatpush3.msra.mxu0 %v22532_v10  ;;  %v12675_v10 = vld [vmem:[#allocation9 + $0xb0] sm:$0xff] }
 0xbed   :  { %15748 = vmatpush3.msra.mxu1 %v22499_v25  ;;  %15706 = vmatprep.subr.mxu0 %v21174_v51  ;;  %v12639_v25 = vld [vmem:[#allocation7 + $0x18] sm:$0xff] }
 0xbee   :  { %15749 = vmatprep.subr.mxu1 %v21174_v51  ;;  %15707 = vmatpush3.msra.mxu0 %v22533_v57  ;;  %v12674_v57 = vld [vmem:[#allocation9 + $0xa8] sm:$0xff] }
 0xbef   :  { %15750 = vmatpush3.msra.mxu1 %v22501_v60  ;;  %15708 = vmatprep.subr.mxu0 %v21174_v51  ;;  %v12637_v60 = vld [vmem:[#allocation7 + $0x8] sm:$0xff] }
 0xbf0   :  { %15751 = vmatprep.subr.mxu1 %v21174_v51  ;;  %15709 = vmatpush3.msra.mxu0 %v22534_v47  ;;  %v12673_v47 = vld [vmem:[#allocation9 + $0xa0] sm:$0xff] }
 0xbf1   :  { %15752 = vmatpush3.msra.mxu1 %v22503_v50  ;;  %15710 = vmatprep.subr.mxu0 %v21174_v51  ;;  %v22546_v50 = vld [vmem:[#allocation55_spill] sm:$0xff] }
 0xbf2   :  { %15753 = vmatprep.subr.mxu1 %v21174_v51  ;;  %15711 = vmatpush3.msra.mxu0 %v22535_v0  ;;  %v3471_v11 = vmax.f32 %v22546_v50, 0.0  ;;  %v12672_v0 = vld [vmem:[#allocation9 + $0x98] sm:$0xff]  ;;  %v12653_v50 = vld [vmem:[#allocation9] sm:$0xff] }
 0xbf3   :  { %15754 = vmatpush3.msra.mxu1 %v22505_v12  ;;  %15712 = vmatprep.subr.mxu0 %v21174_v51  ;;  %v22547_v12 = vld [vmem:[#allocation58_spill] sm:$0xff] }
 0xbf4   :  { %15755 = vmatprep.subr.mxu1 %v21174_v51  ;;  %15713 = vmatpush3.msra.mxu0 %v22536_v52  ;;  %v4998_v16 = vmax.f32 %v22547_v12, 0.0  ;;  %v12671_v52 = vld [vmem:[#allocation9 + $0x90] sm:$0xff] }
 0xbf5   :  { %15756 = vmatpush3.msra.mxu1 %v22507_v17  ;;  %15714 = vmatprep.subr.mxu0 %v21174_v51  ;;  %v22548_v17 = vld [vmem:[#allocation61_spill] sm:$0xff] }
 0xbf6   :  { %15757 = vmatprep.subr.mxu1 %v21174_v51  ;;  %15715 = vmatpush3.msra.mxu0 %v22537_v48  ;;  %v6525_v22 = vmax.f32 %v22548_v17, 0.0  ;;  %v12670_v48 = vld [vmem:[#allocation9 + $0x88] sm:$0xff]  ;;  %v20465_v17 = vld [vmem:[#allocation10 + $0x78] sm:$0xff] }
 0xbf7   :  { %15758 = vmatpush3.msra.mxu1 %v22509_v23  ;;  %15716 = vmatprep.subr.mxu0 %v21174_v51  ;;  %v22549_v23 = vld [vmem:[#allocation67_spill] sm:$0xff] }
 0xbf8   :  { %15759 = vmatprep.subr.mxu1 %v21174_v51  ;;  %15717 = vmatpush3.msra.mxu0 %v22538_v62  ;;  %v12669_v62 = vld [vmem:[#allocation9 + $0x80] sm:$0xff] }
 0xbf9   :  { %15760 = vmatpush3.msra.mxu1 %v22510_v29  ;;  %15718 = vmatprep.subr.mxu0 %v21174_v51  ;;  %v8052_v29 = vmax.f32 %v22549_v23, 0.0 }
 0xbfa   :  { %15761 = vmatprep.subr.mxu1 %v21174_v51  ;;  %15719 = vmatpush3.msra.mxu0 %v22539_v21  ;;  %v12668_v21 = vld [vmem:[#allocation9 + $0x78] sm:$0xff] }
 0xbfb   :  { %15762 = vmatpush3.msra.mxu1 %v22511_v32  ;;  %15720 = vmatprep.subr.mxu0 %v21174_v51  ;;  %v9579_v32 = vmax.f32 %v19642_v3, 0.0  ;;  %v12684_v3 = vld [vmem:[#allocation9 + $0xf8] sm:$0xff] }
 0xbfc   :  { %15763 = vmatprep.subr.mxu1 %v21174_v51  ;;  %15721 = vmatpush3.msra.mxu0 %v22540_v53  ;;  %v12667_v53 = vld [vmem:[#allocation9 + $0x70] sm:$0xff] }
 0xbfd   :  { %15764 = vmatpush3.msra.mxu1 %v22512_v15  ;;  %15765 = vmatprep.mubr.msk.f32.mxu1 %vm16060_vm1, %v21174_v51  ;;  %v11106_v15 = vmax.f32 %v20081_v2, 0.0 }
 0xbfe   :  { %15722 = vmatprep.subr.mxu0 %v21174_v51  ;;  %15766 = vmatmul.mubr.f32.vlgmr.msra.gmra.mxu1 %v20084_v35 }
 0xbff   :  { %15723 = vmatpush3.msra.mxu0 %v22541_v7  ;;  %15730 = vmatprep.mubr.msk.f32.mxu0 %vm16060_vm1, %v21174_v51  ;;  %v12666_v7 = vld [vmem:[#allocation9 + $0x68] sm:$0xff] }
 0xc00   :  { %15724 = vmatprep.subr.mxu0 %v21174_v51  ;;  %12921 = vmatprep.mubr.f32.mxu1 %v21174_v51 }
 0xc01   :  { %15725 = vmatpush3.msra.mxu0 %v22542_v30  ;;  %12857 = vmatprep.subr.mxu1 %v12684_v3  ;;  %v12665_v30 = vld [vmem:[#allocation9 + $0x60] sm:$0xff]  ;;  %v20499_v3 = vld [vmem:[#allocation10 + $0x48] sm:$0xff] }
 0xc02   :  { %15726 = vmatprep.subr.mxu0 %v21174_v51  ;;  %12858 = vmatpush1.msra.mxu1 %v12683_v55  ;;  %v20502_v55 = vld [vmem:[#allocation10 + $0xc0] sm:$0xff] }
 0xc03   :  { %15727 = vmatpush3.msra.mxu0 %v22543_v4  ;;  %12859 = vmatprep.subr.mxu1 %v12682_v63  ;;  %v12664_v4 = vld [vmem:[#allocation9 + $0x58] sm:$0xff]  ;;  %v20505_v63 = vld [vmem:[#allocation10 + $0x40] sm:$0xff] }
 0xc04   :  { %15728 = vmatprep.subr.mxu0 %v21174_v51  ;;  %12860 = vmatpush1.msra.mxu1 %v12681_v33 }
 0xc05   :  { %15729 = vmatpush3.msra.mxu0 %v22544_v56  ;;  %12861 = vmatprep.subr.mxu1 %v12680_v1  ;;  %v12662_v56 = vld [vmem:[#allocation9 + $0x48] sm:$0xff] }
 0xc06   :  { %15731 = vmatmul.mubr.f32.vlgmr.msra.gmra.mxu0 %v20084_v35  ;;  %15768 = vmatprep.subr.mxu0 %v12651_v61  ;;  %v12643_v35 = vld [vmem:[#allocation7 + $0x38] sm:$0xff] }
 0xc07   :  { %15769 = vmatpush3.msra.mxu0 %v12651_v61  ;;  %15800 = vmatprep.mubr.f32.mxu0 %v1945_v27  ;;  %v12663_v61 = vld [vmem:[#allocation9 + $0x50] sm:$0xff] }
 0xc08   :  { %15770 = vmatprep.subr.mxu0 %v12650_v59  ;;  %12862 = vmatpush1.msra.mxu1 %v12679_v8 }
 0xc09   :  { %15771 = vmatpush3.msra.mxu0 %v12650_v59  ;;  %12863 = vmatprep.subr.mxu1 %v12678_v41  ;;  %v12661_v59 = vld [vmem:[#allocation9 + $0x40] sm:$0xff] }
 0xc0a   :  { %15772 = vmatprep.subr.mxu0 %v12649_v49  ;;  %12864 = vmatpush1.msra.mxu1 %v12677_v19 }
 0xc0b   :  { %15773 = vmatpush3.msra.mxu0 %v12649_v49  ;;  %12865 = vmatprep.subr.mxu1 %v12676_v45 }
 0xc0c   :  { %15774 = vmatprep.subr.mxu0 %v12648_v24  ;;  %12866 = vmatpush1.msra.mxu1 %v12675_v10 }
 0xc0d   :  { %15775 = vmatpush3.msra.mxu0 %v12648_v24  ;;  %12867 = vmatprep.subr.mxu1 %v12674_v57  ;;  %v22551_v57 = vld [vmem:[#allocation30_spill] sm:$0xff] }
 0xc0e   :  { %15776 = vmatprep.subr.mxu0 %v12647_v20  ;;  %12868 = vmatpush1.msra.mxu1 %v12673_v47 }
 0xc0f   :  { %15777 = vmatpush3.msra.mxu0 %v12647_v20  ;;  %12869 = vmatprep.subr.mxu1 %v12672_v0  ;;  %v12660_v20 = vld [vmem:[#allocation9 + $0x38] sm:$0xff] }
 0xc10   :  { %15778 = vmatprep.subr.mxu0 %v12646_v18  ;;  %12870 = vmatpush1.msra.mxu1 %v12671_v52 }
 0xc11   :  { %15779 = vmatpush3.msra.mxu0 %v12646_v18  ;;  %12871 = vmatprep.subr.mxu1 %v12670_v48 }
 0xc12   :  { %15780 = vmatprep.subr.mxu0 %v12645_v46  ;;  %12872 = vmatpush1.msra.mxu1 %v12669_v62 }
 0xc13   :  { %15781 = vmatpush3.msra.mxu0 %v12645_v46  ;;  %12873 = vmatprep.subr.mxu1 %v12668_v21  ;;  %v12659_v46 = vld [vmem:[#allocation9 + $0x30] sm:$0xff] }
 0xc14   :  { %15782 = vmatprep.subr.mxu0 %v12644_v44  ;;  %12874 = vmatpush1.msra.mxu1 %v12667_v53 }
 0xc15   :  { %15783 = vmatpush3.msra.mxu0 %v12644_v44  ;;  %12875 = vmatprep.subr.mxu1 %v12666_v7  ;;  %v22550_v44 = vld [vmem:[#allocation43_spill] sm:$0xff] }
 0xc16   :  { %15784 = vmatprep.subr.mxu0 %v12643_v35  ;;  %v20451_v5 = vpop.f32.mrf.mxu1  ;;  %12876 = vmatpush1.msra.mxu1 %v12665_v30 }
 0xc17   :  { %15785 = vmatpush3.msra.mxu0 %v12643_v35  ;;  %12877 = vmatprep.subr.mxu1 %v12664_v4  ;;  %v261_v35 = vadd.f32 %v22550_v44, %v17438_v42  ;;  %v20467_v42 = vld [vmem:[#allocation10 + $0xf0] sm:$0xff] }
 0xc18   :  { %15786 = vmatprep.subr.mxu0 %v12642_v40  ;;  %v11452_v14 = vpop.f32.mrf.mxu1  ;;  %12878 = vmatpush1.msra.mxu1 %v12663_v61 }
 0xc19   :  { %15787 = vmatpush3.msra.mxu0 %v12642_v40  ;;  %12879 = vmatprep.subr.mxu1 %v12662_v56 }
 0xc1a   :  { %15788 = vmatprep.subr.mxu0 %v12641_v39  ;;  %12880 = vmatpush1.msra.mxu1 %v12661_v59  ;;  %v15940_v59 = vld [vmem:[%s20577_s4] ss:$0 sm:$0xff] }
 0xc1b   :  { %15789 = vmatpush3.msra.mxu0 %v12641_v39  ;;  %12881 = vmatprep.subr.mxu1 %v12660_v20  ;;  %v12658_v39 = vld [vmem:[#allocation9 + $0x28] sm:$0xff] }
 0xc1c   :  { %15790 = vmatprep.subr.mxu0 %v12640_v13  ;;  %12882 = vmatpush1.msra.mxu1 %v12659_v46 }
 0xc1d   :  { %15791 = vmatpush3.msra.mxu0 %v12640_v13  ;;  %12883 = vmatprep.subr.mxu1 %v12658_v39  ;;  %v12657_v13 = vld [vmem:[#allocation9 + $0x20] sm:$0xff] }
 0xc1e   :  { %15792 = vmatprep.subr.mxu0 %v12639_v25  ;;  %v20453_v38 = vpop.f32.mrf.mxu0  ;;  %12884 = vmatpush1.msra.mxu1 %v12657_v13 }
 0xc1f   :  { %15793 = vmatpush3.msra.mxu0 %v12639_v25  ;;  %v11451_v33 = vadd.f32 %v20451_v5, %v20453_v38 }
 0xc20   :  { %15794 = vmatprep.subr.mxu0 %v12638_v43  ;;  %v11220_v58 = vpop.f32.mrf.mxu0 }
 0xc21   :  { %15795 = vmatpush3.msra.mxu0 %v12638_v43  ;;  %v11453_v34 = vadd.f32 %v11452_v14, %v11220_v58  ;;  %v12656_v43 = vld [vmem:[#allocation9 + $0x18] sm:$0xff]  ;;  %v20478_v14 = vld [vmem:[#allocation10 + $0xe0] sm:$0xff] }
 0xc22   :  { %15796 = vmatprep.subr.mxu0 %v12637_v60  ;;  %12885 = vmatprep.subr.mxu1 %v12656_v43  ;;  %v20481_v58 = vld [vmem:[#allocation10 + $0x60] sm:$0xff] }
 0xc23   :  { %15797 = vmatpush3.msra.mxu0 %v12637_v60  ;;  %v12655_v60 = vld [vmem:[#allocation9 + $0x10] sm:$0xff] }
 0xc24   :  { %15798 = vmatprep.subr.mxu0 %v12636_v54  ;;  %12886 = vmatpush1.msra.mxu1 %v12655_v60 }
 0xc25   :  { %15799 = vmatpush3.msra.mxu0 %v12636_v54  ;;  %v12654_v54 = vld [vmem:[#allocation9 + $0x8] sm:$0xff] }
 0xc26   :  { %15801 = vmatmul.mubr.f32.vlgmr.msra.gmra.mxu0 %v3471_v11  ;;  %12887 = vmatprep.subr.mxu1 %v12654_v54  ;;  %v20525_v54 = vld [vmem:[%s20579_s6] ss:$0 sm:$0xff] }
 0xc27   :  { %15803 = vmatprep.mubr.f32.mxu0 %v4998_v16  ;;  %12888 = vmatpush1.msra.mxu1 %v12653_v50  ;;  %v12717_v16 = vld [vmem:[#allocation10 + $0xf8] sm:$0xff] }
 0xc28   :  { %14016 = vmatprep.subr.mxu0 %v12717_v16  ;;  %15812 = vmatprep.subr.mxu1 %v12717_v16 }
 0xc29   :  { %14017 = vmatpush3.msra.mxu0 %v20465_v17 }
 0xc2a   :  { %15804 = vmatmul.mubr.f32.gmra.mxu0 %v6525_v22  ;;  %v20469_v22 = vld [vmem:[#allocation10 + $0x70] sm:$0xff]  ;;  %14018 = vmatprep.subr.mxu0 %v20467_v42 }
 0xc2b   :  { %15806 = vmatprep.mubr.f32.mxu0 %v8052_v29  ;;  %v20472_v29 = vld [vmem:[#allocation10 + $0xe8] sm:$0xff]  ;;  %14019 = vmatpush3.msra.mxu0 %v20469_v22 }
 0xc2c   :  { %14020 = vmatprep.subr.mxu0 %v20472_v29 }
 0xc2e   :  { %15807 = vmatmul.mubr.f32.gmra.mxu0 %v9579_v32  ;;  %v20475_v32 = vld [vmem:[#allocation10 + $0x68] sm:$0xff] }
 0xc2f   :  { %15809 = vmatprep.mubr.f32.mxu0 %v11106_v15  ;;  %14021 = vmatpush3.msra.mxu0 %v20475_v32 }
 0xc30   :  { %14022 = vmatprep.subr.mxu0 %v20478_v14 }
 0xc31   :  { %14023 = vmatpush3.msra.mxu0 %v20481_v58 }
 0xc36   :  { %v20455_v37 = vpop.f32.mrf.mxu1 }
 0xc38   :  { %v11695_v31 = vpop.f32.mrf.mxu1 }
 0xc3f   :  { %v20457_v6 = vpop.f32.mrf.mxu0 }
 0xc40   :  { %v11588_v1 = vadd.f32 %v20457_v6, %v11451_v33 }
 0xc41   :  { %v11589_v9 = vpop.f32.mrf.mxu0 }
 0xc42   :  { %v11590_v28 = vadd.f32 %v11589_v9, %v11453_v34  ;;  %v20484_v34 = vld [vmem:[#allocation10 + $0xd8] sm:$0xff]  ;;  %v11694_v8 = vadd.f32 %v20455_v37, %v11588_v1 }
 0xc43   :  { %v20487_v9 = vld [vmem:[#allocation10 + $0x58] sm:$0xff]  ;;  %14024 = vmatprep.subr.mxu0 %v20484_v34 }
 0xc44   :  { %v11696_v36 = vadd.f32 %v11695_v31, %v11590_v28  ;;  %v20490_v28 = vld [vmem:[#allocation10 + $0xd0] sm:$0xff]  ;;  %14025 = vmatpush3.msra.mxu0 %v20487_v9 }
 0xc45   :  { %v20493_v31 = vld [vmem:[#allocation10 + $0x50] sm:$0xff]  ;;  %14026 = vmatprep.subr.mxu0 %v20490_v28 }
 0xc46   :  { %14027 = vmatpush3.msra.mxu0 %v20493_v31 }
 0xc58   :  { %v20459_v26 = vpop.f32.mrf.mxu1 }
 0xc5a   :  { %v11967_v18 = vpop.f32.mrf.mxu1 }
 0xc61   :  { %v20461_v27 = vpop.f32.mrf.mxu0 }
 0xc62   :  { %v11862_v41 = vadd.f32 %v20461_v27, %v11694_v8 }
 0xc63   :  { %v11863_v49 = vpop.f32.mrf.mxu0 }
 0xc64   :  { %v11864_v24 = vadd.f32 %v11863_v49, %v11696_v36  ;;  %v20496_v36 = vld [vmem:[#allocation10 + $0xc8] sm:$0xff]  ;;  %v11966_v10 = vadd.f32 %v20459_v26, %v11862_v41 }
 0xc65   :  { %14028 = vmatprep.subr.mxu0 %v20496_v36 }
 0xc66   :  { %v11968_v40 = vadd.f32 %v11967_v18, %v11864_v24  ;;  %14029 = vmatpush3.msra.mxu0 %v20499_v3  ;;  %v12611_v47 = vadd.f32 %v11966_v10, %v22551_v57  ;;  %v22552_v18 = vld [vmem:[#allocation39_spill] sm:$0xff]  ;;  %v12703_v57 = vld [vmem:[#allocation10 + $0x88] sm:$0xff] }
 0xc67   :  { %14030 = vmatprep.subr.mxu0 %v20502_v55  ;;  %v12688_v10 = vld [vmem:[#allocation10 + $0x10] sm:$0xff] }
 0xc68   :  { %v12612_v25 = vadd.f32 %v11968_v40, %v261_v35  ;;  %14031 = vmatpush3.msra.mxu0 %v20505_v63  ;;  %v13162_v52 = vmul.f32 -1.442695, %v12611_v47  ;;  %v12687_v47 = vld [vmem:[#allocation10 + $0x8] sm:$0xff] }
 0xc6a   :  { %15927 = vpow2.f32 %v13162_v52  ;;  %v13163_v62 = vmul.f32 -1.442695, %v12612_v25  ;;  %v12686_v52 = vld [vmem:[#allocation10] sm:$0xff] }
 0xc6c   :  { %15929 = vpow2.f32 %v13163_v62 }
 0xc77   :  { %v15928_v21 = vpop.eup %15927 }
 0xc78   :  { %v12619_v5 = vadd.f32 1.0, %v15928_v21 }
 0xc79   :  { %v15930_v30 = vpop.eup %15929 }
 0xc7a   :  { %v12208_v11 = vpop.f32.mrf.mxu1  ;;  %15931 = vrcp.f32 %v12619_v5  ;;  %v12620_v26 = vadd.f32 1.0, %v15930_v30  ;;  %v12685_v5 = vld [vmem:[%s20581_s8] sm:$0x3] }
 0xc7c   :  { %v15627_v12 = vpop.f32.mrf.mxu1  ;;  %15933 = vrcp.f32 %v12620_v26 }
 0xc83   :  { %v12057_v23 = vpop.f32.mrf.mxu0 }
 0xc84   :  { %v12209_v6 = vadd.f32 %v12208_v11, %v12057_v23 }
 0xc85   :  { %v15592_v15 = vpop.f32.mrf.mxu0 }
 0xc87   :  { %v15932_v24 = vpop.eup %15931 }
 0xc89   :  { %v15934_v44 = vpop.eup %15933 }
 0xc8a   :  { %v12629_v35 = vsub.f32 1.0, %v15934_v44  ;;  %v12631_v13 = vmul.f32 %v15934_v44, %v20081_v2 }
 0xc9c   :  { %v12401_v19 = vpop.f32.mrf.mxu1 }
 0xc9e   :  { %v15697_v45 = vpop.f32.mrf.mxu1 }
 0xc9f   :  { %v12704_v45 = vld [vmem:[#allocation10 + $0x90] sm:$0xff] }
 0xca5   :  { %v12312_v0 = vpop.f32.mrf.mxu0 }
 0xca6   :  { %v12313_v53 = vadd.f32 %v12312_v0, %v12209_v6  ;;  %v12702_v0 = vld [vmem:[#allocation10 + $0x80] sm:$0xff] }
 0xca7   :  { %v15662_v48 = vpop.f32.mrf.mxu0 }
 0xca8   :  { %v12402_v7 = vadd.f32 %v12401_v19, %v12313_v53  ;;  %v12689_v19 = vld [vmem:[#allocation10 + $0x18] sm:$0xff] }
 0xcbe   :  { %v12607_v38 = vpop.f32.mrf.mxu1 }
 0xcc0   :  { %v15767_v37 = vpop.f32.mrf.mxu1 }
 0xcc1   :  { %v22553_v37 = vld [vmem:[#allocation202_spill] sm:$0xff] }
 0xcc2   :  { %v22554_v53 = vsub.s32 0, %v22553_v37  ;;  %v22555_v30 = vsub.s32 1, %v22553_v37 }
 0xcc6   :  { %v12520_v4 = vpop.f32.mrf.mxu0 }
 0xcc7   :  { %v12521_v61 = vadd.f32 %v12520_v4, %v12402_v7  ;;  %v12850_v7 = vrot.slane %v12685_v5, %v22554_v53  ;;  %v12854_v4 = vrot.slane %v12685_v5, %v22555_v30 }
 0xcc8   :  { %v15732_v56 = vpop.f32.mrf.mxu0 }
 0xcc9   :  { %v12608_v27 = vadd.f32 %v12607_v38, %v12521_v61 }
 0xccb   :  { %v12625_v49 = vadd.f32 %v15940_v59, %v12608_v27 }
 0xccd   :  { %v12626_v20 = vmul.f32 %v15932_v24, %v12625_v49 }
 0xccf   :  { %v12627_v46 = vadd.f32 %v12626_v20, %v22552_v18 }
 0xcd1   :  { %15935 = vtanh.f32 %v12627_v46 }
 0xcde   :  { %v15936_v40 = vpop.eup %15935 }
 0xcdf   :  { %v12630_v39 = vmul.f32 %v15936_v40, %v12629_v35 }
 0xce1   :  { %v12632_v25 = vadd.f32 %v12631_v13, %v12630_v39 }
 0xce3   :  { %v12633_v43 = vmax.f32 %v12632_v25, 0.0 }
 0xce5   :  { %15810 = vmatmul.mubr.f32.gmra.mxu0 %v12633_v43 }
 0xce6   :  { %v15802_v60 = vpop.f32.mrf.mxu0 }
 0xce7   :  { %v12805_v16 = vadd.f32 %v15802_v60, %v20525_v54 }
 0xce8   :  { %v12799_v50 = vpop.f32.mrf.mxu0 }
 0xce9   :  { %v12800_v11 = vadd.f32 %v20525_v54, %v12799_v50  ;;  %v12839_v2 = vmax.f32 %v12805_v16, 0.0 }
 0xcea   :  { %v15805_v12 = vpop.f32.mrf.mxu0 }
 0xceb   :  { %v12838_v23 = vmax.f32 %v12800_v11, 0.0  ;;  %v12815_v8 = vadd.f32 %v15805_v12, %v20525_v54 }
 0xcec   :  { %v12809_v15 = vpop.f32.mrf.mxu0 }
 0xced   :  { %12922 = vmatmul.mubr.f32.vlgmr.msra.gmra.mxu1 %v12838_v23  ;;  %v12810_v33 = vadd.f32 %v20525_v54, %v12809_v15 }
 0xcee   :  { %12927 = vmatprep.mubr.f32.mxu1 %v21174_v51  ;;  %15828 = vmatpush3.msra.mxu1 %v20465_v17  ;;  %v15808_v1 = vpop.f32.mrf.mxu0 }
 0xcef   :  { %15813 = vmatprep.subr.mxu1 %v20467_v42  ;;  %v12840_v41 = vmax.f32 %v12810_v33, 0.0  ;;  %v12841_v42 = vmax.f32 %v12815_v8, 0.0 }
 0xcf0   :  { %15829 = vmatpush3.msra.mxu1 %v20469_v22  ;;  %v12819_v17 = vpop.f32.mrf.mxu0 }
 0xcf1   :  { %12928 = vmatmul.mubr.f32.gmra.mxu1 %v12839_v2  ;;  %15814 = vmatprep.subr.mxu1 %v20472_v29  ;;  %v12820_v22 = vadd.f32 %v20525_v54, %v12819_v17  ;;  %v12825_v29 = vadd.f32 %v15808_v1, %v20525_v54 }
 0xcf2   :  { %12933 = vmatprep.mubr.f32.mxu1 %v21174_v51  ;;  %15830 = vmatpush3.msra.mxu1 %v20475_v32 }
 0xcf3   :  { %15815 = vmatprep.subr.mxu1 %v20478_v14  ;;  %v12842_v32 = vmax.f32 %v12820_v22, 0.0  ;;  %v12843_v14 = vmax.f32 %v12825_v29, 0.0 }
 0xcf4   :  { %15831 = vmatpush3.msra.mxu1 %v20481_v58  ;;  %v12709_v58 = vld [vmem:[#allocation10 + $0xb8] sm:$0xff] }
 0xcf5   :  { %12934 = vmatmul.mubr.f32.gmra.mxu1 %v12840_v41  ;;  %15816 = vmatprep.subr.mxu1 %v20484_v34  ;;  %v12693_v34 = vld [vmem:[#allocation10 + $0x38] sm:$0xff] }
 0xcf6   :  { %12939 = vmatprep.mubr.f32.mxu1 %v21174_v51  ;;  %15832 = vmatpush3.msra.mxu1 %v20487_v9  ;;  %v12708_v9 = vld [vmem:[#allocation10 + $0xb0] sm:$0xff] }
 0xcf7   :  { %15817 = vmatprep.subr.mxu1 %v20490_v28  ;;  %14032 = vmatprep.subr.mxu0 %v12709_v58  ;;  %v12692_v28 = vld [vmem:[#allocation10 + $0x30] sm:$0xff] }
 0xcf8   :  { %15833 = vmatpush3.msra.mxu1 %v20493_v31  ;;  %14033 = vmatpush3.msra.mxu0 %v12693_v34  ;;  %v12707_v31 = vld [vmem:[#allocation10 + $0xa8] sm:$0xff] }
 0xcf9   :  { %12940 = vmatmul.mubr.f32.gmra.mxu1 %v12841_v42  ;;  %15818 = vmatprep.subr.mxu1 %v20496_v36  ;;  %v12691_v36 = vld [vmem:[#allocation10 + $0x28] sm:$0xff] }
 0xcfa   :  { %12945 = vmatprep.mubr.f32.mxu1 %v21174_v51  ;;  %15834 = vmatpush3.msra.mxu1 %v20499_v3  ;;  %v12706_v3 = vld [vmem:[#allocation10 + $0xa0] sm:$0xff] }
 0xcfb   :  { %15819 = vmatprep.subr.mxu1 %v20502_v55  ;;  %14034 = vmatprep.subr.mxu0 %v12708_v9  ;;  %v12690_v55 = vld [vmem:[#allocation10 + $0x20] sm:$0xff] }
 0xcfc   :  { %15835 = vmatpush3.msra.mxu1 %v20505_v63  ;;  %14035 = vmatpush3.msra.mxu0 %v12692_v28  ;;  %v12705_v63 = vld [vmem:[#allocation10 + $0x98] sm:$0xff] }
 0xcfd   :  { %12946 = vmatmul.mubr.f32.gmra.mxu1 %v12842_v32  ;;  %15820 = vmatprep.subr.mxu1 %v12709_v58 }
 0xcfe   :  { %12951 = vmatprep.mubr.f32.mxu1 %v21174_v51  ;;  %15836 = vmatpush3.msra.mxu1 %v12693_v34 }
 0xcff   :  { %15821 = vmatprep.subr.mxu1 %v12708_v9  ;;  %14036 = vmatprep.subr.mxu0 %v12707_v31 }
 0xd00   :  { %15837 = vmatpush3.msra.mxu1 %v12692_v28  ;;  %14037 = vmatpush3.msra.mxu0 %v12691_v36 }
 0xd01   :  { %12952 = vmatmul.mubr.f32.gmra.mxu1 %v12843_v14  ;;  %15822 = vmatprep.subr.mxu1 %v12707_v31 }
 0xd02   :  { %12957 = vmatprep.mubr.f32.mxu1 %v21174_v51  ;;  %15838 = vmatpush3.msra.mxu1 %v12691_v36 }
 0xd03   :  { %14038 = vmatprep.subr.mxu0 %v12706_v3  ;;  %15823 = vmatprep.subr.mxu1 %v12706_v3 }
 0xd04   :  { %14039 = vmatpush3.msra.mxu0 %v12690_v55  ;;  %15839 = vmatpush3.msra.mxu1 %v12690_v55 }
 0xd05   :  { %14040 = vmatprep.subr.mxu0 %v12705_v63  ;;  %15824 = vmatprep.subr.mxu1 %v12705_v63 }
 0xd06   :  { %14041 = vmatpush3.msra.mxu0 %v12689_v19  ;;  %15840 = vmatpush3.msra.mxu1 %v12689_v19 }
 0xd07   :  { %14042 = vmatprep.subr.mxu0 %v12704_v45  ;;  %15825 = vmatprep.subr.mxu1 %v12704_v45 }
 0xd08   :  { %14043 = vmatpush3.msra.mxu0 %v12688_v10  ;;  %15841 = vmatpush3.msra.mxu1 %v12688_v10 }
 0xd09   :  { %14044 = vmatprep.subr.mxu0 %v12703_v57  ;;  %15826 = vmatprep.subr.mxu1 %v12703_v57 }
 0xd0a   :  { %14045 = vmatpush3.msra.mxu0 %v12687_v47  ;;  %15842 = vmatpush3.msra.mxu1 %v12687_v47  ;;  %v13165_v47 = vld [vmem:[%s20583_s10] ss:$0 sm:$0xff]  ;;  %s16061_s10 = smov [#allocation12]  }
 0xd0b   :  { %14046 = vmatprep.subr.mxu0 %v12702_v0  ;;  %15827 = vmatprep.subr.mxu1 %v12702_v0  ;;  %s13110_s2 = sshll.u32 %s16061_s10, 4  ;;  %s13111_s2 = int_to_ptr.vmem [resolvable:$true] %s13110_s2 }
 0xd0c   :  { %14047 = vmatpush3.msra.mxu0 %v12686_v52  ;;  %15843 = vmatpush3.msra.mxu1 %v12686_v52  ;;  %s16021_s22 = scalar_lea.vmem %s13111_s2, 1024  ;;  %p16026_p7 = scmp.lt.s32.totalorder %s13111_s2, %s13111_s2 }
 0xd0d   :  { %p16022_p6 = scmp.ne.s32.totalorder %s13111_s2, %s16021_s22  ;;  %p16027_p8 = scmp.lt.s32.totalorder %s16021_s22, %s16021_s22 }
 0xd0f   :  { %p16028_p9 = por %p16027_p8, %p16026_p7 }
 0xd11   :  { %p16029_p10 = pnand %p16028_p9, %p16022_p6 }
 0xda5   :  { %v15811_v48 = vpop.f32.mrf.mxu0 }
 0xda6   :  { %v12835_v38 = vadd.f32 %v15811_v48, %v20525_v54 }
 0xda7   :  { %v12829_v62 = vpop.f32.mrf.mxu0 }
 0xda8   :  { %v12830_v21 = vadd.f32 %v20525_v54, %v12829_v62  ;;  %v12845_v56 = vmax.f32 %v12835_v38, 0.0 }
 0xdaa   :  { %v12844_v6 = vmax.f32 %v12830_v21, 0.0 }
 0xdac   :  { %12958 = vmatmul.mubr.f32.gmra.mxu1 %v12844_v6 }
 0xdad   :  { %v12923_v61 = vpop.f32.mrf.mxu1  ;;  %12963 = vmatprep.mubr.f32.mxu1 %v21174_v51 }
 0xdae   :  { %v12924_v26 = vadd.f32 %v12923_v61, %v12850_v7 }
 0xdaf   :  { %v12925_v27 = vpop.f32.mrf.mxu1 }
 0xdb0   :  { %v12926_v59 = vadd.f32 %v12925_v27, %v12854_v4  ;;  %12964 = vmatmul.mubr.f32.gmra.mxu1 %v12845_v56  ;;  %v12970_v20 = vmax.f32 %v12924_v26, 0.0 }
 0xdb1   :  { %v12929_v49 = vpop.f32.mrf.mxu1 }
 0xdb2   :  { %v12971_v24 = vmax.f32 %v12926_v59, 0.0  ;;  %v12930_v18 = vadd.f32 %v12929_v49, %v12850_v7 }
 0xdb3   :  { %v12931_v46 = vpop.f32.mrf.mxu1 }
 0xdb4   :  { %v12932_v44 = vadd.f32 %v12931_v46, %v12854_v4  ;;  %13056 = vmatprep.mubr.f32.mxu0 %v12971_v24  ;;  %v12972_v39 = vmax.f32 %v12930_v18, 0.0 }
 0xdb5   :  { %v12935_v35 = vpop.f32.mrf.mxu1  ;;  %13057 = vmatmul.mubr.f32.vlgmr.msra.gmra.mxu0 %v12970_v20 }
 0xdb6   :  { %v12973_v40 = vmax.f32 %v12932_v44, 0.0  ;;  %v12936_v13 = vadd.f32 %v12935_v35, %v12850_v7 }
 0xdb7   :  { %v12937_v25 = vpop.f32.mrf.mxu1 }
 0xdb8   :  { %v12938_v43 = vadd.f32 %v12937_v25, %v12854_v4  ;;  %13061 = vmatprep.mubr.f32.mxu0 %v12973_v40  ;;  %v12974_v54 = vmax.f32 %v12936_v13, 0.0 }
 0xdb9   :  { %v12941_v51 = vpop.f32.mrf.mxu1  ;;  %13062 = vmatmul.mubr.f32.gmra.mxu0 %v12972_v39 }
 0xdba   :  { %v12975_v60 = vmax.f32 %v12938_v43, 0.0  ;;  %v12942_v50 = vadd.f32 %v12941_v51, %v12850_v7 }
 0xdbb   :  { %v12943_v11 = vpop.f32.mrf.mxu1 }
 0xdbc   :  { %v12944_v12 = vadd.f32 %v12943_v11, %v12854_v4  ;;  %13066 = vmatprep.mubr.f32.mxu0 %v12975_v60  ;;  %v12976_v15 = vmax.f32 %v12942_v50, 0.0 }
 0xdbd   :  { %v12947_v16 = vpop.f32.mrf.mxu1  ;;  %13067 = vmatmul.mubr.f32.gmra.mxu0 %v12974_v54 }
 0xdbe   :  { %v12977_v23 = vmax.f32 %v12944_v12, 0.0  ;;  %v12948_v2 = vadd.f32 %v12947_v16, %v12850_v7 }
 0xdbf   :  { %v12949_v33 = vpop.f32.mrf.mxu1 }
 0xdc0   :  { %v12950_v1 = vadd.f32 %v12949_v33, %v12854_v4  ;;  %13071 = vmatprep.mubr.f32.mxu0 %v12977_v23  ;;  %v12978_v17 = vmax.f32 %v12948_v2, 0.0 }
 0xdc1   :  { %v12953_v8 = vpop.f32.mrf.mxu1  ;;  %13072 = vmatmul.mubr.f32.gmra.mxu0 %v12976_v15 }
 0xdc2   :  { %v12979_v41 = vmax.f32 %v12950_v1, 0.0  ;;  %v12954_v42 = vadd.f32 %v12953_v8, %v12850_v7 }
 0xdc3   :  { %v12955_v22 = vpop.f32.mrf.mxu1 }
 0xdc4   :  { %v12956_v29 = vadd.f32 %v12955_v22, %v12854_v4  ;;  %13076 = vmatprep.mubr.f32.mxu1 %v12979_v41  ;;  %v12980_v14 = vmax.f32 %v12954_v42, 0.0 }
 0xdc5   :  { %13077 = vmatmul.mubr.f32.vlgmr.msra.gmra.mxu1 %v12978_v17 }
 0xdc6   :  { %v12981_v32 = vmax.f32 %v12956_v29, 0.0 }
 0xdc8   :  { %13081 = vmatprep.mubr.f32.mxu1 %v12981_v32 }
 0xdc9   :  { %13082 = vmatmul.mubr.f32.gmra.mxu1 %v12980_v14 }
 0xe6c   :  { %v12959_v58 = vpop.f32.mrf.mxu1 }
 0xe6d   :  { %v12960_v34 = vadd.f32 %v12959_v58, %v12850_v7 }
 0xe6e   :  { %v12961_v9 = vpop.f32.mrf.mxu1 }
 0xe6f   :  { %v12962_v28 = vadd.f32 %v12961_v9, %v12854_v4  ;;  %v12982_v3 = vmax.f32 %v12960_v34, 0.0 }
 0xe70   :  { %v12965_v31 = vpop.f32.mrf.mxu1 }
 0xe71   :  { %v12983_v36 = vmax.f32 %v12962_v28, 0.0  ;;  %v12966_v55 = vadd.f32 %v12965_v31, %v12850_v7 }
 0xe72   :  { %v12967_v63 = vpop.f32.mrf.mxu1 }
 0xe73   :  { %v12968_v19 = vadd.f32 %v12967_v63, %v12854_v4  ;;  %13086 = vmatprep.mubr.f32.mxu1 %v12983_v36  ;;  %v12984_v57 = vmax.f32 %v12966_v55, 0.0 }
 0xe74   :  { %13087 = vmatmul.mubr.f32.gmra.mxu1 %v12982_v3 }
 0xe75   :  { %v12985_v45 = vmax.f32 %v12968_v19, 0.0  ;;  %v14048_v10 = vpop.f32.mrf.mxu0 }
 0xe77   :  { %v14049_v0 = vpop.f32.mrf.mxu0  ;;  %13091 = vmatprep.mubr.f32.mxu1 %v12985_v45 }
 0xe78   :  { %v14050_v52 = vadd.f32 %v14049_v0, %v14048_v10  ;;  %13092 = vmatmul.mubr.f32.gmra.mxu1 %v12984_v57 }
 0xe79   :  { %v14051_v48 = vpop.f32.mrf.mxu0 }
 0xe7a   :  { %v13059_v62 = vadd.f32 %v14050_v52, %v13165_v47 }
 0xe7b   :  { %v14052_v21 = vpop.f32.mrf.mxu0 }
 0xe7c   :  { %13097 = vst [vmem:[#allocation12] sm:$0xff] %v13059_v62  ;;  %v14053_v5 = vadd.f32 %v14052_v21, %v14051_v48 }
 0xe7d   :  { %v14054_v38 = vpop.f32.mrf.mxu0 }
 0xe7e   :  { %v13064_v6 = vadd.f32 %v14053_v5, %v13165_v47 }
 0xe7f   :  { %v14055_v37 = vpop.f32.mrf.mxu0 }
 0xe80   :  { %13098 = vst [vmem:[#allocation12 + $0x8] sm:$0xff] %v13064_v6  ;;  %v14056_v53 = vadd.f32 %v14055_v37, %v14054_v38 }
 0xe81   :  { %v14057_v7 = vpop.f32.mrf.mxu0 }
 0xe82   :  { %v13069_v30 = vadd.f32 %v14056_v53, %v13165_v47 }
 0xe83   :  { %v14058_v4 = vpop.f32.mrf.mxu0 }
 0xe84   :  { %13099 = vst [vmem:[#allocation12 + $0x10] sm:$0xff] %v13069_v30  ;;  %v14059_v61 = vadd.f32 %v14058_v4, %v14057_v7 }
 0xe85   :  { %v14060_v56 = vpop.f32.mrf.mxu1 }
 0xe86   :  { %v13074_v26 = vadd.f32 %v14059_v61, %v13165_v47 }
 0xe87   :  { %v14061_v27 = vpop.f32.mrf.mxu1 }
 0xe88   :  { %13100 = vst [vmem:[#allocation12 + $0x18] sm:$0xff] %v13074_v26  ;;  %v14062_v59 = vadd.f32 %v14061_v27, %v14060_v56 }
 0xe89   :  { %v14063_v49 = vpop.f32.mrf.mxu1 }
 0xe8a   :  { %v13079_v24 = vadd.f32 %v14062_v59, %v13165_v47 }
 0xe8b   :  { %v14064_v20 = vpop.f32.mrf.mxu1 }
 0xe8c   :  { %13101 = vst [vmem:[#allocation12 + $0x20] sm:$0xff] %v13079_v24  ;;  %v14065_v18 = vadd.f32 %v14064_v20, %v14063_v49 }
 0xe8e   :  { %v13084_v46 = vadd.f32 %v14065_v18, %v13165_v47 }
 0xe90   :  { %13102 = vst [vmem:[#allocation12 + $0x28] sm:$0xff] %v13084_v46 }
 0xf34   :  { %v14066_v44 = vpop.f32.mrf.mxu1 }
 0xf36   :  { %v14067_v35 = vpop.f32.mrf.mxu1 }
 0xf37   :  { %v14068_v40 = vadd.f32 %v14067_v35, %v14066_v44 }
 0xf38   :  { %v14069_v39 = vpop.f32.mrf.mxu1 }
 0xf39   :  { %v13089_v13 = vadd.f32 %v14068_v40, %v13165_v47 }
 0xf3a   :  { %v14070_v25 = vpop.f32.mrf.mxu1 }
 0xf3b   :  { %13103 = vst [vmem:[#allocation12 + $0x30] sm:$0xff] %v13089_v13  ;;  %v14071_v43 = vadd.f32 %v14070_v25, %v14069_v39 }
 0xf3d   :  { %v13094_v51 = vadd.f32 %v14071_v43, %v13165_v47 }
 0xf3f   :  { %13104 = vst [vmem:[#allocation12 + $0x38] sm:$0xff] %v13094_v51 }
 0xf40   :  { %16032 = shalt.err (!%p16029_p10)
}
 0xf41   :  { %13116 = dma.vmem_to_hbm [thread:$0]  %s13111_s2, 1024, %s20584_s11, [#allocation6], %s16050_s20, %s16050_s20, %s16051_s21  }
 0xf42   :  { %16047 = dma.done.wait [#allocation6], 1024  }
 0xf43   :  { %16048 = vsyncadd [#allocation6], 4294966272 }
 0xf44   :  { %13120 = vsyncpa [#allocation5], 1 }
 0xf45   :  { %13121 = vsyncpa [#allocation8], 1 }
 0xf46   :  { %13122 = vsyncpa [#allocation11], 1 }
 0xf47   :  { %13123 = vsyncpa [#allocation6], 1 }

</bundles_post_ra>
